<compile_context>
chip_gen: v7x
topology: tpu7x:2x2x1
jax: 0.10.0
libtpu: 0.0.40
codegen_flags: <defaults>
</compile_context>

<pallas_src>
import math

import jax
import jax.numpy as jnp
from jax.experimental import pallas as pl
from jax.experimental.pallas import tpu as pltpu

_NEG = -1e30  # large finite mask bias: exp() underflows to 0, no NaN on empty rows


# --------------------------------------------------------------------------------------
# kernel
# --------------------------------------------------------------------------------------
def _make_mha_kernel(bt, seq_len, tile_k, d_model, n_heads, use_einshape, exp_dtype):
    d_k = d_model // n_heads
    bh = bt * n_heads

    def split_heads(x2d, rows):
        # (bt*rows, D) -> (bt*H, rows, d_k)
        if use_einshape:
            x4 = x2d.reshape(bt, rows, n_heads, d_k)
            x4 = pltpu.einshape("bshd->bhsd", x4)      # single relayout, XLU slot
            return x4.reshape(bh, rows, d_k)
        # fallback: explicit slices (proven lowering path on older toolchains)
        return jnp.stack(
            [x2d[b * rows:(b + 1) * rows, h * d_k:(h + 1) * d_k]
             for b in range(bt) for h in range(n_heads)], axis=0)

    def merge_heads(x3d):
        # (bt*H, S, d_k) -> (bt*S, D)
        if use_einshape:
            x4 = x3d.reshape(bt, n_heads, seq_len, d_k)
            x4 = pltpu.einshape("bhsd->bshd", x4)
            return x4.reshape(bt * seq_len, d_model)
        return jnp.concatenate(
            [jnp.concatenate([x3d[b * n_heads + h] for h in range(n_heads)], axis=-1)
             for b in range(bt)], axis=0)

    def kernel(len_ref, q_ref, k_ref, v_ref, wq_ref, wk_ref, wv_ref, wo_ref,
               o_ref, qh_s, m_s, l_s, acc_s):
        g = pl.program_id(0)          # batch block  ("parallel")
        kv = pl.program_id(1)         # kv tile      ("arbitrary", accumulated)
        b0 = g * bt

        # -------- per-batch-block init: project Q once, reset online-softmax state ----
        @pl.when(kv == 0)
        def _init():
            xq = q_ref[...].reshape(bt * seq_len, d_model)
            qp = jnp.dot(xq, wq_ref[...], preferred_element_type=jnp.float32)
            qh_s[...] = split_heads(qp.astype(jnp.bfloat16), seq_len)
            m_s[...] = jnp.full_like(m_s, _NEG)
            l_s[...] = jnp.zeros_like(l_s)
            acc_s[...] = jnp.zeros_like(acc_s)

        # -------- project the current K/V tile (each tile is projected exactly once) --
        xk = k_ref[...].reshape(bt * tile_k, d_model)
        xv = v_ref[...].reshape(bt * tile_k, d_model)
        kp = jnp.dot(xk, wk_ref[...], preferred_element_type=jnp.float32)
        vp = jnp.dot(xv, wv_ref[...], preferred_element_type=jnp.float32)
        kh = split_heads(kp.astype(jnp.bfloat16), tile_k)     # (bt*H, Tk, d_k)
        vh = split_heads(vp.astype(jnp.bfloat16), tile_k)

        # -------- key-padding bias for this tile: one compare per batch row,
        #          broadcast over heads/queries via the add below --------------------
        kidx = kv * tile_k + jax.lax.broadcasted_iota(jnp.int32, (1, 1, tile_k), 2)
        rows = [jnp.where(kidx < len_ref[b0 + b], 0.0, _NEG).astype(jnp.float32)
                for b in range(bt)]
        bias_b = rows[0] if bt == 1 else jnp.concatenate(rows, axis=0)   # (bt, 1, Tk)
        # TODO(synk): use len_ref to skip fully-padded KV tiles entirely with pl.when
        # and drop the bias add on interior (fully valid) tiles.

        # -------- online softmax update ------------------------------------------------
        s = jnp.einsum("bqd,bkd->bqk", qh_s[...], kh,
                       preferred_element_type=jnp.float32)               # (bt*H, S, Tk)
        s = (s.reshape(bt, n_heads, seq_len, tile_k) + bias_b[:, None]
             ).reshape(bh, seq_len, tile_k)

        m_prev = m_s[...]
        m_new = jnp.maximum(m_prev, jnp.max(s, axis=-1, keepdims=True))
        alpha = jnp.exp(m_prev - m_new)
        p = jnp.exp((s - m_new).astype(exp_dtype))                       # unnormalized
        l_s[...] = alpha * l_s[...] + jnp.sum(p, axis=-1, keepdims=True,
                                              dtype=jnp.float32)
        acc_s[...] = alpha * acc_s[...] + jnp.einsum(
            "bqk,bkd->bqd", p.astype(jnp.bfloat16), vh,
            preferred_element_type=jnp.float32)
        m_s[...] = m_new

        # -------- finalize: normalize once (O(S*d_k)), merge heads, output projection --
        @pl.when(kv == pl.num_programs(1) - 1)
        def _finalize():
            ctx = acc_s[...] * pl.reciprocal(l_s[...], approx=True)      # (bt*H, S, d_k)
            attn = merge_heads(ctx).astype(jnp.bfloat16)                 # (bt*S, D)
            out = jnp.dot(attn, wo_ref[...], preferred_element_type=jnp.float32)
            o_ref[...] = out.reshape(bt, seq_len, d_model).astype(o_ref.dtype)

    return kernel


# --------------------------------------------------------------------------------------
# wrapper helpers
# --------------------------------------------------------------------------------------
def _pick_block_batch(B, S):
    divisors = [d for d in range(1, B + 1) if B % d == 0]
    for d in divisors:                       # smallest block giving >=128 MXU rows,
        if d * S >= 128:                     # i.e. the most parallel grid steps
            return d
    # tiny sequences: keep at least 2 grid steps when possible (v7x has 2 TCs)
    return divisors[-2] if len(divisors) > 1 else B


def _pick_kv_block(S):
    if S <= 512:
        return S
    for t in (512, 256, 128):
        if S % t == 0:
            return t
    return S


def _vmem_cap_bytes():
    try:
        kind = jax.devices()[0].device_kind.lower()
    except Exception:
        kind = ""
    return (56 << 20) if "v7" in kind else (100 << 20)   # v7x has 64 MiB physical VMEM


def _estimate_vmem_bytes(bt, S, tk, D, H):
    d_k = D // H
    pad_s = -(-S // 8) * 8
    w = 4 * D * D * 2 * 2                       # weights, worst case double-buffered
    q_in = 2 * bt * S * D * 2                   # bf16 q block, double-buffered
    kv_in = 2 * 2 * bt * tk * D * 2             # bf16 k/v tiles, double-buffered
    out = 2 * bt * S * D * 4                    # f32 output block
    scr = (bt * H * S * d_k * 2                 # bf16 q heads
           + bt * H * S * d_k * 4               # f32 accumulator
           + 2 * bt * H * pad_s * 128 * 4)      # m, l (last dim padded to 128 lanes)
    return w + q_in + kv_in + out + scr


def _build_mha_call(B, S, D, H, bt, tk, use_einshape, single_buf_weights,
                    exp_dtype, vmem_limit):
    d_k = D // H
    kernel = _make_mha_kernel(bt, S, tk, D, H, use_einshape, exp_dtype)

    q_spec = pl.BlockSpec((bt, S, D), lambda g, kv, lens: (g, 0, 0))
    kv_spec = pl.BlockSpec((bt, tk, D), lambda g, kv, lens: (g, kv, 0))
    if single_buf_weights:
        # constant index map -> fetched once; single buffer halves weight VMEM
        w_spec = pl.BlockSpec((D, D), lambda g, kv, lens: (0, 0),
                              pipeline_mode=pl.Buffered(1))
    else:
        w_spec = pl.BlockSpec((D, D), lambda g, kv, lens: (0, 0))
    out_spec = pl.BlockSpec((bt, S, D), lambda g, kv, lens: (g, 0, 0))

    grid_spec = pltpu.PrefetchScalarGridSpec(
        num_scalar_prefetch=1,                          # lengths -> SMEM
        grid=(B // bt, S // tk),
        in_specs=[q_spec, kv_spec, kv_spec, w_spec, w_spec, w_spec, w_spec],
        out_specs=out_spec,
        scratch_shapes=[
            pltpu.VMEM((bt * H, S, d_k), jnp.bfloat16),   # projected Q heads
            pltpu.VMEM((bt * H, S, 1), jnp.float32),      # running max  m
            pltpu.VMEM((bt * H, S, 1), jnp.float32),      # running sum  l
            pltpu.VMEM((bt * H, S, d_k), jnp.float32),    # output accumulator
        ])
    return pl.pallas_call(
        kernel,
        out_shape=jax.ShapeDtypeStruct((B, S, D), jnp.float32),
        grid_spec=grid_spec,
        compiler_params=pltpu.CompilerParams(
            dimension_semantics=("parallel", "arbitrary"),
            vmem_limit_bytes=vmem_limit),
    )


def prepare_mha_params(params, n_heads):
    """One-time weight prep: fold 1/sqrt(d_k) into Wq, cast everything to bf16."""
    D = params["wq"].shape[0]
    scale = 1.0 / math.sqrt(D // n_heads)
    return {
        "wq": (params["wq"] * scale).astype(jnp.bfloat16),
        "wk": params["wk"].astype(jnp.bfloat16),
        "wv": params["wv"].astype(jnp.bfloat16),
        "wo": params["wo"].astype(jnp.bfloat16),
    }


def multi_head_attention_pallas(q, k, v, lengths, prepared_params, n_heads, *,
                                block_batch=None, kv_block=None,
                                exp_dtype=jnp.float32):
    """q,k,v: (B,S,D). lengths: (B,) valid-key counts. prepared_params: see prepare_mha_params.

    exp_dtype=jnp.bfloat16 is a v6e/v7x-only option (faster EUP, half the p buffer);
    keep the default f32 on v5e.  NOTE: for best MXU fill choose configs with
    d_k = D / n_heads >= 128 (small d_k underfills the attention matmuls).
    """
    B, S, D = q.shape
    assert D % n_heads == 0, "d_model must be divisible by h"
    bt = block_batch or _pick_block_batch(B, S)
    assert B % bt == 0
    tk = kv_block or _pick_kv_block(S)
    assert S % tk == 0 and (tk == S or tk % 8 == 0)

    vmem_limit = int(min(_vmem_cap_bytes(),
                         max(32 << 20, 2 * _estimate_vmem_bytes(bt, S, tk, D, n_heads))))

    args = (lengths.astype(jnp.int32),
            q.astype(jnp.bfloat16), k.astype(jnp.bfloat16), v.astype(jnp.bfloat16),
            prepared_params["wq"], prepared_params["wk"],
            prepared_params["wv"], prepared_params["wo"])

    # Preferred path: einshape head permute + single-buffered weights.  Fall back to
    # the slice-based head split / default buffering on toolchains where those are
    # unavailable, so the kernel always runs.
    last_err = None
    for use_einshape, single_buf in ((True, True), (True, False),
                                     (False, True), (False, False)):
        try:
            call = _build_mha_call(B, S, D, n_heads, bt, tk,
                                   use_einshape, single_buf, exp_dtype, vmem_limit)
            return call(*args)
        except Exception as err:          # lowering/availability differences only
            last_err = err
    raise last_err


# --------------------------------------------------------------------------------------
# pure-JAX reference (PyTorch MultiHeadAttention semantics)
# --------------------------------------------------------------------------------------
def mha_ref(q, k, v, mask, params, n_heads):
    B, S, D = q.shape
    d_k = D // n_heads
    query = (q @ params["wq"]).reshape(B, S, n_heads, d_k).transpose(0, 2, 1, 3)
    key = (k @ params["wk"]).reshape(B, S, n_heads, d_k).transpose(0, 2, 1, 3)
    value = (v @ params["wv"]).reshape(B, S, n_heads, d_k).transpose(0, 2, 1, 3)
    scores = jnp.einsum("bhqd,bhkd->bhqk", query, key) / math.sqrt(d_k)
    scores = jnp.where(mask == 0, -jnp.inf, scores)
    attn = jax.nn.softmax(scores, axis=-1)
    ctx = jnp.einsum("bhqk,bhkd->bhqd", attn, value)
    return ctx.transpose(0, 2, 1, 3).reshape(B, S, D) @ params["wo"]


if __name__ == "__main__":
    B, S, D, H = 2, 16, 32, 4

    root = jax.random.PRNGKey(0)
    ks = jax.random.split(root, 7)
    wscale = 0.1
    params = {
        "wq": wscale * jax.random.normal(ks[0], (D, D), jnp.float32),
        "wk": wscale * jax.random.normal(ks[1], (D, D), jnp.float32),
        "wv": wscale * jax.random.normal(ks[2], (D, D), jnp.float32),
        "wo": wscale * jax.random.normal(ks[3], (D, D), jnp.float32),
    }
    q = jax.random.normal(ks[4], (B, S, D), jnp.float32)
    k = jax.random.normal(ks[5], (B, S, D), jnp.float32)
    v = jax.random.normal(ks[6], (B, S, D), jnp.float32)

    # key padding: batch 0 attends to all 16 keys, batch 1 only to the first 5
    # (so its second KV tile is fully masked -> exercises the online-softmax rescale).
    lengths = jnp.array([16, 5], dtype=jnp.int32)

    prepared = prepare_mha_params(params, H)
    # kv_block=8 -> 2 KV tiles per batch block at this toy S (exercises accumulation).
    out = multi_head_attention_pallas(q, k, v, lengths, prepared, H, kv_block=8)
    out = jax.block_until_ready(out)

    mask = (jnp.arange(S)[None, None, None, :] <
            lengths[:, None, None, None]).astype(jnp.float32)
    ref = mha_ref(q, k, v, mask, params, H)

    assert out.shape == (B, S, D)
    max_err = float(jnp.max(jnp.abs(out - ref)))
    assert jnp.allclose(out, ref, atol=2e-2, rtol=2e-2), f"mismatch vs reference: {max_err}"
    print("KERNEL_OK")
</pallas_src>

<mosaic_0001>
module attributes {stable_mosaic.version = 11 : i64} {
  func.func @kernel(%arg0: i32, %arg1: i32, %arg2: memref<2xi32, #tpu.memory_space<smem>>, %arg3: memref<1x16x32xbf16, #tpu.memory_space<vmem>>, %arg4: memref<1x8x32xbf16, #tpu.memory_space<vmem>>, %arg5: memref<1x8x32xbf16, #tpu.memory_space<vmem>>, %arg6: memref<32x32xbf16, #tpu.memory_space<vmem>>, %arg7: memref<32x32xbf16, #tpu.memory_space<vmem>>, %arg8: memref<32x32xbf16, #tpu.memory_space<vmem>>, %arg9: memref<32x32xbf16, #tpu.memory_space<vmem>>, %arg10: memref<1x16x32xf32, #tpu.memory_space<vmem>>, %arg11: memref<4x16x8xbf16, #tpu.memory_space<vmem>>, %arg12: memref<4x16x1xf32, #tpu.memory_space<vmem>>, %arg13: memref<4x16x1xf32, #tpu.memory_space<vmem>>, %arg14: memref<4x16x8xf32, #tpu.memory_space<vmem>>) attributes {dimension_semantics = [#tpu.dimension_semantics<parallel>, #tpu.dimension_semantics<arbitrary>], iteration_bounds = array<i64: 2, 2>, scalar_prefetch = 1 : i64, scratch_operands = 4 : i64, tpu.core_type = #tpu.core_type<tc>, window_params = [{transform_indices = @transform_0, window_bounds = array<i64: 1, 16, 32>}, {transform_indices = @transform_1, window_bounds = array<i64: 1, 8, 32>}, {transform_indices = @transform_2, window_bounds = array<i64: 1, 8, 32>}, {pipeline_mode = #tpu.pipeline_mode<synchronous>, transform_indices = @transform_3, window_bounds = array<i64: 32, 32>}, {pipeline_mode = #tpu.pipeline_mode<synchronous>, transform_indices = @transform_4, window_bounds = array<i64: 32, 32>}, {pipeline_mode = #tpu.pipeline_mode<synchronous>, transform_indices = @transform_5, window_bounds = array<i64: 32, 32>}, {pipeline_mode = #tpu.pipeline_mode<synchronous>, transform_indices = @transform_6, window_bounds = array<i64: 32, 32>}, {transform_indices = @transform_7, window_bounds = array<i64: 1, 16, 32>}]} {
    %c1_i32 = arith.constant 1 : i32
    %0 = arith.muli %arg0, %c1_i32 : i32
    %c0_i32 = arith.constant 0 : i32
    %1 = arith.cmpi eq, %arg1, %c0_i32 : i32
    %2 = arith.extui %1 : i1 to i32
    %c0_i32_0 = arith.constant 0 : i32
    %3 = arith.cmpi ne, %2, %c0_i32_0 : i32
    scf.if %3 {
      %c0_41 = arith.constant 0 : index
      %c0_42 = arith.constant 0 : index
      %c0_43 = arith.constant 0 : index
      %65 = vector.load %arg3[%c0_41, %c0_42, %c0_43] : memref<1x16x32xbf16, #tpu.memory_space<vmem>>, vector<1x16x32xbf16>
      %66 = vector.shape_cast %65 : vector<1x16x32xbf16> to vector<16x32xbf16>
      %c0_44 = arith.constant 0 : index
      %c0_45 = arith.constant 0 : index
      %67 = vector.load %arg6[%c0_44, %c0_45] : memref<32x32xbf16, #tpu.memory_space<vmem>>, vector<32x32xbf16>
      %cst_46 = arith.constant dense<0.000000e+00> : vector<16x32xf32>
      %68 = tpu.matmul %66, %67, %cst_46 {dimension_numbers = #tpu.dot_dimension_numbers<[1], [0], [0], [1], [0, 0, 1, 1], [], []>} : vector<16x32xbf16>, vector<32x32xbf16>, vector<16x32xf32> -> vector<16x32xf32>
      %69 = arith.truncf %68 : vector<16x32xf32> to vector<16x32xbf16>
      %70 = vector.shape_cast %69 : vector<16x32xbf16> to vector<1x16x4x8xbf16>
      %71 = tpu.transpose %70, [0, 2, 1, 3] : vector<1x16x4x8xbf16> -> vector<1x4x16x8xbf16>
      %72 = vector.shape_cast %71 : vector<1x4x16x8xbf16> to vector<4x16x8xbf16>
      %c0_47 = arith.constant 0 : index
      %c0_48 = arith.constant 0 : index
      %c0_49 = arith.constant 0 : index
      %73 = vector.load %arg11[%c0_47, %c0_48, %c0_49] : memref<4x16x8xbf16, #tpu.memory_space<vmem>>, vector<4x16x8xbf16>
      tpu.vector_store %arg11[%c0_47, %c0_48, %c0_49], %72 {strides = array<i32>} : memref<4x16x8xbf16, #tpu.memory_space<vmem>>, vector<4x16x8xbf16>,
      %cst_50 = arith.constant -1.000000e+30 : f32
      %74 = vector.broadcast %cst_50 : f32 to vector<4x16x1xf32>
      %c0_51 = arith.constant 0 : index
      %c0_52 = arith.constant 0 : index
      %c0_53 = arith.constant 0 : index
      %75 = vector.load %arg12[%c0_51, %c0_52, %c0_53] : memref<4x16x1xf32, #tpu.memory_space<vmem>>, vector<4x16x1xf32>
      tpu.vector_store %arg12[%c0_51, %c0_52, %c0_53], %74 {strides = array<i32>} : memref<4x16x1xf32, #tpu.memory_space<vmem>>, vector<4x16x1xf32>,
      %cst_54 = arith.constant 0.000000e+00 : f32
      %76 = vector.broadcast %cst_54 : f32 to vector<4x16x1xf32>
      %c0_55 = arith.constant 0 : index
      %c0_56 = arith.constant 0 : index
      %c0_57 = arith.constant 0 : index
      %77 = vector.load %arg13[%c0_55, %c0_56, %c0_57] : memref<4x16x1xf32, #tpu.memory_space<vmem>>, vector<4x16x1xf32>
      tpu.vector_store %arg13[%c0_55, %c0_56, %c0_57], %76 {strides = array<i32>} : memref<4x16x1xf32, #tpu.memory_space<vmem>>, vector<4x16x1xf32>,
      %cst_58 = arith.constant 0.000000e+00 : f32
      %78 = vector.broadcast %cst_58 : f32 to vector<4x16x8xf32>
      %c0_59 = arith.constant 0 : index
      %c0_60 = arith.constant 0 : index
      %c0_61 = arith.constant 0 : index
      %79 = vector.load %arg14[%c0_59, %c0_60, %c0_61] : memref<4x16x8xf32, #tpu.memory_space<vmem>>, vector<4x16x8xf32>
      tpu.vector_store %arg14[%c0_59, %c0_60, %c0_61], %78 {strides = array<i32>} : memref<4x16x8xf32, #tpu.memory_space<vmem>>, vector<4x16x8xf32>,
    } else {
    }
    %c0 = arith.constant 0 : index
    %c0_1 = arith.constant 0 : index
    %c0_2 = arith.constant 0 : index
    %4 = vector.load %arg4[%c0, %c0_1, %c0_2] : memref<1x8x32xbf16, #tpu.memory_space<vmem>>, vector<1x8x32xbf16>
    %5 = vector.shape_cast %4 : vector<1x8x32xbf16> to vector<8x32xbf16>
    %c0_3 = arith.constant 0 : index
    %c0_4 = arith.constant 0 : index
    %c0_5 = arith.constant 0 : index
    %6 = vector.load %arg5[%c0_3, %c0_4, %c0_5] : memref<1x8x32xbf16, #tpu.memory_space<vmem>>, vector<1x8x32xbf16>
    %7 = vector.shape_cast %6 : vector<1x8x32xbf16> to vector<8x32xbf16>
    %c0_6 = arith.constant 0 : index
    %c0_7 = arith.constant 0 : index
    %8 = vector.load %arg7[%c0_6, %c0_7] : memref<32x32xbf16, #tpu.memory_space<vmem>>, vector<32x32xbf16>
    %cst = arith.constant dense<0.000000e+00> : vector<8x32xf32>
    %9 = tpu.matmul %5, %8, %cst {dimension_numbers = #tpu.dot_dimension_numbers<[1], [0], [0], [1], [0, 0, 1, 1], [], []>} : vector<8x32xbf16>, vector<32x32xbf16>, vector<8x32xf32> -> vector<8x32xf32>
    %c0_8 = arith.constant 0 : index
    %c0_9 = arith.constant 0 : index
    %10 = vector.load %arg8[%c0_8, %c0_9] : memref<32x32xbf16, #tpu.memory_space<vmem>>, vector<32x32xbf16>
    %cst_10 = arith.constant dense<0.000000e+00> : vector<8x32xf32>
    %11 = tpu.matmul %7, %10, %cst_10 {dimension_numbers = #tpu.dot_dimension_numbers<[1], [0], [0], [1], [0, 0, 1, 1], [], []>} : vector<8x32xbf16>, vector<32x32xbf16>, vector<8x32xf32> -> vector<8x32xf32>
    %12 = arith.truncf %9 : vector<8x32xf32> to vector<8x32xbf16>
    %13 = vector.shape_cast %12 : vector<8x32xbf16> to vector<1x8x4x8xbf16>
    %14 = tpu.transpose %13, [0, 2, 1, 3] : vector<1x8x4x8xbf16> -> vector<1x4x8x8xbf16>
    %15 = vector.shape_cast %14 : vector<1x4x8x8xbf16> to vector<4x8x8xbf16>
    %16 = arith.truncf %11 : vector<8x32xf32> to vector<8x32xbf16>
    %17 = vector.shape_cast %16 : vector<8x32xbf16> to vector<1x8x4x8xbf16>
    %18 = tpu.transpose %17, [0, 2, 1, 3] : vector<1x8x4x8xbf16> -> vector<1x4x8x8xbf16>
    %19 = vector.shape_cast %18 : vector<1x4x8x8xbf16> to vector<4x8x8xbf16>
    %c8_i32 = arith.constant 8 : i32
    %20 = arith.muli %arg1, %c8_i32 : i32
    %21 = tpu.iota {dimensions = array<i32: 2>} : vector<1x1x8xi32>
    %22 = vector.broadcast %20 : i32 to vector<1x1x8xi32>
    %23 = arith.addi %22, %21 : vector<1x1x8xi32>
    %c0_i32_11 = arith.constant 0 : i32
    %24 = arith.addi %0, %c0_i32_11 : i32
    %25 = arith.index_cast %24 : i32 to index
    %26 = memref.load %arg2[%25] : memref<2xi32, #tpu.memory_space<smem>>
    %27 = vector.broadcast %26 : i32 to vector<1x1x8xi32>
    %28 = arith.cmpi slt, %23, %27 : vector<1x1x8xi32>
    %cst_12 = arith.constant 0.000000e+00 : f32
    %cst_13 = arith.constant -1.000000e+30 : f32
    %29 = vector.broadcast %cst_12 : f32 to vector<1x1x8xf32>
    %30 = vector.broadcast %cst_13 : f32 to vector<1x1x8xf32>
    %31 = arith.select %28, %29, %30 : vector<1x1x8xi1>, vector<1x1x8xf32>
    %c0_14 = arith.constant 0 : index
    %c0_15 = arith.constant 0 : index
    %c0_16 = arith.constant 0 : index
    %32 = vector.load %arg11[%c0_14, %c0_15, %c0_16] : memref<4x16x8xbf16, #tpu.memory_space<vmem>>, vector<4x16x8xbf16>
    "tpu.trace_start"() <{level = 10 : i32, message = "bqd,bkd->bqk"}> : () -> ()
    %cst_17 = arith.constant dense<0.000000e+00> : vector<4x16x8xf32>
    %33 = tpu.matmul %32, %15, %cst_17 {dimension_numbers = #tpu.dot_dimension_numbers<[2], [2], [1], [1], [0, 0, 0, 1, 1, 1], [0], [0]>} : vector<4x16x8xbf16>, vector<4x8x8xbf16>, vector<4x16x8xf32> -> vector<4x16x8xf32>
    "tpu.trace_stop"() : () -> ()
    %34 = vector.shape_cast %33 : vector<4x16x8xf32> to vector<1x4x16x8xf32>
    %35 = vector.shape_cast %31 : vector<1x1x8xf32> to vector<1x1x1x8xf32>
    %36 = vector.broadcast %35 : vector<1x1x1x8xf32> to vector<1x4x16x8xf32>
    %37 = arith.addf %34, %36 : vector<1x4x16x8xf32>
    %38 = vector.shape_cast %37 : vector<1x4x16x8xf32> to vector<4x16x8xf32>
    %c0_18 = arith.constant 0 : index
    %c0_19 = arith.constant 0 : index
    %c0_20 = arith.constant 0 : index
    %39 = vector.load %arg12[%c0_18, %c0_19, %c0_20] : memref<4x16x1xf32, #tpu.memory_space<vmem>>, vector<4x16x1xf32>
    %cst_21 = arith.constant dense<0xFF800000> : vector<4x16xf32>
    %40 = vector.multi_reduction <maximumf>, %38, %cst_21 [2] : vector<4x16x8xf32> to vector<4x16xf32>
    %41 = vector.shape_cast %40 : vector<4x16xf32> to vector<4x16x1xf32>
    %42 = arith.maximumf %39, %41 : vector<4x16x1xf32>
    %43 = arith.subf %39, %42 : vector<4x16x1xf32>
    %44 = math.exp %43 : vector<4x16x1xf32>
    %45 = vector.broadcast %42 : vector<4x16x1xf32> to vector<4x16x8xf32>
    %46 = arith.subf %38, %45 : vector<4x16x8xf32>
    %47 = math.exp %46 : vector<4x16x8xf32>
    %c0_22 = arith.constant 0 : index
    %c0_23 = arith.constant 0 : index
    %c0_24 = arith.constant 0 : index
    %48 = vector.load %arg13[%c0_22, %c0_23, %c0_24] : memref<4x16x1xf32, #tpu.memory_space<vmem>>, vector<4x16x1xf32>
    %49 = arith.mulf %44, %48 : vector<4x16x1xf32>
    %cst_25 = arith.constant dense<0.000000e+00> : vector<4x16xf32>
    %50 = vector.multi_reduction <add>, %47, %cst_25 [2] : vector<4x16x8xf32> to vector<4x16xf32>
    %51 = vector.shape_cast %50 : vector<4x16xf32> to vector<4x16x1xf32>
    %52 = arith.addf %49, %51 : vector<4x16x1xf32>
    %c0_26 = arith.constant 0 : index
    %c0_27 = arith.constant 0 : index
    %c0_28 = arith.constant 0 : index
    %53 = vector.load %arg13[%c0_26, %c0_27, %c0_28] : memref<4x16x1xf32, #tpu.memory_space<vmem>>, vector<4x16x1xf32>
    tpu.vector_store %arg13[%c0_26, %c0_27, %c0_28], %52 {strides = array<i32>} : memref<4x16x1xf32, #tpu.memory_space<vmem>>, vector<4x16x1xf32>,
    %c0_29 = arith.constant 0 : index
    %c0_30 = arith.constant 0 : index
    %c0_31 = arith.constant 0 : index
    %54 = vector.load %arg14[%c0_29, %c0_30, %c0_31] : memref<4x16x8xf32, #tpu.memory_space<vmem>>, vector<4x16x8xf32>
    %55 = vector.broadcast %44 : vector<4x16x1xf32> to vector<4x16x8xf32>
    %56 = arith.mulf %55, %54 : vector<4x16x8xf32>
    %57 = arith.truncf %47 : vector<4x16x8xf32> to vector<4x16x8xbf16>
    "tpu.trace_start"() <{level = 10 : i32, message = "bqk,bkd->bqd"}> : () -> ()
    %cst_32 = arith.constant dense<0.000000e+00> : vector<4x16x8xf32>
    %58 = tpu.matmul %57, %19, %cst_32 {dimension_numbers = #tpu.dot_dimension_numbers<[2], [1], [1], [2], [0, 0, 0, 1, 1, 2], [0], [0]>} : vector<4x16x8xbf16>, vector<4x8x8xbf16>, vector<4x16x8xf32> -> vector<4x16x8xf32>
    "tpu.trace_stop"() : () -> ()
    %59 = arith.addf %56, %58 : vector<4x16x8xf32>
    %c0_33 = arith.constant 0 : index
    %c0_34 = arith.constant 0 : index
    %c0_35 = arith.constant 0 : index
    %60 = vector.load %arg14[%c0_33, %c0_34, %c0_35] : memref<4x16x8xf32, #tpu.memory_space<vmem>>, vector<4x16x8xf32>
    tpu.vector_store %arg14[%c0_33, %c0_34, %c0_35], %59 {strides = array<i32>} : memref<4x16x8xf32, #tpu.memory_space<vmem>>, vector<4x16x8xf32>,
    %c0_36 = arith.constant 0 : index
    %c0_37 = arith.constant 0 : index
    %c0_38 = arith.constant 0 : index
    %61 = vector.load %arg12[%c0_36, %c0_37, %c0_38] : memref<4x16x1xf32, #tpu.memory_space<vmem>>, vector<4x16x1xf32>
    tpu.vector_store %arg12[%c0_36, %c0_37, %c0_38], %42 {strides = array<i32>} : memref<4x16x1xf32, #tpu.memory_space<vmem>>, vector<4x16x1xf32>,
    %c1_i32_39 = arith.constant 1 : i32
    %62 = arith.cmpi eq, %arg1, %c1_i32_39 : i32
    %63 = arith.extui %62 : i1 to i32
    %c0_i32_40 = arith.constant 0 : i32
    %64 = arith.cmpi ne, %63, %c0_i32_40 : i32
    scf.if %64 {
      %c0_41 = arith.constant 0 : index
      %c0_42 = arith.constant 0 : index
      %c0_43 = arith.constant 0 : index
      %65 = vector.load %arg14[%c0_41, %c0_42, %c0_43] : memref<4x16x8xf32, #tpu.memory_space<vmem>>, vector<4x16x8xf32>
      %c0_44 = arith.constant 0 : index
      %c0_45 = arith.constant 0 : index
      %c0_46 = arith.constant 0 : index
      %66 = vector.load %arg13[%c0_44, %c0_45, %c0_46] : memref<4x16x1xf32, #tpu.memory_space<vmem>>, vector<4x16x1xf32>
      %67 = tpu.reciprocal %66 {approx = true} : vector<4x16x1xf32> -> vector<4x16x1xf32>
      %68 = vector.broadcast %67 : vector<4x16x1xf32> to vector<4x16x8xf32>
      %69 = arith.mulf %65, %68 : vector<4x16x8xf32>
      %70 = vector.shape_cast %69 : vector<4x16x8xf32> to vector<1x4x16x8xf32>
      %71 = tpu.transpose %70, [0, 2, 1, 3] : vector<1x4x16x8xf32> -> vector<1x16x4x8xf32>
      %72 = vector.shape_cast %71 : vector<1x16x4x8xf32> to vector<16x32xf32>
      %73 = arith.truncf %72 : vector<16x32xf32> to vector<16x32xbf16>
      %c0_47 = arith.constant 0 : index
      %c0_48 = arith.constant 0 : index
      %74 = vector.load %arg9[%c0_47, %c0_48] : memref<32x32xbf16, #tpu.memory_space<vmem>>, vector<32x32xbf16>
      %cst_49 = arith.constant dense<0.000000e+00> : vector<16x32xf32>
      %75 = tpu.matmul %73, %74, %cst_49 {dimension_numbers = #tpu.dot_dimension_numbers<[1], [0], [0], [1], [0, 0, 1, 1], [], []>} : vector<16x32xbf16>, vector<32x32xbf16>, vector<16x32xf32> -> vector<16x32xf32>
      %76 = vector.shape_cast %75 : vector<16x32xf32> to vector<1x16x32xf32>
      %c0_50 = arith.constant 0 : index
      %c0_51 = arith.constant 0 : index
      %c0_52 = arith.constant 0 : index
      %77 = vector.load %arg10[%c0_50, %c0_51, %c0_52] : memref<1x16x32xf32, #tpu.memory_space<vmem>>, vector<1x16x32xf32>
      tpu.vector_store %arg10[%c0_50, %c0_51, %c0_52], %76 {strides = array<i32>} : memref<1x16x32xf32, #tpu.memory_space<vmem>>, vector<1x16x32xf32>,
    } else {
    }
    return
  }
  func.func @transform_0(%arg0: i32, %arg1: i32, %arg2: memref<2xi32, #tpu.memory_space<smem>>) -> (i32, i32, i32) {
    %c0_i32 = arith.constant 0 : i32
    %c0_i32_0 = arith.constant 0 : i32
    %c0_i32_1 = arith.constant 0 : i32
    return %arg0, %c0_i32, %c0_i32_0 : i32, i32, i32
  }
  func.func @transform_1(%arg0: i32, %arg1: i32, %arg2: memref<2xi32, #tpu.memory_space<smem>>) -> (i32, i32, i32) {
    %c0_i32 = arith.constant 0 : i32
    %c0_i32_0 = arith.constant 0 : i32
    return %arg0, %arg1, %c0_i32 : i32, i32, i32
  }
  func.func @transform_2(%arg0: i32, %arg1: i32, %arg2: memref<2xi32, #tpu.memory_space<smem>>) -> (i32, i32, i32) {
    %c0_i32 = arith.constant 0 : i32
    %c0_i32_0 = arith.constant 0 : i32
    return %arg0, %arg1, %c0_i32 : i32, i32, i32
  }
  func.func @transform_3(%arg0: i32, %arg1: i32, %arg2: memref<2xi32, #tpu.memory_space<smem>>) -> (i32, i32) {
    %c0_i32 = arith.constant 0 : i32
    %c0_i32_0 = arith.constant 0 : i32
    %c0_i32_1 = arith.constant 0 : i32
    return %c0_i32, %c0_i32_0 : i32, i32
  }
  func.func @transform_4(%arg0: i32, %arg1: i32, %arg2: memref<2xi32, #tpu.memory_space<smem>>) -> (i32, i32) {
    %c0_i32 = arith.constant 0 : i32
    %c0_i32_0 = arith.constant 0 : i32
    %c0_i32_1 = arith.constant 0 : i32
    return %c0_i32, %c0_i32_0 : i32, i32
  }
  func.func @transform_5(%arg0: i32, %arg1: i32, %arg2: memref<2xi32, #tpu.memory_space<smem>>) -> (i32, i32) {
    %c0_i32 = arith.constant 0 : i32
    %c0_i32_0 = arith.constant 0 : i32
    %c0_i32_1 = arith.constant 0 : i32
    return %c0_i32, %c0_i32_0 : i32, i32
  }
  func.func @transform_6(%arg0: i32, %arg1: i32, %arg2: memref<2xi32, #tpu.memory_space<smem>>) -> (i32, i32) {
    %c0_i32 = arith.constant 0 : i32
    %c0_i32_0 = arith.constant 0 : i32
    %c0_i32_1 = arith.constant 0 : i32
    return %c0_i32, %c0_i32_0 : i32, i32
  }
  func.func @transform_7(%arg0: i32, %arg1: i32, %arg2: memref<2xi32, #tpu.memory_space<smem>>) -> (i32, i32, i32) {
    %c0_i32 = arith.constant 0 : i32
    %c0_i32_0 = arith.constant 0 : i32
    %c0_i32_1 = arith.constant 0 : i32
    return %arg0, %c0_i32, %c0_i32_0 : i32, i32, i32
  }
}

module attributes {stable_mosaic.version = 11 : i64} {
  func.func @kernel(%arg0: i32, %arg1: i32, %arg2: memref<2xi32, #tpu.memory_space<smem>>, %arg3: memref<1x16x32xbf16, #tpu.memory_space<vmem>>, %arg4: memref<1x8x32xbf16, #tpu.memory_space<vmem>>, %arg5: memref<1x8x32xbf16, #tpu.memory_space<vmem>>, %arg6: memref<32x32xbf16, #tpu.memory_space<vmem>>, %arg7: memref<32x32xbf16, #tpu.memory_space<vmem>>, %arg8: memref<32x32xbf16, #tpu.memory_space<vmem>>, %arg9: memref<32x32xbf16, #tpu.memory_space<vmem>>, %arg10: memref<1x16x32xf32, #tpu.memory_space<vmem>>, %arg11: memref<4x16x8xbf16, #tpu.memory_space<vmem>>, %arg12: memref<4x16x1xf32, #tpu.memory_space<vmem>>, %arg13: memref<4x16x1xf32, #tpu.memory_space<vmem>>, %arg14: memref<4x16x8xf32, #tpu.memory_space<vmem>>) attributes {dimension_semantics = [#tpu.dimension_semantics<parallel>, #tpu.dimension_semantics<arbitrary>], iteration_bounds = array<i64: 2, 2>, scalar_prefetch = 1 : i64, scratch_operands = 4 : i64, tpu.core_type = #tpu.core_type<tc>, window_params = [{transform_indices = @transform_0, window_bounds = array<i64: 1, 16, 32>}, {transform_indices = @transform_1, window_bounds = array<i64: 1, 8, 32>}, {transform_indices = @transform_2, window_bounds = array<i64: 1, 8, 32>}, {pipeline_mode = #tpu.pipeline_mode<synchronous>, transform_indices = @transform_3, window_bounds = array<i64: 32, 32>}, {pipeline_mode = #tpu.pipeline_mode<synchronous>, transform_indices = @transform_4, window_bounds = array<i64: 32, 32>}, {pipeline_mode = #tpu.pipeline_mode<synchronous>, transform_indices = @transform_5, window_bounds = array<i64: 32, 32>}, {pipeline_mode = #tpu.pipeline_mode<synchronous>, transform_indices = @transform_6, window_bounds = array<i64: 32, 32>}, {transform_indices = @transform_7, window_bounds = array<i64: 1, 16, 32>}]} {
    %c1_i32 = arith.constant 1 : i32
    %0 = arith.muli %arg0, %c1_i32 : i32
    %c0_i32 = arith.constant 0 : i32
    %1 = arith.cmpi eq, %arg1, %c0_i32 : i32
    %2 = arith.extui %1 : i1 to i32
    %c0_i32_0 = arith.constant 0 : i32
    %3 = arith.cmpi ne, %2, %c0_i32_0 : i32
    scf.if %3 {
      %c0_41 = arith.constant 0 : index
      %c0_42 = arith.constant 0 : index
      %c0_43 = arith.constant 0 : index
      %65 = vector.load %arg3[%c0_41, %c0_42, %c0_43] : memref<1x16x32xbf16, #tpu.memory_space<vmem>>, vector<1x16x32xbf16>
      %66 = vector.shape_cast %65 : vector<1x16x32xbf16> to vector<16x32xbf16>
      %c0_44 = arith.constant 0 : index
      %c0_45 = arith.constant 0 : index
      %67 = vector.load %arg6[%c0_44, %c0_45] : memref<32x32xbf16, #tpu.memory_space<vmem>>, vector<32x32xbf16>
      %cst_46 = arith.constant dense<0.000000e+00> : vector<16x32xf32>
      %68 = tpu.matmul %66, %67, %cst_46 {dimension_numbers = #tpu.dot_dimension_numbers<[1], [0], [0], [1], [0, 0, 1, 1], [], []>} : vector<16x32xbf16>, vector<32x32xbf16>, vector<16x32xf32> -> vector<16x32xf32>
      %69 = arith.truncf %68 : vector<16x32xf32> to vector<16x32xbf16>
      %70 = vector.shape_cast %69 : vector<16x32xbf16> to vector<1x16x4x8xbf16>
      %71 = tpu.transpose %70, [0, 2, 1, 3] : vector<1x16x4x8xbf16> -> vector<1x4x16x8xbf16>
      %72 = vector.shape_cast %71 : vector<1x4x16x8xbf16> to vector<4x16x8xbf16>
      %c0_47 = arith.constant 0 : index
      %c0_48 = arith.constant 0 : index
      %c0_49 = arith.constant 0 : index
      %73 = vector.load %arg11[%c0_47, %c0_48, %c0_49] : memref<4x16x8xbf16, #tpu.memory_space<vmem>>, vector<4x16x8xbf16>
      tpu.vector_store %arg11[%c0_47, %c0_48, %c0_49], %72 {strides = array<i32>} : memref<4x16x8xbf16, #tpu.memory_space<vmem>>, vector<4x16x8xbf16>,
      %cst_50 = arith.constant -1.000000e+30 : f32
      %74 = vector.broadcast %cst_50 : f32 to vector<4x16x1xf32>
      %c0_51 = arith.constant 0 : index
      %c0_52 = arith.constant 0 : index
      %c0_53 = arith.constant 0 : index
      %75 = vector.load %arg12[%c0_51, %c0_52, %c0_53] : memref<4x16x1xf32, #tpu.memory_space<vmem>>, vector<4x16x1xf32>
      tpu.vector_store %arg12[%c0_51, %c0_52, %c0_53], %74 {strides = array<i32>} : memref<4x16x1xf32, #tpu.memory_space<vmem>>, vector<4x16x1xf32>,
      %cst_54 = arith.constant 0.000000e+00 : f32
      %76 = vector.broadcast %cst_54 : f32 to vector<4x16x1xf32>
      %c0_55 = arith.constant 0 : index
      %c0_56 = arith.constant 0 : index
      %c0_57 = arith.constant 0 : index
      %77 = vector.load %arg13[%c0_55, %c0_56, %c0_57] : memref<4x16x1xf32, #tpu.memory_space<vmem>>, vector<4x16x1xf32>
      tpu.vector_store %arg13[%c0_55, %c0_56, %c0_57], %76 {strides = array<i32>} : memref<4x16x1xf32, #tpu.memory_space<vmem>>, vector<4x16x1xf32>,
      %cst_58 = arith.constant 0.000000e+00 : f32
      %78 = vector.broadcast %cst_58 : f32 to vector<4x16x8xf32>
      %c0_59 = arith.constant 0 : index
      %c0_60 = arith.constant 0 : index
      %c0_61 = arith.constant 0 : index
      %79 = vector.load %arg14[%c0_59, %c0_60, %c0_61] : memref<4x16x8xf32, #tpu.memory_space<vmem>>, vector<4x16x8xf32>
      tpu.vector_store %arg14[%c0_59, %c0_60, %c0_61], %78 {strides = array<i32>} : memref<4x16x8xf32, #tpu.memory_space<vmem>>, vector<4x16x8xf32>,
    } else {
    }
    %c0 = arith.constant 0 : index
    %c0_1 = arith.constant 0 : index
    %c0_2 = arith.constant 0 : index
    %4 = vector.load %arg4[%c0, %c0_1, %c0_2] : memref<1x8x32xbf16, #tpu.memory_space<vmem>>, vector<1x8x32xbf16>
    %5 = vector.shape_cast %4 : vector<1x8x32xbf16> to vector<8x32xbf16>
    %c0_3 = arith.constant 0 : index
    %c0_4 = arith.constant 0 : index
    %c0_5 = arith.constant 0 : index
    %6 = vector.load %arg5[%c0_3, %c0_4, %c0_5] : memref<1x8x32xbf16, #tpu.memory_space<vmem>>, vector<1x8x32xbf16>
    %7 = vector.shape_cast %6 : vector<1x8x32xbf16> to vector<8x32xbf16>
    %c0_6 = arith.constant 0 : index
    %c0_7 = arith.constant 0 : index
    %8 = vector.load %arg7[%c0_6, %c0_7] : memref<32x32xbf16, #tpu.memory_space<vmem>>, vector<32x32xbf16>
    %cst = arith.constant dense<0.000000e+00> : vector<8x32xf32>
    %9 = tpu.matmul %5, %8, %cst {dimension_numbers = #tpu.dot_dimension_numbers<[1], [0], [0], [1], [0, 0, 1, 1], [], []>} : vector<8x32xbf16>, vector<32x32xbf16>, vector<8x32xf32> -> vector<8x32xf32>
    %c0_8 = arith.constant 0 : index
    %c0_9 = arith.constant 0 : index
    %10 = vector.load %arg8[%c0_8, %c0_9] : memref<32x32xbf16, #tpu.memory_space<vmem>>, vector<32x32xbf16>
    %cst_10 = arith.constant dense<0.000000e+00> : vector<8x32xf32>
    %11 = tpu.matmul %7, %10, %cst_10 {dimension_numbers = #tpu.dot_dimension_numbers<[1], [0], [0], [1], [0, 0, 1, 1], [], []>} : vector<8x32xbf16>, vector<32x32xbf16>, vector<8x32xf32> -> vector<8x32xf32>
    %12 = arith.truncf %9 : vector<8x32xf32> to vector<8x32xbf16>
    %13 = vector.shape_cast %12 : vector<8x32xbf16> to vector<1x8x4x8xbf16>
    %14 = tpu.transpose %13, [0, 2, 1, 3] : vector<1x8x4x8xbf16> -> vector<1x4x8x8xbf16>
    %15 = vector.shape_cast %14 : vector<1x4x8x8xbf16> to vector<4x8x8xbf16>
    %16 = arith.truncf %11 : vector<8x32xf32> to vector<8x32xbf16>
    %17 = vector.shape_cast %16 : vector<8x32xbf16> to vector<1x8x4x8xbf16>
    %18 = tpu.transpose %17, [0, 2, 1, 3] : vector<1x8x4x8xbf16> -> vector<1x4x8x8xbf16>
    %19 = vector.shape_cast %18 : vector<1x4x8x8xbf16> to vector<4x8x8xbf16>
    %c8_i32 = arith.constant 8 : i32
    %20 = arith.muli %arg1, %c8_i32 : i32
    %21 = tpu.iota {dimensions = array<i32: 2>} : vector<1x1x8xi32>
    %22 = vector.broadcast %20 : i32 to vector<1x1x8xi32>
    %23 = arith.addi %22, %21 : vector<1x1x8xi32>
    %c0_i32_11 = arith.constant 0 : i32
    %24 = arith.addi %0, %c0_i32_11 : i32
    %25 = arith.index_cast %24 : i32 to index
    %26 = memref.load %arg2[%25] : memref<2xi32, #tpu.memory_space<smem>>
    %27 = vector.broadcast %26 : i32 to vector<1x1x8xi32>
    %28 = arith.cmpi slt, %23, %27 : vector<1x1x8xi32>
    %cst_12 = arith.constant 0.000000e+00 : f32
    %cst_13 = arith.constant -1.000000e+30 : f32
    %29 = vector.broadcast %cst_12 : f32 to vector<1x1x8xf32>
    %30 = vector.broadcast %cst_13 : f32 to vector<1x1x8xf32>
    %31 = arith.select %28, %29, %30 : vector<1x1x8xi1>, vector<1x1x8xf32>
    %c0_14 = arith.constant 0 : index
    %c0_15 = arith.constant 0 : index
    %c0_16 = arith.constant 0 : index
    %32 = vector.load %arg11[%c0_14, %c0_15, %c0_16] : memref<4x16x8xbf16, #tpu.memory_space<vmem>>, vector<4x16x8xbf16>
    "tpu.trace_start"() <{level = 10 : i32, message = "bqd,bkd->bqk"}> : () -> ()
    %cst_17 = arith.constant dense<0.000000e+00> : vector<4x16x8xf32>
    %33 = tpu.matmul %32, %15, %cst_17 {dimension_numbers = #tpu.dot_dimension_numbers<[2], [2], [1], [1], [0, 0, 0, 1, 1, 1], [0], [0]>} : vector<4x16x8xbf16>, vector<4x8x8xbf16>, vector<4x16x8xf32> -> vector<4x16x8xf32>
    "tpu.trace_stop"() : () -> ()
    %34 = vector.shape_cast %33 : vector<4x16x8xf32> to vector<1x4x16x8xf32>
    %35 = vector.shape_cast %31 : vector<1x1x8xf32> to vector<1x1x1x8xf32>
    %36 = vector.broadcast %35 : vector<1x1x1x8xf32> to vector<1x4x16x8xf32>
    %37 = arith.addf %34, %36 : vector<1x4x16x8xf32>
    %38 = vector.shape_cast %37 : vector<1x4x16x8xf32> to vector<4x16x8xf32>
    %c0_18 = arith.constant 0 : index
    %c0_19 = arith.constant 0 : index
    %c0_20 = arith.constant 0 : index
    %39 = vector.load %arg12[%c0_18, %c0_19, %c0_20] : memref<4x16x1xf32, #tpu.memory_space<vmem>>, vector<4x16x1xf32>
    %cst_21 = arith.constant dense<0xFF800000> : vector<4x16xf32>
    %40 = vector.multi_reduction <maximumf>, %38, %cst_21 [2] : vector<4x16x8xf32> to vector<4x16xf32>
    %41 = vector.shape_cast %40 : vector<4x16xf32> to vector<4x16x1xf32>
    %42 = arith.maximumf %39, %41 : vector<4x16x1xf32>
    %43 = arith.subf %39, %42 : vector<4x16x1xf32>
    %44 = math.exp %43 : vector<4x16x1xf32>
    %45 = vector.broadcast %42 : vector<4x16x1xf32> to vector<4x16x8xf32>
    %46 = arith.subf %38, %45 : vector<4x16x8xf32>
    %47 = math.exp %46 : vector<4x16x8xf32>
    %c0_22 = arith.constant 0 : index
    %c0_23 = arith.constant 0 : index
    %c0_24 = arith.constant 0 : index
    %48 = vector.load %arg13[%c0_22, %c0_23, %c0_24] : memref<4x16x1xf32, #tpu.memory_space<vmem>>, vector<4x16x1xf32>
    %49 = arith.mulf %44, %48 : vector<4x16x1xf32>
    %cst_25 = arith.constant dense<0.000000e+00> : vector<4x16xf32>
    %50 = vector.multi_reduction <add>, %47, %cst_25 [2] : vector<4x16x8xf32> to vector<4x16xf32>
    %51 = vector.shape_cast %50 : vector<4x16xf32> to vector<4x16x1xf32>
    %52 = arith.addf %49, %51 : vector<4x16x1xf32>
    %c0_26 = arith.constant 0 : index
    %c0_27 = arith.constant 0 : index
    %c0_28 = arith.constant 0 : index
    %53 = vector.load %arg13[%c0_26, %c0_27, %c0_28] : memref<4x16x1xf32, #tpu.memory_space<vmem>>, vector<4x16x1xf32>
    tpu.vector_store %arg13[%c0_26, %c0_27, %c0_28], %52 {strides = array<i32>} : memref<4x16x1xf32, #tpu.memory_space<vmem>>, vector<4x16x1xf32>,
    %c0_29 = arith.constant 0 : index
    %c0_30 = arith.constant 0 : index
    %c0_31 = arith.constant 0 : index
    %54 = vector.load %arg14[%c0_29, %c0_30, %c0_31] : memref<4x16x8xf32, #tpu.memory_space<vmem>>, vector<4x16x8xf32>
    %55 = vector.broadcast %44 : vector<4x16x1xf32> to vector<4x16x8xf32>
    %56 = arith.mulf %55, %54 : vector<4x16x8xf32>
    %57 = arith.truncf %47 : vector<4x16x8xf32> to vector<4x16x8xbf16>
    "tpu.trace_start"() <{level = 10 : i32, message = "bqk,bkd->bqd"}> : () -> ()
    %cst_32 = arith.constant dense<0.000000e+00> : vector<4x16x8xf32>
    %58 = tpu.matmul %57, %19, %cst_32 {dimension_numbers = #tpu.dot_dimension_numbers<[2], [1], [1], [2], [0, 0, 0, 1, 1, 2], [0], [0]>} : vector<4x16x8xbf16>, vector<4x8x8xbf16>, vector<4x16x8xf32> -> vector<4x16x8xf32>
    "tpu.trace_stop"() : () -> ()
    %59 = arith.addf %56, %58 : vector<4x16x8xf32>
    %c0_33 = arith.constant 0 : index
    %c0_34 = arith.constant 0 : index
    %c0_35 = arith.constant 0 : index
    %60 = vector.load %arg14[%c0_33, %c0_34, %c0_35] : memref<4x16x8xf32, #tpu.memory_space<vmem>>, vector<4x16x8xf32>
    tpu.vector_store %arg14[%c0_33, %c0_34, %c0_35], %59 {strides = array<i32>} : memref<4x16x8xf32, #tpu.memory_space<vmem>>, vector<4x16x8xf32>,
    %c0_36 = arith.constant 0 : index
    %c0_37 = arith.constant 0 : index
    %c0_38 = arith.constant 0 : index
    %61 = vector.load %arg12[%c0_36, %c0_37, %c0_38] : memref<4x16x1xf32, #tpu.memory_space<vmem>>, vector<4x16x1xf32>
    tpu.vector_store %arg12[%c0_36, %c0_37, %c0_38], %42 {strides = array<i32>} : memref<4x16x1xf32, #tpu.memory_space<vmem>>, vector<4x16x1xf32>,
    %c1_i32_39 = arith.constant 1 : i32
    %62 = arith.cmpi eq, %arg1, %c1_i32_39 : i32
    %63 = arith.extui %62 : i1 to i32
    %c0_i32_40 = arith.constant 0 : i32
    %64 = arith.cmpi ne, %63, %c0_i32_40 : i32
    scf.if %64 {
      %c0_41 = arith.constant 0 : index
      %c0_42 = arith.constant 0 : index
      %c0_43 = arith.constant 0 : index
      %65 = vector.load %arg14[%c0_41, %c0_42, %c0_43] : memref<4x16x8xf32, #tpu.memory_space<vmem>>, vector<4x16x8xf32>
      %c0_44 = arith.constant 0 : index
      %c0_45 = arith.constant 0 : index
      %c0_46 = arith.constant 0 : index
      %66 = vector.load %arg13[%c0_44, %c0_45, %c0_46] : memref<4x16x1xf32, #tpu.memory_space<vmem>>, vector<4x16x1xf32>
      %67 = tpu.reciprocal %66 {approx = true} : vector<4x16x1xf32> -> vector<4x16x1xf32>
      %68 = vector.broadcast %67 : vector<4x16x1xf32> to vector<4x16x8xf32>
      %69 = arith.mulf %65, %68 : vector<4x16x8xf32>
      %70 = vector.shape_cast %69 : vector<4x16x8xf32> to vector<1x4x16x8xf32>
      %71 = tpu.transpose %70, [0, 2, 1, 3] : vector<1x4x16x8xf32> -> vector<1x16x4x8xf32>
      %72 = vector.shape_cast %71 : vector<1x16x4x8xf32> to vector<16x32xf32>
      %73 = arith.truncf %72 : vector<16x32xf32> to vector<16x32xbf16>
      %c0_47 = arith.constant 0 : index
      %c0_48 = arith.constant 0 : index
      %74 = vector.load %arg9[%c0_47, %c0_48] : memref<32x32xbf16, #tpu.memory_space<vmem>>, vector<32x32xbf16>
      %cst_49 = arith.constant dense<0.000000e+00> : vector<16x32xf32>
      %75 = tpu.matmul %73, %74, %cst_49 {dimension_numbers = #tpu.dot_dimension_numbers<[1], [0], [0], [1], [0, 0, 1, 1], [], []>} : vector<16x32xbf16>, vector<32x32xbf16>, vector<16x32xf32> -> vector<16x32xf32>
      %76 = vector.shape_cast %75 : vector<16x32xf32> to vector<1x16x32xf32>
      %c0_50 = arith.constant 0 : index
      %c0_51 = arith.constant 0 : index
      %c0_52 = arith.constant 0 : index
      %77 = vector.load %arg10[%c0_50, %c0_51, %c0_52] : memref<1x16x32xf32, #tpu.memory_space<vmem>>, vector<1x16x32xf32>
      tpu.vector_store %arg10[%c0_50, %c0_51, %c0_52], %76 {strides = array<i32>} : memref<1x16x32xf32, #tpu.memory_space<vmem>>, vector<1x16x32xf32>,
    } else {
    }
    return
  }
  func.func @transform_0(%arg0: i32, %arg1: i32, %arg2: memref<2xi32, #tpu.memory_space<smem>>) -> (i32, i32, i32) {
    %c0_i32 = arith.constant 0 : i32
    %c0_i32_0 = arith.constant 0 : i32
    %c0_i32_1 = arith.constant 0 : i32
    return %arg0, %c0_i32, %c0_i32_0 : i32, i32, i32
  }
  func.func @transform_1(%arg0: i32, %arg1: i32, %arg2: memref<2xi32, #tpu.memory_space<smem>>) -> (i32, i32, i32) {
    %c0_i32 = arith.constant 0 : i32
    %c0_i32_0 = arith.constant 0 : i32
    return %arg0, %arg1, %c0_i32 : i32, i32, i32
  }
  func.func @transform_2(%arg0: i32, %arg1: i32, %arg2: memref<2xi32, #tpu.memory_space<smem>>) -> (i32, i32, i32) {
    %c0_i32 = arith.constant 0 : i32
    %c0_i32_0 = arith.constant 0 : i32
    return %arg0, %arg1, %c0_i32 : i32, i32, i32
  }
  func.func @transform_3(%arg0: i32, %arg1: i32, %arg2: memref<2xi32, #tpu.memory_space<smem>>) -> (i32, i32) {
    %c0_i32 = arith.constant 0 : i32
    %c0_i32_0 = arith.constant 0 : i32
    %c0_i32_1 = arith.constant 0 : i32
    return %c0_i32, %c0_i32_0 : i32, i32
  }
  func.func @transform_4(%arg0: i32, %arg1: i32, %arg2: memref<2xi32, #tpu.memory_space<smem>>) -> (i32, i32) {
    %c0_i32 = arith.constant 0 : i32
    %c0_i32_0 = arith.constant 0 : i32
    %c0_i32_1 = arith.constant 0 : i32
    return %c0_i32, %c0_i32_0 : i32, i32
  }
  func.func @transform_5(%arg0: i32, %arg1: i32, %arg2: memref<2xi32, #tpu.memory_space<smem>>) -> (i32, i32) {
    %c0_i32 = arith.constant 0 : i32
    %c0_i32_0 = arith.constant 0 : i32
    %c0_i32_1 = arith.constant 0 : i32
    return %c0_i32, %c0_i32_0 : i32, i32
  }
  func.func @transform_6(%arg0: i32, %arg1: i32, %arg2: memref<2xi32, #tpu.memory_space<smem>>) -> (i32, i32) {
    %c0_i32 = arith.constant 0 : i32
    %c0_i32_0 = arith.constant 0 : i32
    %c0_i32_1 = arith.constant 0 : i32
    return %c0_i32, %c0_i32_0 : i32, i32
  }
  func.func @transform_7(%arg0: i32, %arg1: i32, %arg2: memref<2xi32, #tpu.memory_space<smem>>) -> (i32, i32, i32) {
    %c0_i32 = arith.constant 0 : i32
    %c0_i32_0 = arith.constant 0 : i32
    %c0_i32_1 = arith.constant 0 : i32
    return %arg0, %c0_i32, %c0_i32_0 : i32, i32, i32
  }
}

module attributes {stable_mosaic.version = 11 : i64} {
  func.func @kernel(%arg0: i32, %arg1: i32, %arg2: memref<2xi32, #tpu.memory_space<smem>>, %arg3: memref<1x16x32xbf16, #tpu.memory_space<vmem>>, %arg4: memref<1x8x32xbf16, #tpu.memory_space<vmem>>, %arg5: memref<1x8x32xbf16, #tpu.memory_space<vmem>>, %arg6: memref<32x32xbf16, #tpu.memory_space<vmem>>, %arg7: memref<32x32xbf16, #tpu.memory_space<vmem>>, %arg8: memref<32x32xbf16, #tpu.memory_space<vmem>>, %arg9: memref<32x32xbf16, #tpu.memory_space<vmem>>, %arg10: memref<1x16x32xf32, #tpu.memory_space<vmem>>, %arg11: memref<4x16x8xbf16, #tpu.memory_space<vmem>>, %arg12: memref<4x16x1xf32, #tpu.memory_space<vmem>>, %arg13: memref<4x16x1xf32, #tpu.memory_space<vmem>>, %arg14: memref<4x16x8xf32, #tpu.memory_space<vmem>>) attributes {dimension_semantics = [#tpu.dimension_semantics<parallel>, #tpu.dimension_semantics<arbitrary>], iteration_bounds = array<i64: 2, 2>, scalar_prefetch = 1 : i64, scratch_operands = 4 : i64, tpu.core_type = #tpu.core_type<tc>, window_params = [{transform_indices = @transform_0, window_bounds = array<i64: 1, 16, 32>}, {transform_indices = @transform_1, window_bounds = array<i64: 1, 8, 32>}, {transform_indices = @transform_2, window_bounds = array<i64: 1, 8, 32>}, {pipeline_mode = #tpu.pipeline_mode<synchronous>, transform_indices = @transform_3, window_bounds = array<i64: 32, 32>}, {pipeline_mode = #tpu.pipeline_mode<synchronous>, transform_indices = @transform_4, window_bounds = array<i64: 32, 32>}, {pipeline_mode = #tpu.pipeline_mode<synchronous>, transform_indices = @transform_5, window_bounds = array<i64: 32, 32>}, {pipeline_mode = #tpu.pipeline_mode<synchronous>, transform_indices = @transform_6, window_bounds = array<i64: 32, 32>}, {transform_indices = @transform_7, window_bounds = array<i64: 1, 16, 32>}]} {
    %c1_i32 = arith.constant 1 : i32
    %0 = arith.muli %arg0, %c1_i32 : i32
    %c0_i32 = arith.constant 0 : i32
    %1 = arith.cmpi eq, %arg1, %c0_i32 : i32
    %2 = arith.extui %1 : i1 to i32
    %c0_i32_0 = arith.constant 0 : i32
    %3 = arith.cmpi ne, %2, %c0_i32_0 : i32
    scf.if %3 {
      %c0_41 = arith.constant 0 : index
      %c0_42 = arith.constant 0 : index
      %c0_43 = arith.constant 0 : index
      %77 = vector.load %arg3[%c0_41, %c0_42, %c0_43] : memref<1x16x32xbf16, #tpu.memory_space<vmem>>, vector<1x16x32xbf16>
      %78 = vector.shape_cast %77 : vector<1x16x32xbf16> to vector<16x32xbf16>
      %c0_44 = arith.constant 0 : index
      %c0_45 = arith.constant 0 : index
      %79 = vector.load %arg6[%c0_44, %c0_45] : memref<32x32xbf16, #tpu.memory_space<vmem>>, vector<32x32xbf16>
      %cst_46 = arith.constant dense<0.000000e+00> : vector<16x32xf32>
      %80 = tpu.matmul %78, %79, %cst_46 {dimension_numbers = #tpu.dot_dimension_numbers<[1], [0], [0], [1], [0, 0, 1, 1], [], []>} : vector<16x32xbf16>, vector<32x32xbf16>, vector<16x32xf32> -> vector<16x32xf32>
      %81 = arith.truncf %80 : vector<16x32xf32> to vector<16x32xbf16>
      %82 = vector.extract_strided_slice %81 {offsets = [0, 0], sizes = [16, 8], strides = [1, 1]} : vector<16x32xbf16> to vector<16x8xbf16>
      %83 = vector.extract_strided_slice %81 {offsets = [0, 8], sizes = [16, 8], strides = [1, 1]} : vector<16x32xbf16> to vector<16x8xbf16>
      %84 = vector.extract_strided_slice %81 {offsets = [0, 16], sizes = [16, 8], strides = [1, 1]} : vector<16x32xbf16> to vector<16x8xbf16>
      %85 = vector.extract_strided_slice %81 {offsets = [0, 24], sizes = [16, 8], strides = [1, 1]} : vector<16x32xbf16> to vector<16x8xbf16>
      %86 = vector.shape_cast %82 : vector<16x8xbf16> to vector<1x16x8xbf16>
      %87 = vector.shape_cast %83 : vector<16x8xbf16> to vector<1x16x8xbf16>
      %88 = vector.shape_cast %84 : vector<16x8xbf16> to vector<1x16x8xbf16>
      %89 = vector.shape_cast %85 : vector<16x8xbf16> to vector<1x16x8xbf16>
      %90 = tpu.concatenate %86, %87, %88, %89 in 0 : vector<1x16x8xbf16>, vector<1x16x8xbf16>, vector<1x16x8xbf16>, vector<1x16x8xbf16> -> vector<4x16x8xbf16>
      %c0_47 = arith.constant 0 : index
      %c0_48 = arith.constant 0 : index
      %c0_49 = arith.constant 0 : index
      %91 = vector.load %arg11[%c0_47, %c0_48, %c0_49] : memref<4x16x8xbf16, #tpu.memory_space<vmem>>, vector<4x16x8xbf16>
      tpu.vector_store %arg11[%c0_47, %c0_48, %c0_49], %90 {strides = array<i32>} : memref<4x16x8xbf16, #tpu.memory_space<vmem>>, vector<4x16x8xbf16>,
      %cst_50 = arith.constant -1.000000e+30 : f32
      %92 = vector.broadcast %cst_50 : f32 to vector<4x16x1xf32>
      %c0_51 = arith.constant 0 : index
      %c0_52 = arith.constant 0 : index
      %c0_53 = arith.constant 0 : index
      %93 = vector.load %arg12[%c0_51, %c0_52, %c0_53] : memref<4x16x1xf32, #tpu.memory_space<vmem>>, vector<4x16x1xf32>
      tpu.vector_store %arg12[%c0_51, %c0_52, %c0_53], %92 {strides = array<i32>} : memref<4x16x1xf32, #tpu.memory_space<vmem>>, vector<4x16x1xf32>,
      %cst_54 = arith.constant 0.000000e+00 : f32
      %94 = vector.broadcast %cst_54 : f32 to vector<4x16x1xf32>
      %c0_55 = arith.constant 0 : index
      %c0_56 = arith.constant 0 : index
      %c0_57 = arith.constant 0 : index
      %95 = vector.load %arg13[%c0_55, %c0_56, %c0_57] : memref<4x16x1xf32, #tpu.memory_space<vmem>>, vector<4x16x1xf32>
      tpu.vector_store %arg13[%c0_55, %c0_56, %c0_57], %94 {strides = array<i32>} : memref<4x16x1xf32, #tpu.memory_space<vmem>>, vector<4x16x1xf32>,
      %cst_58 = arith.constant 0.000000e+00 : f32
      %96 = vector.broadcast %cst_58 : f32 to vector<4x16x8xf32>
      %c0_59 = arith.constant 0 : index
      %c0_60 = arith.constant 0 : index
      %c0_61 = arith.constant 0 : index
      %97 = vector.load %arg14[%c0_59, %c0_60, %c0_61] : memref<4x16x8xf32, #tpu.memory_space<vmem>>, vector<4x16x8xf32>
      tpu.vector_store %arg14[%c0_59, %c0_60, %c0_61], %96 {strides = array<i32>} : memref<4x16x8xf32, #tpu.memory_space<vmem>>, vector<4x16x8xf32>,
    } else {
    }
    %c0 = arith.constant 0 : index
    %c0_1 = arith.constant 0 : index
    %c0_2 = arith.constant 0 : index
    %4 = vector.load %arg4[%c0, %c0_1, %c0_2] : memref<1x8x32xbf16, #tpu.memory_space<vmem>>, vector<1x8x32xbf16>
    %5 = vector.shape_cast %4 : vector<1x8x32xbf16> to vector<8x32xbf16>
    %c0_3 = arith.constant 0 : index
    %c0_4 = arith.constant 0 : index
    %c0_5 = arith.constant 0 : index
    %6 = vector.load %arg5[%c0_3, %c0_4, %c0_5] : memref<1x8x32xbf16, #tpu.memory_space<vmem>>, vector<1x8x32xbf16>
    %7 = vector.shape_cast %6 : vector<1x8x32xbf16> to vector<8x32xbf16>
    %c0_6 = arith.constant 0 : index
    %c0_7 = arith.constant 0 : index
    %8 = vector.load %arg7[%c0_6, %c0_7] : memref<32x32xbf16, #tpu.memory_space<vmem>>, vector<32x32xbf16>
    %cst = arith.constant dense<0.000000e+00> : vector<8x32xf32>
    %9 = tpu.matmul %5, %8, %cst {dimension_numbers = #tpu.dot_dimension_numbers<[1], [0], [0], [1], [0, 0, 1, 1], [], []>} : vector<8x32xbf16>, vector<32x32xbf16>, vector<8x32xf32> -> vector<8x32xf32>
    %c0_8 = arith.constant 0 : index
    %c0_9 = arith.constant 0 : index
    %10 = vector.load %arg8[%c0_8, %c0_9] : memref<32x32xbf16, #tpu.memory_space<vmem>>, vector<32x32xbf16>
    %cst_10 = arith.constant dense<0.000000e+00> : vector<8x32xf32>
    %11 = tpu.matmul %7, %10, %cst_10 {dimension_numbers = #tpu.dot_dimension_numbers<[1], [0], [0], [1], [0, 0, 1, 1], [], []>} : vector<8x32xbf16>, vector<32x32xbf16>, vector<8x32xf32> -> vector<8x32xf32>
    %12 = arith.truncf %9 : vector<8x32xf32> to vector<8x32xbf16>
    %13 = vector.extract_strided_slice %12 {offsets = [0, 0], sizes = [8, 8], strides = [1, 1]} : vector<8x32xbf16> to vector<8x8xbf16>
    %14 = vector.extract_strided_slice %12 {offsets = [0, 8], sizes = [8, 8], strides = [1, 1]} : vector<8x32xbf16> to vector<8x8xbf16>
    %15 = vector.extract_strided_slice %12 {offsets = [0, 16], sizes = [8, 8], strides = [1, 1]} : vector<8x32xbf16> to vector<8x8xbf16>
    %16 = vector.extract_strided_slice %12 {offsets = [0, 24], sizes = [8, 8], strides = [1, 1]} : vector<8x32xbf16> to vector<8x8xbf16>
    %17 = vector.shape_cast %13 : vector<8x8xbf16> to vector<1x8x8xbf16>
    %18 = vector.shape_cast %14 : vector<8x8xbf16> to vector<1x8x8xbf16>
    %19 = vector.shape_cast %15 : vector<8x8xbf16> to vector<1x8x8xbf16>
    %20 = vector.shape_cast %16 : vector<8x8xbf16> to vector<1x8x8xbf16>
    %21 = tpu.concatenate %17, %18, %19, %20 in 0 : vector<1x8x8xbf16>, vector<1x8x8xbf16>, vector<1x8x8xbf16>, vector<1x8x8xbf16> -> vector<4x8x8xbf16>
    %22 = arith.truncf %11 : vector<8x32xf32> to vector<8x32xbf16>
    %23 = vector.extract_strided_slice %22 {offsets = [0, 0], sizes = [8, 8], strides = [1, 1]} : vector<8x32xbf16> to vector<8x8xbf16>
    %24 = vector.extract_strided_slice %22 {offsets = [0, 8], sizes = [8, 8], strides = [1, 1]} : vector<8x32xbf16> to vector<8x8xbf16>
    %25 = vector.extract_strided_slice %22 {offsets = [0, 16], sizes = [8, 8], strides = [1, 1]} : vector<8x32xbf16> to vector<8x8xbf16>
    %26 = vector.extract_strided_slice %22 {offsets = [0, 24], sizes = [8, 8], strides = [1, 1]} : vector<8x32xbf16> to vector<8x8xbf16>
    %27 = vector.shape_cast %23 : vector<8x8xbf16> to vector<1x8x8xbf16>
    %28 = vector.shape_cast %24 : vector<8x8xbf16> to vector<1x8x8xbf16>
    %29 = vector.shape_cast %25 : vector<8x8xbf16> to vector<1x8x8xbf16>
    %30 = vector.shape_cast %26 : vector<8x8xbf16> to vector<1x8x8xbf16>
    %31 = tpu.concatenate %27, %28, %29, %30 in 0 : vector<1x8x8xbf16>, vector<1x8x8xbf16>, vector<1x8x8xbf16>, vector<1x8x8xbf16> -> vector<4x8x8xbf16>
    %c8_i32 = arith.constant 8 : i32
    %32 = arith.muli %arg1, %c8_i32 : i32
    %33 = tpu.iota {dimensions = array<i32: 2>} : vector<1x1x8xi32>
    %34 = vector.broadcast %32 : i32 to vector<1x1x8xi32>
    %35 = arith.addi %34, %33 : vector<1x1x8xi32>
    %c0_i32_11 = arith.constant 0 : i32
    %36 = arith.addi %0, %c0_i32_11 : i32
    %37 = arith.index_cast %36 : i32 to index
    %38 = memref.load %arg2[%37] : memref<2xi32, #tpu.memory_space<smem>>
    %39 = vector.broadcast %38 : i32 to vector<1x1x8xi32>
    %40 = arith.cmpi slt, %35, %39 : vector<1x1x8xi32>
    %cst_12 = arith.constant 0.000000e+00 : f32
    %cst_13 = arith.constant -1.000000e+30 : f32
    %41 = vector.broadcast %cst_12 : f32 to vector<1x1x8xf32>
    %42 = vector.broadcast %cst_13 : f32 to vector<1x1x8xf32>
    %43 = arith.select %40, %41, %42 : vector<1x1x8xi1>, vector<1x1x8xf32>
    %c0_14 = arith.constant 0 : index
    %c0_15 = arith.constant 0 : index
    %c0_16 = arith.constant 0 : index
    %44 = vector.load %arg11[%c0_14, %c0_15, %c0_16] : memref<4x16x8xbf16, #tpu.memory_space<vmem>>, vector<4x16x8xbf16>
    "tpu.trace_start"() <{level = 10 : i32, message = "bqd,bkd->bqk"}> : () -> ()
    %cst_17 = arith.constant dense<0.000000e+00> : vector<4x16x8xf32>
    %45 = tpu.matmul %44, %21, %cst_17 {dimension_numbers = #tpu.dot_dimension_numbers<[2], [2], [1], [1], [0, 0, 0, 1, 1, 1], [0], [0]>} : vector<4x16x8xbf16>, vector<4x8x8xbf16>, vector<4x16x8xf32> -> vector<4x16x8xf32>
    "tpu.trace_stop"() : () -> ()
    %46 = vector.shape_cast %45 : vector<4x16x8xf32> to vector<1x4x16x8xf32>
    %47 = vector.shape_cast %43 : vector<1x1x8xf32> to vector<1x1x1x8xf32>
    %48 = vector.broadcast %47 : vector<1x1x1x8xf32> to vector<1x4x16x8xf32>
    %49 = arith.addf %46, %48 : vector<1x4x16x8xf32>
    %50 = vector.shape_cast %49 : vector<1x4x16x8xf32> to vector<4x16x8xf32>
    %c0_18 = arith.constant 0 : index
    %c0_19 = arith.constant 0 : index
    %c0_20 = arith.constant 0 : index
    %51 = vector.load %arg12[%c0_18, %c0_19, %c0_20] : memref<4x16x1xf32, #tpu.memory_space<vmem>>, vector<4x16x1xf32>
    %cst_21 = arith.constant dense<0xFF800000> : vector<4x16xf32>
    %52 = vector.multi_reduction <maximumf>, %50, %cst_21 [2] : vector<4x16x8xf32> to vector<4x16xf32>
    %53 = vector.shape_cast %52 : vector<4x16xf32> to vector<4x16x1xf32>
    %54 = arith.maximumf %51, %53 : vector<4x16x1xf32>
    %55 = arith.subf %51, %54 : vector<4x16x1xf32>
    %56 = math.exp %55 : vector<4x16x1xf32>
    %57 = vector.broadcast %54 : vector<4x16x1xf32> to vector<4x16x8xf32>
    %58 = arith.subf %50, %57 : vector<4x16x8xf32>
    %59 = math.exp %58 : vector<4x16x8xf32>
    %c0_22 = arith.constant 0 : index
    %c0_23 = arith.constant 0 : index
    %c0_24 = arith.constant 0 : index
    %60 = vector.load %arg13[%c0_22, %c0_23, %c0_24] : memref<4x16x1xf32, #tpu.memory_space<vmem>>, vector<4x16x1xf32>
    %61 = arith.mulf %56, %60 : vector<4x16x1xf32>
    %cst_25 = arith.constant dense<0.000000e+00> : vector<4x16xf32>
    %62 = vector.multi_reduction <add>, %59, %cst_25 [2] : vector<4x16x8xf32> to vector<4x16xf32>
    %63 = vector.shape_cast %62 : vector<4x16xf32> to vector<4x16x1xf32>
    %64 = arith.addf %61, %63 : vector<4x16x1xf32>
    %c0_26 = arith.constant 0 : index
    %c0_27 = arith.constant 0 : index
    %c0_28 = arith.constant 0 : index
    %65 = vector.load %arg13[%c0_26, %c0_27, %c0_28] : memref<4x16x1xf32, #tpu.memory_space<vmem>>, vector<4x16x1xf32>
    tpu.vector_store %arg13[%c0_26, %c0_27, %c0_28], %64 {strides = array<i32>} : memref<4x16x1xf32, #tpu.memory_space<vmem>>, vector<4x16x1xf32>,
    %c0_29 = arith.constant 0 : index
    %c0_30 = arith.constant 0 : index
    %c0_31 = arith.constant 0 : index
    %66 = vector.load %arg14[%c0_29, %c0_30, %c0_31] : memref<4x16x8xf32, #tpu.memory_space<vmem>>, vector<4x16x8xf32>
    %67 = vector.broadcast %56 : vector<4x16x1xf32> to vector<4x16x8xf32>
    %68 = arith.mulf %67, %66 : vector<4x16x8xf32>
    %69 = arith.truncf %59 : vector<4x16x8xf32> to vector<4x16x8xbf16>
    "tpu.trace_start"() <{level = 10 : i32, message = "bqk,bkd->bqd"}> : () -> ()
    %cst_32 = arith.constant dense<0.000000e+00> : vector<4x16x8xf32>
    %70 = tpu.matmul %69, %31, %cst_32 {dimension_numbers = #tpu.dot_dimension_numbers<[2], [1], [1], [2], [0, 0, 0, 1, 1, 2], [0], [0]>} : vector<4x16x8xbf16>, vector<4x8x8xbf16>, vector<4x16x8xf32> -> vector<4x16x8xf32>
    "tpu.trace_stop"() : () -> ()
    %71 = arith.addf %68, %70 : vector<4x16x8xf32>
    %c0_33 = arith.constant 0 : index
    %c0_34 = arith.constant 0 : index
    %c0_35 = arith.constant 0 : index
    %72 = vector.load %arg14[%c0_33, %c0_34, %c0_35] : memref<4x16x8xf32, #tpu.memory_space<vmem>>, vector<4x16x8xf32>
    tpu.vector_store %arg14[%c0_33, %c0_34, %c0_35], %71 {strides = array<i32>} : memref<4x16x8xf32, #tpu.memory_space<vmem>>, vector<4x16x8xf32>,
    %c0_36 = arith.constant 0 : index
    %c0_37 = arith.constant 0 : index
    %c0_38 = arith.constant 0 : index
    %73 = vector.load %arg12[%c0_36, %c0_37, %c0_38] : memref<4x16x1xf32, #tpu.memory_space<vmem>>, vector<4x16x1xf32>
    tpu.vector_store %arg12[%c0_36, %c0_37, %c0_38], %54 {strides = array<i32>} : memref<4x16x1xf32, #tpu.memory_space<vmem>>, vector<4x16x1xf32>,
    %c1_i32_39 = arith.constant 1 : i32
    %74 = arith.cmpi eq, %arg1, %c1_i32_39 : i32
    %75 = arith.extui %74 : i1 to i32
    %c0_i32_40 = arith.constant 0 : i32
    %76 = arith.cmpi ne, %75, %c0_i32_40 : i32
    scf.if %76 {
      %c0_41 = arith.constant 0 : index
      %c0_42 = arith.constant 0 : index
      %c0_43 = arith.constant 0 : index
      %77 = vector.load %arg14[%c0_41, %c0_42, %c0_43] : memref<4x16x8xf32, #tpu.memory_space<vmem>>, vector<4x16x8xf32>
      %c0_44 = arith.constant 0 : index
      %c0_45 = arith.constant 0 : index
      %c0_46 = arith.constant 0 : index
      %78 = vector.load %arg13[%c0_44, %c0_45, %c0_46] : memref<4x16x1xf32, #tpu.memory_space<vmem>>, vector<4x16x1xf32>
      %79 = tpu.reciprocal %78 {approx = true} : vector<4x16x1xf32> -> vector<4x16x1xf32>
      %80 = vector.broadcast %79 : vector<4x16x1xf32> to vector<4x16x8xf32>
      %81 = arith.mulf %77, %80 : vector<4x16x8xf32>
      %82 = vector.extract_strided_slice %81 {offsets = [0, 0, 0], sizes = [1, 16, 8], strides = [1, 1, 1]} : vector<4x16x8xf32> to vector<1x16x8xf32>
      %83 = vector.shape_cast %82 : vector<1x16x8xf32> to vector<16x8xf32>
      %84 = vector.extract_strided_slice %81 {offsets = [1, 0, 0], sizes = [1, 16, 8], strides = [1, 1, 1]} : vector<4x16x8xf32> to vector<1x16x8xf32>
      %85 = vector.shape_cast %84 : vector<1x16x8xf32> to vector<16x8xf32>
      %86 = vector.extract_strided_slice %81 {offsets = [2, 0, 0], sizes = [1, 16, 8], strides = [1, 1, 1]} : vector<4x16x8xf32> to vector<1x16x8xf32>
      %87 = vector.shape_cast %86 : vector<1x16x8xf32> to vector<16x8xf32>
      %88 = vector.extract_strided_slice %81 {offsets = [3, 0, 0], sizes = [1, 16, 8], strides = [1, 1, 1]} : vector<4x16x8xf32> to vector<1x16x8xf32>
      %89 = vector.shape_cast %88 : vector<1x16x8xf32> to vector<16x8xf32>
      %90 = tpu.concatenate %83, %85, %87, %89 in 1 : vector<16x8xf32>, vector<16x8xf32>, vector<16x8xf32>, vector<16x8xf32> -> vector<16x32xf32>
      %91 = arith.truncf %90 : vector<16x32xf32> to vector<16x32xbf16>
      %c0_47 = arith.constant 0 : index
      %c0_48 = arith.constant 0 : index
      %92 = vector.load %arg9[%c0_47, %c0_48] : memref<32x32xbf16, #tpu.memory_space<vmem>>, vector<32x32xbf16>
      %cst_49 = arith.constant dense<0.000000e+00> : vector<16x32xf32>
      %93 = tpu.matmul %91, %92, %cst_49 {dimension_numbers = #tpu.dot_dimension_numbers<[1], [0], [0], [1], [0, 0, 1, 1], [], []>} : vector<16x32xbf16>, vector<32x32xbf16>, vector<16x32xf32> -> vector<16x32xf32>
      %94 = vector.shape_cast %93 : vector<16x32xf32> to vector<1x16x32xf32>
      %c0_50 = arith.constant 0 : index
      %c0_51 = arith.constant 0 : index
      %c0_52 = arith.constant 0 : index
      %95 = vector.load %arg10[%c0_50, %c0_51, %c0_52] : memref<1x16x32xf32, #tpu.memory_space<vmem>>, vector<1x16x32xf32>
      tpu.vector_store %arg10[%c0_50, %c0_51, %c0_52], %94 {strides = array<i32>} : memref<1x16x32xf32, #tpu.memory_space<vmem>>, vector<1x16x32xf32>,
    } else {
    }
    return
  }
  func.func @transform_0(%arg0: i32, %arg1: i32, %arg2: memref<2xi32, #tpu.memory_space<smem>>) -> (i32, i32, i32) {
    %c0_i32 = arith.constant 0 : i32
    %c0_i32_0 = arith.constant 0 : i32
    %c0_i32_1 = arith.constant 0 : i32
    return %arg0, %c0_i32, %c0_i32_0 : i32, i32, i32
  }
  func.func @transform_1(%arg0: i32, %arg1: i32, %arg2: memref<2xi32, #tpu.memory_space<smem>>) -> (i32, i32, i32) {
    %c0_i32 = arith.constant 0 : i32
    %c0_i32_0 = arith.constant 0 : i32
    return %arg0, %arg1, %c0_i32 : i32, i32, i32
  }
  func.func @transform_2(%arg0: i32, %arg1: i32, %arg2: memref<2xi32, #tpu.memory_space<smem>>) -> (i32, i32, i32) {
    %c0_i32 = arith.constant 0 : i32
    %c0_i32_0 = arith.constant 0 : i32
    return %arg0, %arg1, %c0_i32 : i32, i32, i32
  }
  func.func @transform_3(%arg0: i32, %arg1: i32, %arg2: memref<2xi32, #tpu.memory_space<smem>>) -> (i32, i32) {
    %c0_i32 = arith.constant 0 : i32
    %c0_i32_0 = arith.constant 0 : i32
    %c0_i32_1 = arith.constant 0 : i32
    return %c0_i32, %c0_i32_0 : i32, i32
  }
  func.func @transform_4(%arg0: i32, %arg1: i32, %arg2: memref<2xi32, #tpu.memory_space<smem>>) -> (i32, i32) {
    %c0_i32 = arith.constant 0 : i32
    %c0_i32_0 = arith.constant 0 : i32
    %c0_i32_1 = arith.constant 0 : i32
    return %c0_i32, %c0_i32_0 : i32, i32
  }
  func.func @transform_5(%arg0: i32, %arg1: i32, %arg2: memref<2xi32, #tpu.memory_space<smem>>) -> (i32, i32) {
    %c0_i32 = arith.constant 0 : i32
    %c0_i32_0 = arith.constant 0 : i32
    %c0_i32_1 = arith.constant 0 : i32
    return %c0_i32, %c0_i32_0 : i32, i32
  }
  func.func @transform_6(%arg0: i32, %arg1: i32, %arg2: memref<2xi32, #tpu.memory_space<smem>>) -> (i32, i32) {
    %c0_i32 = arith.constant 0 : i32
    %c0_i32_0 = arith.constant 0 : i32
    %c0_i32_1 = arith.constant 0 : i32
    return %c0_i32, %c0_i32_0 : i32, i32
  }
  func.func @transform_7(%arg0: i32, %arg1: i32, %arg2: memref<2xi32, #tpu.memory_space<smem>>) -> (i32, i32, i32) {
    %c0_i32 = arith.constant 0 : i32
    %c0_i32_0 = arith.constant 0 : i32
    %c0_i32_1 = arith.constant 0 : i32
    return %arg0, %c0_i32, %c0_i32_0 : i32, i32, i32
  }
}

module attributes {stable_mosaic.version = 11 : i64} {
  func.func @kernel(%arg0: i32, %arg1: i32, %arg2: memref<2xi32, #tpu.memory_space<smem>>, %arg3: memref<1x16x32xbf16, #tpu.memory_space<vmem>>, %arg4: memref<1x8x32xbf16, #tpu.memory_space<vmem>>, %arg5: memref<1x8x32xbf16, #tpu.memory_space<vmem>>, %arg6: memref<32x32xbf16, #tpu.memory_space<vmem>>, %arg7: memref<32x32xbf16, #tpu.memory_space<vmem>>, %arg8: memref<32x32xbf16, #tpu.memory_space<vmem>>, %arg9: memref<32x32xbf16, #tpu.memory_space<vmem>>, %arg10: memref<1x16x32xf32, #tpu.memory_space<vmem>>, %arg11: memref<4x16x8xbf16, #tpu.memory_space<vmem>>, %arg12: memref<4x16x1xf32, #tpu.memory_space<vmem>>, %arg13: memref<4x16x1xf32, #tpu.memory_space<vmem>>, %arg14: memref<4x16x8xf32, #tpu.memory_space<vmem>>) attributes {dimension_semantics = [#tpu.dimension_semantics<parallel>, #tpu.dimension_semantics<arbitrary>], iteration_bounds = array<i64: 2, 2>, scalar_prefetch = 1 : i64, scratch_operands = 4 : i64, tpu.core_type = #tpu.core_type<tc>, window_params = [{transform_indices = @transform_0, window_bounds = array<i64: 1, 16, 32>}, {transform_indices = @transform_1, window_bounds = array<i64: 1, 8, 32>}, {transform_indices = @transform_2, window_bounds = array<i64: 1, 8, 32>}, {pipeline_mode = #tpu.pipeline_mode<synchronous>, transform_indices = @transform_3, window_bounds = array<i64: 32, 32>}, {pipeline_mode = #tpu.pipeline_mode<synchronous>, transform_indices = @transform_4, window_bounds = array<i64: 32, 32>}, {pipeline_mode = #tpu.pipeline_mode<synchronous>, transform_indices = @transform_5, window_bounds = array<i64: 32, 32>}, {pipeline_mode = #tpu.pipeline_mode<synchronous>, transform_indices = @transform_6, window_bounds = array<i64: 32, 32>}, {transform_indices = @transform_7, window_bounds = array<i64: 1, 16, 32>}]} {
    %c1_i32 = arith.constant 1 : i32
    %0 = arith.muli %arg0, %c1_i32 : i32
    %c0_i32 = arith.constant 0 : i32
    %1 = arith.cmpi eq, %arg1, %c0_i32 : i32
    %2 = arith.extui %1 : i1 to i32
    %c0_i32_0 = arith.constant 0 : i32
    %3 = arith.cmpi ne, %2, %c0_i32_0 : i32
    scf.if %3 {
      %c0_41 = arith.constant 0 : index
      %c0_42 = arith.constant 0 : index
      %c0_43 = arith.constant 0 : index
      %77 = vector.load %arg3[%c0_41, %c0_42, %c0_43] : memref<1x16x32xbf16, #tpu.memory_space<vmem>>, vector<1x16x32xbf16>
      %78 = vector.shape_cast %77 : vector<1x16x32xbf16> to vector<16x32xbf16>
      %c0_44 = arith.constant 0 : index
      %c0_45 = arith.constant 0 : index
      %79 = vector.load %arg6[%c0_44, %c0_45] : memref<32x32xbf16, #tpu.memory_space<vmem>>, vector<32x32xbf16>
      %cst_46 = arith.constant dense<0.000000e+00> : vector<16x32xf32>
      %80 = tpu.matmul %78, %79, %cst_46 {dimension_numbers = #tpu.dot_dimension_numbers<[1], [0], [0], [1], [0, 0, 1, 1], [], []>} : vector<16x32xbf16>, vector<32x32xbf16>, vector<16x32xf32> -> vector<16x32xf32>
      %81 = arith.truncf %80 : vector<16x32xf32> to vector<16x32xbf16>
      %82 = vector.extract_strided_slice %81 {offsets = [0, 0], sizes = [16, 8], strides = [1, 1]} : vector<16x32xbf16> to vector<16x8xbf16>
      %83 = vector.extract_strided_slice %81 {offsets = [0, 8], sizes = [16, 8], strides = [1, 1]} : vector<16x32xbf16> to vector<16x8xbf16>
      %84 = vector.extract_strided_slice %81 {offsets = [0, 16], sizes = [16, 8], strides = [1, 1]} : vector<16x32xbf16> to vector<16x8xbf16>
      %85 = vector.extract_strided_slice %81 {offsets = [0, 24], sizes = [16, 8], strides = [1, 1]} : vector<16x32xbf16> to vector<16x8xbf16>
      %86 = vector.shape_cast %82 : vector<16x8xbf16> to vector<1x16x8xbf16>
      %87 = vector.shape_cast %83 : vector<16x8xbf16> to vector<1x16x8xbf16>
      %88 = vector.shape_cast %84 : vector<16x8xbf16> to vector<1x16x8xbf16>
      %89 = vector.shape_cast %85 : vector<16x8xbf16> to vector<1x16x8xbf16>
      %90 = tpu.concatenate %86, %87, %88, %89 in 0 : vector<1x16x8xbf16>, vector<1x16x8xbf16>, vector<1x16x8xbf16>, vector<1x16x8xbf16> -> vector<4x16x8xbf16>
      %c0_47 = arith.constant 0 : index
      %c0_48 = arith.constant 0 : index
      %c0_49 = arith.constant 0 : index
      %91 = vector.load %arg11[%c0_47, %c0_48, %c0_49] : memref<4x16x8xbf16, #tpu.memory_space<vmem>>, vector<4x16x8xbf16>
      tpu.vector_store %arg11[%c0_47, %c0_48, %c0_49], %90 {strides = array<i32>} : memref<4x16x8xbf16, #tpu.memory_space<vmem>>, vector<4x16x8xbf16>,
      %cst_50 = arith.constant -1.000000e+30 : f32
      %92 = vector.broadcast %cst_50 : f32 to vector<4x16x1xf32>
      %c0_51 = arith.constant 0 : index
      %c0_52 = arith.constant 0 : index
      %c0_53 = arith.constant 0 : index
      %93 = vector.load %arg12[%c0_51, %c0_52, %c0_53] : memref<4x16x1xf32, #tpu.memory_space<vmem>>, vector<4x16x1xf32>
      tpu.vector_store %arg12[%c0_51, %c0_52, %c0_53], %92 {strides = array<i32>} : memref<4x16x1xf32, #tpu.memory_space<vmem>>, vector<4x16x1xf32>,
      %cst_54 = arith.constant 0.000000e+00 : f32
      %94 = vector.broadcast %cst_54 : f32 to vector<4x16x1xf32>
      %c0_55 = arith.constant 0 : index
      %c0_56 = arith.constant 0 : index
      %c0_57 = arith.constant 0 : index
      %95 = vector.load %arg13[%c0_55, %c0_56, %c0_57] : memref<4x16x1xf32, #tpu.memory_space<vmem>>, vector<4x16x1xf32>
      tpu.vector_store %arg13[%c0_55, %c0_56, %c0_57], %94 {strides = array<i32>} : memref<4x16x1xf32, #tpu.memory_space<vmem>>, vector<4x16x1xf32>,
      %cst_58 = arith.constant 0.000000e+00 : f32
      %96 = vector.broadcast %cst_58 : f32 to vector<4x16x8xf32>
      %c0_59 = arith.constant 0 : index
      %c0_60 = arith.constant 0 : index
      %c0_61 = arith.constant 0 : index
      %97 = vector.load %arg14[%c0_59, %c0_60, %c0_61] : memref<4x16x8xf32, #tpu.memory_space<vmem>>, vector<4x16x8xf32>
      tpu.vector_store %arg14[%c0_59, %c0_60, %c0_61], %96 {strides = array<i32>} : memref<4x16x8xf32, #tpu.memory_space<vmem>>, vector<4x16x8xf32>,
    } else {
    }
    %c0 = arith.constant 0 : index
    %c0_1 = arith.constant 0 : index
    %c0_2 = arith.constant 0 : index
    %4 = vector.load %arg4[%c0, %c0_1, %c0_2] : memref<1x8x32xbf16, #tpu.memory_space<vmem>>, vector<1x8x32xbf16>
    %5 = vector.shape_cast %4 : vector<1x8x32xbf16> to vector<8x32xbf16>
    %c0_3 = arith.constant 0 : index
    %c0_4 = arith.constant 0 : index
    %c0_5 = arith.constant 0 : index
    %6 = vector.load %arg5[%c0_3, %c0_4, %c0_5] : memref<1x8x32xbf16, #tpu.memory_space<vmem>>, vector<1x8x32xbf16>
    %7 = vector.shape_cast %6 : vector<1x8x32xbf16> to vector<8x32xbf16>
    %c0_6 = arith.constant 0 : index
    %c0_7 = arith.constant 0 : index
    %8 = vector.load %arg7[%c0_6, %c0_7] : memref<32x32xbf16, #tpu.memory_space<vmem>>, vector<32x32xbf16>
    %cst = arith.constant dense<0.000000e+00> : vector<8x32xf32>
    %9 = tpu.matmul %5, %8, %cst {dimension_numbers = #tpu.dot_dimension_numbers<[1], [0], [0], [1], [0, 0, 1, 1], [], []>} : vector<8x32xbf16>, vector<32x32xbf16>, vector<8x32xf32> -> vector<8x32xf32>
    %c0_8 = arith.constant 0 : index
    %c0_9 = arith.constant 0 : index
    %10 = vector.load %arg8[%c0_8, %c0_9] : memref<32x32xbf16, #tpu.memory_space<vmem>>, vector<32x32xbf16>
    %cst_10 = arith.constant dense<0.000000e+00> : vector<8x32xf32>
    %11 = tpu.matmul %7, %10, %cst_10 {dimension_numbers = #tpu.dot_dimension_numbers<[1], [0], [0], [1], [0, 0, 1, 1], [], []>} : vector<8x32xbf16>, vector<32x32xbf16>, vector<8x32xf32> -> vector<8x32xf32>
    %12 = arith.truncf %9 : vector<8x32xf32> to vector<8x32xbf16>
    %13 = vector.extract_strided_slice %12 {offsets = [0, 0], sizes = [8, 8], strides = [1, 1]} : vector<8x32xbf16> to vector<8x8xbf16>
    %14 = vector.extract_strided_slice %12 {offsets = [0, 8], sizes = [8, 8], strides = [1, 1]} : vector<8x32xbf16> to vector<8x8xbf16>
    %15 = vector.extract_strided_slice %12 {offsets = [0, 16], sizes = [8, 8], strides = [1, 1]} : vector<8x32xbf16> to vector<8x8xbf16>
    %16 = vector.extract_strided_slice %12 {offsets = [0, 24], sizes = [8, 8], strides = [1, 1]} : vector<8x32xbf16> to vector<8x8xbf16>
    %17 = vector.shape_cast %13 : vector<8x8xbf16> to vector<1x8x8xbf16>
    %18 = vector.shape_cast %14 : vector<8x8xbf16> to vector<1x8x8xbf16>
    %19 = vector.shape_cast %15 : vector<8x8xbf16> to vector<1x8x8xbf16>
    %20 = vector.shape_cast %16 : vector<8x8xbf16> to vector<1x8x8xbf16>
    %21 = tpu.concatenate %17, %18, %19, %20 in 0 : vector<1x8x8xbf16>, vector<1x8x8xbf16>, vector<1x8x8xbf16>, vector<1x8x8xbf16> -> vector<4x8x8xbf16>
    %22 = arith.truncf %11 : vector<8x32xf32> to vector<8x32xbf16>
    %23 = vector.extract_strided_slice %22 {offsets = [0, 0], sizes = [8, 8], strides = [1, 1]} : vector<8x32xbf16> to vector<8x8xbf16>
    %24 = vector.extract_strided_slice %22 {offsets = [0, 8], sizes = [8, 8], strides = [1, 1]} : vector<8x32xbf16> to vector<8x8xbf16>
    %25 = vector.extract_strided_slice %22 {offsets = [0, 16], sizes = [8, 8], strides = [1, 1]} : vector<8x32xbf16> to vector<8x8xbf16>
    %26 = vector.extract_strided_slice %22 {offsets = [0, 24], sizes = [8, 8], strides = [1, 1]} : vector<8x32xbf16> to vector<8x8xbf16>
    %27 = vector.shape_cast %23 : vector<8x8xbf16> to vector<1x8x8xbf16>
    %28 = vector.shape_cast %24 : vector<8x8xbf16> to vector<1x8x8xbf16>
    %29 = vector.shape_cast %25 : vector<8x8xbf16> to vector<1x8x8xbf16>
    %30 = vector.shape_cast %26 : vector<8x8xbf16> to vector<1x8x8xbf16>
    %31 = tpu.concatenate %27, %28, %29, %30 in 0 : vector<1x8x8xbf16>, vector<1x8x8xbf16>, vector<1x8x8xbf16>, vector<1x8x8xbf16> -> vector<4x8x8xbf16>
    %c8_i32 = arith.constant 8 : i32
    %32 = arith.muli %arg1, %c8_i32 : i32
    %33 = tpu.iota {dimensions = array<i32: 2>} : vector<1x1x8xi32>
    %34 = vector.broadcast %32 : i32 to vector<1x1x8xi32>
    %35 = arith.addi %34, %33 : vector<1x1x8xi32>
    %c0_i32_11 = arith.constant 0 : i32
    %36 = arith.addi %0, %c0_i32_11 : i32
    %37 = arith.index_cast %36 : i32 to index
    %38 = memref.load %arg2[%37] : memref<2xi32, #tpu.memory_space<smem>>
    %39 = vector.broadcast %38 : i32 to vector<1x1x8xi32>
    %40 = arith.cmpi slt, %35, %39 : vector<1x1x8xi32>
    %cst_12 = arith.constant 0.000000e+00 : f32
    %cst_13 = arith.constant -1.000000e+30 : f32
    %41 = vector.broadcast %cst_12 : f32 to vector<1x1x8xf32>
    %42 = vector.broadcast %cst_13 : f32 to vector<1x1x8xf32>
    %43 = arith.select %40, %41, %42 : vector<1x1x8xi1>, vector<1x1x8xf32>
    %c0_14 = arith.constant 0 : index
    %c0_15 = arith.constant 0 : index
    %c0_16 = arith.constant 0 : index
    %44 = vector.load %arg11[%c0_14, %c0_15, %c0_16] : memref<4x16x8xbf16, #tpu.memory_space<vmem>>, vector<4x16x8xbf16>
    "tpu.trace_start"() <{level = 10 : i32, message = "bqd,bkd->bqk"}> : () -> ()
    %cst_17 = arith.constant dense<0.000000e+00> : vector<4x16x8xf32>
    %45 = tpu.matmul %44, %21, %cst_17 {dimension_numbers = #tpu.dot_dimension_numbers<[2], [2], [1], [1], [0, 0, 0, 1, 1, 1], [0], [0]>} : vector<4x16x8xbf16>, vector<4x8x8xbf16>, vector<4x16x8xf32> -> vector<4x16x8xf32>
    "tpu.trace_stop"() : () -> ()
    %46 = vector.shape_cast %45 : vector<4x16x8xf32> to vector<1x4x16x8xf32>
    %47 = vector.shape_cast %43 : vector<1x1x8xf32> to vector<1x1x1x8xf32>
    %48 = vector.broadcast %47 : vector<1x1x1x8xf32> to vector<1x4x16x8xf32>
    %49 = arith.addf %46, %48 : vector<1x4x16x8xf32>
    %50 = vector.shape_cast %49 : vector<1x4x16x8xf32> to vector<4x16x8xf32>
    %c0_18 = arith.constant 0 : index
    %c0_19 = arith.constant 0 : index
    %c0_20 = arith.constant 0 : index
    %51 = vector.load %arg12[%c0_18, %c0_19, %c0_20] : memref<4x16x1xf32, #tpu.memory_space<vmem>>, vector<4x16x1xf32>
    %cst_21 = arith.constant dense<0xFF800000> : vector<4x16xf32>
    %52 = vector.multi_reduction <maximumf>, %50, %cst_21 [2] : vector<4x16x8xf32> to vector<4x16xf32>
    %53 = vector.shape_cast %52 : vector<4x16xf32> to vector<4x16x1xf32>
    %54 = arith.maximumf %51, %53 : vector<4x16x1xf32>
    %55 = arith.subf %51, %54 : vector<4x16x1xf32>
    %56 = math.exp %55 : vector<4x16x1xf32>
    %57 = vector.broadcast %54 : vector<4x16x1xf32> to vector<4x16x8xf32>
    %58 = arith.subf %50, %57 : vector<4x16x8xf32>
    %59 = math.exp %58 : vector<4x16x8xf32>
    %c0_22 = arith.constant 0 : index
    %c0_23 = arith.constant 0 : index
    %c0_24 = arith.constant 0 : index
    %60 = vector.load %arg13[%c0_22, %c0_23, %c0_24] : memref<4x16x1xf32, #tpu.memory_space<vmem>>, vector<4x16x1xf32>
    %61 = arith.mulf %56, %60 : vector<4x16x1xf32>
    %cst_25 = arith.constant dense<0.000000e+00> : vector<4x16xf32>
    %62 = vector.multi_reduction <add>, %59, %cst_25 [2] : vector<4x16x8xf32> to vector<4x16xf32>
    %63 = vector.shape_cast %62 : vector<4x16xf32> to vector<4x16x1xf32>
    %64 = arith.addf %61, %63 : vector<4x16x1xf32>
    %c0_26 = arith.constant 0 : index
    %c0_27 = arith.constant 0 : index
    %c0_28 = arith.constant 0 : index
    %65 = vector.load %arg13[%c0_26, %c0_27, %c0_28] : memref<4x16x1xf32, #tpu.memory_space<vmem>>, vector<4x16x1xf32>
    tpu.vector_store %arg13[%c0_26, %c0_27, %c0_28], %64 {strides = array<i32>} : memref<4x16x1xf32, #tpu.memory_space<vmem>>, vector<4x16x1xf32>,
    %c0_29 = arith.constant 0 : index
    %c0_30 = arith.constant 0 : index
    %c0_31 = arith.constant 0 : index
    %66 = vector.load %arg14[%c0_29, %c0_30, %c0_31] : memref<4x16x8xf32, #tpu.memory_space<vmem>>, vector<4x16x8xf32>
    %67 = vector.broadcast %56 : vector<4x16x1xf32> to vector<4x16x8xf32>
    %68 = arith.mulf %67, %66 : vector<4x16x8xf32>
    %69 = arith.truncf %59 : vector<4x16x8xf32> to vector<4x16x8xbf16>
    "tpu.trace_start"() <{level = 10 : i32, message = "bqk,bkd->bqd"}> : () -> ()
    %cst_32 = arith.constant dense<0.000000e+00> : vector<4x16x8xf32>
    %70 = tpu.matmul %69, %31, %cst_32 {dimension_numbers = #tpu.dot_dimension_numbers<[2], [1], [1], [2], [0, 0, 0, 1, 1, 2], [0], [0]>} : vector<4x16x8xbf16>, vector<4x8x8xbf16>, vector<4x16x8xf32> -> vector<4x16x8xf32>
    "tpu.trace_stop"() : () -> ()
    %71 = arith.addf %68, %70 : vector<4x16x8xf32>
    %c0_33 = arith.constant 0 : index
    %c0_34 = arith.constant 0 : index
    %c0_35 = arith.constant 0 : index
    %72 = vector.load %arg14[%c0_33, %c0_34, %c0_35] : memref<4x16x8xf32, #tpu.memory_space<vmem>>, vector<4x16x8xf32>
    tpu.vector_store %arg14[%c0_33, %c0_34, %c0_35], %71 {strides = array<i32>} : memref<4x16x8xf32, #tpu.memory_space<vmem>>, vector<4x16x8xf32>,
    %c0_36 = arith.constant 0 : index
    %c0_37 = arith.constant 0 : index
    %c0_38 = arith.constant 0 : index
    %73 = vector.load %arg12[%c0_36, %c0_37, %c0_38] : memref<4x16x1xf32, #tpu.memory_space<vmem>>, vector<4x16x1xf32>
    tpu.vector_store %arg12[%c0_36, %c0_37, %c0_38], %54 {strides = array<i32>} : memref<4x16x1xf32, #tpu.memory_space<vmem>>, vector<4x16x1xf32>,
    %c1_i32_39 = arith.constant 1 : i32
    %74 = arith.cmpi eq, %arg1, %c1_i32_39 : i32
    %75 = arith.extui %74 : i1 to i32
    %c0_i32_40 = arith.constant 0 : i32
    %76 = arith.cmpi ne, %75, %c0_i32_40 : i32
    scf.if %76 {
      %c0_41 = arith.constant 0 : index
      %c0_42 = arith.constant 0 : index
      %c0_43 = arith.constant 0 : index
      %77 = vector.load %arg14[%c0_41, %c0_42, %c0_43] : memref<4x16x8xf32, #tpu.memory_space<vmem>>, vector<4x16x8xf32>
      %c0_44 = arith.constant 0 : index
      %c0_45 = arith.constant 0 : index
      %c0_46 = arith.constant 0 : index
      %78 = vector.load %arg13[%c0_44, %c0_45, %c0_46] : memref<4x16x1xf32, #tpu.memory_space<vmem>>, vector<4x16x1xf32>
      %79 = tpu.reciprocal %78 {approx = true} : vector<4x16x1xf32> -> vector<4x16x1xf32>
      %80 = vector.broadcast %79 : vector<4x16x1xf32> to vector<4x16x8xf32>
      %81 = arith.mulf %77, %80 : vector<4x16x8xf32>
      %82 = vector.extract_strided_slice %81 {offsets = [0, 0, 0], sizes = [1, 16, 8], strides = [1, 1, 1]} : vector<4x16x8xf32> to vector<1x16x8xf32>
      %83 = vector.shape_cast %82 : vector<1x16x8xf32> to vector<16x8xf32>
      %84 = vector.extract_strided_slice %81 {offsets = [1, 0, 0], sizes = [1, 16, 8], strides = [1, 1, 1]} : vector<4x16x8xf32> to vector<1x16x8xf32>
      %85 = vector.shape_cast %84 : vector<1x16x8xf32> to vector<16x8xf32>
      %86 = vector.extract_strided_slice %81 {offsets = [2, 0, 0], sizes = [1, 16, 8], strides = [1, 1, 1]} : vector<4x16x8xf32> to vector<1x16x8xf32>
      %87 = vector.shape_cast %86 : vector<1x16x8xf32> to vector<16x8xf32>
      %88 = vector.extract_strided_slice %81 {offsets = [3, 0, 0], sizes = [1, 16, 8], strides = [1, 1, 1]} : vector<4x16x8xf32> to vector<1x16x8xf32>
      %89 = vector.shape_cast %88 : vector<1x16x8xf32> to vector<16x8xf32>
      %90 = tpu.concatenate %83, %85, %87, %89 in 1 : vector<16x8xf32>, vector<16x8xf32>, vector<16x8xf32>, vector<16x8xf32> -> vector<16x32xf32>
      %91 = arith.truncf %90 : vector<16x32xf32> to vector<16x32xbf16>
      %c0_47 = arith.constant 0 : index
      %c0_48 = arith.constant 0 : index
      %92 = vector.load %arg9[%c0_47, %c0_48] : memref<32x32xbf16, #tpu.memory_space<vmem>>, vector<32x32xbf16>
      %cst_49 = arith.constant dense<0.000000e+00> : vector<16x32xf32>
      %93 = tpu.matmul %91, %92, %cst_49 {dimension_numbers = #tpu.dot_dimension_numbers<[1], [0], [0], [1], [0, 0, 1, 1], [], []>} : vector<16x32xbf16>, vector<32x32xbf16>, vector<16x32xf32> -> vector<16x32xf32>
      %94 = vector.shape_cast %93 : vector<16x32xf32> to vector<1x16x32xf32>
      %c0_50 = arith.constant 0 : index
      %c0_51 = arith.constant 0 : index
      %c0_52 = arith.constant 0 : index
      %95 = vector.load %arg10[%c0_50, %c0_51, %c0_52] : memref<1x16x32xf32, #tpu.memory_space<vmem>>, vector<1x16x32xf32>
      tpu.vector_store %arg10[%c0_50, %c0_51, %c0_52], %94 {strides = array<i32>} : memref<1x16x32xf32, #tpu.memory_space<vmem>>, vector<1x16x32xf32>,
    } else {
    }
    return
  }
  func.func @transform_0(%arg0: i32, %arg1: i32, %arg2: memref<2xi32, #tpu.memory_space<smem>>) -> (i32, i32, i32) {
    %c0_i32 = arith.constant 0 : i32
    %c0_i32_0 = arith.constant 0 : i32
    %c0_i32_1 = arith.constant 0 : i32
    return %arg0, %c0_i32, %c0_i32_0 : i32, i32, i32
  }
  func.func @transform_1(%arg0: i32, %arg1: i32, %arg2: memref<2xi32, #tpu.memory_space<smem>>) -> (i32, i32, i32) {
    %c0_i32 = arith.constant 0 : i32
    %c0_i32_0 = arith.constant 0 : i32
    return %arg0, %arg1, %c0_i32 : i32, i32, i32
  }
  func.func @transform_2(%arg0: i32, %arg1: i32, %arg2: memref<2xi32, #tpu.memory_space<smem>>) -> (i32, i32, i32) {
    %c0_i32 = arith.constant 0 : i32
    %c0_i32_0 = arith.constant 0 : i32
    return %arg0, %arg1, %c0_i32 : i32, i32, i32
  }
  func.func @transform_3(%arg0: i32, %arg1: i32, %arg2: memref<2xi32, #tpu.memory_space<smem>>) -> (i32, i32) {
    %c0_i32 = arith.constant 0 : i32
    %c0_i32_0 = arith.constant 0 : i32
    %c0_i32_1 = arith.constant 0 : i32
    return %c0_i32, %c0_i32_0 : i32, i32
  }
  func.func @transform_4(%arg0: i32, %arg1: i32, %arg2: memref<2xi32, #tpu.memory_space<smem>>) -> (i32, i32) {
    %c0_i32 = arith.constant 0 : i32
    %c0_i32_0 = arith.constant 0 : i32
    %c0_i32_1 = arith.constant 0 : i32
    return %c0_i32, %c0_i32_0 : i32, i32
  }
  func.func @transform_5(%arg0: i32, %arg1: i32, %arg2: memref<2xi32, #tpu.memory_space<smem>>) -> (i32, i32) {
    %c0_i32 = arith.constant 0 : i32
    %c0_i32_0 = arith.constant 0 : i32
    %c0_i32_1 = arith.constant 0 : i32
    return %c0_i32, %c0_i32_0 : i32, i32
  }
  func.func @transform_6(%arg0: i32, %arg1: i32, %arg2: memref<2xi32, #tpu.memory_space<smem>>) -> (i32, i32) {
    %c0_i32 = arith.constant 0 : i32
    %c0_i32_0 = arith.constant 0 : i32
    %c0_i32_1 = arith.constant 0 : i32
    return %c0_i32, %c0_i32_0 : i32, i32
  }
  func.func @transform_7(%arg0: i32, %arg1: i32, %arg2: memref<2xi32, #tpu.memory_space<smem>>) -> (i32, i32, i32) {
    %c0_i32 = arith.constant 0 : i32
    %c0_i32_0 = arith.constant 0 : i32
    %c0_i32_1 = arith.constant 0 : i32
    return %arg0, %c0_i32, %c0_i32_0 : i32, i32, i32
  }
}

</mosaic_0001>

<bundles_post_ra>
// kernel: tpu_custom_call.1
= control target key start
LH: loop header
LB: loop body
LE: loop exit
PB: predicated region body
PF: predicated region fallthrough
CT: control target
= control target key end

     0   :  { %s4156_s0 = inlined_call_operand.hbm [shape: s32[2], index: 0, kind: input, shape index: {}]   ;;  %s4157_s1 = inlined_call_operand.hbm [shape: bf16[2,16,32], index: 1, kind: input, shape index: {}]   ;;  %s4158_s2 = inlined_call_operand.hbm [shape: bf16[2,16,32], index: 2, kind: input, shape index: {}]   ;;  %s4159_s3 = inlined_call_operand.hbm [shape: bf16[2,16,32], index: 3, kind: input, shape index: {}]   ;;  %s4160_s4 = inlined_call_operand.hbm [shape: bf16[32,32], index: 4, kind: input, shape index: {}]   ;;  %s4161_s5 = inlined_call_operand.vmem [shape: bf16[32,32], index: 5, kind: input, shape index: {}]   ;;  %s4162_s6 = inlined_call_operand.hbm [shape: bf16[32,32], index: 6, kind: input, shape index: {}]   ;;  %s4163_s7 = inlined_call_operand.hbm [shape: bf16[32,32], index: 7, kind: input, shape index: {}]   ;;  %s4164_s8 = inlined_call_operand.hbm [shape: f32[2,16,32], index: 8, kind: output, shape index: {}]  }
   0x1   :  { %4196 = sst [smem:[#allocation40_spill]] %s4158_s2  ;;  %s2981_s29 = scalar_lea.hbm %s4156_s0, 16 }
   0x2   :  { %4197 = sst [smem:[#allocation41_spill]] %s4160_s4  ;;  %p2982_p0 = scmp.ne.s32.totalorder %s4156_s0, %s2981_s29 }
   0x3   :  { %4198 = sst [smem:[#allocation42_spill]] %s4161_s5  ;;  %p2985_p1 = scmp.lt.u32.totalorder %s2981_s29, %s4156_s0 }
   0x4   :  { %4199 = sst [smem:[#allocation43_spill]] %s4164_s8 }
   0x5   :  { %p2987_p2 = pnand %p2985_p1, %p2982_p0 }
   0x7   :  { %2990 = shalt.err (!%p2987_p2)  }
   0x8   :  { %s3303_s12 = smov [#allocation7]  }
   0x9   :  { %14 = dma.hbm_to_smem %s4156_s0, 16, %s3303_s12, [#allocation6] }
   0xa   :  { %3237 = dma.done.wait [#allocation6], 16 }
   0xb   :  { %3238 = vsyncadd [#allocation6], 4294967280 }
   0xc   :  { %16 = sfence }
   0xd   :  { %17 = vsyncpa [#allocation9], 0 }
   0xe   :  { %19 = vsyncpa [#allocation9 + $0x1], 0 }
   0xf   :  { %20 = vsyncpa [#allocation12], 0 }
  0x10   :  { %22 = vsyncpa [#allocation12 + $0x1], 0 }
  0x11   :  { %23 = vsyncpa [#allocation15], 0 }
  0x12   :  { %24 = vsyncpa [#allocation18], 0 }
  0x13   :  { %25 = vsyncpa [#allocation10], 0 }
  0x14   :  { %27 = vsyncpa [#allocation10 + $0x1], 0  ;;  %s3396_s15 = smov 0   ;;  %s3398_s16 = smov 0  }
  0x15   :  { %s3400_s17 = smov 0   ;;  %s3402_s18 = smov 0  }
  0x16   :  { %s3404_s0 = smov 0   ;;  %s3406_s19 = smov 0  }
  0x17   :  { %s3408_s20 = smov 0   ;;  %s3410_s21 = smov 0  }
  0x18   :  { %s3412_s22 = smov 0   ;;  %s3414_s23 = smov 0  }
  0x19   :  { %s3416_s24 = smov 0  }
  0x1a LB: > { %4200 = sst [smem:[#allocation26_spill]] %s3265_s16  ;;  %s3452_s25 = sadd.s32 4294967295, %s3301_s24   ;;  %s3301_s24 = sphi %s3416_s24, %s33_s24   ;;  %s3297_s23 = sphi %s3414_s23, %s4269_s23   ;;  %s3293_s22 = sphi %s3412_s22, %s4263_s22   ;;  %s3289_s21 = sphi %s3410_s21, %s4268_s21   ;;  %s3285_s20 = sphi %s3408_s20, %s4262_s20   ;;  %s3281_s19 = sphi %s3406_s19, %s4267_s19   ;;  %s3277_s0 = sphi %s3404_s0, %s4266_s0   ;;  %s3273_s18 = sphi %s3402_s18, %s4265_s18   ;;  %s3269_s17 = sphi %s3400_s17, %s4260_s17   ;;  %s3265_s16 = sphi %s3398_s16, %s4259_s16   ;;  %s3261_s15 = sphi %s3396_s15, %s4258_s15  }
  0x1b   : > { %4201 = sst [smem:[#allocation27_spill]] %s3269_s17  ;;  %s2563_s26 = sadd.s32 4294967294, %s3301_s24  }
  0x1c   : > { %4202 = sst [smem:[#allocation28_spill]] %s3273_s18  ;;  %p65_p3 = scmp.ne.s32.totalorder %s3277_s0, %s3273_s18 }
  0x1d   : > { %4203 = sst [smem:[#allocation29_spill]] %s3285_s20  ;;  %p4167_p4 = scmp.eq.s32.totalorder %s3452_s25, 0 }
  0x1e   : > { %4204 = sst [smem:[#allocation30_spill]] %s3289_s21  ;;  %p235_p6 = scmp.eq.s32.totalorder %s2563_s26, 3 }
  0x1f   : > { %4205 = sst [smem:[#allocation31_spill]] %s3293_s22  ;;  %p3461_p7 = por %p4167_p4, %p65_p3 }
  0x20   : > { %4206 = sst [smem:[#allocation32_spill]] %s3301_s24  ;;  %p2564_p8 = scmp.ge.s32.totalorder %s3301_s24, 1 }
  0x21   : > { %s4207_s27 = scalar_select %p3461_p7, 1, 0 }
  0x22   : > { %p3466_p9 = por %p235_p6, %p65_p3  ;;  %p242_p10 = scmp.lt.s32.totalorder %s3301_s24, 5 }
  0x23   : > { %s3304_s30 = smov [#allocation14]   ;;  %s4212_s4 = sld [smem:[#allocation41_spill]] }
  0x24   : > { %s4208_s28 = scalar_select %p3466_p9, 1, 0 }
  0x25   : > { %p3471_p11 = pnand %p2564_p8, %p242_p10  ;;  %s254_s9 = sshll.u32 %s3304_s30, 4  ;;  %s255_s9 = int_to_ptr.vmem [resolvable:$true] %s254_s9 }
  0x26   : > { %4209 = sst [smem:[#allocation33_spill]] %s4208_s28 }
  0x27   : > { %s4210_s29 = scalar_select %p3471_p11, 1, 0 }
  0x28   : > { %p2753_p12 = pneg %p3471_p11 }
  0x29   : > { %s2991_s13 = scalar_lea.hbm %s4212_s4, 256 }
  0x2a   : > { %p3479_p13 = pnand %p2753_p12, %p4167_p4  ;;  %p2992_p0 = scmp.ne.s32.totalorder %s4212_s4, %s2991_s13 }
  0x2b   : > { %p2998_p6 = scmp.lt.u32.totalorder %s2991_s13, %s4212_s4 }
  0x2c   : > { %s4211_s10 = scalar_select %p3479_p13, 1, 0 }
  0x2d   : > { %p3491_p1 = pneg %p3479_p13 }
  0x2f   : > { %p2994_p2 = pnand %p3491_p1, %p2992_p0 }
  0x31   : > { %p2995_p3 = pneg %p2994_p2 }
  0x33   : > { %p3000_p8 = pnand %p2998_p6, %p2995_p3 }
  0x35   : > { %3003 = shalt.err (!%p3000_p8)
}
  0x36   : > { %s3004_s11 = scalar_lea.vmem %s255_s9, 256  ;;  %p3012_p5 = scmp.lt.s32.totalorder %s255_s9, %s255_s9 }
  0x37   : > { %p3005_p10 = scmp.ne.s32.totalorder %s255_s9, %s3004_s11  ;;  %p3013_p9 = scmp.lt.s32.totalorder %s3004_s11, %s3004_s11 }
  0x39   : > { %p3007_p12 = pnand %p3005_p10, %p3491_p1  ;;  %p3014_p7 = por %p3013_p9, %p3012_p5 }
  0x3b   : > { %p3008_p4 = pneg %p3007_p12 }
  0x3d   : > { %p3015_p11 = pnand %p3014_p7, %p3008_p4 }
  0x3f   : > { %3018 = shalt.err (!%p3015_p11)
}
  0x40   : > { %s4170_s12 = smov 64   ;;  %s4172_s18 = smov 4  }
  0x41   : > { %2756 = dma.hbm_to_vmem [thread:$0]  (!%p3479_p13), %s4212_s4, 256, %s255_s9, [#allocation15], %s4170_s12, %s4170_s12, %s4172_s18  }
  0x42   : > { %s42_s14 = sadd.s32 1, %s3293_s22  ;;  %s45_s26 = sadd.s32 1, %s3297_s23 }
  0x43   : > { %p43_p4 = scmp.ge.s32.totalorder %s42_s14, 2  ;;  %s52_s11 = sadd.s32 1, %s3281_s19 }
  0x44   : > { %p59_p5 = scmp.ne.s32.totalorder %s3281_s19, %s3277_s0  ;;  %p60_p7 = scmp.eq.s32.totalorder %s3301_s24, 0 }
  0x45   : > { %s4271_s14 = smov (%p43_p4, %s42_s14), 0  ;;  %s4273_s26 = smov (!%p43_p4, %s45_s26), %s3297_s23 }
  0x46   : > { %4214 = sst [smem:[#allocation34_spill]] %s4271_s14  ;;  %s76_s9 = ssub.s32 %s3293_s22, %s4271_s14 }
  0x47   : > { %p47_p9 = scmp.ge.s32.totalorder %s4273_s26, 2  ;;  %s80_s28 = sadd.s32 1, %s3269_s17 }
  0x48   : > { %p3525_p11 = por %p60_p7, %p59_p5  ;;  %p87_p0 = scmp.ne.s32.totalorder %s3269_s17, %s3265_s16 }
  0x49   : > { %s4275_s26 = smov (%p47_p9, %s4273_s26), 0  ;;  %p93_p3 = scmp.ne.s32.totalorder %s3265_s16, %s3261_s15 }
  0x4a   : > { %4216 = sst [smem:[#allocation35_spill]] %s4275_s26  ;;  %p3533_p2 = por %p87_p0, %p60_p7 }
  0x4b   : > { %s49_s18 = ssub.s32 %s3297_s23, %s4275_s26  ;;  %p4218_p6 = scmp.eq.s32.totalorder %s3452_s25, 3 }
  0x4c   : > { %p50_p10 = scmp.eq.s32.totalorder %s49_s18, 0  ;;  %s77_s14 = sor.u32 %s76_s9, %s49_s18 }
  0x4d   : > { %p3546_p8 = por %p4218_p6, %p59_p5  ;;  %p78_p12 = scmp.eq.s32.totalorder %s77_s14, 0 }
  0x4e   : > { %p4221_p4 = scmp.eq.s32.totalorder %s3452_s25, 0  ;;  %p2780_p7 = scmp.lt.s32.totalorder %s3301_s24, 4 }
  0x4f   : > { %s4219_s4 = scalar_select %p3546_p8, 1, 0 }
  0x50   : > { %p3552_p9 = por %p93_p3, %p4221_p4  ;;  %s318_s15 = sand.u32 1, %s3301_s24  }
  0x51   : > { %4220 = sst [smem:[#allocation36_spill]] %s4219_s4  ;;  %s320_s26 = sand.u32 1, %s3269_s17  }
  0x52   : > { %s4222_s8 = scalar_select %p3552_p9, 1, 0 }
  0x53   : > { %s3557_s21 = scalar_select %p50_p10, %s3281_s19, %s52_s11  }
  0x54   : > { %4223 = sst [smem:[#allocation37_spill]] %s4222_s8  ;;  %p3567_p5 = pnand %p2780_p7, %p3525_p11 }
  0x55   : > { %4224 = sst [smem:[#allocation38_spill]] %s3557_s21  ;;  %s3571_s18 = sshll.u32 %s320_s26, 2 }
  0x56   : > { %s3560_s5 = scalar_select %p78_p12, %s3269_s17, %s80_s28  }
  0x57   : > { %s4226_s20 = scalar_select %p3567_p5, 1, 0 }
  0x58   : > { %4225 = sst [smem:[#allocation39_spill]] %s3560_s5  ;;  %s2573_s14 = sshll.u32 %s3297_s23, 1 }
  0x59   : > { %s327_s9 = sadd.s32 %s3293_s22, %s2573_s14  ;;  %s322_s16 = scalar_lea.vmem [#allocation11], %s3571_s18 }
  0x5a   : > { %s2574_s4 = sshll.u32 %s327_s9, 6  ;;  %s331_s8 = sshll.u32 %s322_s16, 4  ;;  %s3581_s8 = int_to_ptr.vmem [resolvable:$true] %s331_s8 }
  0x5b   : > { %s4227_s2 = sld [smem:[#allocation40_spill]]  ;;  %p3585_p11 = pnand %p2780_p7, %p3533_p2 }
  0x5c   : > { %s3592_s16 = scalar_lea.hbm %s4159_s3, %s2574_s4  ;;  %s3307_s21 = smov [#allocation16]  }
  0x5d   : > { %s4228_s26 = scalar_select %p3585_p11, 1, 0 }
  0x5e   : > { %s3594_s9 = sshll.u32 %s3307_s21, 4  ;;  %s3596_s11 = scalar_lea.sflag [#allocation12], %s318_s15  ;;  %s271_s9 = int_to_ptr.vmem [resolvable:$true] %s3594_s9 }
  0x5f   : > { %p4190_p3 = pneg %p3585_p11 }
  0x61   : > { %s3579_s28 = scalar_lea.hbm %s4227_s2, %s2574_s4  ;;  %s3024_s13 = scalar_lea.hbm %s4227_s2, 256 }
  0x62   : > { %s3019_s22 = scalar_lea.hbm %s3579_s28, 64  ;;  %p3025_p10 = scmp.lt.u32.totalorder %s3579_s28, %s4227_s2 }
  0x63   : > { %p3020_p0 = scmp.ne.s32.totalorder %s3579_s28, %s3019_s22  ;;  %p3026_p12 = scmp.lt.u32.totalorder %s3024_s13, %s3019_s22 }
  0x64   : > { %p3028_p7 = scmp.lt.u32.totalorder %s3019_s22, %s3579_s28 }
  0x65   : > { %p3022_p2 = pnand %p4190_p3, %p3020_p0  ;;  %p3027_p4 = por %p3026_p12, %p3025_p10 }
  0x67   : > { %p3023_p6 = pneg %p3022_p2  ;;  %p3029_p8 = por %p3028_p7, %p3027_p4 }
  0x69   : > { %p3030_p9 = pnand %p3029_p8, %p3023_p6 }
  0x6b   : > { %3033 = shalt.err (!%p3030_p9)
}
  0x6c   : > { %s3034_s15 = scalar_lea.vmem %s3581_s8, 64  ;;  %s3308_s5 = smov [#allocation11]  }
  0x6d   : > { %p3035_p0 = scmp.ne.s32.totalorder %s3581_s8, %s3034_s15  ;;  %s3039_s21 = sshll.u32 %s3308_s5, 4  ;;  %s3040_s21 = int_to_ptr.vmem [resolvable:$false] %s3039_s21 }
  0x6e   : > { %s3041_s12 = scalar_lea.vmem %s3040_s21, 128  ;;  %p3042_p13 = scmp.lt.s32.totalorder %s3581_s8, %s3040_s21 }
  0x6f   : > { %p3037_p2 = pnand %p3035_p0, %p4190_p3  ;;  %p3043_p10 = scmp.lt.s32.totalorder %s3041_s12, %s3034_s15 }
  0x71   : > { %p3038_p5 = pneg %p3037_p2  ;;  %p3044_p12 = por %p3043_p10, %p3042_p13 }
  0x73   : > { %p3045_p4 = pnand %p3044_p12, %p3038_p5 }
  0x75   : > { %3048 = shalt.err (!%p3045_p4)
}
  0x76   : > { %2769 = dma.hbm_to_vmem [thread:$0]  (!%p3585_p11), %s3579_s28, 64, %s3581_s8, %s3596_s11  }
  0x77   : > { %s3049_s14 = scalar_lea.hbm %s4162_s6, 256 }
  0x78   : > { %p3050_p8 = scmp.ne.s32.totalorder %s4162_s6, %s3049_s14  ;;  %p3056_p5 = scmp.lt.u32.totalorder %s3049_s14, %s4162_s6 }
  0x7a   : > { %p3052_p13 = pnand %p3050_p8, %p3491_p1 }
  0x7c   : > { %p3053_p9 = pneg %p3052_p13 }
  0x7e   : > { %p3058_p6 = pnand %p3056_p5, %p3053_p9 }
  0x80   : > { %3061 = shalt.err (!%p3058_p6)
}
  0x81   : > { %s3062_s12 = scalar_lea.vmem %s271_s9, 256  ;;  %p3070_p10 = scmp.lt.s32.totalorder %s271_s9, %s271_s9 }
  0x82   : > { %p3063_p7 = scmp.ne.s32.totalorder %s271_s9, %s3062_s12  ;;  %p3071_p12 = scmp.lt.s32.totalorder %s3062_s12, %s3062_s12 }
  0x84   : > { %p3065_p0 = pnand %p3063_p7, %p3491_p1  ;;  %p3072_p4 = por %p3071_p12, %p3070_p10 }
  0x86   : > { %p3066_p2 = pneg %p3065_p0 }
  0x88   : > { %p3073_p3 = pnand %p3072_p4, %p3066_p2 }
  0x8a   : > { %3076 = shalt.err (!%p3073_p3)
}
  0x8b   : > { %p4229_p8 = scmp.ne.s32.totalorder %s4211_s10, 0  ;;  %s4230_s8 = smov 4  }
  0x8c   : > { %s4231_s28 = smov 64   ;;  %s3309_s14 = smov [#allocation17]  }
  0x8d   : > { %2759 = dma.hbm_to_vmem [thread:$0]  (!%p4229_p8), %s4162_s6, 256, %s271_s9, [#allocation15], %s4231_s28, %s4231_s28, %s4230_s8  }
  0x8e   : > { %s283_s4 = sshll.u32 %s3309_s14, 4  ;;  %s297_s5 = sand.u32 1, %s3281_s19   ;;  %s284_s4 = int_to_ptr.vmem [resolvable:$true] %s283_s4 }
  0x8f   : > { %s3077_s12 = scalar_lea.hbm %s4163_s7, 256 }
  0x90   : > { %p3078_p3 = scmp.ne.s32.totalorder %s4163_s7, %s3077_s12  ;;  %p3084_p5 = scmp.lt.u32.totalorder %s3077_s12, %s4163_s7 }
  0x92   : > { %p3080_p13 = pnand %p3078_p3, %p3491_p1 }
  0x94   : > { %p3081_p9 = pneg %p3080_p13 }
  0x96   : > { %p3086_p6 = pnand %p3084_p5, %p3081_p9 }
  0x98   : > { %3089 = shalt.err (!%p3086_p6)
}
  0x99   : > { %s3090_s9 = scalar_lea.vmem %s284_s4, 256  ;;  %p3098_p10 = scmp.lt.s32.totalorder %s284_s4, %s284_s4 }
  0x9a   : > { %p3091_p7 = scmp.ne.s32.totalorder %s284_s4, %s3090_s9  ;;  %p3099_p12 = scmp.lt.s32.totalorder %s3090_s9, %s3090_s9 }
  0x9c   : > { %p3093_p0 = pnand %p3091_p7, %p3491_p1  ;;  %p3100_p4 = por %p3099_p12, %p3098_p10 }
  0x9e   : > { %p3094_p2 = pneg %p3093_p0 }
  0xa0   : > { %p3101_p11 = pnand %p3100_p4, %p3094_p2 }
  0xa2   : > { %3104 = shalt.err (!%p3101_p11)
}
  0xa3   : > { %2762 = dma.hbm_to_vmem [thread:$0]  (!%p4229_p8), %s4163_s7, 256, %s284_s4, [#allocation18], %s4231_s28, %s4231_s28, %s4230_s8  }
  0xa4   : > { %s2569_s24 = sshll.u32 %s297_s5, 3  ;;  %s2623_s30 = sshll.u32 %s3297_s23, 7 }
  0xa5   : > { %s3672_s15 = scalar_lea.hbm %s4157_s1, %s2623_s30  ;;  %s301_s10 = scalar_lea.vmem [#allocation8], %s2569_s24 }
  0xa6   : > { %s308_s21 = sshll.u32 %s301_s10, 4  ;;  %s342_s12 = scalar_lea.vmem [#allocation13], %s3571_s18  ;;  %s3675_s21 = int_to_ptr.vmem [resolvable:$true] %s308_s21 }
  0xa7   : > { %s351_s22 = sshll.u32 %s342_s12, 4  ;;  %s3679_s4 = scalar_lea.sflag [#allocation9], %s297_s5  ;;  %s3677_s22 = int_to_ptr.vmem [resolvable:$true] %s351_s22 }
  0xa8   : > { %s3105_s9 = scalar_lea.hbm %s3672_s15, 128  ;;  %p4232_p11 = scmp.ne.s32.totalorder %s4226_s20, 0 }
  0xa9   : > { %p3106_p1 = scmp.ne.s32.totalorder %s3672_s15, %s3105_s9  ;;  %s3110_s24 = scalar_lea.hbm %s4157_s1, 256 }
  0xaa   : > { %p3107_p8 = pneg %p4232_p11  ;;  %p3111_p9 = scmp.lt.u32.totalorder %s3672_s15, %s4157_s1 }
  0xab   : > { %p3112_p5 = scmp.lt.u32.totalorder %s3110_s24, %s3105_s9  ;;  %p3114_p7 = scmp.lt.u32.totalorder %s3105_s9, %s3672_s15 }
  0xac   : > { %p3108_p3 = pnand %p3107_p8, %p3106_p1 }
  0xad   : > { %p3113_p6 = por %p3112_p5, %p3111_p9 }
  0xae   : > { %p3109_p13 = pneg %p3108_p3 }
  0xaf   : > { %p3115_p0 = por %p3114_p7, %p3113_p6 }
  0xb1   : > { %p3116_p2 = pnand %p3115_p0, %p3109_p13 }
  0xb3   : > { %3119 = shalt.err (!%p3116_p2)
}
  0xb4   : > { %s3120_s5 = scalar_lea.vmem %s3675_s21, 128  ;;  %s3310_s13 = smov [#allocation8]  }
  0xb5   : > { %p3121_p10 = scmp.ne.s32.totalorder %s3675_s21, %s3120_s5  ;;  %s3125_s14 = sshll.u32 %s3310_s13, 4  ;;  %s3126_s14 = int_to_ptr.vmem [resolvable:$false] %s3125_s14 }
  0xb6   : > { %s3127_s10 = scalar_lea.vmem %s3126_s14, 256  ;;  %p3128_p1 = scmp.lt.s32.totalorder %s3675_s21, %s3126_s14 }
  0xb7   : > { %p3123_p12 = pnand %p3121_p10, %p3107_p8  ;;  %p3129_p3 = scmp.lt.s32.totalorder %s3127_s10, %s3120_s5 }
  0xb9   : > { %p3124_p4 = pneg %p3123_p12  ;;  %p3130_p9 = por %p3129_p3, %p3128_p1 }
  0xbb   : > { %p3131_p5 = pnand %p3130_p9, %p3124_p4 }
  0xbd   : > { %3134 = shalt.err (!%p3131_p5)
}
  0xbe   : > { %2766 = dma.hbm_to_vmem [thread:$0]  (!%p4232_p11), %s3672_s15, 128, %s3675_s21, %s3679_s4, %s4231_s28, %s4231_s28, %s4230_s8  }
  0xbf   : > { %s3135_s12 = scalar_lea.hbm %s3592_s16, 64  ;;  %p4233_p13 = scmp.ne.s32.totalorder %s4228_s26, 0 }
  0xc0   : > { %p3136_p8 = scmp.ne.s32.totalorder %s3592_s16, %s3135_s12  ;;  %s3140_s2 = scalar_lea.hbm %s4159_s3, 256 }
  0xc1   : > { %p4234_p6 = pneg %p4233_p13  ;;  %p3141_p2 = scmp.lt.u32.totalorder %s3592_s16, %s4159_s3 }
  0xc2   : > { %p3142_p10 = scmp.lt.u32.totalorder %s3140_s2, %s3135_s12  ;;  %p3144_p4 = scmp.lt.u32.totalorder %s3135_s12, %s3592_s16 }
  0xc3   : > { %p3138_p7 = pnand %p3136_p8, %p4234_p6 }
  0xc4   : > { %p3143_p12 = por %p3142_p10, %p3141_p2 }
  0xc5   : > { %p3139_p0 = pneg %p3138_p7 }
  0xc6   : > { %p3145_p1 = por %p3144_p4, %p3143_p12 }
  0xc8   : > { %p3146_p3 = pnand %p3145_p1, %p3139_p0 }
  0xca   : > { %3149 = shalt.err (!%p3146_p3)
}
  0xcb   : > { %s3150_s8 = scalar_lea.vmem %s3677_s22, 64  ;;  %p4235_p9 = pmov %p4234_p6 }
  0xcc   : > { %p3151_p11 = scmp.ne.s32.totalorder %s3677_s22, %s3150_s8  ;;  %s3311_s28 = smov [#allocation13]  }
  0xcd   : > { %s3155_s15 = sshll.u32 %s3311_s28, 4  ;;  %s3156_s15 = int_to_ptr.vmem [resolvable:$false] %s3155_s15 }
  0xce   : > { %p3153_p5 = pnand %p3151_p11, %p4235_p9  ;;  %s3157_s21 = scalar_lea.vmem %s3156_s15, 128 }
  0xcf   : > { %p3158_p6 = scmp.lt.s32.totalorder %s3677_s22, %s3156_s15  ;;  %p3159_p7 = scmp.lt.s32.totalorder %s3157_s21, %s3150_s8 }
  0xd0   : > { %p3154_p8 = pneg %p3153_p5 }
  0xd1   : > { %p3160_p2 = por %p3159_p7, %p3158_p6 }
  0xd3   : > { %p3161_p10 = pnand %p3160_p2, %p3154_p8 }
  0xd5   : > { %3164 = shalt.err (!%p3161_p10)
}
  0xd6   : > { %2772 = dma.hbm_to_vmem [thread:$0]  (!%p4233_p13), %s3592_s16, 64, %s3677_s22, %s3596_s11  }
  0xd7   : > { %p4236_p0 = scmp.ne.s32.totalorder %s4210_s29, 0 }
  0xd8   : > { %s3737_s4 = sand.u32 (!%p4236_p0), 1, %s3277_s0   ;;  %p4237_p12 = scmp.ne.s32.totalorder (!%p4236_p0), %s4207_s27, 0 }
  0xd9   : > { %360 = sbr.rel (%p4236_p0) target bundleno = 2201 (0x899), region = 48  ;;  %s2579_s18 = sshll.u32 (!%p4236_p0), %s3737_s4, 3 }
  0xda   : > { %s363_s30 = scalar_lea.sflag (!%p4236_p0), [#allocation9], %s3737_s4  ;;  %s3741_s5 = scalar_lea.vmem (!%p4236_p0), [#allocation8], %s2579_s18 }
  0xe0   : > { %3240 = dma.done.wait (%p4237_p12), %s363_s30, 128  }
  0xe1   : > { %3242 = vsyncadd (%p4237_p12), %s363_s30, 4294967168  ;;  %s4238_s26 = sld [smem:[#allocation26_spill]]  ;;  %s4239_s16 = sld [smem:[#allocation37_spill]] }
  0xe2   : > { %s371_s29 = sand.u32 1, %s3452_s25  }
  0xe3   : > { %s372_s13 = scalar_lea.sflag [#allocation12], %s371_s29 }
  0xe7   : > { %s373_s11 = sand.u32 1, %s4238_s26   ;;  %p4240_p13 = scmp.ne.s32.totalorder %s4239_s16, 0 }
  0xe8   : > { %s3749_s22 = sshll.u32 %s373_s11, 2 }
  0xe9   : > { %s375_s14 = scalar_lea.vmem [#allocation11], %s3749_s22 }
  0xea   : > { %3244 = dma.done.wait (%p4240_p13), %s372_s13, 128  }
  0xeb   : > { %3246 = vsyncadd (%p4240_p13), %s372_s13, 4294967168  ;;  %s384_s10 = scalar_lea.vmem [#allocation13], %s3749_s22  ;;  %p4241_p4 = scmp.eq.s32.totalorder %s3452_s25, 0 }
  0xed   : > { %3248 = dma.done.wait (%p4241_p4), [#allocation15], 512   ;;  %p4242_p1 = pmov %p4241_p4 }
  0xef   : > { %3250 = vsyncadd (%p4242_p1), [#allocation15], 4294966784  ;;  %p4243_p3 = pmov %p4242_p1 }
  0xf0   : > { %p4244_p11 = pmov %p4242_p1 }
  0xf1   : > { %3252 = dma.done.wait (%p4243_p3), [#allocation18], 256  }
  0xf2   : > { %3254 = vsyncadd (%p4244_p11), [#allocation18], 4294967040  ;;  %s2585_s27 = sshll.u32 %s3737_s4, 4  ;;  %s4245_s9 = sld [smem:[#allocation29_spill]] }
  0xf3   : > { %s3766_s12 = scalar_lea.vmem [#allocation19], %s2585_s27 }
  0xf8   : > { %p2586_p9 = scmp.ne.s32.totalorder %s4245_s9, 0 }
  0xf9   : > { %vm793_vm0 = vcmask (!%p2586_p9), 7168   ;;  %v3312_v0 = vmov (!%p2586_p9), 0.0   ;;  %v3313_v1 = vmov (!%p2586_p9), -1e+30   ;;  %v2905_v2 = vld [vmem:[#allocation14] sm:$0xff] (!%p2586_p9)   ;;  %vm3314_vm1 = vmmov (!%p2586_p9), 0  }
  0xfa   : > { %441 = sbr.rel (%p2586_p9) target bundleno = 621 (0x26d), region = 76  ;;  %2653 = vmatprep.subr.bf16.mxu0 (!%p2586_p9), %v3312_v0  ;;  %794 = vst.msk [vmem:[#allocation3] sm:$0xff] (!%p2586_p9), %vm793_vm0, %v3313_v1  ;;  %795 = vst.msk [vmem:[#allocation3 + $0x8] sm:$0xff] (!%p2586_p9), %vm793_vm0, %v3313_v1  ;;  %2657 = vmatprep.mubr.msk.bf16.mxu0 (!%p2586_p9), %vm3314_vm1, %v3312_v0  ;;  %v2906_v3 = vld [vmem:[#allocation14 + $0x8] sm:$0xff] (!%p2586_p9)   ;;  %vm465_vm2 = vcmask (!%p2586_p9), 261120   ;;  %vm788_vm3 = vcmask (!%p2586_p9), 64512   ;;  %v544_v12 = vlaneseq (!%p2586_p9) }
  0xfb   : > { %796 = vst.msk [vmem:[#allocation3 + $0x10] sm:$0xff] (!%p2586_p9), %vm793_vm0, %v3313_v1  ;;  %797 = vst.msk [vmem:[#allocation3 + $0x18] sm:$0xff] (!%p2586_p9), %vm793_vm0, %v3313_v1  ;;  %2654 = vmatpush3.bf16.msra.mxu0 (!%p2586_p9), %v2905_v2  ;;  %v2907_v4 = vld [vmem:[%s3741_s5] sm:$0xff] (!%p2586_p9)   ;;  %s3315_s25 = smov (!%p2586_p9), 104   ;;  %s3316_s20 = smov (!%p2586_p9), 120   ;;  %v3320_v18 = vmov (!%p2586_p9), 0  }
  0xfc   : > { %798 = vst.msk [vmem:[#allocation3 + $0x20] sm:$0xff] (!%p2586_p9), %vm793_vm0, %v3313_v1  ;;  %799 = vst.msk [vmem:[#allocation3 + $0x28] sm:$0xff] (!%p2586_p9), %vm793_vm0, %v3313_v1  ;;  %2655 = vmatprep.subr.bf16.mxu0 (!%p2586_p9), %v3312_v0  ;;  %s3317_s2 = smov (!%p2586_p9), 112   ;;  %v3318_v10 = vmov (!%p2586_p9), 1983009808   ;;  %v545_v14 = vshrl.u32 (!%p2586_p9), %v544_v12, 7  ;;  %v535_v19 = vpack.i.b16 (!%p2586_p9), %v3320_v18, %v3320_v18 }
  0xfd   : > { %800 = vst.msk [vmem:[#allocation3 + $0x30] sm:$0xff] (!%p2586_p9), %vm793_vm0, %v3313_v1  ;;  %801 = vst.msk [vmem:[#allocation3 + $0x38] sm:$0xff] (!%p2586_p9), %vm793_vm0, %v3313_v1  ;;  %v542_v11 = vunpack.c.l.s4 (!%p2586_p9), %v3318_v10  ;;  %v3319_v15 = vmov (!%p2586_p9), 1934713408  }
  0xfe   : > { %802 = vst.msk [vmem:[#allocation4] sm:$0xff] (!%p2586_p9), %vm793_vm0, %v3312_v0  ;;  %803 = vst.msk [vmem:[#allocation4 + $0x8] sm:$0xff] (!%p2586_p9), %vm793_vm0, %v3312_v0  ;;  %v573_v16 = vunpack.c.l.s4 (!%p2586_p9), %v3319_v15 }
  0xff   : > { %804 = vst.msk [vmem:[#allocation4 + $0x10] sm:$0xff] (!%p2586_p9), %vm793_vm0, %v3312_v0  ;;  %805 = vst.msk [vmem:[#allocation4 + $0x18] sm:$0xff] (!%p2586_p9), %vm793_vm0, %v3312_v0  ;;  %2656 = vmatpush3.bf16.msra.mxu0 (!%p2586_p9), %v2906_v3  ;;  %v543_v13 = vunpack.c.0.s8 (!%p2586_p9), %v542_v11 }
 0x100   : > { %806 = vst.msk [vmem:[#allocation4 + $0x20] sm:$0xff] (!%p2586_p9), %vm793_vm0, %v3312_v0  ;;  %807 = vst.msk [vmem:[#allocation4 + $0x28] sm:$0xff] (!%p2586_p9), %vm793_vm0, %v3312_v0  ;;  %v574_v25 = vunpack.c.0.s8 (!%p2586_p9), %v573_v16 }
 0x101   : > { %808 = vst.msk [vmem:[#allocation4 + $0x30] sm:$0xff] %vm793_vm0, %v3312_v0  ;;  %809 = vst.msk [vmem:[#allocation4 + $0x38] sm:$0xff] %vm793_vm0, %v3312_v0  ;;  %v546_v24 = vsub.s32 %v543_v13, %v545_v14 }
 0x102   : > { %2658 = vmatmul.mubr.msk.bf16.vlgmr.msra.gmra.mrb[0].mxu0 %vm465_vm2, %v2907_v4  ;;  %810 = vst.msk [vmem:[#allocation5] sm:$0xff] %vm788_vm3, %v3312_v0  ;;  %811 = vst.msk [vmem:[#allocation5 + $0x8] sm:$0xff] %vm788_vm3, %v3312_v0  ;;  %v577_v33 = vsub.s32 %v574_v25, %v545_v14 }
 0x103   : > { %812 = vst.msk [vmem:[#allocation5 + $0x10] sm:$0xff] %vm788_vm3, %v3312_v0  ;;  %813 = vst.msk [vmem:[#allocation5 + $0x18] sm:$0xff] %vm788_vm3, %v3312_v0 }
 0x104   : > { %814 = vst.msk [vmem:[#allocation5 + $0x20] sm:$0xff] %vm788_vm3, %v3312_v0  ;;  %815 = vst.msk [vmem:[#allocation5 + $0x28] sm:$0xff] %vm788_vm3, %v3312_v0 }
 0x105   : > { %816 = vst.msk [vmem:[#allocation5 + $0x30] sm:$0xff] %vm788_vm3, %v3312_v0  ;;  %817 = vst.msk [vmem:[#allocation5 + $0x38] sm:$0xff] %vm788_vm3, %v3312_v0 }
 0x1d5   : > { %v503_v5 = vpop.f32.mrb[0].mxu0 }
 0x1d6   : > { %v2659_v6 = vpop.f32.mrb[1].mxu0 }
 0x1d7   : > { %v506_v7 = vpop.f32.mrb[2].mxu0 }
 0x1d8   : > { %v510_v8 = vpack.c.bf16 %v506_v7, %v503_v5  ;;  %v2660_v9 = vpop.f32.mrb[3].mxu0 }
 0x1da   : > { %516 = vrot.lane.b32.xlu1 %v510_v8, %s3315_s25  ;;  %512 = vrot.lane.b32.xlu0 %v510_v8, %s3316_s20  ;;  %v522_v22 = vshrl.u32 %v510_v8, 16 }
 0x1de   : > { %514 = vrot.lane.b32.xlu0 %v510_v8, %s3317_s2 }
 0x24c   : > { %v513_v17 = vpop.permute.xlu0 %512  ;;  %v517_v23 = vpop.permute.xlu1 %516 }
 0x24d   : > { %v520_v20 = vpack.i.b16 %v513_v17, %v510_v8  ;;  %v523_v21 = vshrl.u32 %v513_v17, 16  ;;  %v531_v30 = vshrl.u32 %v517_v23, 16 }
 0x24f   : > { %v524_v26 = vpack.i.b16 %v523_v21, %v522_v22  ;;  %v540_v28 = vcombine.high %v520_v20, %v535_v19  ;;  %v547_v32 = vrot.slane %v520_v20, %v546_v24 }
 0x250   : > { %v515_v27 = vpop.permute.xlu0 %514 }
 0x251   : > { %v528_v29 = vpack.i.b16 %v517_v23, %v515_v27  ;;  %v530_v31 = vshrl.u32 %v515_v27, 16  ;;  %v606_v36 = vcombine.high %v524_v26, %v535_v19  ;;  %v554_v38 = vrot.slane %v540_v28, %v546_v24 }
 0x252   : > { %v613_v42 = vrot.slane %v524_v26, %v546_v24 }
 0x253   : > { %v555_v34 = vcombine.high %v528_v29, %v535_v19  ;;  %v562_v35 = vrot.slane %v528_v29, %v546_v24  ;;  %v532_v37 = vpack.i.b16 %v531_v30, %v530_v31  ;;  %v620_v49 = vrot.slane %v606_v36, %v546_v24 }
 0x255   : > { %v569_v39 = vrot.slane %v555_v34, %v546_v24  ;;  %v570_v40 = vcombine.low %v547_v32, %v562_v35  ;;  %v571_v41 = vcombine.high %v547_v32, %v562_v35  ;;  %v621_v43 = vcombine.high %v532_v37, %v535_v19 }
 0x256   : > { %v628_v44 = vrot.slane %v532_v37, %v546_v24 }
 0x257   : > { %v578_v45 = vrot.slane %v570_v40, %v577_v33  ;;  %v585_v46 = vrot.slane %v571_v41, %v577_v33  ;;  %v586_v47 = vcombine.low %v554_v38, %v569_v39  ;;  %v587_v48 = vcombine.high %v554_v38, %v569_v39 }
 0x258   : > { %v635_v50 = vrot.slane %v621_v43, %v546_v24  ;;  %v636_v51 = vcombine.low %v613_v42, %v628_v44  ;;  %v637_v52 = vcombine.high %v613_v42, %v628_v44 }
 0x259   : > { %v594_v53 = vrot.slane %v586_v47, %v577_v33  ;;  %v601_v54 = vrot.slane %v587_v48, %v577_v33  ;;  %v672_v55 = vcombine.low %v578_v45, %v585_v46  ;;  %v2591_v56 = vcombine.high %v578_v45, %v585_v46 }
 0x25a   : > { %v644_v57 = vrot.slane %v636_v51, %v577_v33  ;;  %v651_v58 = vrot.slane %v637_v52, %v577_v33  ;;  %v652_v59 = vcombine.low %v620_v49, %v635_v50  ;;  %v653_v60 = vcombine.high %v620_v49, %v635_v50 }
 0x25b   : > { %v679_v61 = vrot.slane %v672_v55, %v546_v24  ;;  %v687_v62 = vrot.slane %v2591_v56, %v546_v24  ;;  %v688_v63 = vcombine.low %v594_v53, %v601_v54  ;;  %v2592_v0 = vcombine.high %v594_v53, %v601_v54 }
 0x25c   : > { %v660_v1 = vrot.slane %v652_v59, %v577_v33  ;;  %v667_v2 = vrot.slane %v653_v60, %v577_v33  ;;  %v722_v3 = vcombine.low %v644_v57, %v651_v58  ;;  %v2593_v4 = vcombine.high %v644_v57, %v651_v58 }
 0x25d   : > { %v695_v5 = vrot.slane %v688_v63, %v546_v24  ;;  %v703_v6 = vrot.slane %v2592_v0, %v546_v24  ;;  %v704_v7 = vcombine.low %v679_v61, %v687_v62 }
 0x25e   : > { %v729_v8 = vrot.slane %v722_v3, %v546_v24  ;;  %v737_v9 = vrot.slane %v2593_v4, %v546_v24  ;;  %v738_v10 = vcombine.low %v660_v1, %v667_v2  ;;  %v2594_v11 = vcombine.high %v660_v1, %v667_v2 }
 0x25f   : > { %v712_v12 = vcombine.low %v695_v5, %v703_v6  ;;  %v711_v16 = vrot.slane %v704_v7, %v577_v33 }
 0x260   : > { %v745_v13 = vrot.slane %v738_v10, %v546_v24  ;;  %v753_v14 = vrot.slane %v2594_v11, %v546_v24  ;;  %v754_v15 = vcombine.low %v729_v8, %v737_v9 }
 0x261   : > { %v719_v17 = vrot.slane %v712_v12, %v577_v33 }
 0x262   : > { %v762_v18 = vcombine.low %v745_v13, %v753_v14  ;;  %v761_v21 = vrot.slane %v754_v15, %v577_v33 }
 0x263   : > { %v720_v19 = vcombine.low %v711_v16, %v719_v17  ;;  %v721_v20 = vcombine.high %v711_v16, %v719_v17 }
 0x264   : > { %v769_v22 = vrot.slane %v762_v18, %v577_v33 }
 0x265   : > { %v776_v26 = vshrl.u32 %v720_v19, 16  ;;  %v784_v27 = vshrl.u32 %v721_v20, 16 }
 0x266   : > { %v770_v23 = vcombine.low %v761_v21, %v769_v22  ;;  %v771_v25 = vcombine.high %v761_v21, %v769_v22 }
 0x268   : > { %v774_v28 = vpack.i.b16 %v770_v23, %v720_v19  ;;  %v777_v29 = vshrl.u32 %v770_v23, 16  ;;  %v782_v30 = vpack.i.b16 %v771_v25, %v721_v20  ;;  %v785_v31 = vshrl.u32 %v771_v25, 16 }
 0x26a   : > { %v778_v32 = vpack.i.b16 %v777_v29, %v776_v26  ;;  %v786_v34 = vpack.i.b16 %v785_v31, %v784_v27  ;;  %789 = vst.msk [vmem:[#allocation2] sm:$0xff] %vm788_vm3, %v774_v28  ;;  %791 = vst.msk [vmem:[#allocation2 + $0x10] sm:$0xff] %vm788_vm3, %v782_v30 }
 0x26c   : > { %790 = vst.msk [vmem:[#allocation2 + $0x8] sm:$0xff] %vm788_vm3, %v778_v32  ;;  %792 = vst.msk [vmem:[#allocation2 + $0x18] sm:$0xff] %vm788_vm3, %v786_v34 }
 0x26d PF: > { %s4246_s8 = sld [smem:[#allocation42_spill]]  ;;  %v3321_v33 = vmov 0.0   ;;  %vm3322_vm4 = vmmov 0   ;;  %v818_v36 = vld [vmem:[%s375_s14] sm:$0xf]  ;;  %vm836_vm5 = vcmask 261120   ;;  %v950_v48 = vlaneseq }
 0x26e   : > { %2661 = vmatprep.subr.bf16.mxu0 %v3321_v33  ;;  %2669 = vmatprep.subr.bf16.mxu1 %v3321_v33  ;;  %v3323_v37 = vmov 0   ;;  %s3324_s21 = smov 104   ;;  %s3325_s18 = smov 120   ;;  %v2912_v43 = vld [vmem:[#allocation16] sm:$0xff]   ;;  %v2913_v44 = vld [vmem:[#allocation16 + $0x8] sm:$0xff]   ;;  %vm1290_vm6 = vcmask 64512  }
 0x26f   : > { %2665 = vmatprep.mubr.msk.bf16.mxu0 %vm3322_vm4, %v3321_v33  ;;  %2673 = vmatprep.mubr.msk.bf16.mxu1 %vm3322_vm4, %v3321_v33  ;;  %s3326_s30 = smov 112   ;;  %v819_v45 = vld [vmem:[%s384_s10] sm:$0xf]  ;;  %v3327_v46 = vmov 1983009808   ;;  %v951_v52 = vshrl.u32 %v950_v48, 7 }
 0x270   : > { %2908 = vset.pattern.permute.xlu0 %v3323_v37  ;;  %2909 = vset.pattern.permute.xlu1 %v3323_v37  ;;  %v948_v47 = vunpack.c.l.s4 %v3327_v46  ;;  %v3328_v49 = vmov 1934713408   ;;  %s4247_s5 = sld [smem:[#allocation30_spill]]  ;;  %s4248_s26 = sld [smem:[#allocation29_spill]]  ;;  %vm1663_vm8 = vcmask 7168   ;;  %vm1735_vm9 = vcmask 1043456  }
 0x271   : > { %2670 = vmatpush3.bf16.msra.mxu1 %v2912_v43  ;;  %v965_v50 = vunpack.c.l.s4 %v3328_v49 }
 0x272   : > { %2671 = vmatprep.subr.bf16.mxu1 %v3321_v33  ;;  %v949_v51 = vunpack.c.0.s8 %v948_v47 }
 0x273   : > { %v2910_v24 = vld [vmem:[%s4246_s8] sm:$0xff]   ;;  %v2911_v35 = vld [vmem:[%s4246_s8 + $0x8] sm:$0xff]   ;;  %v966_v53 = vunpack.c.0.s8 %v965_v50 }
 0x274   : > { %2662 = vmatpush3.bf16.msra.mxu0 %v2910_v24  ;;  %v3830_v54 = vsub.s32 %v949_v51, %v951_v52 }
 0x275   : > { %2663 = vmatprep.subr.bf16.mxu0 %v3321_v33  ;;  %2672 = vmatpush3.bf16.msra.mxu1 %v2913_v44  ;;  %v3833_v58 = vsub.s32 %v966_v53, %v951_v52  ;;  %v1286_v53 = vld [vmem:[#allocation2] sm:$0xff] }
 0x276   : > { %2683 = vmatprep.subr.bf16.mxu1 %v3321_v33  ;;  %s1282_s16 = sld [smem:[#allocation7 + %s4247_s5]]  ;;  %s2601_s29 = sshll.u32 %s4248_s26, 3 }
 0x277   : > { %p2610_p5 = scmp.ne.s32.totalorder %s4248_s26, 1 }
 0x278   : > { %2664 = vmatpush3.bf16.msra.mxu0 %v2911_v35  ;;  %2674 = vmatmul.mubr.msk.bf16.vlgmr.msra.gmra.mrb[0].mxu1 %vm836_vm5, %v819_v45  ;;  %vm3332_vm10 = vmmov (!%p2610_p5), 0   ;;  %s3333_s11 = smov (!%p2610_p5), 16   ;;  %s3334_s22 = smov (!%p2610_p5), 8   ;;  %vm2319_vm11 = vcmask (!%p2610_p5), 130048   ;;  %vm2322_vm12 = vcmask (!%p2610_p5), 195584  }
 0x279   : > { %2677 = vmatprep.subr.bf16.mxu0 %v3321_v33  ;;  %2685 = vmatprep.mubr.msk.bf16.mxu1 %vm3322_vm4, %v3321_v33  ;;  %s3335_s13 = smov (!%p2610_p5), 24  }
 0x27b   : > { %2666 = vmatmul.mubr.msk.bf16.vlgmr.msra.gmra.mrb[0].mxu0 %vm836_vm5, %v818_v36 }
 0x27c   : > { %2679 = vmatprep.mubr.msk.bf16.mxu0 %vm3322_vm4, %v3321_v33 }
 0x34e   : > { %v874_v38 = vpop.f32.mrb[0].mxu0 }
 0x34f   : > { %v939_v39 = vpack.c.bf16 %v874_v38, %v874_v38  ;;  %v2667_v40 = vpop.f32.mrb[1].mxu0 }
 0x350   : > { %v877_v41 = vpop.f32.mrb[2].mxu0 }
 0x351   : > { %945 = vrot.lane.b32.xlu1 %v939_v39, %s3324_s21  ;;  %941 = vrot.lane.b32.xlu0 %v939_v39, %s3325_s18  ;;  %v2668_v42 = vpop.f32.mrb[3].mxu0  ;;  %v953_v1 = vrot.slane %v939_v39, %v3830_v54 }
 0x355   : > { %943 = vrot.lane.b32.xlu0 %v939_v39, %s3326_s30 }
 0x3c3   : > { %v946_v55 = vpop.permute.xlu1 %945  ;;  %v942_v56 = vpop.permute.xlu0 %941 }
 0x3c4   : > { %v995_v57 = vrot.slane %v946_v55, %v3830_v54  ;;  %v987_v59 = vrot.slane %v942_v56, %v3830_v54  ;;  %v1287_v56 = vld [vmem:[#allocation2 + $0x8] sm:$0xff] }
 0x3c6   : > { %v996_v60 = vcombine.low %v987_v59, %v995_v57  ;;  %v997_v61 = vcombine.high %v987_v59, %v995_v57 }
 0x3c7   : > { %v944_v62 = vpop.permute.xlu0 %943 }
 0x3c8   : > { %v1004_v63 = vrot.slane %v996_v60, %v3833_v58  ;;  %v961_v0 = vrot.slane %v944_v62, %v3830_v54  ;;  %v1011_v2 = vrot.slane %v997_v61, %v3833_v58  ;;  %v1288_v60 = vld [vmem:[#allocation2 + $0x10] sm:$0xff]  ;;  %v1289_v61 = vld [vmem:[#allocation2 + $0x18] sm:$0xff]  ;;  %v933_v62 = vpop.f32.mrb[0].mxu1 }
 0x3ca   : > { %v962_v3 = vcombine.low %v953_v1, %v961_v0  ;;  %v963_v4 = vcombine.high %v953_v1, %v961_v0  ;;  %v1012_v5 = vcombine.high %v1004_v63, %v3323_v37  ;;  %v1013_v8 = vcombine.high %v1011_v2, %v3323_v37 }
 0x3cb   : > { %v1019_v9 = vshrl.u32 %v1004_v63, 16  ;;  %v1035_v15 = vshrl.u32 %v1011_v2, 16 }
 0x3cc   : > { %v970_v6 = vrot.slane %v962_v3, %v3833_v58  ;;  %v977_v7 = vrot.slane %v963_v4, %v3833_v58  ;;  %v1027_v14 = vshrl.u32 %v1012_v5, 16  ;;  %v1043_v22 = vshrl.u32 %v1013_v8, 16 }
 0x3cd   : > { %v1280_v3 = vstv %s2601_s29 }
 0x3ce   : > { %v978_v10 = vcombine.high %v970_v6, %v3323_v37  ;;  %v979_v11 = vcombine.high %v977_v7, %v3323_v37  ;;  %v1016_v12 = vpack.i.b16 %v1004_v63, %v970_v6  ;;  %v1018_v13 = vshrl.u32 %v970_v6, 16  ;;  %v2675_v63 = vpop.f32.mrb[1].mxu1 }
 0x3cf   : > { %v1032_v16 = vpack.i.b16 %v1011_v2, %v977_v7  ;;  %v1034_v17 = vshrl.u32 %v977_v7, 16  ;;  %v936_v0 = vpop.f32.mrb[2].mxu1  ;;  %v1279_v2 = vand.u32 127, %v950_v48  ;;  %v3329_v6 = vmov -1e+30   ;;  %v1492_v63 = vld [vmem:[#allocation3 + $0x28] sm:$0xff] }
 0x3d0   : > { %v1020_v18 = vpack.i.b16 %v1019_v9, %v1018_v13  ;;  %v1024_v19 = vpack.i.b16 %v1012_v5, %v978_v10  ;;  %v1026_v20 = vshrl.u32 %v978_v10, 16  ;;  %v1040_v21 = vpack.i.b16 %v1013_v8, %v979_v11  ;;  %v2676_v1 = vpop.f32.mrb[3].mxu1 }
 0x3d1   : > { %v1036_v23 = vpack.i.b16 %v1035_v15, %v1034_v17  ;;  %v1042_v25 = vshrl.u32 %v979_v11, 16  ;;  %v1046_v26 = vcombine.low %v1016_v12, %v1032_v16  ;;  %v1281_v4 = vadd.s32 %v1280_v3, %v1279_v2 }
 0x3d2   : > { %v1028_v27 = vpack.i.b16 %v1027_v14, %v1026_v20  ;;  %v1054_v28 = vcombine.low %v1024_v19, %v1040_v21  ;;  %v1283_v5 = vstv %s1282_s16 }
 0x3d3   : > { %v1044_v29 = vpack.i.b16 %v1043_v22, %v1042_v25  ;;  %v1071_v30 = vcombine.low %v1020_v18, %v1036_v23  ;;  %v1053_v31 = vrot.slane %v1046_v26, %v3830_v54  ;;  %vm1284_vm7 = vcmp.lt.s32.totalorder %v1281_v4, %v1283_v5 }
 0x3d4   : > { %v1061_v32 = vrot.slane %v1054_v28, %v3830_v54  ;;  %v1285_v7 = vsel %vm1284_vm7, 0.0, %v3329_v6 }
 0x3d5   : > { %v1079_v34 = vcombine.low %v1028_v27, %v1044_v29  ;;  %v1078_v35 = vrot.slane %v1071_v30, %v3830_v54 }
 0x3d6   : > { %v1062_v24 = vcombine.low %v1053_v31, %v1061_v32 }
 0x3d7   : > { %v1086_v36 = vrot.slane %v1079_v34, %v3830_v54 }
 0x3d8   : > { %v1069_v38 = vrot.slane %v1062_v24, %v3833_v58 }
 0x3d9   : > { %v1087_v39 = vcombine.low %v1078_v35, %v1086_v36 }
 0x3da   : > { %v1099_v42 = vshrl.u32 %v1069_v38, 16  ;;  %v1070_v47 = vcombine.high %v1069_v38, %v3323_v37 }
 0x3db   : > { %v1094_v40 = vrot.slane %v1087_v39, %v3833_v58 }
 0x3dc   : > { %v1105_v52 = vshrl.u32 %v1070_v47, 16 }
 0x3dd   : > { %v1098_v41 = vpack.i.b16 %v1094_v40, %v1069_v38  ;;  %v1100_v43 = vshrl.u32 %v1094_v40, 16  ;;  %v1095_v44 = vcombine.high %v1094_v40, %v3323_v37 }
 0x3df   : > { %v1295_v45 = vsel %vm1290_vm6, %v1098_v41, 0  ;;  %v1101_v46 = vpack.i.b16 %v1100_v43, %v1099_v42  ;;  %v1106_v50 = vshrl.u32 %v1095_v44, 16  ;;  %v1104_v51 = vpack.i.b16 %v1095_v44, %v1070_v47  ;;  %v1487_v42 = vld [vmem:[#allocation3] sm:$0xff]  ;;  %v1488_v44 = vld [vmem:[#allocation3 + $0x8] sm:$0xff]  ;;  %v1490_v47 = vld [vmem:[#allocation3 + $0x18] sm:$0xff] }
 0x3e0   : > { %2678 = vmatpush3.bf16.xpose.msra.mxu0 %v1295_v45  ;;  %v3909_v41 = vpack.c.bf16 %v933_v62, %v933_v62  ;;  %v1491_v62 = vld [vmem:[#allocation3 + $0x20] sm:$0xff] }
 0x3e1   : > { %v1342_v49 = vsel %vm1290_vm6, %v1101_v46, 0  ;;  %2689 = vmatprep.subr.bf16.mxu0 %v3321_v33  ;;  %v1107_v55 = vpack.i.b16 %v1106_v50, %v1105_v52  ;;  %v1389_v57 = vsel %vm1290_vm6, %v1104_v51, 0  ;;  %v1489_v52 = vld [vmem:[#allocation3 + $0x10] sm:$0xff] }
 0x3e2   : > { %2684 = vmatpush3.bf16.xpose.msra.mxu1 %v1342_v49 }
 0x3e3   : > { %2695 = vmatprep.subr.bf16.mxu1 %v3321_v33  ;;  %v1436_v59 = vsel %vm1290_vm6, %v1107_v55, 0 }
 0x3e7   : > { %2680 = vmatmul.mubr.msk.bf16.vlgmr.msra.gmra.mrb[4].mxu0 %vm1290_vm6, %v1286_v53 }
 0x3e8   : > { %2690 = vmatpush3.bf16.xpose.msra.mxu0 %v1389_v57  ;;  %2691 = vmatprep.mubr.msk.bf16.mxu0 %vm3322_vm4, %v3321_v33 }
 0x3e9   : > { %2686 = vmatmul.mubr.msk.bf16.vlgmr.msra.gmra.mrb[4].mxu1 %vm1290_vm6, %v1287_v56  ;;  %2701 = vmatprep.subr.bf16.mxu0 %v3321_v33 }
 0x3ea   : > { %2696 = vmatpush3.bf16.xpose.msra.mxu1 %v1436_v59  ;;  %2697 = vmatprep.mubr.msk.bf16.mxu1 %vm3322_vm4, %v3321_v33 }
 0x3eb   : > { %2707 = vmatprep.subr.bf16.mxu1 %v3321_v33 }
 0x3ef   : > { %2692 = vmatmul.mubr.msk.bf16.vlgmr.msra.gmra.mrb[8].mxu0 %vm1290_vm6, %v1288_v60 }
 0x3f0   : > { %2703 = vmatprep.mubr.msk.bf16.mxu0 %vm3322_vm4, %v3321_v33 }
 0x3f1   : > { %2698 = vmatmul.mubr.msk.bf16.vlgmr.msra.gmra.mrb[8].mxu1 %vm1290_vm6, %v1289_v61 }
 0x3f2   : > { %2709 = vmatprep.mubr.msk.bf16.mxu1 %vm3322_vm4, %v3321_v33 }
 0x4ba   : > { %v1331_v8 = vpop.f32.mrb[4].mxu0 }
 0x4bb   : > { %v3877_v9 = vadd.f32 %v1331_v8, %v1285_v7  ;;  %v2681_v10 = vpop.f32.mrb[5].mxu0  ;;  %v3923_v8 = vld [vmem:[#allocation3 + $0x38] sm:$0xff] }
 0x4bc   : > { %v1334_v11 = vpop.f32.mrb[6].mxu0  ;;  %v1378_v12 = vpop.f32.mrb[4].mxu1 }
 0x4bd   : > { %v3879_v13 = vadd.f32 %v1334_v11, %v1285_v7  ;;  %v2682_v14 = vpop.f32.mrb[7].mxu0  ;;  %v2687_v15 = vpop.f32.mrb[5].mxu1  ;;  %v1495_v16 = vsel %vm1290_vm6, %v3877_v9, -inf  ;;  %v3883_v17 = vadd.f32 %v1378_v12, %v1285_v7 }
 0x4be   : > { %v1381_v48 = vpop.f32.mrb[6].mxu1  ;;  %1496 = vmax.xlane.f32.xlu1 %v1495_v16 }
 0x4bf   : > { %v3885_v18 = vadd.f32 %v1381_v48, %v1285_v7  ;;  %v2688_v19 = vpop.f32.mrb[7].mxu1  ;;  %v1498_v20 = vsel %vm1290_vm6, %v3879_v13, -inf  ;;  %v1501_v26 = vsel %vm1290_vm6, %v3883_v17, -inf }
 0x4c0   : > { %1499 = vmax.xlane.f32.xlu0 %v1498_v20 }
 0x4c1   : > { %v1504_v21 = vsel %vm1290_vm6, %v3885_v18, -inf }
 0x4c2   : > { %1505 = vmax.xlane.f32.xlu1 %v1504_v21  ;;  %v1425_v22 = vpop.f32.mrb[8].mxu0 }
 0x4c3   : > { %v3891_v23 = vadd.f32 %v1425_v22, %v1285_v7  ;;  %v2693_v25 = vpop.f32.mrb[9].mxu0 }
 0x4c4   : > { %v1472_v27 = vpop.f32.mrb[8].mxu1  ;;  %1502 = vmax.xlane.f32.xlu0 %v1501_v26  ;;  %v1428_v28 = vpop.f32.mrb[10].mxu0  ;;  %v1122_v26 = vrot.slane %v3909_v41, %v3830_v54 }
 0x4c5   : > { %v3895_v29 = vadd.f32 %v1428_v28, %v1285_v7  ;;  %v2694_v30 = vpop.f32.mrb[11].mxu0  ;;  %v2699_v31 = vpop.f32.mrb[9].mxu1  ;;  %v3897_v34 = vadd.f32 %v1472_v27, %v1285_v7  ;;  %v1507_v36 = vsel %vm1290_vm6, %v3891_v23, -inf }
 0x4c6   : > { %v1475_v32 = vpop.f32.mrb[10].mxu1 }
 0x4c7   : > { %v3899_v24 = vadd.f32 %v1475_v32, %v1285_v7  ;;  %v2700_v35 = vpop.f32.mrb[11].mxu1  ;;  %v1510_v38 = vsel %vm1290_vm6, %v3895_v29, -inf  ;;  %v1513_v39 = vsel %vm1290_vm6, %v3897_v34, -inf  ;;  %v3921_v7 = vld [vmem:[#allocation3 + $0x30] sm:$0xff] }
 0x4c8   : > { %1508 = vmax.xlane.f32.xlu0 %v1507_v36  ;;  %1511 = vmax.xlane.f32.xlu1 %v1510_v38 }
 0x4c9   : > { %v1516_v40 = vsel %vm1290_vm6, %v3899_v24, -inf }
 0x4cc   : > { %1514 = vmax.xlane.f32.xlu0 %v1513_v39  ;;  %1517 = vmax.xlane.f32.xlu1 %v1516_v40 }
 0x4dd   : > { %1112 = vrot.lane.b32.xlu1 %v3909_v41, %s3326_s30 }
 0x4e1   : > { %1114 = vrot.lane.b32.xlu1 %v3909_v41, %s3324_s21 }
 0x4e2   : > { %1110 = vrot.lane.b32.xlu0 %v3909_v41, %s3325_s18 }
 0x54b   : > { %v1497_v43 = vpop.xlane.xlu1 %1496 }
 0x54c   : > { %v1519_v45 = vmax.f32 %v1487_v42, %v1497_v43 }
 0x54d   : > { %v1500_v46 = vpop.xlane.xlu0 %1499 }
 0x54e   : > { %v1527_v49 = vsub.f32 %v1487_v42, %v1519_v45  ;;  %1937 = vst.msk [vmem:[#allocation3] sm:$0xff] %vm1663_vm8, %v1519_v45  ;;  %v1520_v50 = vmax.f32 %v1488_v44, %v1500_v46  ;;  %1553 = vperm.xlu0 %2908, %v1519_v45  }
 0x54f   : > { %v1506_v51 = vpop.xlane.xlu1 %1505 }
 0x550   : > { %v1528_v53 = vsub.f32 %v1488_v44, %v1520_v50  ;;  %1938 = vst.msk [vmem:[#allocation3 + $0x8] sm:$0xff] %vm1663_vm8, %v1520_v50  ;;  %v1522_v55 = vmax.f32 %v1490_v47, %v1506_v51  ;;  %1558 = vperm.xlu1 %2909, %v1520_v50   ;;  %v1535_v56 = vmul.f32 1.442695, %v1527_v49 }
 0x551   : > { %v1503_v57 = vpop.xlane.xlu0 %1502 }
 0x552   : > { %v1537_v59 = vmul.f32 1.442695, %v1528_v53  ;;  %v1530_v60 = vsub.f32 %v1490_v47, %v1522_v55  ;;  %1940 = vst.msk [vmem:[#allocation3 + $0x18] sm:$0xff] %vm1663_vm8, %v1522_v55  ;;  %v1521_v61 = vmax.f32 %v1489_v52, %v1503_v57  ;;  %1568 = vperm.xlu0 %2908, %v1522_v55  }
 0x554   : > { %2914 = vpow2.f32 %v1537_v59  ;;  %v1529_v0 = vsub.f32 %v1489_v52, %v1521_v61  ;;  %1939 = vst.msk [vmem:[#allocation3 + $0x10] sm:$0xff] %vm1663_vm8, %v1521_v61  ;;  %1563 = vperm.xlu1 %2909, %v1521_v61   ;;  %v1541_v1 = vmul.f32 1.442695, %v1530_v60 }
 0x555   : > { %2916 = vpow2.f32 %v1535_v56  ;;  %v1509_v2 = vpop.xlane.xlu0 %1508  ;;  %v1512_v3 = vpop.xlane.xlu1 %1511 }
 0x556   : > { %v1539_v4 = vmul.f32 1.442695, %v1529_v0  ;;  %v1523_v5 = vmax.f32 %v1491_v62, %v1509_v2  ;;  %v1524_v6 = vmax.f32 %v1492_v63, %v1512_v3 }
 0x558   : > { %2918 = vpow2.f32 %v1539_v4  ;;  %v1531_v10 = vsub.f32 %v1491_v62, %v1523_v5  ;;  %1941 = vst.msk [vmem:[#allocation3 + $0x20] sm:$0xff] %vm1663_vm8, %v1523_v5  ;;  %v1532_v11 = vsub.f32 %v1492_v63, %v1524_v6  ;;  %1942 = vst.msk [vmem:[#allocation3 + $0x28] sm:$0xff] %vm1663_vm8, %v1524_v6  ;;  %1573 = vperm.xlu1 %2909, %v1523_v5   ;;  %1578 = vperm.xlu0 %2908, %v1524_v6  }
 0x559   : > { %2920 = vpow2.f32 %v1541_v1  ;;  %v1515_v12 = vpop.xlane.xlu0 %1514  ;;  %v1518_v14 = vpop.xlane.xlu1 %1517 }
 0x55a   : > { %v1543_v15 = vmul.f32 1.442695, %v1531_v10  ;;  %v1545_v16 = vmul.f32 1.442695, %v1532_v11  ;;  %v3928_v48 = vmax.f32 %v3921_v7, %v1515_v12  ;;  %v3931_v19 = vmax.f32 %v3923_v8, %v1518_v14 }
 0x55c   : > { %2922 = vpow2.f32 %v1543_v15  ;;  %v1533_v20 = vsub.f32 %v3921_v7, %v3928_v48  ;;  %1943 = vst.msk [vmem:[#allocation3 + $0x30] sm:$0xff] %vm1663_vm8, %v3928_v48  ;;  %v1534_v21 = vsub.f32 %v3923_v8, %v3931_v19  ;;  %1944 = vst.msk [vmem:[#allocation3 + $0x38] sm:$0xff] %vm1663_vm8, %v3931_v19  ;;  %1583 = vperm.xlu1 %2909, %v3928_v48   ;;  %1588 = vperm.xlu0 %2908, %v3931_v19   ;;  %v1615_v7 = vld [vmem:[#allocation4] sm:$0xff]  ;;  %v1618_v8 = vld [vmem:[#allocation4 + $0x18] sm:$0xff] }
 0x55d   : > { %2924 = vpow2.f32 %v1545_v16  ;;  %v1113_v22 = vpop.permute.xlu1 %1112  ;;  %v1111_v30 = vpop.permute.xlu0 %1110 }
 0x55e   : > { %v3943_v25 = vpop.eup %2914  ;;  %v1130_v27 = vrot.slane %v1113_v22, %v3830_v54  ;;  %v1156_v41 = vrot.slane %v1111_v30, %v3830_v54 }
 0x55f   : > { %v3948_v28 = vpop.eup %2916 }
 0x560   : > { %v1131_v31 = vcombine.low %v1122_v26, %v1130_v27  ;;  %v1132_v32 = vcombine.high %v1122_v26, %v1130_v27  ;;  %1687 = vperm.xlu1 %2909, %v3943_v25   ;;  %1682 = vperm.xlu0 %2908, %v3948_v28  }
 0x561   : > { %v1115_v35 = vpop.permute.xlu1 %1114 }
 0x562   : > { %v3952_v36 = vpop.eup %2918  ;;  %v1139_v38 = vrot.slane %v1131_v31, %v3833_v58  ;;  %v1164_v39 = vrot.slane %v1115_v35, %v3830_v54  ;;  %v1146_v42 = vrot.slane %v1132_v32, %v3833_v58 }
 0x563   : > { %v3956_v40 = vpop.eup %2920 }
 0x564   : > { %1692 = vperm.xlu1 %2909, %v3952_v36   ;;  %1697 = vperm.xlu0 %2908, %v3956_v40   ;;  %v1165_v43 = vcombine.low %v1156_v41, %v1164_v39  ;;  %v1166_v44 = vcombine.high %v1156_v41, %v1164_v39  ;;  %v1147_v46 = vcombine.high %v1139_v38, %v3323_v37  ;;  %v1187_v52 = vshrl.u32 %v1139_v38, 16 }
 0x565   : > { %v1148_v51 = vcombine.high %v1146_v42, %v3323_v37  ;;  %v1203_v60 = vshrl.u32 %v1146_v42, 16 }
 0x566   : > { %v3962_v45 = vpop.eup %2922  ;;  %v1173_v49 = vrot.slane %v1165_v43, %v3833_v58  ;;  %v1180_v50 = vrot.slane %v1166_v44, %v3833_v58  ;;  %v1195_v59 = vshrl.u32 %v1147_v46, 16 }
 0x567   : > { %v3965_v47 = vpop.eup %2924  ;;  %v1211_v3 = vshrl.u32 %v1148_v51, 16 }
 0x568   : > { %1702 = vperm.xlu1 %2909, %v3962_v45   ;;  %1707 = vperm.xlu0 %2908, %v3965_v47   ;;  %v1181_v53 = vcombine.high %v1173_v49, %v3323_v37  ;;  %v1182_v55 = vcombine.high %v1180_v50, %v3323_v37  ;;  %v1185_v56 = vpack.i.b16 %v1173_v49, %v1139_v38  ;;  %v1188_v57 = vshrl.u32 %v1173_v49, 16 }
 0x569   : > { %v1201_v61 = vpack.i.b16 %v1180_v50, %v1146_v42  ;;  %v1204_v62 = vshrl.u32 %v1180_v50, 16 }
 0x56a   : > { %v1189_v63 = vpack.i.b16 %v1188_v57, %v1187_v52  ;;  %v1193_v0 = vpack.i.b16 %v1181_v53, %v1147_v46  ;;  %v1196_v1 = vshrl.u32 %v1181_v53, 16  ;;  %v1209_v2 = vpack.i.b16 %v1182_v55, %v1148_v51 }
 0x56b   : > { %v1205_v4 = vpack.i.b16 %v1204_v62, %v1203_v60  ;;  %v1212_v5 = vshrl.u32 %v1182_v55, 16  ;;  %v1215_v6 = vcombine.low %v1185_v56, %v1201_v61 }
 0x56c   : > { %v1197_v10 = vpack.i.b16 %v1196_v1, %v1195_v59  ;;  %v1223_v11 = vcombine.low %v1193_v0, %v1209_v2 }
 0x56d   : > { %v1213_v12 = vpack.i.b16 %v1212_v5, %v1211_v3  ;;  %v1240_v14 = vcombine.low %v1189_v63, %v1205_v4  ;;  %v1222_v15 = vrot.slane %v1215_v6, %v3830_v54 }
 0x56e   : > { %v1230_v16 = vrot.slane %v1223_v11, %v3830_v54 }
 0x56f   : > { %v1248_v22 = vcombine.low %v1197_v10, %v1213_v12  ;;  %v1247_v27 = vrot.slane %v1240_v14, %v3830_v54 }
 0x570   : > { %v1231_v26 = vcombine.low %v1222_v15, %v1230_v16 }
 0x571   : > { %v1255_v30 = vrot.slane %v1248_v22, %v3830_v54 }
 0x572   : > { %v1238_v31 = vrot.slane %v1231_v26, %v3833_v58 }
 0x573   : > { %v1256_v32 = vcombine.low %v1247_v27, %v1255_v30 }
 0x574   : > { %v1239_v35 = vcombine.high %v1238_v31, %v3323_v37  ;;  %v1268_v41 = vshrl.u32 %v1238_v31, 16 }
 0x575   : > { %v1263_v38 = vrot.slane %v1256_v32, %v3833_v58 }
 0x576   : > { %v1274_v44 = vshrl.u32 %v1239_v35, 16 }
 0x577   : > { %v1267_v39 = vpack.i.b16 %v1263_v38, %v1238_v31  ;;  %v1269_v42 = vshrl.u32 %v1263_v38, 16  ;;  %v1264_v43 = vcombine.high %v1263_v38, %v3323_v37 }
 0x579   : > { %v1737_v46 = vsel %vm1735_vm9, %v1267_v39, 0  ;;  %v1270_v49 = vpack.i.b16 %v1269_v42, %v1268_v41  ;;  %v1273_v50 = vpack.i.b16 %v1264_v43, %v1239_v35  ;;  %v1275_v51 = vshrl.u32 %v1264_v43, 16 }
 0x57a   : > { %2702 = vmatpush3.bf16.msra.mxu0 %v1737_v46 }
 0x57b   : > { %v1784_v52 = vsel %vm1735_vm9, %v1270_v49, 0  ;;  %2713 = vmatprep.subr.bf16.mxu0 %v3321_v33  ;;  %v1831_v53 = vsel %vm1735_vm9, %v1273_v50, 0  ;;  %v1276_v55 = vpack.i.b16 %v1275_v51, %v1274_v44  ;;  %v1549_v51 = vmul.f32 1.442695, %v1534_v21 }
 0x57c   : > { %2708 = vmatpush3.bf16.msra.mxu1 %v1784_v52 }
 0x57d   : > { %2719 = vmatprep.subr.bf16.mxu1 %v3321_v33  ;;  %v1878_v56 = vsel %vm1735_vm9, %v1276_v55, 0 }
 0x5cd   : > { %v1554_v37 = vpop.permute.xlu0 %1553 }
 0x5ce   : > { %v1591_v57 = vsub.f32 %v3877_v9, %v1554_v37 }
 0x5cf   : > { %v1559_v59 = vpop.permute.xlu1 %1558 }
 0x5d0   : > { %v1599_v60 = vmul.f32 1.442695, %v1591_v57  ;;  %v1592_v61 = vsub.f32 %v3879_v13, %v1559_v59 }
 0x5d1   : > { %v1569_v62 = vpop.permute.xlu0 %1568 }
 0x5d2   : > { %2926 = vpow2.f32 %v1599_v60  ;;  %v1601_v63 = vmul.f32 1.442695, %v1592_v61  ;;  %v1594_v0 = vsub.f32 %v3885_v18, %v1569_v62  ;;  %v1623_v60 = vmul.f32 %v3948_v28, %v1615_v7  ;;  %v1620_v28 = vld [vmem:[#allocation4 + $0x28] sm:$0xff] }
 0x5d3   : > { %v1564_v1 = vpop.permute.xlu1 %1563 }
 0x5d4   : > { %2928 = vpow2.f32 %v1601_v63  ;;  %v1605_v2 = vmul.f32 1.442695, %v1594_v0  ;;  %v1593_v3 = vsub.f32 %v3883_v17, %v1564_v1  ;;  %v1617_v63 = vld [vmem:[#allocation4 + $0x10] sm:$0xff]  ;;  %v1626_v1 = vmul.f32 %v3956_v40, %v1618_v8  ;;  %v1622_v40 = vld [vmem:[#allocation4 + $0x38] sm:$0xff] }
 0x5d6   : > { %2930 = vpow2.f32 %v1605_v2  ;;  %v1603_v4 = vmul.f32 1.442695, %v1593_v3 }
 0x5d7   : > { %v1579_v5 = vpop.permute.xlu0 %1578  ;;  %v1574_v6 = vpop.permute.xlu1 %1573 }
 0x5d8   : > { %2932 = vpow2.f32 %v1603_v4  ;;  %v1596_v9 = vsub.f32 %v3895_v29, %v1579_v5  ;;  %v1595_v10 = vsub.f32 %v3891_v23, %v1574_v6  ;;  %v1625_v4 = vmul.f32 %v3952_v36, %v1617_v63 }
 0x5da   : > { %v1609_v13 = vmul.f32 1.442695, %v1596_v9  ;;  %v1607_v11 = vmul.f32 1.442695, %v1595_v10  ;;  %v1619_v9 = vld [vmem:[#allocation4 + $0x20] sm:$0xff] }
 0x5db   : > { %v1589_v12 = vpop.permute.xlu0 %1588  ;;  %v1584_v14 = vpop.permute.xlu1 %1583  ;;  %v1627_v10 = vmul.f32 %v3962_v45, %v1619_v9  ;;  %v1672_v45 = vld [vmem:[#allocation5] sm:$0xff] }
 0x5dc   : > { %v2927_v15 = vpop.eup %2926  ;;  %2934 = vpow2.f32 %v1609_v13  ;;  %v1598_v18 = vsub.f32 %v3899_v24, %v1589_v12  ;;  %v1597_v16 = vsub.f32 %v3897_v34, %v1584_v14  ;;  %v1621_v14 = vld [vmem:[#allocation4 + $0x30] sm:$0xff] }
 0x5dd   : > { %2936 = vpow2.f32 %v1607_v11  ;;  %v1631_v17 = vsel %vm1290_vm6, %v2927_v15, 0.0 }
 0x5de   : > { %v2929_v22 = vpop.eup %2928  ;;  %v1613_v26 = vmul.f32 1.442695, %v1598_v18  ;;  %v1611_v27 = vmul.f32 1.442695, %v1597_v16  ;;  %1632 = vadd.xlane.f32.xlu1 %v1631_v17 }
 0x5df   : > { %v1634_v29 = vsel %vm1290_vm6, %v2929_v22, 0.0  ;;  %v1728_v23 = vpack.c.bf16 %v2929_v22, %v2927_v15  ;;  %v1688_v55 = vpop.permute.xlu1 %1687 }
 0x5e0   : > { %v2931_v30 = vpop.eup %2930  ;;  %2938 = vpow2.f32 %v1613_v26  ;;  %1635 = vadd.xlane.f32.xlu0 %v1634_v29  ;;  %v1674_v29 = vld [vmem:[#allocation5 + $0x10] sm:$0xff] }
 0x5e1   : > { %2940 = vpow2.f32 %v1611_v27  ;;  %2704 = vmatmul.mubr.msk.bf16.vlgmr.msra.gmra.mrb[12].mxu0 %vm1290_vm6, %v1728_v23  ;;  %v1640_v24 = vsel %vm1290_vm6, %v2931_v30, 0.0 }
 0x5e2   : > { %v2933_v31 = vpop.eup %2932  ;;  %2714 = vmatpush3.bf16.msra.mxu0 %v1831_v53  ;;  %1641 = vadd.xlane.f32.xlu1 %v1640_v24 }
 0x5e3   : > { %v1637_v34 = vsel %vm1290_vm6, %v2933_v31, 0.0  ;;  %v1729_v32 = vpack.c.bf16 %v2931_v30, %v2933_v31  ;;  %2715 = vmatprep.mubr.msk.bf16.mxu0 %vm3322_vm4, %v3321_v33  ;;  %v1693_v37 = vpop.permute.xlu1 %1692 }
 0x5e4   : > { %1638 = vadd.xlane.f32.xlu0 %v1637_v34  ;;  %v1675_v34 = vld [vmem:[#allocation5 + $0x18] sm:$0xff] }
 0x5e5   : > { %2710 = vmatmul.mubr.msk.bf16.vlgmr.msra.gmra.mrb[12].mxu1 %vm1290_vm6, %v1729_v32 }
 0x5e6   : > { %v2935_v35 = vpop.eup %2934  ;;  %2720 = vmatpush3.bf16.msra.mxu1 %v1878_v56  ;;  %2721 = vmatprep.mubr.msk.bf16.mxu1 %vm3322_vm4, %v3321_v33  ;;  %v1547_v33 = vmul.f32 1.442695, %v1533_v20  ;;  %v1683_v56 = vpop.permute.xlu0 %1682  ;;  %v1616_v20 = vld [vmem:[#allocation4 + $0x8] sm:$0xff] }
 0x5e7   : > { %v2937_v38 = vpop.eup %2936  ;;  %v1646_v39 = vsel %vm1290_vm6, %v2935_v35, 0.0  ;;  %v4018_v59 = vpop.permute.xlu1 %1702  ;;  %v1624_v21 = vmul.f32 %v3943_v25, %v1616_v20  ;;  %v1628_v25 = vmul.f32 %v3965_v47, %v1620_v28  ;;  %v1673_v47 = vld [vmem:[#allocation5 + $0x8] sm:$0xff]  ;;  %v1720_v27 = vmul.f32 %v1683_v56, %v1672_v45  ;;  %v1679_v20 = vld [vmem:[#allocation5 + $0x38] sm:$0xff] }
 0x5e8   : > { %1647 = vadd.xlane.f32.xlu1 %v1646_v39  ;;  %v1643_v41 = vsel %vm1290_vm6, %v2937_v38, 0.0  ;;  %v1730_v42 = vpack.c.bf16 %v2935_v35, %v2937_v38  ;;  %2942 = vpow2.f32 %v1547_v33  ;;  %v1721_v30 = vmul.f32 %v1688_v55, %v1673_v47 }
 0x5e9   : > { %1644 = vadd.xlane.f32.xlu0 %v1643_v41  ;;  %2944 = vpow2.f32 %v1549_v51  ;;  %v1722_v35 = vmul.f32 %v1693_v37, %v1674_v29  ;;  %v3330_v28 = vmov (!%p2610_p5), 0  }
 0x5ea   : > { %v2939_v43 = vpop.eup %2938  ;;  %2716 = vmatmul.mubr.msk.bf16.vlgmr.msra.gmra.mrb[16].mxu0 %vm1290_vm6, %v1730_v42  ;;  %v1698_v57 = vpop.permute.xlu0 %1697 }
 0x5eb   : > { %v2941_v44 = vpop.eup %2940  ;;  %v1652_v46 = vsel %vm1290_vm6, %v2939_v43, 0.0  ;;  %v1723_v42 = vmul.f32 %v1698_v57, %v1675_v34 }
 0x5ec   : > { %1653 = vadd.xlane.f32.xlu1 %v1652_v46  ;;  %v1649_v49 = vsel %vm1290_vm6, %v2941_v44, 0.0  ;;  %v1731_v50 = vpack.c.bf16 %v2939_v43, %v2941_v44  ;;  %v1676_v43 = vld [vmem:[#allocation5 + $0x20] sm:$0xff] }
 0x5ed   : > { %1650 = vadd.xlane.f32.xlu0 %v1649_v49 }
 0x5ee   : > { %2722 = vmatmul.mubr.msk.bf16.vlgmr.msra.gmra.mrb[16].mxu1 %vm1290_vm6, %v1731_v50  ;;  %v4020_v48 = vpop.permute.xlu0 %1707  ;;  %v1677_v50 = vld [vmem:[#allocation5 + $0x28] sm:$0xff] }
 0x5ef   : > { %v1725_v37 = vmul.f32 %v4020_v48, %v1677_v50 }
 0x5f2   : > { %v2943_v52 = vpop.eup %2942 }
 0x5f3   : > { %v2945_v53 = vpop.eup %2944  ;;  %v1629_v18 = vmul.f32 %v2943_v52, %v1621_v14 }
 0x5f4   : > { %v1630_v36 = vmul.f32 %v2945_v53, %v1622_v40 }
 0x5fd   : > { %1712 = vperm.xlu1 %2909, %v2943_v52   ;;  %v1724_v52 = vmul.f32 %v4018_v59, %v1676_v43 }
 0x601   : > { %2947 = vset.pattern.permute.xlu1 (!%p2610_p5), %v3330_v28 }
 0x603   : > { %1717 = vperm.xlu0 %2908, %v2945_v53   ;;  %v1678_v53 = vld [vmem:[#allocation5 + $0x30] sm:$0xff] }
 0x607   : > { %2946 = vset.pattern.permute.xlu0 (!%p2610_p5), %v3330_v28 }
 0x66b   : > { %v1633_v61 = vpop.xlane.xlu1 %1632 }
 0x66c   : > { %v1655_v19 = vadd.f32 %v1633_v61, %v1623_v60 }
 0x66d   : > { %v1636_v62 = vpop.xlane.xlu0 %1635 }
 0x66e   : > { %1664 = vst.msk [vmem:[#allocation4] sm:$0xff] %vm1663_vm8, %v1655_v19  ;;  %v1656_v0 = vadd.f32 %v1636_v62, %v1624_v21 }
 0x66f   : > { %v1642_v2 = vpop.xlane.xlu1 %1641 }
 0x670   : > { %1665 = vst.msk [vmem:[#allocation4 + $0x8] sm:$0xff] %vm1663_vm8, %v1656_v0  ;;  %v1658_v3 = vadd.f32 %v1642_v2, %v1626_v1 }
 0x671   : > { %v1639_v5 = vpop.xlane.xlu0 %1638 }
 0x672   : > { %1667 = vst.msk [vmem:[#allocation4 + $0x18] sm:$0xff] %vm1663_vm8, %v1658_v3  ;;  %v1657_v6 = vadd.f32 %v1639_v5, %v1625_v4 }
 0x674   : > { %1666 = vst.msk [vmem:[#allocation4 + $0x10] sm:$0xff] %vm1663_vm8, %v1657_v6 }
 0x675   : > { %v1648_v13 = vpop.xlane.xlu1 %1647  ;;  %v1957_v4 = vld [vmem:[#allocation4] sm:$0xff] (!%p2610_p5) }
 0x676   : > { %v1645_v11 = vpop.xlane.xlu0 %1644  ;;  %v1660_v12 = vadd.f32 %v1648_v13, %v1628_v25 }
 0x677   : > { %v1659_v15 = vadd.f32 %v1645_v11, %v1627_v10  ;;  %v1958_v6 = vld [vmem:[#allocation4 + $0x8] sm:$0xff] (!%p2610_p5) }
 0x678   : > { %1669 = vst.msk [vmem:[#allocation4 + $0x28] sm:$0xff] %vm1663_vm8, %v1660_v12 }
 0x679   : > { %1668 = vst.msk [vmem:[#allocation4 + $0x20] sm:$0xff] %vm1663_vm8, %v1659_v15  ;;  %v1654_v16 = vpop.xlane.xlu1 %1653  ;;  %v1960_v5 = vld [vmem:[#allocation4 + $0x18] sm:$0xff] (!%p2610_p5) }
 0x67a   : > { %v1651_v17 = vpop.xlane.xlu0 %1650  ;;  %v1662_v22 = vadd.f32 %v1654_v16, %v1630_v36 }
 0x67b   : > { %v1661_v26 = vadd.f32 %v1651_v17, %v1629_v18  ;;  %v1959_v3 = vld [vmem:[#allocation4 + $0x10] sm:$0xff] (!%p2610_p5) }
 0x67c   : > { %1671 = vst.msk [vmem:[#allocation4 + $0x38] sm:$0xff] %vm1663_vm8, %v1662_v22  ;;  %2965 = vrcp.f32 (!%p2610_p5), %v1959_v3 }
 0x67d   : > { %1670 = vst.msk [vmem:[#allocation4 + $0x30] sm:$0xff] %vm1663_vm8, %v1661_v26  ;;  %v1713_v55 = vpop.permute.xlu1 %1712  ;;  %2967 = vrcp.f32 (!%p2610_p5), %v1957_v4 }
 0x67e   : > { %v1726_v8 = vmul.f32 %v1713_v55, %v1678_v53  ;;  %2969 = vrcp.f32 (!%p2610_p5), %v1960_v5 }
 0x67f   : > { %2971 = vrcp.f32 (!%p2610_p5), %v1958_v6  ;;  %v1962_v9 = vld [vmem:[#allocation4 + $0x28] sm:$0xff] (!%p2610_p5) }
 0x680   : > { %v1961_v25 = vld [vmem:[#allocation4 + $0x20] sm:$0xff] (!%p2610_p5)  ;;  %2973 = vrcp.f32 (!%p2610_p5), %v1962_v9 }
 0x681   : > { %2975 = vrcp.f32 (!%p2610_p5), %v1961_v25 }
 0x682   : > { %v1718_v60 = vpop.permute.xlu0 %1717 }
 0x683   : > { %v1727_v63 = vmul.f32 %v1718_v60, %v1679_v20  ;;  %v1964_v10 = vld [vmem:[#allocation4 + $0x38] sm:$0xff] (!%p2610_p5) }
 0x684   : > { %v1963_v13 = vld [vmem:[#allocation4 + $0x30] sm:$0xff] (!%p2610_p5)  ;;  %2977 = vrcp.f32 (!%p2610_p5), %v1964_v10 }
 0x685   : > { %2979 = vrcp.f32 (!%p2610_p5), %v1963_v13 }
 0x686   : > { %v2966_v40 = vpop.eup (!%p2610_p5), %2965 }
 0x687   : > { %v2968_v11 = vpop.eup (!%p2610_p5), %2967  ;;  %1985 = vperm.xlu1 (!%p2610_p5), %2947, %v2966_v40  }
 0x688   : > { %v2970_v12 = vpop.eup (!%p2610_p5), %2969  ;;  %1975 = vperm.xlu0 (!%p2610_p5), %2946, %v2968_v11  }
 0x689   : > { %v2972_v14 = vpop.eup (!%p2610_p5), %2971 }
 0x68a   : > { %v2974_v15 = vpop.eup (!%p2610_p5), %2973 }
 0x68b   : > { %1990 = vperm.xlu1 (!%p2610_p5), %2947, %v2970_v12   ;;  %v2976_v36 = vpop.eup (!%p2610_p5), %2975 }
 0x68c   : > { %1980 = vperm.xlu0 (!%p2610_p5), %2946, %v2972_v14  }
 0x68e   : > { %v2978_v18 = vpop.eup (!%p2610_p5), %2977 }
 0x68f   : > { %2000 = vperm.xlu1 (!%p2610_p5), %2947, %v2974_v15   ;;  %v2980_v16 = vpop.eup (!%p2610_p5), %2979 }
 0x690   : > { %1995 = vperm.xlu0 (!%p2610_p5), %2946, %v2976_v36  }
 0x693   : > { %2010 = vperm.xlu1 (!%p2610_p5), %2947, %v2978_v18  }
 0x694   : > { %2005 = vperm.xlu0 (!%p2610_p5), %2946, %v2980_v16  }
 0x6b4   : > { %v1773_v23 = vpop.f32.mrb[12].mxu0 }
 0x6b5   : > { %v1921_v24 = vadd.f32 %v1773_v23, %v1720_v27  ;;  %v2705_v31 = vpop.f32.mrb[13].mxu0 }
 0x6b6   : > { %v1776_v32 = vpop.f32.mrb[14].mxu0 }
 0x6b7   : > { %1929 = vst.msk [vmem:[#allocation5] sm:$0xff] %vm1290_vm6, %v1921_v24  ;;  %v1922_v38 = vadd.f32 %v1776_v32, %v1721_v30  ;;  %v2706_v39 = vpop.f32.mrb[15].mxu0 }
 0x6b8   : > { %v1820_v41 = vpop.f32.mrb[12].mxu1 }
 0x6b9   : > { %1930 = vst.msk [vmem:[#allocation5 + $0x8] sm:$0xff] %vm1290_vm6, %v1922_v38  ;;  %v1923_v44 = vadd.f32 %v1820_v41, %v1722_v35  ;;  %v2711_v46 = vpop.f32.mrb[13].mxu1 }
 0x6ba   : > { %v1823_v49 = vpop.f32.mrb[14].mxu1 }
 0x6bb   : > { %1931 = vst.msk [vmem:[#allocation5 + $0x10] sm:$0xff] %vm1290_vm6, %v1923_v44  ;;  %v1924_v33 = vadd.f32 %v1823_v49, %v1723_v42  ;;  %v2712_v51 = vpop.f32.mrb[15].mxu1 }
 0x6bd   : > { %1932 = vst.msk [vmem:[#allocation5 + $0x18] sm:$0xff] %vm1290_vm6, %v1924_v33  ;;  %v1867_v56 = vpop.f32.mrb[16].mxu0 }
 0x6be   : > { %v1925_v57 = vadd.f32 %v1867_v56, %v1724_v52  ;;  %v2717_v7 = vpop.f32.mrb[17].mxu0  ;;  %v1949_v30 = vld [vmem:[#allocation5] sm:$0xff] (!%p2610_p5) }
 0x6bf   : > { %v1870_v61 = vpop.f32.mrb[18].mxu0 }
 0x6c0   : > { %1933 = vst.msk [vmem:[#allocation5 + $0x20] sm:$0xff] %vm1290_vm6, %v1925_v57  ;;  %v1926_v19 = vadd.f32 %v1870_v61, %v1725_v37  ;;  %v2718_v21 = vpop.f32.mrb[19].mxu0  ;;  %1948 = sbr.rel (%p2610_p5) target bundleno = 2173 (0x87d), region = 80  ;;  %v1950_v29 = vld [vmem:[#allocation5 + $0x8] sm:$0xff] (!%p2610_p5) }
 0x6c1   : > { %v1914_v62 = vpop.f32.mrb[16].mxu1 }
 0x6c2   : > { %1934 = vst.msk [vmem:[#allocation5 + $0x28] sm:$0xff] %vm1290_vm6, %v1926_v19  ;;  %v1927_v59 = vadd.f32 %v1914_v62, %v1726_v8  ;;  %v2723_v0 = vpop.f32.mrb[17].mxu1  ;;  %v1951_v38 = vld [vmem:[#allocation5 + $0x10] sm:$0xff] (!%p2610_p5) }
 0x6c3   : > { %v1917_v1 = vpop.f32.mrb[18].mxu1 }
 0x6c4   : > { %1935 = vst.msk [vmem:[#allocation5 + $0x30] sm:$0xff] %vm1290_vm6, %v1927_v59  ;;  %v1928_v48 = vadd.f32 %v1917_v1, %v1727_v63  ;;  %v2724_v2 = vpop.f32.mrb[19].mxu1  ;;  %v1952_v34 = vld [vmem:[#allocation5 + $0x18] sm:$0xff] (!%p2610_p5) }
 0x6c6   : > { %1936 = vst.msk [vmem:[#allocation5 + $0x38] sm:$0xff] %vm1290_vm6, %v1928_v48 }
 0x6c7   : > { %v1953_v27 = vld [vmem:[#allocation5 + $0x20] sm:$0xff] }
 0x6c9   : > { %v1954_v47 = vld [vmem:[#allocation5 + $0x28] sm:$0xff] }
 0x6cb   : > { %v1955_v41 = vld [vmem:[#allocation5 + $0x30] sm:$0xff] }
 0x6cd   : > { %v1956_v35 = vld [vmem:[#allocation5 + $0x38] sm:$0xff] }
 0x706   : > { %v1986_v17 = vpop.permute.xlu1 %1985 }
 0x707   : > { %v1976_v22 = vpop.permute.xlu0 %1975  ;;  %v2015_v51 = vmul.f32 %v1986_v17, %v1951_v38 }
 0x708   : > { %v2013_v42 = vmul.f32 %v1976_v22, %v1949_v30 }
 0x70a   : > { %v1991_v26 = vpop.permute.xlu1 %1990 }
 0x70b   : > { %v1981_v45 = vpop.permute.xlu0 %1980  ;;  %v2016_v44 = vmul.f32 %v1991_v26, %v1952_v34 }
 0x70c   : > { %v2014_v39 = vmul.f32 %v1981_v45, %v1950_v29 }
 0x70e   : > { %v2001_v23 = vpop.permute.xlu1 %2000 }
 0x70f   : > { %v2018_v24 = vmul.f32 %v2001_v23, %v1954_v47  ;;  %v1996_v31 = vpop.permute.xlu0 %1995 }
 0x710   : > { %v2017_v32 = vmul.f32 %v1996_v31, %v1953_v27 }
 0x711   : > { %v2089_v46 = vcombine.low %v2014_v39, %v2018_v24  ;;  %v2090_v49 = vcombine.high %v2014_v39, %v2018_v24 }
 0x712   : > { %v2011_v43 = vpop.permute.xlu1 %2010  ;;  %v2021_v52 = vcombine.low %v2013_v42, %v2017_v32  ;;  %v2022_v53 = vcombine.high %v2013_v42, %v2017_v32 }
 0x713   : > { %v2020_v50 = vmul.f32 %v2011_v43, %v1956_v35  ;;  %v2006_v33 = vpop.permute.xlu0 %2005  ;;  %v2097_v20 = vrot.slane %v2089_v46, %v3830_v54  ;;  %v2104_v60 = vrot.slane %v2090_v49, %v3830_v54 }
 0x714   : > { %v2019_v55 = vmul.f32 %v2006_v33, %v1955_v41  ;;  %v2029_v19 = vrot.slane %v2021_v52, %v3830_v54  ;;  %v2036_v21 = vrot.slane %v2022_v53, %v3830_v54 }
 0x715   : > { %v2105_v56 = vcombine.low %v2016_v44, %v2020_v50  ;;  %v2106_v37 = vcombine.high %v2016_v44, %v2020_v50 }
 0x716   : > { %v2037_v57 = vcombine.low %v2015_v51, %v2019_v55  ;;  %v2038_v7 = vcombine.high %v2015_v51, %v2019_v55 }
 0x717   : > { %v2113_v61 = vrot.slane %v2105_v56, %v3830_v54  ;;  %v2120_v8 = vrot.slane %v2106_v37, %v3830_v54  ;;  %v2963_v56 = vld [vmem:[#allocation17] sm:$0xff]  }
 0x718   : > { %v2045_v62 = vrot.slane %v2037_v57, %v3830_v54  ;;  %v2052_v63 = vrot.slane %v2038_v7, %v3830_v54 }
 0x719   : > { %v2121_v59 = vcombine.low %v2097_v20, %v2113_v61  ;;  %v2122_v0 = vcombine.high %v2097_v20, %v2113_v61  ;;  %v2137_v1 = vcombine.low %v2104_v60, %v2120_v8  ;;  %v2138_v48 = vcombine.high %v2104_v60, %v2120_v8 }
 0x71a   : > { %v2053_v2 = vcombine.low %v2029_v19, %v2045_v62  ;;  %v2054_v3 = vcombine.high %v2029_v19, %v2045_v62  ;;  %v2069_v4 = vcombine.low %v2036_v21, %v2052_v63  ;;  %v2070_v5 = vcombine.high %v2036_v21, %v2052_v63  ;;  %v2964_v21 = vld [vmem:[#allocation17 + $0x8] sm:$0xff]  }
 0x71b   : > { %v2129_v28 = vrot.slane %v2121_v59, %v3833_v58  ;;  %v2136_v6 = vrot.slane %v2122_v0, %v3833_v58  ;;  %v2145_v9 = vrot.slane %v2137_v1, %v3833_v58  ;;  %v2152_v25 = vrot.slane %v2138_v48, %v3833_v58 }
 0x71c   : > { %v2061_v10 = vrot.slane %v2053_v2, %v3833_v58  ;;  %v2068_v13 = vrot.slane %v2054_v3, %v3833_v58  ;;  %v2077_v40 = vrot.slane %v2069_v4, %v3833_v58  ;;  %v2084_v11 = vrot.slane %v2070_v5, %v3833_v58 }
 0x71d   : > { %v2225_v12 = vcombine.low %v2129_v28, %v2136_v6  ;;  %v2613_v14 = vcombine.high %v2129_v28, %v2136_v6  ;;  %v2241_v15 = vcombine.low %v2145_v9, %v2152_v25  ;;  %v2614_v36 = vcombine.high %v2145_v9, %v2152_v25 }
 0x71e   : > { %v2157_v18 = vcombine.low %v2061_v10, %v2068_v13  ;;  %v2611_v16 = vcombine.high %v2061_v10, %v2068_v13  ;;  %v2173_v17 = vcombine.low %v2077_v40, %v2084_v11  ;;  %v2612_v22 = vcombine.high %v2077_v40, %v2084_v11 }
 0x71f   : > { %v2232_v26 = vrot.slane %v2225_v12, %v3830_v54  ;;  %v2240_v45 = vrot.slane %v2613_v14, %v3830_v54  ;;  %v2248_v47 = vrot.slane %v2241_v15, %v3830_v54  ;;  %v2256_v27 = vrot.slane %v2614_v36, %v3830_v54 }
 0x720   : > { %v2164_v29 = vrot.slane %v2157_v18, %v3830_v54  ;;  %v2172_v23 = vrot.slane %v2611_v16, %v3830_v54  ;;  %v2180_v30 = vrot.slane %v2173_v17, %v3830_v54  ;;  %v2188_v24 = vrot.slane %v2612_v22, %v3830_v54 }
 0x721   : > { %v2258_v31 = vcombine.high %v2232_v26, %v2240_v45  ;;  %v2274_v34 = vcombine.high %v2248_v47, %v2256_v27  ;;  %v2257_v32 = vcombine.low %v2232_v26, %v2240_v45  ;;  %v2273_v35 = vcombine.low %v2248_v47, %v2256_v27 }
 0x722   : > { %v2190_v38 = vcombine.high %v2164_v29, %v2172_v23  ;;  %v2206_v39 = vcombine.high %v2180_v30, %v2188_v24  ;;  %v2189_v41 = vcombine.low %v2164_v29, %v2172_v23  ;;  %v2205_v42 = vcombine.low %v2180_v30, %v2188_v24 }
 0x723   : > { %v2272_v43 = vrot.slane %v2258_v31, %v3833_v58  ;;  %v2288_v44 = vrot.slane %v2274_v34, %v3833_v58  ;;  %v2265_v46 = vrot.slane %v2257_v32, %v3833_v58  ;;  %v2281_v49 = vrot.slane %v2273_v35, %v3833_v58 }
 0x724   : > { %v2204_v50 = vrot.slane %v2190_v38, %v3833_v58  ;;  %v2220_v54 = vrot.slane %v2206_v39, %v3833_v58  ;;  %v2197_v33 = vrot.slane %v2189_v41, %v3833_v58  ;;  %v2213_v51 = vrot.slane %v2205_v42, %v3833_v58 }
 0x725   : > { %v2291_v52 = vcombine.low %v2272_v43, %v2288_v44  ;;  %v2290_v53 = vcombine.high %v2265_v46, %v2281_v49  ;;  %v2289_v55 = vcombine.low %v2265_v46, %v2281_v49  ;;  %v2292_v7 = vcombine.high %v2272_v43, %v2288_v44 }
 0x726   : > { %v2223_v37 = vcombine.low %v2204_v50, %v2220_v54  ;;  %v2222_v57 = vcombine.high %v2197_v33, %v2213_v51  ;;  %v2221_v20 = vcombine.low %v2197_v33, %v2213_v51  ;;  %v2224_v8 = vcombine.high %v2204_v50, %v2220_v54 }
 0x727   : > { %v3331_v19 = vmov 0.0  }
 0x728   : > { %v2953_v60 = vpack.i.bf16 %v2291_v52, %v2223_v37  ;;  %v2948_v61 = vpack.i.bf16 %v2290_v53, %v2222_v57  ;;  %2725 = vmatprep.subr.bf16.mxu0 %v3331_v19  ;;  %2729 = vmatprep.mubr.msk.bf16.mxu0 %vm3332_vm10, %v3331_v19  ;;  %v2958_v58 = vpack.i.bf16 %v2292_v7, %v2224_v8 }
 0x729   : > { %2726 = vmatpush3.bf16.msra.mxu0 %v2963_v56 }
 0x72a   : > { %2954 = vrot.lane.b32.xlu1 %v2953_v60, %s3333_s11  ;;  %2949 = vrot.lane.b32.xlu0 %v2948_v61, %s3334_s22 }
 0x72b   : > { %2727 = vmatprep.subr.bf16.mxu0 %v3331_v19 }
 0x72d   : > { %2728 = vmatpush3.bf16.msra.mxu0 %v2964_v21 }
 0x72e   : > { %2959 = vrot.lane.b32.xlu0 %v2958_v58, %s3335_s13 }
 0x79c   : > { %v2955_v62 = vpop.permute.xlu1 %2954  ;;  %v2950_v63 = vpop.permute.xlu0 %2949 }
 0x79d   : > { %v2952_v59 = vunpack.i.h.bf16 %v2950_v63  ;;  %v2951_v0 = vunpack.i.l.bf16 %v2950_v63  ;;  %v2957_v1 = vunpack.i.h.bf16 %v2955_v62  ;;  %v2956_v48 = vunpack.i.l.bf16 %v2955_v62 }
 0x79f   : > { %v2318_v2 = vsel %vm1290_vm6, %v2289_v55, %v2952_v59  ;;  %v2317_v3 = vsel %vm1290_vm6, %v2221_v20, %v2951_v0 }
 0x7a0   : > { %v2960_v4 = vpop.permute.xlu0 %2959  ;;  %v2321_v6 = vsel %vm2319_vm11, %v2318_v2, %v2957_v1  ;;  %v2320_v9 = vsel %vm2319_vm11, %v2317_v3, %v2956_v48 }
 0x7a1   : > { %v2962_v5 = vunpack.i.h.bf16 %v2960_v4  ;;  %v2961_v28 = vunpack.i.l.bf16 %v2960_v4 }
 0x7a3   : > { %v2323_v25 = vsel %vm2322_vm12, %v2320_v9, %v2961_v28  ;;  %v2324_v10 = vsel %vm2322_vm12, %v2321_v6, %v2962_v5 }
 0x7a4   : > { %v2325_v13 = vpack.c.bf16 %v2324_v10, %v2323_v25 }
 0x7a6   : > { %2730 = vmatmul.mubr.msk.bf16.vlgmr.msra.gmra.mrb[0].mxu0 %vm836_vm5, %v2325_v13 }
 0x879   : > { %v2379_v40 = vpop.f32.mrb[0].mxu0 }
 0x87a   : > { %2386 = vst.msk [vmem:[%s3766_s12] sm:$0xff] %vm836_vm5, %v2379_v40  ;;  %v2731_v11 = vpop.f32.mrb[1].mxu0 }
 0x87b   : > { %v2382_v12 = vpop.f32.mrb[2].mxu0 }
 0x87c   : > { %2387 = vst.msk [vmem:[%s3766_s12 + $0x8] sm:$0xff] %vm836_vm5, %v2382_v12  ;;  %v2732_v14 = vpop.f32.mrb[3].mxu0 }
 0x87d PF: > { %s4249_s14 = sld [smem:[#allocation30_spill]]  ;;  %s4250_s10 = sld [smem:[#allocation36_spill]] }
 0x87e   : > { %s4251_s20 = sld [smem:[#allocation43_spill]]  ;;  %s2402_s24 = sshll.u32 %s3766_s12, 4  ;;  %s4093_s24 = int_to_ptr.vmem [resolvable:$true] %s2402_s24 }
 0x87f   : > { %s2389_s28 = scalar_lea.sflag [#allocation10], %s3737_s4  ;;  %s3165_s15 = scalar_lea.vmem %s4093_s24, 256 }
 0x880   : > { %p3166_p8 = scmp.ne.s32.totalorder %s4093_s24, %s3165_s15  ;;  %s3336_s21 = smov [#allocation19]  }
 0x881   : > { %s3169_s18 = sshll.u32 %s3336_s21, 4  ;;  %s3170_s18 = int_to_ptr.vmem [resolvable:$false] %s3169_s18 }
 0x882   : > { %s3171_s30 = scalar_lea.vmem %s3170_s18, 512  ;;  %p3172_p10 = scmp.lt.s32.totalorder %s4093_s24, %s3170_s18 }
 0x883   : > { %s2624_s27 = sshll.u32 %s4249_s14, 8  ;;  %p4253_p6 = scmp.ne.s32.totalorder %s4250_s10, 0 }
 0x884   : > { %s4252_s2 = smov %s4251_s20  ;;  %s4090_s17 = scalar_lea.hbm %s4251_s20, %s2624_s27 }
 0x885   : > { %p3167_p7 = pnand %p3166_p8, %p4253_p6  ;;  %p3173_p0 = scmp.lt.s32.totalorder %s3171_s30, %s3165_s15 }
 0x887   : > { %p3168_p2 = pneg %p3167_p7  ;;  %p3174_p12 = por %p3173_p0, %p3172_p10 }
 0x889   : > { %p3175_p13 = pnand %p3174_p12, %p3168_p2 }
 0x88b   : > { %3178 = shalt.err (!%p3175_p13)
}
 0x88c   : > { %s3179_s12 = scalar_lea.hbm %s4090_s17, 256  ;;  %s3183_s16 = scalar_lea.hbm %s4252_s2, 512 }
 0x88d   : > { %p3180_p4 = scmp.ne.s32.totalorder %s4090_s17, %s3179_s12  ;;  %p3184_p11 = scmp.lt.u32.totalorder %s4090_s17, %s4252_s2 }
 0x88e   : > { %p3185_p9 = scmp.lt.u32.totalorder %s3183_s16, %s3179_s12  ;;  %p3187_p8 = scmp.lt.u32.totalorder %s3179_s12, %s4090_s17 }
 0x88f   : > { %p3181_p1 = pnand %p3180_p4, %p4253_p6 }
 0x890   : > { %p3186_p5 = por %p3185_p9, %p3184_p11 }
 0x891   : > { %p3182_p3 = pneg %p3181_p1 }
 0x892   : > { %p3188_p7 = por %p3187_p8, %p3186_p5 }
 0x894   : > { %p3189_p2 = pnand %p3188_p7, %p3182_p3 }
 0x896   : > { %3192 = shalt.err (!%p3189_p2)
}
 0x897   : > { %s3337_s22 = smov 128   ;;  %s3338_s13 = smov 8  }
 0x898   : > { %2751 = dma.vmem_to_hbm [thread:$0]  (%p4253_p6), %s4093_s24, 256, %s4090_s17, %s2389_s28, %s3337_s22, %s3337_s22, %s3338_s13  }
 0x899 PF: > { %s4254_s14 = sld [smem:[#allocation32_spill]]  ;;  %s4255_s27 = sld [smem:[#allocation28_spill]] }
 0x89a   : > { %s4256_s9 = sld [smem:[#allocation33_spill]] }
 0x89f   : > { %p2784_p10 = scmp.ge.s32.totalorder %s4254_s14, 2  ;;  %s2417_s25 = sand.u32 1, %s4255_s27  }
 0x8a0   : > { %p4257_p0 = scmp.ne.s32.totalorder %s4256_s9, 0  ;;  %s2418_s20 = scalar_lea.sflag [#allocation10], %s2417_s25 }
 0x8a2   : > { %p2774_p12 = pnand %p2784_p10, %p4257_p0 }
 0x8a4   : > { %3256 = dma.done.wait (!%p2774_p12), %s2418_s20, 256  }
 0x8a5   : > { %3258 = vsyncadd (!%p2774_p12), %s2418_s20, 4294967040  ;;  %s33_s24 = sadd.s32 1, %s4254_s14   ;;  %s4258_s15 = sld [smem:[#allocation26_spill]] }
 0x8a6   : > { %p30_p13 = scmp.ge.s32.totalorder %s33_s24, 6   ;;  %s4259_s16 = sld [smem:[#allocation27_spill]] }
 0x8a7   : > { %s4260_s17 = sld [smem:[#allocation39_spill]]  ;;  %s4261_s4 = sld [smem:[#allocation38_spill]] }
 0x8a8   : > { %s4262_s20 = sld [smem:[#allocation31_spill]]  ;;  %s4263_s22 = sld [smem:[#allocation34_spill]] }
 0x8a9   : > { %s4264_s10 = sld [smem:[#allocation35_spill]]  ;;  %s4265_s18 = smov %s3277_s0 }
 0x8aa   : > { %s4266_s0 = smov %s3281_s19  ;;  %s4268_s21 = smov %s3297_s23 }
 0x8ab   :  { %32 = sbr.rel (!%p30_p13) target bundleno = 26 (0x1a), region = 137 }
 0x8ad   : > { %s4267_s19 = smov %s4261_s4 }
 0x8af   : > { %s4269_s23 = smov %s4264_s10 }
 0x8b2   :  { %2423 = vsyncpa [#allocation9], 1 }
 0x8b3   :  { %2425 = vsyncpa [#allocation9 + $0x1], 1 }
 0x8b4   :  { %2426 = vsyncpa [#allocation12], 1 }
 0x8b5   :  { %2428 = vsyncpa [#allocation12 + $0x1], 1 }
 0x8b6   :  { %2429 = vsyncpa [#allocation15], 1 }
 0x8b7   :  { %2430 = vsyncpa [#allocation18], 1 }
 0x8b8   :  { %2431 = vsyncpa [#allocation10], 1 }
 0x8b9   :  { %2433 = vsyncpa [#allocation10 + $0x1], 1 }

// kernel: tpu_custom_call.1
= control target key start
LH: loop header
LB: loop body
LE: loop exit
PB: predicated region body
PF: predicated region fallthrough
CT: control target
= control target key end

     0   :  { %s4156_s0 = inlined_call_operand.hbm [shape: s32[2], index: 0, kind: input, shape index: {}]   ;;  %s4157_s1 = inlined_call_operand.hbm [shape: bf16[2,16,32], index: 1, kind: input, shape index: {}]   ;;  %s4158_s2 = inlined_call_operand.hbm [shape: bf16[2,16,32], index: 2, kind: input, shape index: {}]   ;;  %s4159_s3 = inlined_call_operand.hbm [shape: bf16[2,16,32], index: 3, kind: input, shape index: {}]   ;;  %s4160_s4 = inlined_call_operand.hbm [shape: bf16[32,32], index: 4, kind: input, shape index: {}]   ;;  %s4161_s5 = inlined_call_operand.vmem [shape: bf16[32,32], index: 5, kind: input, shape index: {}]   ;;  %s4162_s6 = inlined_call_operand.hbm [shape: bf16[32,32], index: 6, kind: input, shape index: {}]   ;;  %s4163_s7 = inlined_call_operand.hbm [shape: bf16[32,32], index: 7, kind: input, shape index: {}]   ;;  %s4164_s8 = inlined_call_operand.hbm [shape: f32[2,16,32], index: 8, kind: output, shape index: {}]  }
   0x1   :  { %4196 = sst [smem:[#allocation40_spill]] %s4158_s2  ;;  %s2981_s29 = scalar_lea.hbm %s4156_s0, 16 }
   0x2   :  { %4197 = sst [smem:[#allocation41_spill]] %s4160_s4  ;;  %p2982_p0 = scmp.ne.s32.totalorder %s4156_s0, %s2981_s29 }
   0x3   :  { %4198 = sst [smem:[#allocation42_spill]] %s4161_s5  ;;  %p2985_p1 = scmp.lt.u32.totalorder %s2981_s29, %s4156_s0 }
   0x4   :  { %4199 = sst [smem:[#allocation43_spill]] %s4164_s8 }
   0x5   :  { %p2987_p2 = pnand %p2985_p1, %p2982_p0 }
   0x7   :  { %2990 = shalt.err (!%p2987_p2)  }
   0x8   :  { %s3303_s12 = smov [#allocation7]  }
   0x9   :  { %14 = dma.hbm_to_smem %s4156_s0, 16, %s3303_s12, [#allocation6] }
   0xa   :  { %3237 = dma.done.wait [#allocation6], 16 }
   0xb   :  { %3238 = vsyncadd [#allocation6], 4294967280 }
   0xc   :  { %16 = sfence }
   0xd   :  { %17 = vsyncpa [#allocation9], 0 }
   0xe   :  { %19 = vsyncpa [#allocation9 + $0x1], 0 }
   0xf   :  { %20 = vsyncpa [#allocation12], 0 }
  0x10   :  { %22 = vsyncpa [#allocation12 + $0x1], 0 }
  0x11   :  { %23 = vsyncpa [#allocation15], 0 }
  0x12   :  { %24 = vsyncpa [#allocation18], 0 }
  0x13   :  { %25 = vsyncpa [#allocation10], 0 }
  0x14   :  { %27 = vsyncpa [#allocation10 + $0x1], 0  ;;  %s3396_s15 = smov 0   ;;  %s3398_s16 = smov 0  }
  0x15   :  { %s3400_s17 = smov 0   ;;  %s3402_s18 = smov 0  }
  0x16   :  { %s3404_s0 = smov 0   ;;  %s3406_s19 = smov 0  }
  0x17   :  { %s3408_s20 = smov 0   ;;  %s3410_s21 = smov 0  }
  0x18   :  { %s3412_s22 = smov 0   ;;  %s3414_s23 = smov 0  }
  0x19   :  { %s3416_s24 = smov 0  }
  0x1a LB: > { %4200 = sst [smem:[#allocation26_spill]] %s3265_s16  ;;  %s3452_s25 = sadd.s32 4294967295, %s3301_s24   ;;  %s3301_s24 = sphi %s3416_s24, %s33_s24   ;;  %s3297_s23 = sphi %s3414_s23, %s4269_s23   ;;  %s3293_s22 = sphi %s3412_s22, %s4263_s22   ;;  %s3289_s21 = sphi %s3410_s21, %s4268_s21   ;;  %s3285_s20 = sphi %s3408_s20, %s4262_s20   ;;  %s3281_s19 = sphi %s3406_s19, %s4267_s19   ;;  %s3277_s0 = sphi %s3404_s0, %s4266_s0   ;;  %s3273_s18 = sphi %s3402_s18, %s4265_s18   ;;  %s3269_s17 = sphi %s3400_s17, %s4260_s17   ;;  %s3265_s16 = sphi %s3398_s16, %s4259_s16   ;;  %s3261_s15 = sphi %s3396_s15, %s4258_s15  }
  0x1b   : > { %4201 = sst [smem:[#allocation27_spill]] %s3269_s17  ;;  %s2563_s26 = sadd.s32 4294967294, %s3301_s24  }
  0x1c   : > { %4202 = sst [smem:[#allocation28_spill]] %s3273_s18  ;;  %p65_p3 = scmp.ne.s32.totalorder %s3277_s0, %s3273_s18 }
  0x1d   : > { %4203 = sst [smem:[#allocation29_spill]] %s3285_s20  ;;  %p4167_p4 = scmp.eq.s32.totalorder %s3452_s25, 0 }
  0x1e   : > { %4204 = sst [smem:[#allocation30_spill]] %s3289_s21  ;;  %p235_p6 = scmp.eq.s32.totalorder %s2563_s26, 3 }
  0x1f   : > { %4205 = sst [smem:[#allocation31_spill]] %s3293_s22  ;;  %p3461_p7 = por %p4167_p4, %p65_p3 }
  0x20   : > { %4206 = sst [smem:[#allocation32_spill]] %s3301_s24  ;;  %p2564_p8 = scmp.ge.s32.totalorder %s3301_s24, 1 }
  0x21   : > { %s4207_s27 = scalar_select %p3461_p7, 1, 0 }
  0x22   : > { %p3466_p9 = por %p235_p6, %p65_p3  ;;  %p242_p10 = scmp.lt.s32.totalorder %s3301_s24, 5 }
  0x23   : > { %s3304_s30 = smov [#allocation14]   ;;  %s4212_s4 = sld [smem:[#allocation41_spill]] }
  0x24   : > { %s4208_s28 = scalar_select %p3466_p9, 1, 0 }
  0x25   : > { %p3471_p11 = pnand %p2564_p8, %p242_p10  ;;  %s254_s9 = sshll.u32 %s3304_s30, 4  ;;  %s255_s9 = int_to_ptr.vmem [resolvable:$true] %s254_s9 }
  0x26   : > { %4209 = sst [smem:[#allocation33_spill]] %s4208_s28 }
  0x27   : > { %s4210_s29 = scalar_select %p3471_p11, 1, 0 }
  0x28   : > { %p2753_p12 = pneg %p3471_p11 }
  0x29   : > { %s2991_s13 = scalar_lea.hbm %s4212_s4, 256 }
  0x2a   : > { %p3479_p13 = pnand %p2753_p12, %p4167_p4  ;;  %p2992_p0 = scmp.ne.s32.totalorder %s4212_s4, %s2991_s13 }
  0x2b   : > { %p2998_p6 = scmp.lt.u32.totalorder %s2991_s13, %s4212_s4 }
  0x2c   : > { %s4211_s10 = scalar_select %p3479_p13, 1, 0 }
  0x2d   : > { %p3491_p1 = pneg %p3479_p13 }
  0x2f   : > { %p2994_p2 = pnand %p3491_p1, %p2992_p0 }
  0x31   : > { %p2995_p3 = pneg %p2994_p2 }
  0x33   : > { %p3000_p8 = pnand %p2998_p6, %p2995_p3 }
  0x35   : > { %3003 = shalt.err (!%p3000_p8)
}
  0x36   : > { %s3004_s11 = scalar_lea.vmem %s255_s9, 256  ;;  %p3012_p5 = scmp.lt.s32.totalorder %s255_s9, %s255_s9 }
  0x37   : > { %p3005_p10 = scmp.ne.s32.totalorder %s255_s9, %s3004_s11  ;;  %p3013_p9 = scmp.lt.s32.totalorder %s3004_s11, %s3004_s11 }
  0x39   : > { %p3007_p12 = pnand %p3005_p10, %p3491_p1  ;;  %p3014_p7 = por %p3013_p9, %p3012_p5 }
  0x3b   : > { %p3008_p4 = pneg %p3007_p12 }
  0x3d   : > { %p3015_p11 = pnand %p3014_p7, %p3008_p4 }
  0x3f   : > { %3018 = shalt.err (!%p3015_p11)
}
  0x40   : > { %s4170_s12 = smov 64   ;;  %s4172_s18 = smov 4  }
  0x41   : > { %2756 = dma.hbm_to_vmem [thread:$0]  (!%p3479_p13), %s4212_s4, 256, %s255_s9, [#allocation15], %s4170_s12, %s4170_s12, %s4172_s18  }
  0x42   : > { %s42_s14 = sadd.s32 1, %s3293_s22  ;;  %s45_s26 = sadd.s32 1, %s3297_s23 }
  0x43   : > { %p43_p4 = scmp.ge.s32.totalorder %s42_s14, 2  ;;  %s52_s11 = sadd.s32 1, %s3281_s19 }
  0x44   : > { %p59_p5 = scmp.ne.s32.totalorder %s3281_s19, %s3277_s0  ;;  %p60_p7 = scmp.eq.s32.totalorder %s3301_s24, 0 }
  0x45   : > { %s4271_s14 = smov (%p43_p4, %s42_s14), 0  ;;  %s4273_s26 = smov (!%p43_p4, %s45_s26), %s3297_s23 }
  0x46   : > { %4214 = sst [smem:[#allocation34_spill]] %s4271_s14  ;;  %s76_s9 = ssub.s32 %s3293_s22, %s4271_s14 }
  0x47   : > { %p47_p9 = scmp.ge.s32.totalorder %s4273_s26, 2  ;;  %s80_s28 = sadd.s32 1, %s3269_s17 }
  0x48   : > { %p3525_p11 = por %p60_p7, %p59_p5  ;;  %p87_p0 = scmp.ne.s32.totalorder %s3269_s17, %s3265_s16 }
  0x49   : > { %s4275_s26 = smov (%p47_p9, %s4273_s26), 0  ;;  %p93_p3 = scmp.ne.s32.totalorder %s3265_s16, %s3261_s15 }
  0x4a   : > { %4216 = sst [smem:[#allocation35_spill]] %s4275_s26  ;;  %p3533_p2 = por %p87_p0, %p60_p7 }
  0x4b   : > { %s49_s18 = ssub.s32 %s3297_s23, %s4275_s26  ;;  %p4218_p6 = scmp.eq.s32.totalorder %s3452_s25, 3 }
  0x4c   : > { %p50_p10 = scmp.eq.s32.totalorder %s49_s18, 0  ;;  %s77_s14 = sor.u32 %s76_s9, %s49_s18 }
  0x4d   : > { %p3546_p8 = por %p4218_p6, %p59_p5  ;;  %p78_p12 = scmp.eq.s32.totalorder %s77_s14, 0 }
  0x4e   : > { %p4221_p4 = scmp.eq.s32.totalorder %s3452_s25, 0  ;;  %p2780_p7 = scmp.lt.s32.totalorder %s3301_s24, 4 }
  0x4f   : > { %s4219_s4 = scalar_select %p3546_p8, 1, 0 }
  0x50   : > { %p3552_p9 = por %p93_p3, %p4221_p4  ;;  %s318_s15 = sand.u32 1, %s3301_s24  }
  0x51   : > { %4220 = sst [smem:[#allocation36_spill]] %s4219_s4  ;;  %s320_s26 = sand.u32 1, %s3269_s17  }
  0x52   : > { %s4222_s8 = scalar_select %p3552_p9, 1, 0 }
  0x53   : > { %s3557_s21 = scalar_select %p50_p10, %s3281_s19, %s52_s11  }
  0x54   : > { %4223 = sst [smem:[#allocation37_spill]] %s4222_s8  ;;  %p3567_p5 = pnand %p2780_p7, %p3525_p11 }
  0x55   : > { %4224 = sst [smem:[#allocation38_spill]] %s3557_s21  ;;  %s3571_s18 = sshll.u32 %s320_s26, 2 }
  0x56   : > { %s3560_s5 = scalar_select %p78_p12, %s3269_s17, %s80_s28  }
  0x57   : > { %s4226_s20 = scalar_select %p3567_p5, 1, 0 }
  0x58   : > { %4225 = sst [smem:[#allocation39_spill]] %s3560_s5  ;;  %s2573_s14 = sshll.u32 %s3297_s23, 1 }
  0x59   : > { %s327_s9 = sadd.s32 %s3293_s22, %s2573_s14  ;;  %s322_s16 = scalar_lea.vmem [#allocation11], %s3571_s18 }
  0x5a   : > { %s2574_s4 = sshll.u32 %s327_s9, 6  ;;  %s331_s8 = sshll.u32 %s322_s16, 4  ;;  %s3581_s8 = int_to_ptr.vmem [resolvable:$true] %s331_s8 }
  0x5b   : > { %s4227_s2 = sld [smem:[#allocation40_spill]]  ;;  %p3585_p11 = pnand %p2780_p7, %p3533_p2 }
  0x5c   : > { %s3592_s16 = scalar_lea.hbm %s4159_s3, %s2574_s4  ;;  %s3307_s21 = smov [#allocation16]  }
  0x5d   : > { %s4228_s26 = scalar_select %p3585_p11, 1, 0 }
  0x5e   : > { %s3594_s9 = sshll.u32 %s3307_s21, 4  ;;  %s3596_s11 = scalar_lea.sflag [#allocation12], %s318_s15  ;;  %s271_s9 = int_to_ptr.vmem [resolvable:$true] %s3594_s9 }
  0x5f   : > { %p4190_p3 = pneg %p3585_p11 }
  0x61   : > { %s3579_s28 = scalar_lea.hbm %s4227_s2, %s2574_s4  ;;  %s3024_s13 = scalar_lea.hbm %s4227_s2, 256 }
  0x62   : > { %s3019_s22 = scalar_lea.hbm %s3579_s28, 64  ;;  %p3025_p10 = scmp.lt.u32.totalorder %s3579_s28, %s4227_s2 }
  0x63   : > { %p3020_p0 = scmp.ne.s32.totalorder %s3579_s28, %s3019_s22  ;;  %p3026_p12 = scmp.lt.u32.totalorder %s3024_s13, %s3019_s22 }
  0x64   : > { %p3028_p7 = scmp.lt.u32.totalorder %s3019_s22, %s3579_s28 }
  0x65   : > { %p3022_p2 = pnand %p4190_p3, %p3020_p0  ;;  %p3027_p4 = por %p3026_p12, %p3025_p10 }
  0x67   : > { %p3023_p6 = pneg %p3022_p2  ;;  %p3029_p8 = por %p3028_p7, %p3027_p4 }
  0x69   : > { %p3030_p9 = pnand %p3029_p8, %p3023_p6 }
  0x6b   : > { %3033 = shalt.err (!%p3030_p9)
}
  0x6c   : > { %s3034_s15 = scalar_lea.vmem %s3581_s8, 64  ;;  %s3308_s5 = smov [#allocation11]  }
  0x6d   : > { %p3035_p0 = scmp.ne.s32.totalorder %s3581_s8, %s3034_s15  ;;  %s3039_s21 = sshll.u32 %s3308_s5, 4  ;;  %s3040_s21 = int_to_ptr.vmem [resolvable:$false] %s3039_s21 }
  0x6e   : > { %s3041_s12 = scalar_lea.vmem %s3040_s21, 128  ;;  %p3042_p13 = scmp.lt.s32.totalorder %s3581_s8, %s3040_s21 }
  0x6f   : > { %p3037_p2 = pnand %p3035_p0, %p4190_p3  ;;  %p3043_p10 = scmp.lt.s32.totalorder %s3041_s12, %s3034_s15 }
  0x71   : > { %p3038_p5 = pneg %p3037_p2  ;;  %p3044_p12 = por %p3043_p10, %p3042_p13 }
  0x73   : > { %p3045_p4 = pnand %p3044_p12, %p3038_p5 }
  0x75   : > { %3048 = shalt.err (!%p3045_p4)
}
  0x76   : > { %2769 = dma.hbm_to_vmem [thread:$0]  (!%p3585_p11), %s3579_s28, 64, %s3581_s8, %s3596_s11  }
  0x77   : > { %s3049_s14 = scalar_lea.hbm %s4162_s6, 256 }
  0x78   : > { %p3050_p8 = scmp.ne.s32.totalorder %s4162_s6, %s3049_s14  ;;  %p3056_p5 = scmp.lt.u32.totalorder %s3049_s14, %s4162_s6 }
  0x7a   : > { %p3052_p13 = pnand %p3050_p8, %p3491_p1 }
  0x7c   : > { %p3053_p9 = pneg %p3052_p13 }
  0x7e   : > { %p3058_p6 = pnand %p3056_p5, %p3053_p9 }
  0x80   : > { %3061 = shalt.err (!%p3058_p6)
}
  0x81   : > { %s3062_s12 = scalar_lea.vmem %s271_s9, 256  ;;  %p3070_p10 = scmp.lt.s32.totalorder %s271_s9, %s271_s9 }
  0x82   : > { %p3063_p7 = scmp.ne.s32.totalorder %s271_s9, %s3062_s12  ;;  %p3071_p12 = scmp.lt.s32.totalorder %s3062_s12, %s3062_s12 }
  0x84   : > { %p3065_p0 = pnand %p3063_p7, %p3491_p1  ;;  %p3072_p4 = por %p3071_p12, %p3070_p10 }
  0x86   : > { %p3066_p2 = pneg %p3065_p0 }
  0x88   : > { %p3073_p3 = pnand %p3072_p4, %p3066_p2 }
  0x8a   : > { %3076 = shalt.err (!%p3073_p3)
}
  0x8b   : > { %p4229_p8 = scmp.ne.s32.totalorder %s4211_s10, 0  ;;  %s4230_s8 = smov 4  }
  0x8c   : > { %s4231_s28 = smov 64   ;;  %s3309_s14 = smov [#allocation17]  }
  0x8d   : > { %2759 = dma.hbm_to_vmem [thread:$0]  (!%p4229_p8), %s4162_s6, 256, %s271_s9, [#allocation15], %s4231_s28, %s4231_s28, %s4230_s8  }
  0x8e   : > { %s283_s4 = sshll.u32 %s3309_s14, 4  ;;  %s297_s5 = sand.u32 1, %s3281_s19   ;;  %s284_s4 = int_to_ptr.vmem [resolvable:$true] %s283_s4 }
  0x8f   : > { %s3077_s12 = scalar_lea.hbm %s4163_s7, 256 }
  0x90   : > { %p3078_p3 = scmp.ne.s32.totalorder %s4163_s7, %s3077_s12  ;;  %p3084_p5 = scmp.lt.u32.totalorder %s3077_s12, %s4163_s7 }
  0x92   : > { %p3080_p13 = pnand %p3078_p3, %p3491_p1 }
  0x94   : > { %p3081_p9 = pneg %p3080_p13 }
  0x96   : > { %p3086_p6 = pnand %p3084_p5, %p3081_p9 }
  0x98   : > { %3089 = shalt.err (!%p3086_p6)
}
  0x99   : > { %s3090_s9 = scalar_lea.vmem %s284_s4, 256  ;;  %p3098_p10 = scmp.lt.s32.totalorder %s284_s4, %s284_s4 }
  0x9a   : > { %p3091_p7 = scmp.ne.s32.totalorder %s284_s4, %s3090_s9  ;;  %p3099_p12 = scmp.lt.s32.totalorder %s3090_s9, %s3090_s9 }
  0x9c   : > { %p3093_p0 = pnand %p3091_p7, %p3491_p1  ;;  %p3100_p4 = por %p3099_p12, %p3098_p10 }
  0x9e   : > { %p3094_p2 = pneg %p3093_p0 }
  0xa0   : > { %p3101_p11 = pnand %p3100_p4, %p3094_p2 }
  0xa2   : > { %3104 = shalt.err (!%p3101_p11)
}
  0xa3   : > { %2762 = dma.hbm_to_vmem [thread:$0]  (!%p4229_p8), %s4163_s7, 256, %s284_s4, [#allocation18], %s4231_s28, %s4231_s28, %s4230_s8  }
  0xa4   : > { %s2569_s24 = sshll.u32 %s297_s5, 3  ;;  %s2623_s30 = sshll.u32 %s3297_s23, 7 }
  0xa5   : > { %s3672_s15 = scalar_lea.hbm %s4157_s1, %s2623_s30  ;;  %s301_s10 = scalar_lea.vmem [#allocation8], %s2569_s24 }
  0xa6   : > { %s308_s21 = sshll.u32 %s301_s10, 4  ;;  %s342_s12 = scalar_lea.vmem [#allocation13], %s3571_s18  ;;  %s3675_s21 = int_to_ptr.vmem [resolvable:$true] %s308_s21 }
  0xa7   : > { %s351_s22 = sshll.u32 %s342_s12, 4  ;;  %s3679_s4 = scalar_lea.sflag [#allocation9], %s297_s5  ;;  %s3677_s22 = int_to_ptr.vmem [resolvable:$true] %s351_s22 }
  0xa8   : > { %s3105_s9 = scalar_lea.hbm %s3672_s15, 128  ;;  %p4232_p11 = scmp.ne.s32.totalorder %s4226_s20, 0 }
  0xa9   : > { %p3106_p1 = scmp.ne.s32.totalorder %s3672_s15, %s3105_s9  ;;  %s3110_s24 = scalar_lea.hbm %s4157_s1, 256 }
  0xaa   : > { %p3107_p8 = pneg %p4232_p11  ;;  %p3111_p9 = scmp.lt.u32.totalorder %s3672_s15, %s4157_s1 }
  0xab   : > { %p3112_p5 = scmp.lt.u32.totalorder %s3110_s24, %s3105_s9  ;;  %p3114_p7 = scmp.lt.u32.totalorder %s3105_s9, %s3672_s15 }
  0xac   : > { %p3108_p3 = pnand %p3107_p8, %p3106_p1 }
  0xad   : > { %p3113_p6 = por %p3112_p5, %p3111_p9 }
  0xae   : > { %p3109_p13 = pneg %p3108_p3 }
  0xaf   : > { %p3115_p0 = por %p3114_p7, %p3113_p6 }
  0xb1   : > { %p3116_p2 = pnand %p3115_p0, %p3109_p13 }
  0xb3   : > { %3119 = shalt.err (!%p3116_p2)
}
  0xb4   : > { %s3120_s5 = scalar_lea.vmem %s3675_s21, 128  ;;  %s3310_s13 = smov [#allocation8]  }
  0xb5   : > { %p3121_p10 = scmp.ne.s32.totalorder %s3675_s21, %s3120_s5  ;;  %s3125_s14 = sshll.u32 %s3310_s13, 4  ;;  %s3126_s14 = int_to_ptr.vmem [resolvable:$false] %s3125_s14 }
  0xb6   : > { %s3127_s10 = scalar_lea.vmem %s3126_s14, 256  ;;  %p3128_p1 = scmp.lt.s32.totalorder %s3675_s21, %s3126_s14 }
  0xb7   : > { %p3123_p12 = pnand %p3121_p10, %p3107_p8  ;;  %p3129_p3 = scmp.lt.s32.totalorder %s3127_s10, %s3120_s5 }
  0xb9   : > { %p3124_p4 = pneg %p3123_p12  ;;  %p3130_p9 = por %p3129_p3, %p3128_p1 }
  0xbb   : > { %p3131_p5 = pnand %p3130_p9, %p3124_p4 }
  0xbd   : > { %3134 = shalt.err (!%p3131_p5)
}
  0xbe   : > { %2766 = dma.hbm_to_vmem [thread:$0]  (!%p4232_p11), %s3672_s15, 128, %s3675_s21, %s3679_s4, %s4231_s28, %s4231_s28, %s4230_s8  }
  0xbf   : > { %s3135_s12 = scalar_lea.hbm %s3592_s16, 64  ;;  %p4233_p13 = scmp.ne.s32.totalorder %s4228_s26, 0 }
  0xc0   : > { %p3136_p8 = scmp.ne.s32.totalorder %s3592_s16, %s3135_s12  ;;  %s3140_s2 = scalar_lea.hbm %s4159_s3, 256 }
  0xc1   : > { %p4234_p6 = pneg %p4233_p13  ;;  %p3141_p2 = scmp.lt.u32.totalorder %s3592_s16, %s4159_s3 }
  0xc2   : > { %p3142_p10 = scmp.lt.u32.totalorder %s3140_s2, %s3135_s12  ;;  %p3144_p4 = scmp.lt.u32.totalorder %s3135_s12, %s3592_s16 }
  0xc3   : > { %p3138_p7 = pnand %p3136_p8, %p4234_p6 }
  0xc4   : > { %p3143_p12 = por %p3142_p10, %p3141_p2 }
  0xc5   : > { %p3139_p0 = pneg %p3138_p7 }
  0xc6   : > { %p3145_p1 = por %p3144_p4, %p3143_p12 }
  0xc8   : > { %p3146_p3 = pnand %p3145_p1, %p3139_p0 }
  0xca   : > { %3149 = shalt.err (!%p3146_p3)
}
  0xcb   : > { %s3150_s8 = scalar_lea.vmem %s3677_s22, 64  ;;  %p4235_p9 = pmov %p4234_p6 }
  0xcc   : > { %p3151_p11 = scmp.ne.s32.totalorder %s3677_s22, %s3150_s8  ;;  %s3311_s28 = smov [#allocation13]  }
  0xcd   : > { %s3155_s15 = sshll.u32 %s3311_s28, 4  ;;  %s3156_s15 = int_to_ptr.vmem [resolvable:$false] %s3155_s15 }
  0xce   : > { %p3153_p5 = pnand %p3151_p11, %p4235_p9  ;;  %s3157_s21 = scalar_lea.vmem %s3156_s15, 128 }
  0xcf   : > { %p3158_p6 = scmp.lt.s32.totalorder %s3677_s22, %s3156_s15  ;;  %p3159_p7 = scmp.lt.s32.totalorder %s3157_s21, %s3150_s8 }
  0xd0   : > { %p3154_p8 = pneg %p3153_p5 }
  0xd1   : > { %p3160_p2 = por %p3159_p7, %p3158_p6 }
  0xd3   : > { %p3161_p10 = pnand %p3160_p2, %p3154_p8 }
  0xd5   : > { %3164 = shalt.err (!%p3161_p10)
}
  0xd6   : > { %2772 = dma.hbm_to_vmem [thread:$0]  (!%p4233_p13), %s3592_s16, 64, %s3677_s22, %s3596_s11  }
  0xd7   : > { %p4236_p0 = scmp.ne.s32.totalorder %s4210_s29, 0 }
  0xd8   : > { %s3737_s4 = sand.u32 (!%p4236_p0), 1, %s3277_s0   ;;  %p4237_p12 = scmp.ne.s32.totalorder (!%p4236_p0), %s4207_s27, 0 }
  0xd9   : > { %360 = sbr.rel (%p4236_p0) target bundleno = 2201 (0x899), region = 48  ;;  %s2579_s18 = sshll.u32 (!%p4236_p0), %s3737_s4, 3 }
  0xda   : > { %s363_s30 = scalar_lea.sflag (!%p4236_p0), [#allocation9], %s3737_s4  ;;  %s3741_s5 = scalar_lea.vmem (!%p4236_p0), [#allocation8], %s2579_s18 }
  0xe0   : > { %3240 = dma.done.wait (%p4237_p12), %s363_s30, 128  }
  0xe1   : > { %3242 = vsyncadd (%p4237_p12), %s363_s30, 4294967168  ;;  %s4238_s26 = sld [smem:[#allocation26_spill]]  ;;  %s4239_s16 = sld [smem:[#allocation37_spill]] }
  0xe2   : > { %s371_s29 = sand.u32 1, %s3452_s25  }
  0xe3   : > { %s372_s13 = scalar_lea.sflag [#allocation12], %s371_s29 }
  0xe7   : > { %s373_s11 = sand.u32 1, %s4238_s26   ;;  %p4240_p13 = scmp.ne.s32.totalorder %s4239_s16, 0 }
  0xe8   : > { %s3749_s22 = sshll.u32 %s373_s11, 2 }
  0xe9   : > { %s375_s14 = scalar_lea.vmem [#allocation11], %s3749_s22 }
  0xea   : > { %3244 = dma.done.wait (%p4240_p13), %s372_s13, 128  }
  0xeb   : > { %3246 = vsyncadd (%p4240_p13), %s372_s13, 4294967168  ;;  %s384_s10 = scalar_lea.vmem [#allocation13], %s3749_s22  ;;  %p4241_p4 = scmp.eq.s32.totalorder %s3452_s25, 0 }
  0xed   : > { %3248 = dma.done.wait (%p4241_p4), [#allocation15], 512   ;;  %p4242_p1 = pmov %p4241_p4 }
  0xef   : > { %3250 = vsyncadd (%p4242_p1), [#allocation15], 4294966784  ;;  %p4243_p3 = pmov %p4242_p1 }
  0xf0   : > { %p4244_p11 = pmov %p4242_p1 }
  0xf1   : > { %3252 = dma.done.wait (%p4243_p3), [#allocation18], 256  }
  0xf2   : > { %3254 = vsyncadd (%p4244_p11), [#allocation18], 4294967040  ;;  %s2585_s27 = sshll.u32 %s3737_s4, 4  ;;  %s4245_s9 = sld [smem:[#allocation29_spill]] }
  0xf3   : > { %s3766_s12 = scalar_lea.vmem [#allocation19], %s2585_s27 }
  0xf8   : > { %p2586_p9 = scmp.ne.s32.totalorder %s4245_s9, 0 }
  0xf9   : > { %vm793_vm0 = vcmask (!%p2586_p9), 7168   ;;  %v3312_v0 = vmov (!%p2586_p9), 0.0   ;;  %v3313_v1 = vmov (!%p2586_p9), -1e+30   ;;  %v2905_v2 = vld [vmem:[#allocation14] sm:$0xff] (!%p2586_p9)   ;;  %vm3314_vm1 = vmmov (!%p2586_p9), 0  }
  0xfa   : > { %441 = sbr.rel (%p2586_p9) target bundleno = 621 (0x26d), region = 76  ;;  %2653 = vmatprep.subr.bf16.mxu0 (!%p2586_p9), %v3312_v0  ;;  %794 = vst.msk [vmem:[#allocation3] sm:$0xff] (!%p2586_p9), %vm793_vm0, %v3313_v1  ;;  %795 = vst.msk [vmem:[#allocation3 + $0x8] sm:$0xff] (!%p2586_p9), %vm793_vm0, %v3313_v1  ;;  %2657 = vmatprep.mubr.msk.bf16.mxu0 (!%p2586_p9), %vm3314_vm1, %v3312_v0  ;;  %v2906_v3 = vld [vmem:[#allocation14 + $0x8] sm:$0xff] (!%p2586_p9)   ;;  %vm465_vm2 = vcmask (!%p2586_p9), 261120   ;;  %vm788_vm3 = vcmask (!%p2586_p9), 64512   ;;  %v544_v12 = vlaneseq (!%p2586_p9) }
  0xfb   : > { %796 = vst.msk [vmem:[#allocation3 + $0x10] sm:$0xff] (!%p2586_p9), %vm793_vm0, %v3313_v1  ;;  %797 = vst.msk [vmem:[#allocation3 + $0x18] sm:$0xff] (!%p2586_p9), %vm793_vm0, %v3313_v1  ;;  %2654 = vmatpush3.bf16.msra.mxu0 (!%p2586_p9), %v2905_v2  ;;  %v2907_v4 = vld [vmem:[%s3741_s5] sm:$0xff] (!%p2586_p9)   ;;  %s3315_s25 = smov (!%p2586_p9), 104   ;;  %s3316_s20 = smov (!%p2586_p9), 120   ;;  %v3320_v18 = vmov (!%p2586_p9), 0  }
  0xfc   : > { %798 = vst.msk [vmem:[#allocation3 + $0x20] sm:$0xff] (!%p2586_p9), %vm793_vm0, %v3313_v1  ;;  %799 = vst.msk [vmem:[#allocation3 + $0x28] sm:$0xff] (!%p2586_p9), %vm793_vm0, %v3313_v1  ;;  %2655 = vmatprep.subr.bf16.mxu0 (!%p2586_p9), %v3312_v0  ;;  %s3317_s2 = smov (!%p2586_p9), 112   ;;  %v3318_v10 = vmov (!%p2586_p9), 1983009808   ;;  %v545_v14 = vshrl.u32 (!%p2586_p9), %v544_v12, 7  ;;  %v535_v19 = vpack.i.b16 (!%p2586_p9), %v3320_v18, %v3320_v18 }
  0xfd   : > { %800 = vst.msk [vmem:[#allocation3 + $0x30] sm:$0xff] (!%p2586_p9), %vm793_vm0, %v3313_v1  ;;  %801 = vst.msk [vmem:[#allocation3 + $0x38] sm:$0xff] (!%p2586_p9), %vm793_vm0, %v3313_v1  ;;  %v542_v11 = vunpack.c.l.s4 (!%p2586_p9), %v3318_v10  ;;  %v3319_v15 = vmov (!%p2586_p9), 1934713408  }
  0xfe   : > { %802 = vst.msk [vmem:[#allocation4] sm:$0xff] (!%p2586_p9), %vm793_vm0, %v3312_v0  ;;  %803 = vst.msk [vmem:[#allocation4 + $0x8] sm:$0xff] (!%p2586_p9), %vm793_vm0, %v3312_v0  ;;  %v573_v16 = vunpack.c.l.s4 (!%p2586_p9), %v3319_v15 }
  0xff   : > { %804 = vst.msk [vmem:[#allocation4 + $0x10] sm:$0xff] (!%p2586_p9), %vm793_vm0, %v3312_v0  ;;  %805 = vst.msk [vmem:[#allocation4 + $0x18] sm:$0xff] (!%p2586_p9), %vm793_vm0, %v3312_v0  ;;  %2656 = vmatpush3.bf16.msra.mxu0 (!%p2586_p9), %v2906_v3  ;;  %v543_v13 = vunpack.c.0.s8 (!%p2586_p9), %v542_v11 }
 0x100   : > { %806 = vst.msk [vmem:[#allocation4 + $0x20] sm:$0xff] (!%p2586_p9), %vm793_vm0, %v3312_v0  ;;  %807 = vst.msk [vmem:[#allocation4 + $0x28] sm:$0xff] (!%p2586_p9), %vm793_vm0, %v3312_v0  ;;  %v574_v25 = vunpack.c.0.s8 (!%p2586_p9), %v573_v16 }
 0x101   : > { %808 = vst.msk [vmem:[#allocation4 + $0x30] sm:$0xff] %vm793_vm0, %v3312_v0  ;;  %809 = vst.msk [vmem:[#allocation4 + $0x38] sm:$0xff] %vm793_vm0, %v3312_v0  ;;  %v546_v24 = vsub.s32 %v543_v13, %v545_v14 }
 0x102   : > { %2658 = vmatmul.mubr.msk.bf16.vlgmr.msra.gmra.mrb[0].mxu0 %vm465_vm2, %v2907_v4  ;;  %810 = vst.msk [vmem:[#allocation5] sm:$0xff] %vm788_vm3, %v3312_v0  ;;  %811 = vst.msk [vmem:[#allocation5 + $0x8] sm:$0xff] %vm788_vm3, %v3312_v0  ;;  %v577_v33 = vsub.s32 %v574_v25, %v545_v14 }
 0x103   : > { %812 = vst.msk [vmem:[#allocation5 + $0x10] sm:$0xff] %vm788_vm3, %v3312_v0  ;;  %813 = vst.msk [vmem:[#allocation5 + $0x18] sm:$0xff] %vm788_vm3, %v3312_v0 }
 0x104   : > { %814 = vst.msk [vmem:[#allocation5 + $0x20] sm:$0xff] %vm788_vm3, %v3312_v0  ;;  %815 = vst.msk [vmem:[#allocation5 + $0x28] sm:$0xff] %vm788_vm3, %v3312_v0 }
 0x105   : > { %816 = vst.msk [vmem:[#allocation5 + $0x30] sm:$0xff] %vm788_vm3, %v3312_v0  ;;  %817 = vst.msk [vmem:[#allocation5 + $0x38] sm:$0xff] %vm788_vm3, %v3312_v0 }
 0x1d5   : > { %v503_v5 = vpop.f32.mrb[0].mxu0 }
 0x1d6   : > { %v2659_v6 = vpop.f32.mrb[1].mxu0 }
 0x1d7   : > { %v506_v7 = vpop.f32.mrb[2].mxu0 }
 0x1d8   : > { %v510_v8 = vpack.c.bf16 %v506_v7, %v503_v5  ;;  %v2660_v9 = vpop.f32.mrb[3].mxu0 }
 0x1da   : > { %516 = vrot.lane.b32.xlu1 %v510_v8, %s3315_s25  ;;  %512 = vrot.lane.b32.xlu0 %v510_v8, %s3316_s20  ;;  %v522_v22 = vshrl.u32 %v510_v8, 16 }
 0x1de   : > { %514 = vrot.lane.b32.xlu0 %v510_v8, %s3317_s2 }
 0x24c   : > { %v513_v17 = vpop.permute.xlu0 %512  ;;  %v517_v23 = vpop.permute.xlu1 %516 }
 0x24d   : > { %v520_v20 = vpack.i.b16 %v513_v17, %v510_v8  ;;  %v523_v21 = vshrl.u32 %v513_v17, 16  ;;  %v531_v30 = vshrl.u32 %v517_v23, 16 }
 0x24f   : > { %v524_v26 = vpack.i.b16 %v523_v21, %v522_v22  ;;  %v540_v28 = vcombine.high %v520_v20, %v535_v19  ;;  %v547_v32 = vrot.slane %v520_v20, %v546_v24 }
 0x250   : > { %v515_v27 = vpop.permute.xlu0 %514 }
 0x251   : > { %v528_v29 = vpack.i.b16 %v517_v23, %v515_v27  ;;  %v530_v31 = vshrl.u32 %v515_v27, 16  ;;  %v606_v36 = vcombine.high %v524_v26, %v535_v19  ;;  %v554_v38 = vrot.slane %v540_v28, %v546_v24 }
 0x252   : > { %v613_v42 = vrot.slane %v524_v26, %v546_v24 }
 0x253   : > { %v555_v34 = vcombine.high %v528_v29, %v535_v19  ;;  %v562_v35 = vrot.slane %v528_v29, %v546_v24  ;;  %v532_v37 = vpack.i.b16 %v531_v30, %v530_v31  ;;  %v620_v49 = vrot.slane %v606_v36, %v546_v24 }
 0x255   : > { %v569_v39 = vrot.slane %v555_v34, %v546_v24  ;;  %v570_v40 = vcombine.low %v547_v32, %v562_v35  ;;  %v571_v41 = vcombine.high %v547_v32, %v562_v35  ;;  %v621_v43 = vcombine.high %v532_v37, %v535_v19 }
 0x256   : > { %v628_v44 = vrot.slane %v532_v37, %v546_v24 }
 0x257   : > { %v578_v45 = vrot.slane %v570_v40, %v577_v33  ;;  %v585_v46 = vrot.slane %v571_v41, %v577_v33  ;;  %v586_v47 = vcombine.low %v554_v38, %v569_v39  ;;  %v587_v48 = vcombine.high %v554_v38, %v569_v39 }
 0x258   : > { %v635_v50 = vrot.slane %v621_v43, %v546_v24  ;;  %v636_v51 = vcombine.low %v613_v42, %v628_v44  ;;  %v637_v52 = vcombine.high %v613_v42, %v628_v44 }
 0x259   : > { %v594_v53 = vrot.slane %v586_v47, %v577_v33  ;;  %v601_v54 = vrot.slane %v587_v48, %v577_v33  ;;  %v672_v55 = vcombine.low %v578_v45, %v585_v46  ;;  %v2591_v56 = vcombine.high %v578_v45, %v585_v46 }
 0x25a   : > { %v644_v57 = vrot.slane %v636_v51, %v577_v33  ;;  %v651_v58 = vrot.slane %v637_v52, %v577_v33  ;;  %v652_v59 = vcombine.low %v620_v49, %v635_v50  ;;  %v653_v60 = vcombine.high %v620_v49, %v635_v50 }
 0x25b   : > { %v679_v61 = vrot.slane %v672_v55, %v546_v24  ;;  %v687_v62 = vrot.slane %v2591_v56, %v546_v24  ;;  %v688_v63 = vcombine.low %v594_v53, %v601_v54  ;;  %v2592_v0 = vcombine.high %v594_v53, %v601_v54 }
 0x25c   : > { %v660_v1 = vrot.slane %v652_v59, %v577_v33  ;;  %v667_v2 = vrot.slane %v653_v60, %v577_v33  ;;  %v722_v3 = vcombine.low %v644_v57, %v651_v58  ;;  %v2593_v4 = vcombine.high %v644_v57, %v651_v58 }
 0x25d   : > { %v695_v5 = vrot.slane %v688_v63, %v546_v24  ;;  %v703_v6 = vrot.slane %v2592_v0, %v546_v24  ;;  %v704_v7 = vcombine.low %v679_v61, %v687_v62 }
 0x25e   : > { %v729_v8 = vrot.slane %v722_v3, %v546_v24  ;;  %v737_v9 = vrot.slane %v2593_v4, %v546_v24  ;;  %v738_v10 = vcombine.low %v660_v1, %v667_v2  ;;  %v2594_v11 = vcombine.high %v660_v1, %v667_v2 }
 0x25f   : > { %v712_v12 = vcombine.low %v695_v5, %v703_v6  ;;  %v711_v16 = vrot.slane %v704_v7, %v577_v33 }
 0x260   : > { %v745_v13 = vrot.slane %v738_v10, %v546_v24  ;;  %v753_v14 = vrot.slane %v2594_v11, %v546_v24  ;;  %v754_v15 = vcombine.low %v729_v8, %v737_v9 }
 0x261   : > { %v719_v17 = vrot.slane %v712_v12, %v577_v33 }
 0x262   : > { %v762_v18 = vcombine.low %v745_v13, %v753_v14  ;;  %v761_v21 = vrot.slane %v754_v15, %v577_v33 }
 0x263   : > { %v720_v19 = vcombine.low %v711_v16, %v719_v17  ;;  %v721_v20 = vcombine.high %v711_v16, %v719_v17 }
 0x264   : > { %v769_v22 = vrot.slane %v762_v18, %v577_v33 }
 0x265   : > { %v776_v26 = vshrl.u32 %v720_v19, 16  ;;  %v784_v27 = vshrl.u32 %v721_v20, 16 }
 0x266   : > { %v770_v23 = vcombine.low %v761_v21, %v769_v22  ;;  %v771_v25 = vcombine.high %v761_v21, %v769_v22 }
 0x268   : > { %v774_v28 = vpack.i.b16 %v770_v23, %v720_v19  ;;  %v777_v29 = vshrl.u32 %v770_v23, 16  ;;  %v782_v30 = vpack.i.b16 %v771_v25, %v721_v20  ;;  %v785_v31 = vshrl.u32 %v771_v25, 16 }
 0x26a   : > { %v778_v32 = vpack.i.b16 %v777_v29, %v776_v26  ;;  %v786_v34 = vpack.i.b16 %v785_v31, %v784_v27  ;;  %789 = vst.msk [vmem:[#allocation2] sm:$0xff] %vm788_vm3, %v774_v28  ;;  %791 = vst.msk [vmem:[#allocation2 + $0x10] sm:$0xff] %vm788_vm3, %v782_v30 }
 0x26c   : > { %790 = vst.msk [vmem:[#allocation2 + $0x8] sm:$0xff] %vm788_vm3, %v778_v32  ;;  %792 = vst.msk [vmem:[#allocation2 + $0x18] sm:$0xff] %vm788_vm3, %v786_v34 }
 0x26d PF: > { %s4246_s8 = sld [smem:[#allocation42_spill]]  ;;  %v3321_v33 = vmov 0.0   ;;  %vm3322_vm4 = vmmov 0   ;;  %v818_v36 = vld [vmem:[%s375_s14] sm:$0xf]  ;;  %vm836_vm5 = vcmask 261120   ;;  %v950_v48 = vlaneseq }
 0x26e   : > { %2661 = vmatprep.subr.bf16.mxu0 %v3321_v33  ;;  %2669 = vmatprep.subr.bf16.mxu1 %v3321_v33  ;;  %v3323_v37 = vmov 0   ;;  %s3324_s21 = smov 104   ;;  %s3325_s18 = smov 120   ;;  %v2912_v43 = vld [vmem:[#allocation16] sm:$0xff]   ;;  %v2913_v44 = vld [vmem:[#allocation16 + $0x8] sm:$0xff]   ;;  %vm1290_vm6 = vcmask 64512  }
 0x26f   : > { %2665 = vmatprep.mubr.msk.bf16.mxu0 %vm3322_vm4, %v3321_v33  ;;  %2673 = vmatprep.mubr.msk.bf16.mxu1 %vm3322_vm4, %v3321_v33  ;;  %s3326_s30 = smov 112   ;;  %v819_v45 = vld [vmem:[%s384_s10] sm:$0xf]  ;;  %v3327_v46 = vmov 1983009808   ;;  %v951_v52 = vshrl.u32 %v950_v48, 7 }
 0x270   : > { %2908 = vset.pattern.permute.xlu0 %v3323_v37  ;;  %2909 = vset.pattern.permute.xlu1 %v3323_v37  ;;  %v948_v47 = vunpack.c.l.s4 %v3327_v46  ;;  %v3328_v49 = vmov 1934713408   ;;  %s4247_s5 = sld [smem:[#allocation30_spill]]  ;;  %s4248_s26 = sld [smem:[#allocation29_spill]]  ;;  %vm1663_vm8 = vcmask 7168   ;;  %vm1735_vm9 = vcmask 1043456  }
 0x271   : > { %2670 = vmatpush3.bf16.msra.mxu1 %v2912_v43  ;;  %v965_v50 = vunpack.c.l.s4 %v3328_v49 }
 0x272   : > { %2671 = vmatprep.subr.bf16.mxu1 %v3321_v33  ;;  %v949_v51 = vunpack.c.0.s8 %v948_v47 }
 0x273   : > { %v2910_v24 = vld [vmem:[%s4246_s8] sm:$0xff]   ;;  %v2911_v35 = vld [vmem:[%s4246_s8 + $0x8] sm:$0xff]   ;;  %v966_v53 = vunpack.c.0.s8 %v965_v50 }
 0x274   : > { %2662 = vmatpush3.bf16.msra.mxu0 %v2910_v24  ;;  %v3830_v54 = vsub.s32 %v949_v51, %v951_v52 }
 0x275   : > { %2663 = vmatprep.subr.bf16.mxu0 %v3321_v33  ;;  %2672 = vmatpush3.bf16.msra.mxu1 %v2913_v44  ;;  %v3833_v58 = vsub.s32 %v966_v53, %v951_v52  ;;  %v1286_v53 = vld [vmem:[#allocation2] sm:$0xff] }
 0x276   : > { %2683 = vmatprep.subr.bf16.mxu1 %v3321_v33  ;;  %s1282_s16 = sld [smem:[#allocation7 + %s4247_s5]]  ;;  %s2601_s29 = sshll.u32 %s4248_s26, 3 }
 0x277   : > { %p2610_p5 = scmp.ne.s32.totalorder %s4248_s26, 1 }
 0x278   : > { %2664 = vmatpush3.bf16.msra.mxu0 %v2911_v35  ;;  %2674 = vmatmul.mubr.msk.bf16.vlgmr.msra.gmra.mrb[0].mxu1 %vm836_vm5, %v819_v45  ;;  %vm3332_vm10 = vmmov (!%p2610_p5), 0   ;;  %s3333_s11 = smov (!%p2610_p5), 16   ;;  %s3334_s22 = smov (!%p2610_p5), 8   ;;  %vm2319_vm11 = vcmask (!%p2610_p5), 130048   ;;  %vm2322_vm12 = vcmask (!%p2610_p5), 195584  }
 0x279   : > { %2677 = vmatprep.subr.bf16.mxu0 %v3321_v33  ;;  %2685 = vmatprep.mubr.msk.bf16.mxu1 %vm3322_vm4, %v3321_v33  ;;  %s3335_s13 = smov (!%p2610_p5), 24  }
 0x27b   : > { %2666 = vmatmul.mubr.msk.bf16.vlgmr.msra.gmra.mrb[0].mxu0 %vm836_vm5, %v818_v36 }
 0x27c   : > { %2679 = vmatprep.mubr.msk.bf16.mxu0 %vm3322_vm4, %v3321_v33 }
 0x34e   : > { %v874_v38 = vpop.f32.mrb[0].mxu0 }
 0x34f   : > { %v939_v39 = vpack.c.bf16 %v874_v38, %v874_v38  ;;  %v2667_v40 = vpop.f32.mrb[1].mxu0 }
 0x350   : > { %v877_v41 = vpop.f32.mrb[2].mxu0 }
 0x351   : > { %945 = vrot.lane.b32.xlu1 %v939_v39, %s3324_s21  ;;  %941 = vrot.lane.b32.xlu0 %v939_v39, %s3325_s18  ;;  %v2668_v42 = vpop.f32.mrb[3].mxu0  ;;  %v953_v1 = vrot.slane %v939_v39, %v3830_v54 }
 0x355   : > { %943 = vrot.lane.b32.xlu0 %v939_v39, %s3326_s30 }
 0x3c3   : > { %v946_v55 = vpop.permute.xlu1 %945  ;;  %v942_v56 = vpop.permute.xlu0 %941 }
 0x3c4   : > { %v995_v57 = vrot.slane %v946_v55, %v3830_v54  ;;  %v987_v59 = vrot.slane %v942_v56, %v3830_v54  ;;  %v1287_v56 = vld [vmem:[#allocation2 + $0x8] sm:$0xff] }
 0x3c6   : > { %v996_v60 = vcombine.low %v987_v59, %v995_v57  ;;  %v997_v61 = vcombine.high %v987_v59, %v995_v57 }
 0x3c7   : > { %v944_v62 = vpop.permute.xlu0 %943 }
 0x3c8   : > { %v1004_v63 = vrot.slane %v996_v60, %v3833_v58  ;;  %v961_v0 = vrot.slane %v944_v62, %v3830_v54  ;;  %v1011_v2 = vrot.slane %v997_v61, %v3833_v58  ;;  %v1288_v60 = vld [vmem:[#allocation2 + $0x10] sm:$0xff]  ;;  %v1289_v61 = vld [vmem:[#allocation2 + $0x18] sm:$0xff]  ;;  %v933_v62 = vpop.f32.mrb[0].mxu1 }
 0x3ca   : > { %v962_v3 = vcombine.low %v953_v1, %v961_v0  ;;  %v963_v4 = vcombine.high %v953_v1, %v961_v0  ;;  %v1012_v5 = vcombine.high %v1004_v63, %v3323_v37  ;;  %v1013_v8 = vcombine.high %v1011_v2, %v3323_v37 }
 0x3cb   : > { %v1019_v9 = vshrl.u32 %v1004_v63, 16  ;;  %v1035_v15 = vshrl.u32 %v1011_v2, 16 }
 0x3cc   : > { %v970_v6 = vrot.slane %v962_v3, %v3833_v58  ;;  %v977_v7 = vrot.slane %v963_v4, %v3833_v58  ;;  %v1027_v14 = vshrl.u32 %v1012_v5, 16  ;;  %v1043_v22 = vshrl.u32 %v1013_v8, 16 }
 0x3cd   : > { %v1280_v3 = vstv %s2601_s29 }
 0x3ce   : > { %v978_v10 = vcombine.high %v970_v6, %v3323_v37  ;;  %v979_v11 = vcombine.high %v977_v7, %v3323_v37  ;;  %v1016_v12 = vpack.i.b16 %v1004_v63, %v970_v6  ;;  %v1018_v13 = vshrl.u32 %v970_v6, 16  ;;  %v2675_v63 = vpop.f32.mrb[1].mxu1 }
 0x3cf   : > { %v1032_v16 = vpack.i.b16 %v1011_v2, %v977_v7  ;;  %v1034_v17 = vshrl.u32 %v977_v7, 16  ;;  %v936_v0 = vpop.f32.mrb[2].mxu1  ;;  %v1279_v2 = vand.u32 127, %v950_v48  ;;  %v3329_v6 = vmov -1e+30   ;;  %v1492_v63 = vld [vmem:[#allocation3 + $0x28] sm:$0xff] }
 0x3d0   : > { %v1020_v18 = vpack.i.b16 %v1019_v9, %v1018_v13  ;;  %v1024_v19 = vpack.i.b16 %v1012_v5, %v978_v10  ;;  %v1026_v20 = vshrl.u32 %v978_v10, 16  ;;  %v1040_v21 = vpack.i.b16 %v1013_v8, %v979_v11  ;;  %v2676_v1 = vpop.f32.mrb[3].mxu1 }
 0x3d1   : > { %v1036_v23 = vpack.i.b16 %v1035_v15, %v1034_v17  ;;  %v1042_v25 = vshrl.u32 %v979_v11, 16  ;;  %v1046_v26 = vcombine.low %v1016_v12, %v1032_v16  ;;  %v1281_v4 = vadd.s32 %v1280_v3, %v1279_v2 }
 0x3d2   : > { %v1028_v27 = vpack.i.b16 %v1027_v14, %v1026_v20  ;;  %v1054_v28 = vcombine.low %v1024_v19, %v1040_v21  ;;  %v1283_v5 = vstv %s1282_s16 }
 0x3d3   : > { %v1044_v29 = vpack.i.b16 %v1043_v22, %v1042_v25  ;;  %v1071_v30 = vcombine.low %v1020_v18, %v1036_v23  ;;  %v1053_v31 = vrot.slane %v1046_v26, %v3830_v54  ;;  %vm1284_vm7 = vcmp.lt.s32.totalorder %v1281_v4, %v1283_v5 }
 0x3d4   : > { %v1061_v32 = vrot.slane %v1054_v28, %v3830_v54  ;;  %v1285_v7 = vsel %vm1284_vm7, 0.0, %v3329_v6 }
 0x3d5   : > { %v1079_v34 = vcombine.low %v1028_v27, %v1044_v29  ;;  %v1078_v35 = vrot.slane %v1071_v30, %v3830_v54 }
 0x3d6   : > { %v1062_v24 = vcombine.low %v1053_v31, %v1061_v32 }
 0x3d7   : > { %v1086_v36 = vrot.slane %v1079_v34, %v3830_v54 }
 0x3d8   : > { %v1069_v38 = vrot.slane %v1062_v24, %v3833_v58 }
 0x3d9   : > { %v1087_v39 = vcombine.low %v1078_v35, %v1086_v36 }
 0x3da   : > { %v1099_v42 = vshrl.u32 %v1069_v38, 16  ;;  %v1070_v47 = vcombine.high %v1069_v38, %v3323_v37 }
 0x3db   : > { %v1094_v40 = vrot.slane %v1087_v39, %v3833_v58 }
 0x3dc   : > { %v1105_v52 = vshrl.u32 %v1070_v47, 16 }
 0x3dd   : > { %v1098_v41 = vpack.i.b16 %v1094_v40, %v1069_v38  ;;  %v1100_v43 = vshrl.u32 %v1094_v40, 16  ;;  %v1095_v44 = vcombine.high %v1094_v40, %v3323_v37 }
 0x3df   : > { %v1295_v45 = vsel %vm1290_vm6, %v1098_v41, 0  ;;  %v1101_v46 = vpack.i.b16 %v1100_v43, %v1099_v42  ;;  %v1106_v50 = vshrl.u32 %v1095_v44, 16  ;;  %v1104_v51 = vpack.i.b16 %v1095_v44, %v1070_v47  ;;  %v1487_v42 = vld [vmem:[#allocation3] sm:$0xff]  ;;  %v1488_v44 = vld [vmem:[#allocation3 + $0x8] sm:$0xff]  ;;  %v1490_v47 = vld [vmem:[#allocation3 + $0x18] sm:$0xff] }
 0x3e0   : > { %2678 = vmatpush3.bf16.xpose.msra.mxu0 %v1295_v45  ;;  %v3909_v41 = vpack.c.bf16 %v933_v62, %v933_v62  ;;  %v1491_v62 = vld [vmem:[#allocation3 + $0x20] sm:$0xff] }
 0x3e1   : > { %v1342_v49 = vsel %vm1290_vm6, %v1101_v46, 0  ;;  %2689 = vmatprep.subr.bf16.mxu0 %v3321_v33  ;;  %v1107_v55 = vpack.i.b16 %v1106_v50, %v1105_v52  ;;  %v1389_v57 = vsel %vm1290_vm6, %v1104_v51, 0  ;;  %v1489_v52 = vld [vmem:[#allocation3 + $0x10] sm:$0xff] }
 0x3e2   : > { %2684 = vmatpush3.bf16.xpose.msra.mxu1 %v1342_v49 }
 0x3e3   : > { %2695 = vmatprep.subr.bf16.mxu1 %v3321_v33  ;;  %v1436_v59 = vsel %vm1290_vm6, %v1107_v55, 0 }
 0x3e7   : > { %2680 = vmatmul.mubr.msk.bf16.vlgmr.msra.gmra.mrb[4].mxu0 %vm1290_vm6, %v1286_v53 }
 0x3e8   : > { %2690 = vmatpush3.bf16.xpose.msra.mxu0 %v1389_v57  ;;  %2691 = vmatprep.mubr.msk.bf16.mxu0 %vm3322_vm4, %v3321_v33 }
 0x3e9   : > { %2686 = vmatmul.mubr.msk.bf16.vlgmr.msra.gmra.mrb[4].mxu1 %vm1290_vm6, %v1287_v56  ;;  %2701 = vmatprep.subr.bf16.mxu0 %v3321_v33 }
 0x3ea   : > { %2696 = vmatpush3.bf16.xpose.msra.mxu1 %v1436_v59  ;;  %2697 = vmatprep.mubr.msk.bf16.mxu1 %vm3322_vm4, %v3321_v33 }
 0x3eb   : > { %2707 = vmatprep.subr.bf16.mxu1 %v3321_v33 }
 0x3ef   : > { %2692 = vmatmul.mubr.msk.bf16.vlgmr.msra.gmra.mrb[8].mxu0 %vm1290_vm6, %v1288_v60 }
 0x3f0   : > { %2703 = vmatprep.mubr.msk.bf16.mxu0 %vm3322_vm4, %v3321_v33 }
 0x3f1   : > { %2698 = vmatmul.mubr.msk.bf16.vlgmr.msra.gmra.mrb[8].mxu1 %vm1290_vm6, %v1289_v61 }
 0x3f2   : > { %2709 = vmatprep.mubr.msk.bf16.mxu1 %vm3322_vm4, %v3321_v33 }
 0x4ba   : > { %v1331_v8 = vpop.f32.mrb[4].mxu0 }
 0x4bb   : > { %v3877_v9 = vadd.f32 %v1331_v8, %v1285_v7  ;;  %v2681_v10 = vpop.f32.mrb[5].mxu0  ;;  %v3923_v8 = vld [vmem:[#allocation3 + $0x38] sm:$0xff] }
 0x4bc   : > { %v1334_v11 = vpop.f32.mrb[6].mxu0  ;;  %v1378_v12 = vpop.f32.mrb[4].mxu1 }
 0x4bd   : > { %v3879_v13 = vadd.f32 %v1334_v11, %v1285_v7  ;;  %v2682_v14 = vpop.f32.mrb[7].mxu0  ;;  %v2687_v15 = vpop.f32.mrb[5].mxu1  ;;  %v1495_v16 = vsel %vm1290_vm6, %v3877_v9, -inf  ;;  %v3883_v17 = vadd.f32 %v1378_v12, %v1285_v7 }
 0x4be   : > { %v1381_v48 = vpop.f32.mrb[6].mxu1  ;;  %1496 = vmax.xlane.f32.xlu1 %v1495_v16 }
 0x4bf   : > { %v3885_v18 = vadd.f32 %v1381_v48, %v1285_v7  ;;  %v2688_v19 = vpop.f32.mrb[7].mxu1  ;;  %v1498_v20 = vsel %vm1290_vm6, %v3879_v13, -inf  ;;  %v1501_v26 = vsel %vm1290_vm6, %v3883_v17, -inf }
 0x4c0   : > { %1499 = vmax.xlane.f32.xlu0 %v1498_v20 }
 0x4c1   : > { %v1504_v21 = vsel %vm1290_vm6, %v3885_v18, -inf }
 0x4c2   : > { %1505 = vmax.xlane.f32.xlu1 %v1504_v21  ;;  %v1425_v22 = vpop.f32.mrb[8].mxu0 }
 0x4c3   : > { %v3891_v23 = vadd.f32 %v1425_v22, %v1285_v7  ;;  %v2693_v25 = vpop.f32.mrb[9].mxu0 }
 0x4c4   : > { %v1472_v27 = vpop.f32.mrb[8].mxu1  ;;  %1502 = vmax.xlane.f32.xlu0 %v1501_v26  ;;  %v1428_v28 = vpop.f32.mrb[10].mxu0  ;;  %v1122_v26 = vrot.slane %v3909_v41, %v3830_v54 }
 0x4c5   : > { %v3895_v29 = vadd.f32 %v1428_v28, %v1285_v7  ;;  %v2694_v30 = vpop.f32.mrb[11].mxu0  ;;  %v2699_v31 = vpop.f32.mrb[9].mxu1  ;;  %v3897_v34 = vadd.f32 %v1472_v27, %v1285_v7  ;;  %v1507_v36 = vsel %vm1290_vm6, %v3891_v23, -inf }
 0x4c6   : > { %v1475_v32 = vpop.f32.mrb[10].mxu1 }
 0x4c7   : > { %v3899_v24 = vadd.f32 %v1475_v32, %v1285_v7  ;;  %v2700_v35 = vpop.f32.mrb[11].mxu1  ;;  %v1510_v38 = vsel %vm1290_vm6, %v3895_v29, -inf  ;;  %v1513_v39 = vsel %vm1290_vm6, %v3897_v34, -inf  ;;  %v3921_v7 = vld [vmem:[#allocation3 + $0x30] sm:$0xff] }
 0x4c8   : > { %1508 = vmax.xlane.f32.xlu0 %v1507_v36  ;;  %1511 = vmax.xlane.f32.xlu1 %v1510_v38 }
 0x4c9   : > { %v1516_v40 = vsel %vm1290_vm6, %v3899_v24, -inf }
 0x4cc   : > { %1514 = vmax.xlane.f32.xlu0 %v1513_v39  ;;  %1517 = vmax.xlane.f32.xlu1 %v1516_v40 }
 0x4dd   : > { %1112 = vrot.lane.b32.xlu1 %v3909_v41, %s3326_s30 }
 0x4e1   : > { %1114 = vrot.lane.b32.xlu1 %v3909_v41, %s3324_s21 }
 0x4e2   : > { %1110 = vrot.lane.b32.xlu0 %v3909_v41, %s3325_s18 }
 0x54b   : > { %v1497_v43 = vpop.xlane.xlu1 %1496 }
 0x54c   : > { %v1519_v45 = vmax.f32 %v1487_v42, %v1497_v43 }
 0x54d   : > { %v1500_v46 = vpop.xlane.xlu0 %1499 }
 0x54e   : > { %v1527_v49 = vsub.f32 %v1487_v42, %v1519_v45  ;;  %1937 = vst.msk [vmem:[#allocation3] sm:$0xff] %vm1663_vm8, %v1519_v45  ;;  %v1520_v50 = vmax.f32 %v1488_v44, %v1500_v46  ;;  %1553 = vperm.xlu0 %2908, %v1519_v45  }
 0x54f   : > { %v1506_v51 = vpop.xlane.xlu1 %1505 }
 0x550   : > { %v1528_v53 = vsub.f32 %v1488_v44, %v1520_v50  ;;  %1938 = vst.msk [vmem:[#allocation3 + $0x8] sm:$0xff] %vm1663_vm8, %v1520_v50  ;;  %v1522_v55 = vmax.f32 %v1490_v47, %v1506_v51  ;;  %1558 = vperm.xlu1 %2909, %v1520_v50   ;;  %v1535_v56 = vmul.f32 1.442695, %v1527_v49 }
 0x551   : > { %v1503_v57 = vpop.xlane.xlu0 %1502 }
 0x552   : > { %v1537_v59 = vmul.f32 1.442695, %v1528_v53  ;;  %v1530_v60 = vsub.f32 %v1490_v47, %v1522_v55  ;;  %1940 = vst.msk [vmem:[#allocation3 + $0x18] sm:$0xff] %vm1663_vm8, %v1522_v55  ;;  %v1521_v61 = vmax.f32 %v1489_v52, %v1503_v57  ;;  %1568 = vperm.xlu0 %2908, %v1522_v55  }
 0x554   : > { %2914 = vpow2.f32 %v1537_v59  ;;  %v1529_v0 = vsub.f32 %v1489_v52, %v1521_v61  ;;  %1939 = vst.msk [vmem:[#allocation3 + $0x10] sm:$0xff] %vm1663_vm8, %v1521_v61  ;;  %1563 = vperm.xlu1 %2909, %v1521_v61   ;;  %v1541_v1 = vmul.f32 1.442695, %v1530_v60 }
 0x555   : > { %2916 = vpow2.f32 %v1535_v56  ;;  %v1509_v2 = vpop.xlane.xlu0 %1508  ;;  %v1512_v3 = vpop.xlane.xlu1 %1511 }
 0x556   : > { %v1539_v4 = vmul.f32 1.442695, %v1529_v0  ;;  %v1523_v5 = vmax.f32 %v1491_v62, %v1509_v2  ;;  %v1524_v6 = vmax.f32 %v1492_v63, %v1512_v3 }
 0x558   : > { %2918 = vpow2.f32 %v1539_v4  ;;  %v1531_v10 = vsub.f32 %v1491_v62, %v1523_v5  ;;  %1941 = vst.msk [vmem:[#allocation3 + $0x20] sm:$0xff] %vm1663_vm8, %v1523_v5  ;;  %v1532_v11 = vsub.f32 %v1492_v63, %v1524_v6  ;;  %1942 = vst.msk [vmem:[#allocation3 + $0x28] sm:$0xff] %vm1663_vm8, %v1524_v6  ;;  %1573 = vperm.xlu1 %2909, %v1523_v5   ;;  %1578 = vperm.xlu0 %2908, %v1524_v6  }
 0x559   : > { %2920 = vpow2.f32 %v1541_v1  ;;  %v1515_v12 = vpop.xlane.xlu0 %1514  ;;  %v1518_v14 = vpop.xlane.xlu1 %1517 }
 0x55a   : > { %v1543_v15 = vmul.f32 1.442695, %v1531_v10  ;;  %v1545_v16 = vmul.f32 1.442695, %v1532_v11  ;;  %v3928_v48 = vmax.f32 %v3921_v7, %v1515_v12  ;;  %v3931_v19 = vmax.f32 %v3923_v8, %v1518_v14 }
 0x55c   : > { %2922 = vpow2.f32 %v1543_v15  ;;  %v1533_v20 = vsub.f32 %v3921_v7, %v3928_v48  ;;  %1943 = vst.msk [vmem:[#allocation3 + $0x30] sm:$0xff] %vm1663_vm8, %v3928_v48  ;;  %v1534_v21 = vsub.f32 %v3923_v8, %v3931_v19  ;;  %1944 = vst.msk [vmem:[#allocation3 + $0x38] sm:$0xff] %vm1663_vm8, %v3931_v19  ;;  %1583 = vperm.xlu1 %2909, %v3928_v48   ;;  %1588 = vperm.xlu0 %2908, %v3931_v19   ;;  %v1615_v7 = vld [vmem:[#allocation4] sm:$0xff]  ;;  %v1618_v8 = vld [vmem:[#allocation4 + $0x18] sm:$0xff] }
 0x55d   : > { %2924 = vpow2.f32 %v1545_v16  ;;  %v1113_v22 = vpop.permute.xlu1 %1112  ;;  %v1111_v30 = vpop.permute.xlu0 %1110 }
 0x55e   : > { %v3943_v25 = vpop.eup %2914  ;;  %v1130_v27 = vrot.slane %v1113_v22, %v3830_v54  ;;  %v1156_v41 = vrot.slane %v1111_v30, %v3830_v54 }
 0x55f   : > { %v3948_v28 = vpop.eup %2916 }
 0x560   : > { %v1131_v31 = vcombine.low %v1122_v26, %v1130_v27  ;;  %v1132_v32 = vcombine.high %v1122_v26, %v1130_v27  ;;  %1687 = vperm.xlu1 %2909, %v3943_v25   ;;  %1682 = vperm.xlu0 %2908, %v3948_v28  }
 0x561   : > { %v1115_v35 = vpop.permute.xlu1 %1114 }
 0x562   : > { %v3952_v36 = vpop.eup %2918  ;;  %v1139_v38 = vrot.slane %v1131_v31, %v3833_v58  ;;  %v1164_v39 = vrot.slane %v1115_v35, %v3830_v54  ;;  %v1146_v42 = vrot.slane %v1132_v32, %v3833_v58 }
 0x563   : > { %v3956_v40 = vpop.eup %2920 }
 0x564   : > { %1692 = vperm.xlu1 %2909, %v3952_v36   ;;  %1697 = vperm.xlu0 %2908, %v3956_v40   ;;  %v1165_v43 = vcombine.low %v1156_v41, %v1164_v39  ;;  %v1166_v44 = vcombine.high %v1156_v41, %v1164_v39  ;;  %v1147_v46 = vcombine.high %v1139_v38, %v3323_v37  ;;  %v1187_v52 = vshrl.u32 %v1139_v38, 16 }
 0x565   : > { %v1148_v51 = vcombine.high %v1146_v42, %v3323_v37  ;;  %v1203_v60 = vshrl.u32 %v1146_v42, 16 }
 0x566   : > { %v3962_v45 = vpop.eup %2922  ;;  %v1173_v49 = vrot.slane %v1165_v43, %v3833_v58  ;;  %v1180_v50 = vrot.slane %v1166_v44, %v3833_v58  ;;  %v1195_v59 = vshrl.u32 %v1147_v46, 16 }
 0x567   : > { %v3965_v47 = vpop.eup %2924  ;;  %v1211_v3 = vshrl.u32 %v1148_v51, 16 }
 0x568   : > { %1702 = vperm.xlu1 %2909, %v3962_v45   ;;  %1707 = vperm.xlu0 %2908, %v3965_v47   ;;  %v1181_v53 = vcombine.high %v1173_v49, %v3323_v37  ;;  %v1182_v55 = vcombine.high %v1180_v50, %v3323_v37  ;;  %v1185_v56 = vpack.i.b16 %v1173_v49, %v1139_v38  ;;  %v1188_v57 = vshrl.u32 %v1173_v49, 16 }
 0x569   : > { %v1201_v61 = vpack.i.b16 %v1180_v50, %v1146_v42  ;;  %v1204_v62 = vshrl.u32 %v1180_v50, 16 }
 0x56a   : > { %v1189_v63 = vpack.i.b16 %v1188_v57, %v1187_v52  ;;  %v1193_v0 = vpack.i.b16 %v1181_v53, %v1147_v46  ;;  %v1196_v1 = vshrl.u32 %v1181_v53, 16  ;;  %v1209_v2 = vpack.i.b16 %v1182_v55, %v1148_v51 }
 0x56b   : > { %v1205_v4 = vpack.i.b16 %v1204_v62, %v1203_v60  ;;  %v1212_v5 = vshrl.u32 %v1182_v55, 16  ;;  %v1215_v6 = vcombine.low %v1185_v56, %v1201_v61 }
 0x56c   : > { %v1197_v10 = vpack.i.b16 %v1196_v1, %v1195_v59  ;;  %v1223_v11 = vcombine.low %v1193_v0, %v1209_v2 }
 0x56d   : > { %v1213_v12 = vpack.i.b16 %v1212_v5, %v1211_v3  ;;  %v1240_v14 = vcombine.low %v1189_v63, %v1205_v4  ;;  %v1222_v15 = vrot.slane %v1215_v6, %v3830_v54 }
 0x56e   : > { %v1230_v16 = vrot.slane %v1223_v11, %v3830_v54 }
 0x56f   : > { %v1248_v22 = vcombine.low %v1197_v10, %v1213_v12  ;;  %v1247_v27 = vrot.slane %v1240_v14, %v3830_v54 }
 0x570   : > { %v1231_v26 = vcombine.low %v1222_v15, %v1230_v16 }
 0x571   : > { %v1255_v30 = vrot.slane %v1248_v22, %v3830_v54 }
 0x572   : > { %v1238_v31 = vrot.slane %v1231_v26, %v3833_v58 }
 0x573   : > { %v1256_v32 = vcombine.low %v1247_v27, %v1255_v30 }
 0x574   : > { %v1239_v35 = vcombine.high %v1238_v31, %v3323_v37  ;;  %v1268_v41 = vshrl.u32 %v1238_v31, 16 }
 0x575   : > { %v1263_v38 = vrot.slane %v1256_v32, %v3833_v58 }
 0x576   : > { %v1274_v44 = vshrl.u32 %v1239_v35, 16 }
 0x577   : > { %v1267_v39 = vpack.i.b16 %v1263_v38, %v1238_v31  ;;  %v1269_v42 = vshrl.u32 %v1263_v38, 16  ;;  %v1264_v43 = vcombine.high %v1263_v38, %v3323_v37 }
 0x579   : > { %v1737_v46 = vsel %vm1735_vm9, %v1267_v39, 0  ;;  %v1270_v49 = vpack.i.b16 %v1269_v42, %v1268_v41  ;;  %v1273_v50 = vpack.i.b16 %v1264_v43, %v1239_v35  ;;  %v1275_v51 = vshrl.u32 %v1264_v43, 16 }
 0x57a   : > { %2702 = vmatpush3.bf16.msra.mxu0 %v1737_v46 }
 0x57b   : > { %v1784_v52 = vsel %vm1735_vm9, %v1270_v49, 0  ;;  %2713 = vmatprep.subr.bf16.mxu0 %v3321_v33  ;;  %v1831_v53 = vsel %vm1735_vm9, %v1273_v50, 0  ;;  %v1276_v55 = vpack.i.b16 %v1275_v51, %v1274_v44  ;;  %v1549_v51 = vmul.f32 1.442695, %v1534_v21 }
 0x57c   : > { %2708 = vmatpush3.bf16.msra.mxu1 %v1784_v52 }
 0x57d   : > { %2719 = vmatprep.subr.bf16.mxu1 %v3321_v33  ;;  %v1878_v56 = vsel %vm1735_vm9, %v1276_v55, 0 }
 0x5cd   : > { %v1554_v37 = vpop.permute.xlu0 %1553 }
 0x5ce   : > { %v1591_v57 = vsub.f32 %v3877_v9, %v1554_v37 }
 0x5cf   : > { %v1559_v59 = vpop.permute.xlu1 %1558 }
 0x5d0   : > { %v1599_v60 = vmul.f32 1.442695, %v1591_v57  ;;  %v1592_v61 = vsub.f32 %v3879_v13, %v1559_v59 }
 0x5d1   : > { %v1569_v62 = vpop.permute.xlu0 %1568 }
 0x5d2   : > { %2926 = vpow2.f32 %v1599_v60  ;;  %v1601_v63 = vmul.f32 1.442695, %v1592_v61  ;;  %v1594_v0 = vsub.f32 %v3885_v18, %v1569_v62  ;;  %v1623_v60 = vmul.f32 %v3948_v28, %v1615_v7  ;;  %v1620_v28 = vld [vmem:[#allocation4 + $0x28] sm:$0xff] }
 0x5d3   : > { %v1564_v1 = vpop.permute.xlu1 %1563 }
 0x5d4   : > { %2928 = vpow2.f32 %v1601_v63  ;;  %v1605_v2 = vmul.f32 1.442695, %v1594_v0  ;;  %v1593_v3 = vsub.f32 %v3883_v17, %v1564_v1  ;;  %v1617_v63 = vld [vmem:[#allocation4 + $0x10] sm:$0xff]  ;;  %v1626_v1 = vmul.f32 %v3956_v40, %v1618_v8  ;;  %v1622_v40 = vld [vmem:[#allocation4 + $0x38] sm:$0xff] }
 0x5d6   : > { %2930 = vpow2.f32 %v1605_v2  ;;  %v1603_v4 = vmul.f32 1.442695, %v1593_v3 }
 0x5d7   : > { %v1579_v5 = vpop.permute.xlu0 %1578  ;;  %v1574_v6 = vpop.permute.xlu1 %1573 }
 0x5d8   : > { %2932 = vpow2.f32 %v1603_v4  ;;  %v1596_v9 = vsub.f32 %v3895_v29, %v1579_v5  ;;  %v1595_v10 = vsub.f32 %v3891_v23, %v1574_v6  ;;  %v1625_v4 = vmul.f32 %v3952_v36, %v1617_v63 }
 0x5da   : > { %v1609_v13 = vmul.f32 1.442695, %v1596_v9  ;;  %v1607_v11 = vmul.f32 1.442695, %v1595_v10  ;;  %v1619_v9 = vld [vmem:[#allocation4 + $0x20] sm:$0xff] }
 0x5db   : > { %v1589_v12 = vpop.permute.xlu0 %1588  ;;  %v1584_v14 = vpop.permute.xlu1 %1583  ;;  %v1627_v10 = vmul.f32 %v3962_v45, %v1619_v9  ;;  %v1672_v45 = vld [vmem:[#allocation5] sm:$0xff] }
 0x5dc   : > { %v2927_v15 = vpop.eup %2926  ;;  %2934 = vpow2.f32 %v1609_v13  ;;  %v1598_v18 = vsub.f32 %v3899_v24, %v1589_v12  ;;  %v1597_v16 = vsub.f32 %v3897_v34, %v1584_v14  ;;  %v1621_v14 = vld [vmem:[#allocation4 + $0x30] sm:$0xff] }
 0x5dd   : > { %2936 = vpow2.f32 %v1607_v11  ;;  %v1631_v17 = vsel %vm1290_vm6, %v2927_v15, 0.0 }
 0x5de   : > { %v2929_v22 = vpop.eup %2928  ;;  %v1613_v26 = vmul.f32 1.442695, %v1598_v18  ;;  %v1611_v27 = vmul.f32 1.442695, %v1597_v16  ;;  %1632 = vadd.xlane.f32.xlu1 %v1631_v17 }
 0x5df   : > { %v1634_v29 = vsel %vm1290_vm6, %v2929_v22, 0.0  ;;  %v1728_v23 = vpack.c.bf16 %v2929_v22, %v2927_v15  ;;  %v1688_v55 = vpop.permute.xlu1 %1687 }
 0x5e0   : > { %v2931_v30 = vpop.eup %2930  ;;  %2938 = vpow2.f32 %v1613_v26  ;;  %1635 = vadd.xlane.f32.xlu0 %v1634_v29  ;;  %v1674_v29 = vld [vmem:[#allocation5 + $0x10] sm:$0xff] }
 0x5e1   : > { %2940 = vpow2.f32 %v1611_v27  ;;  %2704 = vmatmul.mubr.msk.bf16.vlgmr.msra.gmra.mrb[12].mxu0 %vm1290_vm6, %v1728_v23  ;;  %v1640_v24 = vsel %vm1290_vm6, %v2931_v30, 0.0 }
 0x5e2   : > { %v2933_v31 = vpop.eup %2932  ;;  %2714 = vmatpush3.bf16.msra.mxu0 %v1831_v53  ;;  %1641 = vadd.xlane.f32.xlu1 %v1640_v24 }
 0x5e3   : > { %v1637_v34 = vsel %vm1290_vm6, %v2933_v31, 0.0  ;;  %v1729_v32 = vpack.c.bf16 %v2931_v30, %v2933_v31  ;;  %2715 = vmatprep.mubr.msk.bf16.mxu0 %vm3322_vm4, %v3321_v33  ;;  %v1693_v37 = vpop.permute.xlu1 %1692 }
 0x5e4   : > { %1638 = vadd.xlane.f32.xlu0 %v1637_v34  ;;  %v1675_v34 = vld [vmem:[#allocation5 + $0x18] sm:$0xff] }
 0x5e5   : > { %2710 = vmatmul.mubr.msk.bf16.vlgmr.msra.gmra.mrb[12].mxu1 %vm1290_vm6, %v1729_v32 }
 0x5e6   : > { %v2935_v35 = vpop.eup %2934  ;;  %2720 = vmatpush3.bf16.msra.mxu1 %v1878_v56  ;;  %2721 = vmatprep.mubr.msk.bf16.mxu1 %vm3322_vm4, %v3321_v33  ;;  %v1547_v33 = vmul.f32 1.442695, %v1533_v20  ;;  %v1683_v56 = vpop.permute.xlu0 %1682  ;;  %v1616_v20 = vld [vmem:[#allocation4 + $0x8] sm:$0xff] }
 0x5e7   : > { %v2937_v38 = vpop.eup %2936  ;;  %v1646_v39 = vsel %vm1290_vm6, %v2935_v35, 0.0  ;;  %v4018_v59 = vpop.permute.xlu1 %1702  ;;  %v1624_v21 = vmul.f32 %v3943_v25, %v1616_v20  ;;  %v1628_v25 = vmul.f32 %v3965_v47, %v1620_v28  ;;  %v1673_v47 = vld [vmem:[#allocation5 + $0x8] sm:$0xff]  ;;  %v1720_v27 = vmul.f32 %v1683_v56, %v1672_v45  ;;  %v1679_v20 = vld [vmem:[#allocation5 + $0x38] sm:$0xff] }
 0x5e8   : > { %1647 = vadd.xlane.f32.xlu1 %v1646_v39  ;;  %v1643_v41 = vsel %vm1290_vm6, %v2937_v38, 0.0  ;;  %v1730_v42 = vpack.c.bf16 %v2935_v35, %v2937_v38  ;;  %2942 = vpow2.f32 %v1547_v33  ;;  %v1721_v30 = vmul.f32 %v1688_v55, %v1673_v47 }
 0x5e9   : > { %1644 = vadd.xlane.f32.xlu0 %v1643_v41  ;;  %2944 = vpow2.f32 %v1549_v51  ;;  %v1722_v35 = vmul.f32 %v1693_v37, %v1674_v29  ;;  %v3330_v28 = vmov (!%p2610_p5), 0  }
 0x5ea   : > { %v2939_v43 = vpop.eup %2938  ;;  %2716 = vmatmul.mubr.msk.bf16.vlgmr.msra.gmra.mrb[16].mxu0 %vm1290_vm6, %v1730_v42  ;;  %v1698_v57 = vpop.permute.xlu0 %1697 }
 0x5eb   : > { %v2941_v44 = vpop.eup %2940  ;;  %v1652_v46 = vsel %vm1290_vm6, %v2939_v43, 0.0  ;;  %v1723_v42 = vmul.f32 %v1698_v57, %v1675_v34 }
 0x5ec   : > { %1653 = vadd.xlane.f32.xlu1 %v1652_v46  ;;  %v1649_v49 = vsel %vm1290_vm6, %v2941_v44, 0.0  ;;  %v1731_v50 = vpack.c.bf16 %v2939_v43, %v2941_v44  ;;  %v1676_v43 = vld [vmem:[#allocation5 + $0x20] sm:$0xff] }
 0x5ed   : > { %1650 = vadd.xlane.f32.xlu0 %v1649_v49 }
 0x5ee   : > { %2722 = vmatmul.mubr.msk.bf16.vlgmr.msra.gmra.mrb[16].mxu1 %vm1290_vm6, %v1731_v50  ;;  %v4020_v48 = vpop.permute.xlu0 %1707  ;;  %v1677_v50 = vld [vmem:[#allocation5 + $0x28] sm:$0xff] }
 0x5ef   : > { %v1725_v37 = vmul.f32 %v4020_v48, %v1677_v50 }
 0x5f2   : > { %v2943_v52 = vpop.eup %2942 }
 0x5f3   : > { %v2945_v53 = vpop.eup %2944  ;;  %v1629_v18 = vmul.f32 %v2943_v52, %v1621_v14 }
 0x5f4   : > { %v1630_v36 = vmul.f32 %v2945_v53, %v1622_v40 }
 0x5fd   : > { %1712 = vperm.xlu1 %2909, %v2943_v52   ;;  %v1724_v52 = vmul.f32 %v4018_v59, %v1676_v43 }
 0x601   : > { %2947 = vset.pattern.permute.xlu1 (!%p2610_p5), %v3330_v28 }
 0x603   : > { %1717 = vperm.xlu0 %2908, %v2945_v53   ;;  %v1678_v53 = vld [vmem:[#allocation5 + $0x30] sm:$0xff] }
 0x607   : > { %2946 = vset.pattern.permute.xlu0 (!%p2610_p5), %v3330_v28 }
 0x66b   : > { %v1633_v61 = vpop.xlane.xlu1 %1632 }
 0x66c   : > { %v1655_v19 = vadd.f32 %v1633_v61, %v1623_v60 }
 0x66d   : > { %v1636_v62 = vpop.xlane.xlu0 %1635 }
 0x66e   : > { %1664 = vst.msk [vmem:[#allocation4] sm:$0xff] %vm1663_vm8, %v1655_v19  ;;  %v1656_v0 = vadd.f32 %v1636_v62, %v1624_v21 }
 0x66f   : > { %v1642_v2 = vpop.xlane.xlu1 %1641 }
 0x670   : > { %1665 = vst.msk [vmem:[#allocation4 + $0x8] sm:$0xff] %vm1663_vm8, %v1656_v0  ;;  %v1658_v3 = vadd.f32 %v1642_v2, %v1626_v1 }
 0x671   : > { %v1639_v5 = vpop.xlane.xlu0 %1638 }
 0x672   : > { %1667 = vst.msk [vmem:[#allocation4 + $0x18] sm:$0xff] %vm1663_vm8, %v1658_v3  ;;  %v1657_v6 = vadd.f32 %v1639_v5, %v1625_v4 }
 0x674   : > { %1666 = vst.msk [vmem:[#allocation4 + $0x10] sm:$0xff] %vm1663_vm8, %v1657_v6 }
 0x675   : > { %v1648_v13 = vpop.xlane.xlu1 %1647  ;;  %v1957_v4 = vld [vmem:[#allocation4] sm:$0xff] (!%p2610_p5) }
 0x676   : > { %v1645_v11 = vpop.xlane.xlu0 %1644  ;;  %v1660_v12 = vadd.f32 %v1648_v13, %v1628_v25 }
 0x677   : > { %v1659_v15 = vadd.f32 %v1645_v11, %v1627_v10  ;;  %v1958_v6 = vld [vmem:[#allocation4 + $0x8] sm:$0xff] (!%p2610_p5) }
 0x678   : > { %1669 = vst.msk [vmem:[#allocation4 + $0x28] sm:$0xff] %vm1663_vm8, %v1660_v12 }
 0x679   : > { %1668 = vst.msk [vmem:[#allocation4 + $0x20] sm:$0xff] %vm1663_vm8, %v1659_v15  ;;  %v1654_v16 = vpop.xlane.xlu1 %1653  ;;  %v1960_v5 = vld [vmem:[#allocation4 + $0x18] sm:$0xff] (!%p2610_p5) }
 0x67a   : > { %v1651_v17 = vpop.xlane.xlu0 %1650  ;;  %v1662_v22 = vadd.f32 %v1654_v16, %v1630_v36 }
 0x67b   : > { %v1661_v26 = vadd.f32 %v1651_v17, %v1629_v18  ;;  %v1959_v3 = vld [vmem:[#allocation4 + $0x10] sm:$0xff] (!%p2610_p5) }
 0x67c   : > { %1671 = vst.msk [vmem:[#allocation4 + $0x38] sm:$0xff] %vm1663_vm8, %v1662_v22  ;;  %2965 = vrcp.f32 (!%p2610_p5), %v1959_v3 }
 0x67d   : > { %1670 = vst.msk [vmem:[#allocation4 + $0x30] sm:$0xff] %vm1663_vm8, %v1661_v26  ;;  %v1713_v55 = vpop.permute.xlu1 %1712  ;;  %2967 = vrcp.f32 (!%p2610_p5), %v1957_v4 }
 0x67e   : > { %v1726_v8 = vmul.f32 %v1713_v55, %v1678_v53  ;;  %2969 = vrcp.f32 (!%p2610_p5), %v1960_v5 }
 0x67f   : > { %2971 = vrcp.f32 (!%p2610_p5), %v1958_v6  ;;  %v1962_v9 = vld [vmem:[#allocation4 + $0x28] sm:$0xff] (!%p2610_p5) }
 0x680   : > { %v1961_v25 = vld [vmem:[#allocation4 + $0x20] sm:$0xff] (!%p2610_p5)  ;;  %2973 = vrcp.f32 (!%p2610_p5), %v1962_v9 }
 0x681   : > { %2975 = vrcp.f32 (!%p2610_p5), %v1961_v25 }
 0x682   : > { %v1718_v60 = vpop.permute.xlu0 %1717 }
 0x683   : > { %v1727_v63 = vmul.f32 %v1718_v60, %v1679_v20  ;;  %v1964_v10 = vld [vmem:[#allocation4 + $0x38] sm:$0xff] (!%p2610_p5) }
 0x684   : > { %v1963_v13 = vld [vmem:[#allocation4 + $0x30] sm:$0xff] (!%p2610_p5)  ;;  %2977 = vrcp.f32 (!%p2610_p5), %v1964_v10 }
 0x685   : > { %2979 = vrcp.f32 (!%p2610_p5), %v1963_v13 }
 0x686   : > { %v2966_v40 = vpop.eup (!%p2610_p5), %2965 }
 0x687   : > { %v2968_v11 = vpop.eup (!%p2610_p5), %2967  ;;  %1985 = vperm.xlu1 (!%p2610_p5), %2947, %v2966_v40  }
 0x688   : > { %v2970_v12 = vpop.eup (!%p2610_p5), %2969  ;;  %1975 = vperm.xlu0 (!%p2610_p5), %2946, %v2968_v11  }
 0x689   : > { %v2972_v14 = vpop.eup (!%p2610_p5), %2971 }
 0x68a   : > { %v2974_v15 = vpop.eup (!%p2610_p5), %2973 }
 0x68b   : > { %1990 = vperm.xlu1 (!%p2610_p5), %2947, %v2970_v12   ;;  %v2976_v36 = vpop.eup (!%p2610_p5), %2975 }
 0x68c   : > { %1980 = vperm.xlu0 (!%p2610_p5), %2946, %v2972_v14  }
 0x68e   : > { %v2978_v18 = vpop.eup (!%p2610_p5), %2977 }
 0x68f   : > { %2000 = vperm.xlu1 (!%p2610_p5), %2947, %v2974_v15   ;;  %v2980_v16 = vpop.eup (!%p2610_p5), %2979 }
 0x690   : > { %1995 = vperm.xlu0 (!%p2610_p5), %2946, %v2976_v36  }
 0x693   : > { %2010 = vperm.xlu1 (!%p2610_p5), %2947, %v2978_v18  }
 0x694   : > { %2005 = vperm.xlu0 (!%p2610_p5), %2946, %v2980_v16  }
 0x6b4   : > { %v1773_v23 = vpop.f32.mrb[12].mxu0 }
 0x6b5   : > { %v1921_v24 = vadd.f32 %v1773_v23, %v1720_v27  ;;  %v2705_v31 = vpop.f32.mrb[13].mxu0 }
 0x6b6   : > { %v1776_v32 = vpop.f32.mrb[14].mxu0 }
 0x6b7   : > { %1929 = vst.msk [vmem:[#allocation5] sm:$0xff] %vm1290_vm6, %v1921_v24  ;;  %v1922_v38 = vadd.f32 %v1776_v32, %v1721_v30  ;;  %v2706_v39 = vpop.f32.mrb[15].mxu0 }
 0x6b8   : > { %v1820_v41 = vpop.f32.mrb[12].mxu1 }
 0x6b9   : > { %1930 = vst.msk [vmem:[#allocation5 + $0x8] sm:$0xff] %vm1290_vm6, %v1922_v38  ;;  %v1923_v44 = vadd.f32 %v1820_v41, %v1722_v35  ;;  %v2711_v46 = vpop.f32.mrb[13].mxu1 }
 0x6ba   : > { %v1823_v49 = vpop.f32.mrb[14].mxu1 }
 0x6bb   : > { %1931 = vst.msk [vmem:[#allocation5 + $0x10] sm:$0xff] %vm1290_vm6, %v1923_v44  ;;  %v1924_v33 = vadd.f32 %v1823_v49, %v1723_v42  ;;  %v2712_v51 = vpop.f32.mrb[15].mxu1 }
 0x6bd   : > { %1932 = vst.msk [vmem:[#allocation5 + $0x18] sm:$0xff] %vm1290_vm6, %v1924_v33  ;;  %v1867_v56 = vpop.f32.mrb[16].mxu0 }
 0x6be   : > { %v1925_v57 = vadd.f32 %v1867_v56, %v1724_v52  ;;  %v2717_v7 = vpop.f32.mrb[17].mxu0  ;;  %v1949_v30 = vld [vmem:[#allocation5] sm:$0xff] (!%p2610_p5) }
 0x6bf   : > { %v1870_v61 = vpop.f32.mrb[18].mxu0 }
 0x6c0   : > { %1933 = vst.msk [vmem:[#allocation5 + $0x20] sm:$0xff] %vm1290_vm6, %v1925_v57  ;;  %v1926_v19 = vadd.f32 %v1870_v61, %v1725_v37  ;;  %v2718_v21 = vpop.f32.mrb[19].mxu0  ;;  %1948 = sbr.rel (%p2610_p5) target bundleno = 2173 (0x87d), region = 80  ;;  %v1950_v29 = vld [vmem:[#allocation5 + $0x8] sm:$0xff] (!%p2610_p5) }
 0x6c1   : > { %v1914_v62 = vpop.f32.mrb[16].mxu1 }
 0x6c2   : > { %1934 = vst.msk [vmem:[#allocation5 + $0x28] sm:$0xff] %vm1290_vm6, %v1926_v19  ;;  %v1927_v59 = vadd.f32 %v1914_v62, %v1726_v8  ;;  %v2723_v0 = vpop.f32.mrb[17].mxu1  ;;  %v1951_v38 = vld [vmem:[#allocation5 + $0x10] sm:$0xff] (!%p2610_p5) }
 0x6c3   : > { %v1917_v1 = vpop.f32.mrb[18].mxu1 }
 0x6c4   : > { %1935 = vst.msk [vmem:[#allocation5 + $0x30] sm:$0xff] %vm1290_vm6, %v1927_v59  ;;  %v1928_v48 = vadd.f32 %v1917_v1, %v1727_v63  ;;  %v2724_v2 = vpop.f32.mrb[19].mxu1  ;;  %v1952_v34 = vld [vmem:[#allocation5 + $0x18] sm:$0xff] (!%p2610_p5) }
 0x6c6   : > { %1936 = vst.msk [vmem:[#allocation5 + $0x38] sm:$0xff] %vm1290_vm6, %v1928_v48 }
 0x6c7   : > { %v1953_v27 = vld [vmem:[#allocation5 + $0x20] sm:$0xff] }
 0x6c9   : > { %v1954_v47 = vld [vmem:[#allocation5 + $0x28] sm:$0xff] }
 0x6cb   : > { %v1955_v41 = vld [vmem:[#allocation5 + $0x30] sm:$0xff] }
 0x6cd   : > { %v1956_v35 = vld [vmem:[#allocation5 + $0x38] sm:$0xff] }
 0x706   : > { %v1986_v17 = vpop.permute.xlu1 %1985 }
 0x707   : > { %v1976_v22 = vpop.permute.xlu0 %1975  ;;  %v2015_v51 = vmul.f32 %v1986_v17, %v1951_v38 }
 0x708   : > { %v2013_v42 = vmul.f32 %v1976_v22, %v1949_v30 }
 0x70a   : > { %v1991_v26 = vpop.permute.xlu1 %1990 }
 0x70b   : > { %v1981_v45 = vpop.permute.xlu0 %1980  ;;  %v2016_v44 = vmul.f32 %v1991_v26, %v1952_v34 }
 0x70c   : > { %v2014_v39 = vmul.f32 %v1981_v45, %v1950_v29 }
 0x70e   : > { %v2001_v23 = vpop.permute.xlu1 %2000 }
 0x70f   : > { %v2018_v24 = vmul.f32 %v2001_v23, %v1954_v47  ;;  %v1996_v31 = vpop.permute.xlu0 %1995 }
 0x710   : > { %v2017_v32 = vmul.f32 %v1996_v31, %v1953_v27 }
 0x711   : > { %v2089_v46 = vcombine.low %v2014_v39, %v2018_v24  ;;  %v2090_v49 = vcombine.high %v2014_v39, %v2018_v24 }
 0x712   : > { %v2011_v43 = vpop.permute.xlu1 %2010  ;;  %v2021_v52 = vcombine.low %v2013_v42, %v2017_v32  ;;  %v2022_v53 = vcombine.high %v2013_v42, %v2017_v32 }
 0x713   : > { %v2020_v50 = vmul.f32 %v2011_v43, %v1956_v35  ;;  %v2006_v33 = vpop.permute.xlu0 %2005  ;;  %v2097_v20 = vrot.slane %v2089_v46, %v3830_v54  ;;  %v2104_v60 = vrot.slane %v2090_v49, %v3830_v54 }
 0x714   : > { %v2019_v55 = vmul.f32 %v2006_v33, %v1955_v41  ;;  %v2029_v19 = vrot.slane %v2021_v52, %v3830_v54  ;;  %v2036_v21 = vrot.slane %v2022_v53, %v3830_v54 }
 0x715   : > { %v2105_v56 = vcombine.low %v2016_v44, %v2020_v50  ;;  %v2106_v37 = vcombine.high %v2016_v44, %v2020_v50 }
 0x716   : > { %v2037_v57 = vcombine.low %v2015_v51, %v2019_v55  ;;  %v2038_v7 = vcombine.high %v2015_v51, %v2019_v55 }
 0x717   : > { %v2113_v61 = vrot.slane %v2105_v56, %v3830_v54  ;;  %v2120_v8 = vrot.slane %v2106_v37, %v3830_v54  ;;  %v2963_v56 = vld [vmem:[#allocation17] sm:$0xff]  }
 0x718   : > { %v2045_v62 = vrot.slane %v2037_v57, %v3830_v54  ;;  %v2052_v63 = vrot.slane %v2038_v7, %v3830_v54 }
 0x719   : > { %v2121_v59 = vcombine.low %v2097_v20, %v2113_v61  ;;  %v2122_v0 = vcombine.high %v2097_v20, %v2113_v61  ;;  %v2137_v1 = vcombine.low %v2104_v60, %v2120_v8  ;;  %v2138_v48 = vcombine.high %v2104_v60, %v2120_v8 }
 0x71a   : > { %v2053_v2 = vcombine.low %v2029_v19, %v2045_v62  ;;  %v2054_v3 = vcombine.high %v2029_v19, %v2045_v62  ;;  %v2069_v4 = vcombine.low %v2036_v21, %v2052_v63  ;;  %v2070_v5 = vcombine.high %v2036_v21, %v2052_v63  ;;  %v2964_v21 = vld [vmem:[#allocation17 + $0x8] sm:$0xff]  }
 0x71b   : > { %v2129_v28 = vrot.slane %v2121_v59, %v3833_v58  ;;  %v2136_v6 = vrot.slane %v2122_v0, %v3833_v58  ;;  %v2145_v9 = vrot.slane %v2137_v1, %v3833_v58  ;;  %v2152_v25 = vrot.slane %v2138_v48, %v3833_v58 }
 0x71c   : > { %v2061_v10 = vrot.slane %v2053_v2, %v3833_v58  ;;  %v2068_v13 = vrot.slane %v2054_v3, %v3833_v58  ;;  %v2077_v40 = vrot.slane %v2069_v4, %v3833_v58  ;;  %v2084_v11 = vrot.slane %v2070_v5, %v3833_v58 }
 0x71d   : > { %v2225_v12 = vcombine.low %v2129_v28, %v2136_v6  ;;  %v2613_v14 = vcombine.high %v2129_v28, %v2136_v6  ;;  %v2241_v15 = vcombine.low %v2145_v9, %v2152_v25  ;;  %v2614_v36 = vcombine.high %v2145_v9, %v2152_v25 }
 0x71e   : > { %v2157_v18 = vcombine.low %v2061_v10, %v2068_v13  ;;  %v2611_v16 = vcombine.high %v2061_v10, %v2068_v13  ;;  %v2173_v17 = vcombine.low %v2077_v40, %v2084_v11  ;;  %v2612_v22 = vcombine.high %v2077_v40, %v2084_v11 }
 0x71f   : > { %v2232_v26 = vrot.slane %v2225_v12, %v3830_v54  ;;  %v2240_v45 = vrot.slane %v2613_v14, %v3830_v54  ;;  %v2248_v47 = vrot.slane %v2241_v15, %v3830_v54  ;;  %v2256_v27 = vrot.slane %v2614_v36, %v3830_v54 }
 0x720   : > { %v2164_v29 = vrot.slane %v2157_v18, %v3830_v54  ;;  %v2172_v23 = vrot.slane %v2611_v16, %v3830_v54  ;;  %v2180_v30 = vrot.slane %v2173_v17, %v3830_v54  ;;  %v2188_v24 = vrot.slane %v2612_v22, %v3830_v54 }
 0x721   : > { %v2258_v31 = vcombine.high %v2232_v26, %v2240_v45  ;;  %v2274_v34 = vcombine.high %v2248_v47, %v2256_v27  ;;  %v2257_v32 = vcombine.low %v2232_v26, %v2240_v45  ;;  %v2273_v35 = vcombine.low %v2248_v47, %v2256_v27 }
 0x722   : > { %v2190_v38 = vcombine.high %v2164_v29, %v2172_v23  ;;  %v2206_v39 = vcombine.high %v2180_v30, %v2188_v24  ;;  %v2189_v41 = vcombine.low %v2164_v29, %v2172_v23  ;;  %v2205_v42 = vcombine.low %v2180_v30, %v2188_v24 }
 0x723   : > { %v2272_v43 = vrot.slane %v2258_v31, %v3833_v58  ;;  %v2288_v44 = vrot.slane %v2274_v34, %v3833_v58  ;;  %v2265_v46 = vrot.slane %v2257_v32, %v3833_v58  ;;  %v2281_v49 = vrot.slane %v2273_v35, %v3833_v58 }
 0x724   : > { %v2204_v50 = vrot.slane %v2190_v38, %v3833_v58  ;;  %v2220_v54 = vrot.slane %v2206_v39, %v3833_v58  ;;  %v2197_v33 = vrot.slane %v2189_v41, %v3833_v58  ;;  %v2213_v51 = vrot.slane %v2205_v42, %v3833_v58 }
 0x725   : > { %v2291_v52 = vcombine.low %v2272_v43, %v2288_v44  ;;  %v2290_v53 = vcombine.high %v2265_v46, %v2281_v49  ;;  %v2289_v55 = vcombine.low %v2265_v46, %v2281_v49  ;;  %v2292_v7 = vcombine.high %v2272_v43, %v2288_v44 }
 0x726   : > { %v2223_v37 = vcombine.low %v2204_v50, %v2220_v54  ;;  %v2222_v57 = vcombine.high %v2197_v33, %v2213_v51  ;;  %v2221_v20 = vcombine.low %v2197_v33, %v2213_v51  ;;  %v2224_v8 = vcombine.high %v2204_v50, %v2220_v54 }
 0x727   : > { %v3331_v19 = vmov 0.0  }
 0x728   : > { %v2953_v60 = vpack.i.bf16 %v2291_v52, %v2223_v37  ;;  %v2948_v61 = vpack.i.bf16 %v2290_v53, %v2222_v57  ;;  %2725 = vmatprep.subr.bf16.mxu0 %v3331_v19  ;;  %2729 = vmatprep.mubr.msk.bf16.mxu0 %vm3332_vm10, %v3331_v19  ;;  %v2958_v58 = vpack.i.bf16 %v2292_v7, %v2224_v8 }
 0x729   : > { %2726 = vmatpush3.bf16.msra.mxu0 %v2963_v56 }
 0x72a   : > { %2954 = vrot.lane.b32.xlu1 %v2953_v60, %s3333_s11  ;;  %2949 = vrot.lane.b32.xlu0 %v2948_v61, %s3334_s22 }
 0x72b   : > { %2727 = vmatprep.subr.bf16.mxu0 %v3331_v19 }
 0x72d   : > { %2728 = vmatpush3.bf16.msra.mxu0 %v2964_v21 }
 0x72e   : > { %2959 = vrot.lane.b32.xlu0 %v2958_v58, %s3335_s13 }
 0x79c   : > { %v2955_v62 = vpop.permute.xlu1 %2954  ;;  %v2950_v63 = vpop.permute.xlu0 %2949 }
 0x79d   : > { %v2952_v59 = vunpack.i.h.bf16 %v2950_v63  ;;  %v2951_v0 = vunpack.i.l.bf16 %v2950_v63  ;;  %v2957_v1 = vunpack.i.h.bf16 %v2955_v62  ;;  %v2956_v48 = vunpack.i.l.bf16 %v2955_v62 }
 0x79f   : > { %v2318_v2 = vsel %vm1290_vm6, %v2289_v55, %v2952_v59  ;;  %v2317_v3 = vsel %vm1290_vm6, %v2221_v20, %v2951_v0 }
 0x7a0   : > { %v2960_v4 = vpop.permute.xlu0 %2959  ;;  %v2321_v6 = vsel %vm2319_vm11, %v2318_v2, %v2957_v1  ;;  %v2320_v9 = vsel %vm2319_vm11, %v2317_v3, %v2956_v48 }
 0x7a1   : > { %v2962_v5 = vunpack.i.h.bf16 %v2960_v4  ;;  %v2961_v28 = vunpack.i.l.bf16 %v2960_v4 }
 0x7a3   : > { %v2323_v25 = vsel %vm2322_vm12, %v2320_v9, %v2961_v28  ;;  %v2324_v10 = vsel %vm2322_vm12, %v2321_v6, %v2962_v5 }
 0x7a4   : > { %v2325_v13 = vpack.c.bf16 %v2324_v10, %v2323_v25 }
 0x7a6   : > { %2730 = vmatmul.mubr.msk.bf16.vlgmr.msra.gmra.mrb[0].mxu0 %vm836_vm5, %v2325_v13 }
 0x879   : > { %v2379_v40 = vpop.f32.mrb[0].mxu0 }
 0x87a   : > { %2386 = vst.msk [vmem:[%s3766_s12] sm:$0xff] %vm836_vm5, %v2379_v40  ;;  %v2731_v11 = vpop.f32.mrb[1].mxu0 }
 0x87b   : > { %v2382_v12 = vpop.f32.mrb[2].mxu0 }
 0x87c   : > { %2387 = vst.msk [vmem:[%s3766_s12 + $0x8] sm:$0xff] %vm836_vm5, %v2382_v12  ;;  %v2732_v14 = vpop.f32.mrb[3].mxu0 }
 0x87d PF: > { %s4249_s14 = sld [smem:[#allocation30_spill]]  ;;  %s4250_s10 = sld [smem:[#allocation36_spill]] }
 0x87e   : > { %s4251_s20 = sld [smem:[#allocation43_spill]]  ;;  %s2402_s24 = sshll.u32 %s3766_s12, 4  ;;  %s4093_s24 = int_to_ptr.vmem [resolvable:$true] %s2402_s24 }
 0x87f   : > { %s2389_s28 = scalar_lea.sflag [#allocation10], %s3737_s4  ;;  %s3165_s15 = scalar_lea.vmem %s4093_s24, 256 }
 0x880   : > { %p3166_p8 = scmp.ne.s32.totalorder %s4093_s24, %s3165_s15  ;;  %s3336_s21 = smov [#allocation19]  }
 0x881   : > { %s3169_s18 = sshll.u32 %s3336_s21, 4  ;;  %s3170_s18 = int_to_ptr.vmem [resolvable:$false] %s3169_s18 }
 0x882   : > { %s3171_s30 = scalar_lea.vmem %s3170_s18, 512  ;;  %p3172_p10 = scmp.lt.s32.totalorder %s4093_s24, %s3170_s18 }
 0x883   : > { %s2624_s27 = sshll.u32 %s4249_s14, 8  ;;  %p4253_p6 = scmp.ne.s32.totalorder %s4250_s10, 0 }
 0x884   : > { %s4252_s2 = smov %s4251_s20  ;;  %s4090_s17 = scalar_lea.hbm %s4251_s20, %s2624_s27 }
 0x885   : > { %p3167_p7 = pnand %p3166_p8, %p4253_p6  ;;  %p3173_p0 = scmp.lt.s32.totalorder %s3171_s30, %s3165_s15 }
 0x887   : > { %p3168_p2 = pneg %p3167_p7  ;;  %p3174_p12 = por %p3173_p0, %p3172_p10 }
 0x889   : > { %p3175_p13 = pnand %p3174_p12, %p3168_p2 }
 0x88b   : > { %3178 = shalt.err (!%p3175_p13)
}
 0x88c   : > { %s3179_s12 = scalar_lea.hbm %s4090_s17, 256  ;;  %s3183_s16 = scalar_lea.hbm %s4252_s2, 512 }
 0x88d   : > { %p3180_p4 = scmp.ne.s32.totalorder %s4090_s17, %s3179_s12  ;;  %p3184_p11 = scmp.lt.u32.totalorder %s4090_s17, %s4252_s2 }
 0x88e   : > { %p3185_p9 = scmp.lt.u32.totalorder %s3183_s16, %s3179_s12  ;;  %p3187_p8 = scmp.lt.u32.totalorder %s3179_s12, %s4090_s17 }
 0x88f   : > { %p3181_p1 = pnand %p3180_p4, %p4253_p6 }
 0x890   : > { %p3186_p5 = por %p3185_p9, %p3184_p11 }
 0x891   : > { %p3182_p3 = pneg %p3181_p1 }
 0x892   : > { %p3188_p7 = por %p3187_p8, %p3186_p5 }
 0x894   : > { %p3189_p2 = pnand %p3188_p7, %p3182_p3 }
 0x896   : > { %3192 = shalt.err (!%p3189_p2)
}
 0x897   : > { %s3337_s22 = smov 128   ;;  %s3338_s13 = smov 8  }
 0x898   : > { %2751 = dma.vmem_to_hbm [thread:$0]  (%p4253_p6), %s4093_s24, 256, %s4090_s17, %s2389_s28, %s3337_s22, %s3337_s22, %s3338_s13  }
 0x899 PF: > { %s4254_s14 = sld [smem:[#allocation32_spill]]  ;;  %s4255_s27 = sld [smem:[#allocation28_spill]] }
 0x89a   : > { %s4256_s9 = sld [smem:[#allocation33_spill]] }
 0x89f   : > { %p2784_p10 = scmp.ge.s32.totalorder %s4254_s14, 2  ;;  %s2417_s25 = sand.u32 1, %s4255_s27  }
 0x8a0   : > { %p4257_p0 = scmp.ne.s32.totalorder %s4256_s9, 0  ;;  %s2418_s20 = scalar_lea.sflag [#allocation10], %s2417_s25 }
 0x8a2   : > { %p2774_p12 = pnand %p2784_p10, %p4257_p0 }
 0x8a4   : > { %3256 = dma.done.wait (!%p2774_p12), %s2418_s20, 256  }
 0x8a5   : > { %3258 = vsyncadd (!%p2774_p12), %s2418_s20, 4294967040  ;;  %s33_s24 = sadd.s32 1, %s4254_s14   ;;  %s4258_s15 = sld [smem:[#allocation26_spill]] }
 0x8a6   : > { %p30_p13 = scmp.ge.s32.totalorder %s33_s24, 6   ;;  %s4259_s16 = sld [smem:[#allocation27_spill]] }
 0x8a7   : > { %s4260_s17 = sld [smem:[#allocation39_spill]]  ;;  %s4261_s4 = sld [smem:[#allocation38_spill]] }
 0x8a8   : > { %s4262_s20 = sld [smem:[#allocation31_spill]]  ;;  %s4263_s22 = sld [smem:[#allocation34_spill]] }
 0x8a9   : > { %s4264_s10 = sld [smem:[#allocation35_spill]]  ;;  %s4265_s18 = smov %s3277_s0 }
 0x8aa   : > { %s4266_s0 = smov %s3281_s19  ;;  %s4268_s21 = smov %s3297_s23 }
 0x8ab   :  { %32 = sbr.rel (!%p30_p13) target bundleno = 26 (0x1a), region = 137 }
 0x8ad   : > { %s4267_s19 = smov %s4261_s4 }
 0x8af   : > { %s4269_s23 = smov %s4264_s10 }
 0x8b2   :  { %2423 = vsyncpa [#allocation9], 1 }
 0x8b3   :  { %2425 = vsyncpa [#allocation9 + $0x1], 1 }
 0x8b4   :  { %2426 = vsyncpa [#allocation12], 1 }
 0x8b5   :  { %2428 = vsyncpa [#allocation12 + $0x1], 1 }
 0x8b6   :  { %2429 = vsyncpa [#allocation15], 1 }
 0x8b7   :  { %2430 = vsyncpa [#allocation18], 1 }
 0x8b8   :  { %2431 = vsyncpa [#allocation10], 1 }
 0x8b9   :  { %2433 = vsyncpa [#allocation10 + $0x1], 1 }

// kernel: tpu_custom_call.1
= control target key start
LH: loop header
LB: loop body
LE: loop exit
PB: predicated region body
PF: predicated region fallthrough
CT: control target
= control target key end

     0   :  { %s3191_s0 = inlined_call_operand.hbm [shape: s32[2], index: 0, kind: input, shape index: {}]   ;;  %s3192_s1 = inlined_call_operand.hbm [shape: bf16[2,16,32], index: 1, kind: input, shape index: {}]   ;;  %s3193_s2 = inlined_call_operand.hbm [shape: bf16[2,16,32], index: 2, kind: input, shape index: {}]   ;;  %s3194_s3 = inlined_call_operand.hbm [shape: bf16[2,16,32], index: 3, kind: input, shape index: {}]   ;;  %s3195_s4 = inlined_call_operand.hbm [shape: bf16[32,32], index: 4, kind: input, shape index: {}]   ;;  %s3196_s5 = inlined_call_operand.vmem [shape: bf16[32,32], index: 5, kind: input, shape index: {}]   ;;  %s3197_s6 = inlined_call_operand.hbm [shape: bf16[32,32], index: 6, kind: input, shape index: {}]   ;;  %s3198_s7 = inlined_call_operand.hbm [shape: bf16[32,32], index: 7, kind: input, shape index: {}]   ;;  %s3199_s8 = inlined_call_operand.hbm [shape: f32[2,16,32], index: 8, kind: output, shape index: {}]  }
   0x1   :  { %3231 = sst [smem:[#allocation40_spill]] %s3193_s2  ;;  %s2107_s29 = scalar_lea.hbm %s3191_s0, 16 }
   0x2   :  { %3232 = sst [smem:[#allocation41_spill]] %s3195_s4  ;;  %p2108_p0 = scmp.ne.s32.totalorder %s3191_s0, %s2107_s29 }
   0x3   :  { %3233 = sst [smem:[#allocation42_spill]] %s3196_s5  ;;  %p2111_p1 = scmp.lt.u32.totalorder %s2107_s29, %s3191_s0 }
   0x4   :  { %3234 = sst [smem:[#allocation43_spill]] %s3199_s8 }
   0x5   :  { %p2113_p2 = pnand %p2111_p1, %p2108_p0 }
   0x7   :  { %2116 = shalt.err (!%p2113_p2)  }
   0x8   :  { %s2429_s12 = smov [#allocation7]  }
   0x9   :  { %14 = dma.hbm_to_smem %s3191_s0, 16, %s2429_s12, [#allocation6] }
   0xa   :  { %2363 = dma.done.wait [#allocation6], 16 }
   0xb   :  { %2364 = vsyncadd [#allocation6], 4294967280 }
   0xc   :  { %16 = sfence }
   0xd   :  { %17 = vsyncpa [#allocation9], 0 }
   0xe   :  { %19 = vsyncpa [#allocation9 + $0x1], 0 }
   0xf   :  { %20 = vsyncpa [#allocation12], 0 }
  0x10   :  { %22 = vsyncpa [#allocation12 + $0x1], 0 }
  0x11   :  { %23 = vsyncpa [#allocation15], 0 }
  0x12   :  { %24 = vsyncpa [#allocation18], 0 }
  0x13   :  { %25 = vsyncpa [#allocation10], 0 }
  0x14   :  { %27 = vsyncpa [#allocation10 + $0x1], 0  ;;  %s2517_s15 = smov 0   ;;  %s2519_s16 = smov 0  }
  0x15   :  { %s2521_s17 = smov 0   ;;  %s2523_s18 = smov 0  }
  0x16   :  { %s2525_s0 = smov 0   ;;  %s2527_s19 = smov 0  }
  0x17   :  { %s2529_s20 = smov 0   ;;  %s2531_s21 = smov 0  }
  0x18   :  { %s2533_s22 = smov 0   ;;  %s2535_s23 = smov 0  }
  0x19   :  { %s2537_s24 = smov 0  }
  0x1a LB: > { %3235 = sst [smem:[#allocation26_spill]] %s2391_s16  ;;  %s2573_s25 = sadd.s32 4294967295, %s2427_s24   ;;  %s2427_s24 = sphi %s2537_s24, %s33_s24   ;;  %s2423_s23 = sphi %s2535_s23, %s3304_s23   ;;  %s2419_s22 = sphi %s2533_s22, %s3298_s22   ;;  %s2415_s21 = sphi %s2531_s21, %s3303_s21   ;;  %s2411_s20 = sphi %s2529_s20, %s3297_s20   ;;  %s2407_s19 = sphi %s2527_s19, %s3302_s19   ;;  %s2403_s0 = sphi %s2525_s0, %s3301_s0   ;;  %s2399_s18 = sphi %s2523_s18, %s3300_s18   ;;  %s2395_s17 = sphi %s2521_s17, %s3295_s17   ;;  %s2391_s16 = sphi %s2519_s16, %s3294_s16   ;;  %s2387_s15 = sphi %s2517_s15, %s3293_s15  }
  0x1b   : > { %3236 = sst [smem:[#allocation27_spill]] %s2395_s17  ;;  %s1702_s26 = sadd.s32 4294967294, %s2427_s24  }
  0x1c   : > { %3237 = sst [smem:[#allocation28_spill]] %s2399_s18  ;;  %p65_p3 = scmp.ne.s32.totalorder %s2403_s0, %s2399_s18 }
  0x1d   : > { %3238 = sst [smem:[#allocation29_spill]] %s2411_s20  ;;  %p3202_p4 = scmp.eq.s32.totalorder %s2573_s25, 0 }
  0x1e   : > { %3239 = sst [smem:[#allocation30_spill]] %s2415_s21  ;;  %p235_p6 = scmp.eq.s32.totalorder %s1702_s26, 3 }
  0x1f   : > { %3240 = sst [smem:[#allocation31_spill]] %s2419_s22  ;;  %p2582_p7 = por %p3202_p4, %p65_p3 }
  0x20   : > { %3241 = sst [smem:[#allocation32_spill]] %s2427_s24  ;;  %p1703_p8 = scmp.ge.s32.totalorder %s2427_s24, 1 }
  0x21   : > { %s3242_s27 = scalar_select %p2582_p7, 1, 0 }
  0x22   : > { %p2587_p9 = por %p235_p6, %p65_p3  ;;  %p242_p10 = scmp.lt.s32.totalorder %s2427_s24, 5 }
  0x23   : > { %s2430_s30 = smov [#allocation14]   ;;  %s3247_s4 = sld [smem:[#allocation41_spill]] }
  0x24   : > { %s3243_s28 = scalar_select %p2587_p9, 1, 0 }
  0x25   : > { %p2592_p11 = pnand %p1703_p8, %p242_p10  ;;  %s254_s9 = sshll.u32 %s2430_s30, 4  ;;  %s255_s9 = int_to_ptr.vmem [resolvable:$true] %s254_s9 }
  0x26   : > { %3244 = sst [smem:[#allocation33_spill]] %s3243_s28 }
  0x27   : > { %s3245_s29 = scalar_select %p2592_p11, 1, 0 }
  0x28   : > { %p1884_p12 = pneg %p2592_p11 }
  0x29   : > { %s2117_s13 = scalar_lea.hbm %s3247_s4, 256 }
  0x2a   : > { %p2600_p13 = pnand %p1884_p12, %p3202_p4  ;;  %p2118_p0 = scmp.ne.s32.totalorder %s3247_s4, %s2117_s13 }
  0x2b   : > { %p2124_p6 = scmp.lt.u32.totalorder %s2117_s13, %s3247_s4 }
  0x2c   : > { %s3246_s10 = scalar_select %p2600_p13, 1, 0 }
  0x2d   : > { %p2612_p1 = pneg %p2600_p13 }
  0x2f   : > { %p2120_p2 = pnand %p2612_p1, %p2118_p0 }
  0x31   : > { %p2121_p3 = pneg %p2120_p2 }
  0x33   : > { %p2126_p8 = pnand %p2124_p6, %p2121_p3 }
  0x35   : > { %2129 = shalt.err (!%p2126_p8)
}
  0x36   : > { %s2130_s11 = scalar_lea.vmem %s255_s9, 256  ;;  %p2138_p5 = scmp.lt.s32.totalorder %s255_s9, %s255_s9 }
  0x37   : > { %p2131_p10 = scmp.ne.s32.totalorder %s255_s9, %s2130_s11  ;;  %p2139_p9 = scmp.lt.s32.totalorder %s2130_s11, %s2130_s11 }
  0x39   : > { %p2133_p12 = pnand %p2131_p10, %p2612_p1  ;;  %p2140_p7 = por %p2139_p9, %p2138_p5 }
  0x3b   : > { %p2134_p4 = pneg %p2133_p12 }
  0x3d   : > { %p2141_p11 = pnand %p2140_p7, %p2134_p4 }
  0x3f   : > { %2144 = shalt.err (!%p2141_p11)
}
  0x40   : > { %s3205_s12 = smov 64   ;;  %s3207_s18 = smov 4  }
  0x41   : > { %1887 = dma.hbm_to_vmem [thread:$0]  (!%p2600_p13), %s3247_s4, 256, %s255_s9, [#allocation15], %s3205_s12, %s3205_s12, %s3207_s18  }
  0x42   : > { %s42_s14 = sadd.s32 1, %s2419_s22  ;;  %s45_s26 = sadd.s32 1, %s2423_s23 }
  0x43   : > { %p43_p4 = scmp.ge.s32.totalorder %s42_s14, 2  ;;  %s52_s11 = sadd.s32 1, %s2407_s19 }
  0x44   : > { %p59_p5 = scmp.ne.s32.totalorder %s2407_s19, %s2403_s0  ;;  %p60_p7 = scmp.eq.s32.totalorder %s2427_s24, 0 }
  0x45   : > { %s3306_s14 = smov (%p43_p4, %s42_s14), 0  ;;  %s3308_s26 = smov (!%p43_p4, %s45_s26), %s2423_s23 }
  0x46   : > { %3249 = sst [smem:[#allocation34_spill]] %s3306_s14  ;;  %s76_s9 = ssub.s32 %s2419_s22, %s3306_s14 }
  0x47   : > { %p47_p9 = scmp.ge.s32.totalorder %s3308_s26, 2  ;;  %s80_s28 = sadd.s32 1, %s2395_s17 }
  0x48   : > { %p2646_p11 = por %p60_p7, %p59_p5  ;;  %p87_p0 = scmp.ne.s32.totalorder %s2395_s17, %s2391_s16 }
  0x49   : > { %s3310_s26 = smov (%p47_p9, %s3308_s26), 0  ;;  %p93_p3 = scmp.ne.s32.totalorder %s2391_s16, %s2387_s15 }
  0x4a   : > { %3251 = sst [smem:[#allocation35_spill]] %s3310_s26  ;;  %p2654_p2 = por %p87_p0, %p60_p7 }
  0x4b   : > { %s49_s18 = ssub.s32 %s2423_s23, %s3310_s26  ;;  %p3253_p6 = scmp.eq.s32.totalorder %s2573_s25, 3 }
  0x4c   : > { %p50_p10 = scmp.eq.s32.totalorder %s49_s18, 0  ;;  %s77_s14 = sor.u32 %s76_s9, %s49_s18 }
  0x4d   : > { %p2667_p8 = por %p3253_p6, %p59_p5  ;;  %p78_p12 = scmp.eq.s32.totalorder %s77_s14, 0 }
  0x4e   : > { %p3256_p4 = scmp.eq.s32.totalorder %s2573_s25, 0  ;;  %p1911_p7 = scmp.lt.s32.totalorder %s2427_s24, 4 }
  0x4f   : > { %s3254_s4 = scalar_select %p2667_p8, 1, 0 }
  0x50   : > { %p2673_p9 = por %p93_p3, %p3256_p4  ;;  %s318_s15 = sand.u32 1, %s2427_s24  }
  0x51   : > { %3255 = sst [smem:[#allocation36_spill]] %s3254_s4  ;;  %s320_s26 = sand.u32 1, %s2395_s17  }
  0x52   : > { %s3257_s8 = scalar_select %p2673_p9, 1, 0 }
  0x53   : > { %s2678_s21 = scalar_select %p50_p10, %s2407_s19, %s52_s11  }
  0x54   : > { %3258 = sst [smem:[#allocation37_spill]] %s3257_s8  ;;  %p2688_p5 = pnand %p1911_p7, %p2646_p11 }
  0x55   : > { %3259 = sst [smem:[#allocation38_spill]] %s2678_s21  ;;  %s2692_s18 = sshll.u32 %s320_s26, 2 }
  0x56   : > { %s2681_s5 = scalar_select %p78_p12, %s2395_s17, %s80_s28  }
  0x57   : > { %s3261_s20 = scalar_select %p2688_p5, 1, 0 }
  0x58   : > { %3260 = sst [smem:[#allocation39_spill]] %s2681_s5  ;;  %s1712_s14 = sshll.u32 %s2423_s23, 1 }
  0x59   : > { %s327_s9 = sadd.s32 %s2419_s22, %s1712_s14  ;;  %s322_s16 = scalar_lea.vmem [#allocation11], %s2692_s18 }
  0x5a   : > { %s1713_s4 = sshll.u32 %s327_s9, 6  ;;  %s331_s8 = sshll.u32 %s322_s16, 4  ;;  %s2702_s8 = int_to_ptr.vmem [resolvable:$true] %s331_s8 }
  0x5b   : > { %s3262_s2 = sld [smem:[#allocation40_spill]]  ;;  %p2706_p11 = pnand %p1911_p7, %p2654_p2 }
  0x5c   : > { %s2713_s16 = scalar_lea.hbm %s3194_s3, %s1713_s4  ;;  %s2433_s21 = smov [#allocation16]  }
  0x5d   : > { %s3263_s26 = scalar_select %p2706_p11, 1, 0 }
  0x5e   : > { %s2715_s9 = sshll.u32 %s2433_s21, 4  ;;  %s2717_s11 = scalar_lea.sflag [#allocation12], %s318_s15  ;;  %s271_s9 = int_to_ptr.vmem [resolvable:$true] %s2715_s9 }
  0x5f   : > { %p3225_p3 = pneg %p2706_p11 }
  0x61   : > { %s2700_s28 = scalar_lea.hbm %s3262_s2, %s1713_s4  ;;  %s2150_s13 = scalar_lea.hbm %s3262_s2, 256 }
  0x62   : > { %s2145_s22 = scalar_lea.hbm %s2700_s28, 64  ;;  %p2151_p10 = scmp.lt.u32.totalorder %s2700_s28, %s3262_s2 }
  0x63   : > { %p2146_p0 = scmp.ne.s32.totalorder %s2700_s28, %s2145_s22  ;;  %p2152_p12 = scmp.lt.u32.totalorder %s2150_s13, %s2145_s22 }
  0x64   : > { %p2154_p7 = scmp.lt.u32.totalorder %s2145_s22, %s2700_s28 }
  0x65   : > { %p2148_p2 = pnand %p3225_p3, %p2146_p0  ;;  %p2153_p4 = por %p2152_p12, %p2151_p10 }
  0x67   : > { %p2149_p6 = pneg %p2148_p2  ;;  %p2155_p8 = por %p2154_p7, %p2153_p4 }
  0x69   : > { %p2156_p9 = pnand %p2155_p8, %p2149_p6 }
  0x6b   : > { %2159 = shalt.err (!%p2156_p9)
}
  0x6c   : > { %s2160_s15 = scalar_lea.vmem %s2702_s8, 64  ;;  %s2434_s5 = smov [#allocation11]  }
  0x6d   : > { %p2161_p0 = scmp.ne.s32.totalorder %s2702_s8, %s2160_s15  ;;  %s2165_s21 = sshll.u32 %s2434_s5, 4  ;;  %s2166_s21 = int_to_ptr.vmem [resolvable:$false] %s2165_s21 }
  0x6e   : > { %s2167_s12 = scalar_lea.vmem %s2166_s21, 128  ;;  %p2168_p13 = scmp.lt.s32.totalorder %s2702_s8, %s2166_s21 }
  0x6f   : > { %p2163_p2 = pnand %p2161_p0, %p3225_p3  ;;  %p2169_p10 = scmp.lt.s32.totalorder %s2167_s12, %s2160_s15 }
  0x71   : > { %p2164_p5 = pneg %p2163_p2  ;;  %p2170_p12 = por %p2169_p10, %p2168_p13 }
  0x73   : > { %p2171_p4 = pnand %p2170_p12, %p2164_p5 }
  0x75   : > { %2174 = shalt.err (!%p2171_p4)
}
  0x76   : > { %1900 = dma.hbm_to_vmem [thread:$0]  (!%p2706_p11), %s2700_s28, 64, %s2702_s8, %s2717_s11  }
  0x77   : > { %s2175_s14 = scalar_lea.hbm %s3197_s6, 256 }
  0x78   : > { %p2176_p8 = scmp.ne.s32.totalorder %s3197_s6, %s2175_s14  ;;  %p2182_p5 = scmp.lt.u32.totalorder %s2175_s14, %s3197_s6 }
  0x7a   : > { %p2178_p13 = pnand %p2176_p8, %p2612_p1 }
  0x7c   : > { %p2179_p9 = pneg %p2178_p13 }
  0x7e   : > { %p2184_p6 = pnand %p2182_p5, %p2179_p9 }
  0x80   : > { %2187 = shalt.err (!%p2184_p6)
}
  0x81   : > { %s2188_s12 = scalar_lea.vmem %s271_s9, 256  ;;  %p2196_p10 = scmp.lt.s32.totalorder %s271_s9, %s271_s9 }
  0x82   : > { %p2189_p7 = scmp.ne.s32.totalorder %s271_s9, %s2188_s12  ;;  %p2197_p12 = scmp.lt.s32.totalorder %s2188_s12, %s2188_s12 }
  0x84   : > { %p2191_p0 = pnand %p2189_p7, %p2612_p1  ;;  %p2198_p4 = por %p2197_p12, %p2196_p10 }
  0x86   : > { %p2192_p2 = pneg %p2191_p0 }
  0x88   : > { %p2199_p3 = pnand %p2198_p4, %p2192_p2 }
  0x8a   : > { %2202 = shalt.err (!%p2199_p3)
}
  0x8b   : > { %p3264_p8 = scmp.ne.s32.totalorder %s3246_s10, 0  ;;  %s3265_s8 = smov 4  }
  0x8c   : > { %s3266_s28 = smov 64   ;;  %s2435_s14 = smov [#allocation17]  }
  0x8d   : > { %1890 = dma.hbm_to_vmem [thread:$0]  (!%p3264_p8), %s3197_s6, 256, %s271_s9, [#allocation15], %s3266_s28, %s3266_s28, %s3265_s8  }
  0x8e   : > { %s283_s4 = sshll.u32 %s2435_s14, 4  ;;  %s297_s5 = sand.u32 1, %s2407_s19   ;;  %s284_s4 = int_to_ptr.vmem [resolvable:$true] %s283_s4 }
  0x8f   : > { %s2203_s12 = scalar_lea.hbm %s3198_s7, 256 }
  0x90   : > { %p2204_p3 = scmp.ne.s32.totalorder %s3198_s7, %s2203_s12  ;;  %p2210_p5 = scmp.lt.u32.totalorder %s2203_s12, %s3198_s7 }
  0x92   : > { %p2206_p13 = pnand %p2204_p3, %p2612_p1 }
  0x94   : > { %p2207_p9 = pneg %p2206_p13 }
  0x96   : > { %p2212_p6 = pnand %p2210_p5, %p2207_p9 }
  0x98   : > { %2215 = shalt.err (!%p2212_p6)
}
  0x99   : > { %s2216_s9 = scalar_lea.vmem %s284_s4, 256  ;;  %p2224_p10 = scmp.lt.s32.totalorder %s284_s4, %s284_s4 }
  0x9a   : > { %p2217_p7 = scmp.ne.s32.totalorder %s284_s4, %s2216_s9  ;;  %p2225_p12 = scmp.lt.s32.totalorder %s2216_s9, %s2216_s9 }
  0x9c   : > { %p2219_p0 = pnand %p2217_p7, %p2612_p1  ;;  %p2226_p4 = por %p2225_p12, %p2224_p10 }
  0x9e   : > { %p2220_p2 = pneg %p2219_p0 }
  0xa0   : > { %p2227_p11 = pnand %p2226_p4, %p2220_p2 }
  0xa2   : > { %2230 = shalt.err (!%p2227_p11)
}
  0xa3   : > { %1893 = dma.hbm_to_vmem [thread:$0]  (!%p3264_p8), %s3198_s7, 256, %s284_s4, [#allocation18], %s3266_s28, %s3266_s28, %s3265_s8  }
  0xa4   : > { %s1708_s24 = sshll.u32 %s297_s5, 3  ;;  %s1754_s30 = sshll.u32 %s2423_s23, 7 }
  0xa5   : > { %s2793_s15 = scalar_lea.hbm %s3192_s1, %s1754_s30  ;;  %s301_s10 = scalar_lea.vmem [#allocation8], %s1708_s24 }
  0xa6   : > { %s308_s21 = sshll.u32 %s301_s10, 4  ;;  %s342_s12 = scalar_lea.vmem [#allocation13], %s2692_s18  ;;  %s2796_s21 = int_to_ptr.vmem [resolvable:$true] %s308_s21 }
  0xa7   : > { %s351_s22 = sshll.u32 %s342_s12, 4  ;;  %s2800_s4 = scalar_lea.sflag [#allocation9], %s297_s5  ;;  %s2798_s22 = int_to_ptr.vmem [resolvable:$true] %s351_s22 }
  0xa8   : > { %s2231_s9 = scalar_lea.hbm %s2793_s15, 128  ;;  %p3267_p11 = scmp.ne.s32.totalorder %s3261_s20, 0 }
  0xa9   : > { %p2232_p1 = scmp.ne.s32.totalorder %s2793_s15, %s2231_s9  ;;  %s2236_s24 = scalar_lea.hbm %s3192_s1, 256 }
  0xaa   : > { %p2233_p8 = pneg %p3267_p11  ;;  %p2237_p9 = scmp.lt.u32.totalorder %s2793_s15, %s3192_s1 }
  0xab   : > { %p2238_p5 = scmp.lt.u32.totalorder %s2236_s24, %s2231_s9  ;;  %p2240_p7 = scmp.lt.u32.totalorder %s2231_s9, %s2793_s15 }
  0xac   : > { %p2234_p3 = pnand %p2233_p8, %p2232_p1 }
  0xad   : > { %p2239_p6 = por %p2238_p5, %p2237_p9 }
  0xae   : > { %p2235_p13 = pneg %p2234_p3 }
  0xaf   : > { %p2241_p0 = por %p2240_p7, %p2239_p6 }
  0xb1   : > { %p2242_p2 = pnand %p2241_p0, %p2235_p13 }
  0xb3   : > { %2245 = shalt.err (!%p2242_p2)
}
  0xb4   : > { %s2246_s5 = scalar_lea.vmem %s2796_s21, 128  ;;  %s2436_s13 = smov [#allocation8]  }
  0xb5   : > { %p2247_p10 = scmp.ne.s32.totalorder %s2796_s21, %s2246_s5  ;;  %s2251_s14 = sshll.u32 %s2436_s13, 4  ;;  %s2252_s14 = int_to_ptr.vmem [resolvable:$false] %s2251_s14 }
  0xb6   : > { %s2253_s10 = scalar_lea.vmem %s2252_s14, 256  ;;  %p2254_p1 = scmp.lt.s32.totalorder %s2796_s21, %s2252_s14 }
  0xb7   : > { %p2249_p12 = pnand %p2247_p10, %p2233_p8  ;;  %p2255_p3 = scmp.lt.s32.totalorder %s2253_s10, %s2246_s5 }
  0xb9   : > { %p2250_p4 = pneg %p2249_p12  ;;  %p2256_p9 = por %p2255_p3, %p2254_p1 }
  0xbb   : > { %p2257_p5 = pnand %p2256_p9, %p2250_p4 }
  0xbd   : > { %2260 = shalt.err (!%p2257_p5)
}
  0xbe   : > { %1897 = dma.hbm_to_vmem [thread:$0]  (!%p3267_p11), %s2793_s15, 128, %s2796_s21, %s2800_s4, %s3266_s28, %s3266_s28, %s3265_s8  }
  0xbf   : > { %s2261_s12 = scalar_lea.hbm %s2713_s16, 64  ;;  %p3268_p13 = scmp.ne.s32.totalorder %s3263_s26, 0 }
  0xc0   : > { %p2262_p8 = scmp.ne.s32.totalorder %s2713_s16, %s2261_s12  ;;  %s2266_s2 = scalar_lea.hbm %s3194_s3, 256 }
  0xc1   : > { %p3269_p6 = pneg %p3268_p13  ;;  %p2267_p2 = scmp.lt.u32.totalorder %s2713_s16, %s3194_s3 }
  0xc2   : > { %p2268_p10 = scmp.lt.u32.totalorder %s2266_s2, %s2261_s12  ;;  %p2270_p4 = scmp.lt.u32.totalorder %s2261_s12, %s2713_s16 }
  0xc3   : > { %p2264_p7 = pnand %p2262_p8, %p3269_p6 }
  0xc4   : > { %p2269_p12 = por %p2268_p10, %p2267_p2 }
  0xc5   : > { %p2265_p0 = pneg %p2264_p7 }
  0xc6   : > { %p2271_p1 = por %p2270_p4, %p2269_p12 }
  0xc8   : > { %p2272_p3 = pnand %p2271_p1, %p2265_p0 }
  0xca   : > { %2275 = shalt.err (!%p2272_p3)
}
  0xcb   : > { %s2276_s8 = scalar_lea.vmem %s2798_s22, 64  ;;  %p3270_p9 = pmov %p3269_p6 }
  0xcc   : > { %p2277_p11 = scmp.ne.s32.totalorder %s2798_s22, %s2276_s8  ;;  %s2437_s28 = smov [#allocation13]  }
  0xcd   : > { %s2281_s15 = sshll.u32 %s2437_s28, 4  ;;  %s2282_s15 = int_to_ptr.vmem [resolvable:$false] %s2281_s15 }
  0xce   : > { %p2279_p5 = pnand %p2277_p11, %p3270_p9  ;;  %s2283_s21 = scalar_lea.vmem %s2282_s15, 128 }
  0xcf   : > { %p2284_p6 = scmp.lt.s32.totalorder %s2798_s22, %s2282_s15  ;;  %p2285_p7 = scmp.lt.s32.totalorder %s2283_s21, %s2276_s8 }
  0xd0   : > { %p2280_p8 = pneg %p2279_p5 }
  0xd1   : > { %p2286_p2 = por %p2285_p7, %p2284_p6 }
  0xd3   : > { %p2287_p10 = pnand %p2286_p2, %p2280_p8 }
  0xd5   : > { %2290 = shalt.err (!%p2287_p10)
}
  0xd6   : > { %1903 = dma.hbm_to_vmem [thread:$0]  (!%p3268_p13), %s2713_s16, 64, %s2798_s22, %s2717_s11  }
  0xd7   : > { %p3271_p0 = scmp.ne.s32.totalorder %s3245_s29, 0 }
  0xd8   : > { %s2858_s4 = sand.u32 (!%p3271_p0), 1, %s2403_s0   ;;  %p3272_p12 = scmp.ne.s32.totalorder (!%p3271_p0), %s3242_s27, 0 }
  0xd9   : > { %360 = sbr.rel (%p3271_p0) target bundleno = 2127 (0x84f), region = 48  ;;  %s1718_s18 = sshll.u32 (!%p3271_p0), %s2858_s4, 3 }
  0xda   : > { %s363_s30 = scalar_lea.sflag (!%p3271_p0), [#allocation9], %s2858_s4  ;;  %s2862_s5 = scalar_lea.vmem (!%p3271_p0), [#allocation8], %s1718_s18 }
  0xe0   : > { %2366 = dma.done.wait (%p3272_p12), %s363_s30, 128  }
  0xe1   : > { %2368 = vsyncadd (%p3272_p12), %s363_s30, 4294967168  ;;  %s3273_s26 = sld [smem:[#allocation26_spill]]  ;;  %s3274_s16 = sld [smem:[#allocation37_spill]] }
  0xe2   : > { %s371_s29 = sand.u32 1, %s2573_s25  }
  0xe3   : > { %s372_s13 = scalar_lea.sflag [#allocation12], %s371_s29 }
  0xe7   : > { %s373_s11 = sand.u32 1, %s3273_s26   ;;  %p3275_p13 = scmp.ne.s32.totalorder %s3274_s16, 0 }
  0xe8   : > { %s2870_s22 = sshll.u32 %s373_s11, 2 }
  0xe9   : > { %s375_s14 = scalar_lea.vmem [#allocation11], %s2870_s22 }
  0xea   : > { %2370 = dma.done.wait (%p3275_p13), %s372_s13, 128  }
  0xeb   : > { %2372 = vsyncadd (%p3275_p13), %s372_s13, 4294967168  ;;  %s384_s10 = scalar_lea.vmem [#allocation13], %s2870_s22  ;;  %p3276_p4 = scmp.eq.s32.totalorder %s2573_s25, 0 }
  0xed   : > { %2374 = dma.done.wait (%p3276_p4), [#allocation15], 512   ;;  %p3277_p1 = pmov %p3276_p4 }
  0xef   : > { %2376 = vsyncadd (%p3277_p1), [#allocation15], 4294966784  ;;  %p3278_p3 = pmov %p3277_p1 }
  0xf0   : > { %p3279_p11 = pmov %p3277_p1 }
  0xf1   : > { %2378 = dma.done.wait (%p3278_p3), [#allocation18], 256  }
  0xf2   : > { %2380 = vsyncadd (%p3279_p11), [#allocation18], 4294967040  ;;  %s1724_s27 = sshll.u32 %s2858_s4, 4  ;;  %s3280_s9 = sld [smem:[#allocation29_spill]] }
  0xf3   : > { %s2887_s12 = scalar_lea.vmem [#allocation19], %s1724_s27 }
  0xf8   : > { %p1725_p9 = scmp.ne.s32.totalorder %s3280_s9, 0 }
  0xf9   : > { %vm526_vm0 = vcmask (!%p1725_p9), 7168   ;;  %v2438_v0 = vmov (!%p1725_p9), 0.0   ;;  %v2439_v1 = vmov (!%p1725_p9), -1e+30   ;;  %v2031_v2 = vld [vmem:[#allocation14] sm:$0xff] (!%p1725_p9)   ;;  %vm2440_vm1 = vmmov (!%p1725_p9), 0  }
  0xfa   : > { %441 = sbr.rel (%p1725_p9) target bundleno = 594 (0x252), region = 76  ;;  %1784 = vmatprep.subr.bf16.mxu0 (!%p1725_p9), %v2438_v0  ;;  %527 = vst.msk [vmem:[#allocation3] sm:$0xff] (!%p1725_p9), %vm526_vm0, %v2439_v1  ;;  %528 = vst.msk [vmem:[#allocation3 + $0x8] sm:$0xff] (!%p1725_p9), %vm526_vm0, %v2439_v1  ;;  %1788 = vmatprep.mubr.msk.bf16.mxu0 (!%p1725_p9), %vm2440_vm1, %v2438_v0  ;;  %v2032_v3 = vld [vmem:[#allocation14 + $0x8] sm:$0xff] (!%p1725_p9)   ;;  %vm465_vm2 = vcmask (!%p1725_p9), 261120   ;;  %vm521_vm3 = vcmask (!%p1725_p9), 64512  }
  0xfb   : > { %529 = vst.msk [vmem:[#allocation3 + $0x10] sm:$0xff] (!%p1725_p9), %vm526_vm0, %v2439_v1  ;;  %530 = vst.msk [vmem:[#allocation3 + $0x18] sm:$0xff] (!%p1725_p9), %vm526_vm0, %v2439_v1  ;;  %1785 = vmatpush3.bf16.msra.mxu0 (!%p1725_p9), %v2031_v2  ;;  %v2033_v4 = vld [vmem:[%s2862_s5] sm:$0xff] (!%p1725_p9)   ;;  %s2441_s25 = smov (!%p1725_p9), 104   ;;  %s2442_s20 = smov (!%p1725_p9), 120  }
  0xfc   : > { %531 = vst.msk [vmem:[#allocation3 + $0x20] sm:$0xff] (!%p1725_p9), %vm526_vm0, %v2439_v1  ;;  %532 = vst.msk [vmem:[#allocation3 + $0x28] sm:$0xff] (!%p1725_p9), %vm526_vm0, %v2439_v1  ;;  %1786 = vmatprep.subr.bf16.mxu0 (!%p1725_p9), %v2438_v0  ;;  %s2443_s2 = smov (!%p1725_p9), 112  }
  0xfd   : > { %533 = vst.msk [vmem:[#allocation3 + $0x30] sm:$0xff] (!%p1725_p9), %vm526_vm0, %v2439_v1  ;;  %534 = vst.msk [vmem:[#allocation3 + $0x38] sm:$0xff] (!%p1725_p9), %vm526_vm0, %v2439_v1 }
  0xfe   : > { %535 = vst.msk [vmem:[#allocation4] sm:$0xff] (!%p1725_p9), %vm526_vm0, %v2438_v0  ;;  %536 = vst.msk [vmem:[#allocation4 + $0x8] sm:$0xff] (!%p1725_p9), %vm526_vm0, %v2438_v0 }
  0xff   : > { %537 = vst.msk [vmem:[#allocation4 + $0x10] sm:$0xff] (!%p1725_p9), %vm526_vm0, %v2438_v0  ;;  %538 = vst.msk [vmem:[#allocation4 + $0x18] sm:$0xff] (!%p1725_p9), %vm526_vm0, %v2438_v0  ;;  %1787 = vmatpush3.bf16.msra.mxu0 (!%p1725_p9), %v2032_v3 }
 0x100   : > { %539 = vst.msk [vmem:[#allocation4 + $0x20] sm:$0xff] (!%p1725_p9), %vm526_vm0, %v2438_v0  ;;  %540 = vst.msk [vmem:[#allocation4 + $0x28] sm:$0xff] (!%p1725_p9), %vm526_vm0, %v2438_v0 }
 0x101   : > { %541 = vst.msk [vmem:[#allocation4 + $0x30] sm:$0xff] %vm526_vm0, %v2438_v0  ;;  %542 = vst.msk [vmem:[#allocation4 + $0x38] sm:$0xff] %vm526_vm0, %v2438_v0 }
 0x102   : > { %1789 = vmatmul.mubr.msk.bf16.vlgmr.msra.gmra.mrb[0].mxu0 %vm465_vm2, %v2033_v4  ;;  %543 = vst.msk [vmem:[#allocation5] sm:$0xff] %vm521_vm3, %v2438_v0  ;;  %544 = vst.msk [vmem:[#allocation5 + $0x8] sm:$0xff] %vm521_vm3, %v2438_v0 }
 0x103   : > { %545 = vst.msk [vmem:[#allocation5 + $0x10] sm:$0xff] %vm521_vm3, %v2438_v0  ;;  %546 = vst.msk [vmem:[#allocation5 + $0x18] sm:$0xff] %vm521_vm3, %v2438_v0 }
 0x104   : > { %547 = vst.msk [vmem:[#allocation5 + $0x20] sm:$0xff] %vm521_vm3, %v2438_v0  ;;  %548 = vst.msk [vmem:[#allocation5 + $0x28] sm:$0xff] %vm521_vm3, %v2438_v0 }
 0x105   : > { %549 = vst.msk [vmem:[#allocation5 + $0x30] sm:$0xff] %vm521_vm3, %v2438_v0  ;;  %550 = vst.msk [vmem:[#allocation5 + $0x38] sm:$0xff] %vm521_vm3, %v2438_v0 }
 0x1d5   : > { %v503_v5 = vpop.f32.mrb[0].mxu0 }
 0x1d6   : > { %v1790_v6 = vpop.f32.mrb[1].mxu0 }
 0x1d7   : > { %v506_v7 = vpop.f32.mrb[2].mxu0 }
 0x1d8   : > { %v510_v8 = vpack.c.bf16 %v506_v7, %v503_v5  ;;  %v1791_v9 = vpop.f32.mrb[3].mxu0 }
 0x1da   : > { %522 = vst.msk [vmem:[#allocation2] sm:$0xff] %vm521_vm3, %v510_v8  ;;  %518 = vrot.lane.b32.xlu1 %v510_v8, %s2441_s25  ;;  %512 = vrot.lane.b32.xlu0 %v510_v8, %s2442_s20 }
 0x1de   : > { %515 = vrot.lane.b32.xlu0 %v510_v8, %s2443_s2 }
 0x24c   : > { %v519_v10 = vpop.permute.xlu1 %518  ;;  %v513_v11 = vpop.permute.xlu0 %512 }
 0x24d   : > { %525 = vst.msk [vmem:[#allocation2 + $0x18] sm:$0xff] %vm521_vm3, %v519_v10  ;;  %523 = vst.msk [vmem:[#allocation2 + $0x8] sm:$0xff] %vm521_vm3, %v513_v11 }
 0x250   : > { %v516_v12 = vpop.permute.xlu0 %515 }
 0x251   : > { %524 = vst.msk [vmem:[#allocation2 + $0x10] sm:$0xff] %vm521_vm3, %v516_v12 }
 0x252 PF: > { %s3281_s8 = sld [smem:[#allocation42_spill]]  ;;  %v2444_v14 = vmov 0.0   ;;  %vm2445_vm4 = vmmov 0   ;;  %v551_v16 = vld [vmem:[%s375_s14] sm:$0xf]  ;;  %vm569_vm5 = vcmask 261120   ;;  %v689_v42 = vlaneseq }
 0x253   : > { %1792 = vmatprep.subr.bf16.mxu0 %v2444_v14  ;;  %1800 = vmatprep.subr.bf16.mxu1 %v2444_v14  ;;  %v2038_v17 = vld [vmem:[#allocation16] sm:$0xff]   ;;  %v2039_v18 = vld [vmem:[#allocation16 + $0x8] sm:$0xff]   ;;  %vm701_vm6 = vcmask 64512   ;;  %s2446_s21 = smov 104   ;;  %s2447_s18 = smov 120   ;;  %v697_v26 = vld [vmem:[#allocation2] sm:$0xff] }
 0x254   : > { %1796 = vmatprep.mubr.msk.bf16.mxu0 %vm2445_vm4, %v2444_v14  ;;  %1804 = vmatprep.mubr.msk.bf16.mxu1 %vm2445_vm4, %v2444_v14  ;;  %v552_v19 = vld [vmem:[%s384_s10] sm:$0xf]  ;;  %s2448_s30 = smov 112   ;;  %v698_v36 = vld [vmem:[#allocation2 + $0x8] sm:$0xff]  ;;  %vm1146_vm7 = vcmask 1043456   ;;  %s3282_s5 = sld [smem:[#allocation30_spill]] }
 0x255   : > { %1801 = vmatpush3.bf16.msra.mxu1 %v2038_v17  ;;  %s3283_s26 = sld [smem:[#allocation29_spill]]  ;;  %v700_v41 = vld [vmem:[#allocation2 + $0x18] sm:$0xff]  ;;  %v690_v43 = vand.u32 127, %v689_v42  ;;  %v2449_v47 = vmov -1e+30   ;;  %v2450_v57 = vmov 0  }
 0x256   : > { %1802 = vmatprep.subr.bf16.mxu1 %v2444_v14  ;;  %2034 = vset.pattern.permute.xlu0 %v2450_v57  ;;  %vm1074_vm9 = vcmask 7168  }
 0x257   : > { %2035 = vset.pattern.permute.xlu1 %v2450_v57 }
 0x258   : > { %v2036_v13 = vld [vmem:[%s3281_s8] sm:$0xff]   ;;  %v2037_v15 = vld [vmem:[%s3281_s8 + $0x8] sm:$0xff]  }
 0x259   : > { %1793 = vmatpush3.bf16.msra.mxu0 %v2036_v13  ;;  %1803 = vmatpush3.bf16.msra.mxu1 %v2039_v18  ;;  %v699_v39 = vld [vmem:[#allocation2 + $0x10] sm:$0xff] }
 0x25a   : > { %1794 = vmatprep.subr.bf16.mxu0 %v2444_v14  ;;  %1814 = vmatprep.subr.bf16.mxu1 %v2444_v14  ;;  %s693_s16 = sld [smem:[#allocation7 + %s3282_s5]] }
 0x25b   : > { %s1736_s29 = sshll.u32 %s3283_s26, 3  ;;  %p1745_p5 = scmp.ne.s32.totalorder %s3283_s26, 1 }
 0x25c   : > { %1805 = vmatmul.mubr.msk.bf16.vlgmr.msra.gmra.mrb[0].mxu1 %vm569_vm5, %v552_v19  ;;  %v691_v44 = vstv %s1736_s29  ;;  %v898_v19 = vld [vmem:[#allocation3] sm:$0xff]  ;;  %vm2453_vm10 = vmmov (!%p1745_p5), 0   ;;  %s2454_s11 = smov (!%p1745_p5), 16   ;;  %s2455_s22 = smov (!%p1745_p5), 8   ;;  %vm1458_vm11 = vcmask (!%p1745_p5), 130048   ;;  %vm1461_vm12 = vcmask (!%p1745_p5), 195584  }
 0x25d   : > { %1795 = vmatpush3.bf16.msra.mxu0 %v2037_v15  ;;  %1816 = vmatprep.mubr.msk.bf16.mxu1 %vm2445_vm4, %v2444_v14  ;;  %v692_v45 = vadd.s32 %v691_v44, %v690_v43  ;;  %s2456_s13 = smov (!%p1745_p5), 24  }
 0x25e   : > { %1808 = vmatprep.subr.bf16.mxu0 %v2444_v14 }
 0x260   : > { %1797 = vmatmul.mubr.msk.bf16.vlgmr.msra.gmra.mrb[0].mxu0 %vm569_vm5, %v551_v16  ;;  %v694_v46 = vstv %s693_s16 }
 0x261   : > { %1810 = vmatprep.mubr.msk.bf16.mxu0 %vm2445_vm4, %v2444_v14  ;;  %vm695_vm8 = vcmp.lt.s32.totalorder %v692_v45, %v694_v46  ;;  %v3019_v45 = vld [vmem:[#allocation3 + $0x38] sm:$0xff] }
 0x262   : > { %v696_v48 = vsel %vm695_vm8, 0.0, %v2449_v47 }
 0x32f   : > { %v666_v27 = vpop.f32.mrb[0].mxu1 }
 0x330   : > { %v1806_v28 = vpop.f32.mrb[1].mxu1  ;;  %v2956_v37 = vpack.c.bf16 %v666_v27, %v666_v27 }
 0x331   : > { %v669_v29 = vpop.f32.mrb[2].mxu1 }
 0x332   : > { %v1807_v30 = vpop.f32.mrb[3].mxu1  ;;  %v1148_v40 = vsel %vm1146_vm7, %v2956_v37, 0  ;;  %v900_v29 = vld [vmem:[#allocation3 + $0x10] sm:$0xff] }
 0x333   : > { %v607_v20 = vpop.f32.mrb[0].mxu0 }
 0x334   : > { %v672_v21 = vpack.c.bf16 %v607_v20, %v607_v20  ;;  %v1798_v22 = vpop.f32.mrb[1].mxu0 }
 0x335   : > { %v610_v23 = vpop.f32.mrb[2].mxu0 }
 0x336   : > { %678 = vrot.lane.b32.xlu1 %v672_v21, %s2446_s21  ;;  %674 = vrot.lane.b32.xlu0 %v672_v21, %s2447_s18  ;;  %v1799_v24 = vpop.f32.mrb[3].mxu0  ;;  %v706_v25 = vsel %vm701_vm6, %v672_v21, 0 }
 0x337   : > { %1809 = vmatpush3.bf16.xpose.msra.mxu0 %v706_v25 }
 0x338   : > { %1820 = vmatprep.subr.bf16.mxu0 %v2444_v14 }
 0x33a   : > { %676 = vrot.lane.b32.xlu0 %v672_v21, %s2448_s30  ;;  %v899_v21 = vld [vmem:[#allocation3 + $0x8] sm:$0xff] }
 0x33e   : > { %1811 = vmatmul.mubr.msk.bf16.vlgmr.msra.gmra.mrb[4].mxu0 %vm701_vm6, %v697_v26 }
 0x33f   : > { %1822 = vmatprep.mubr.msk.bf16.mxu0 %vm2445_vm4, %v2444_v14 }
 0x3a8   : > { %v675_v31 = vpop.permute.xlu0 %674  ;;  %v679_v35 = vpop.permute.xlu1 %678 }
 0x3a9   : > { %v753_v32 = vsel %vm701_vm6, %v675_v31, 0  ;;  %v847_v38 = vsel %vm701_vm6, %v679_v35, 0  ;;  %v901_v31 = vld [vmem:[#allocation3 + $0x18] sm:$0xff] }
 0x3aa   : > { %1815 = vmatpush3.bf16.xpose.msra.mxu1 %v753_v32 }
 0x3ab   : > { %1826 = vmatprep.subr.bf16.mxu1 %v2444_v14 }
 0x3ac   : > { %v677_v33 = vpop.permute.xlu0 %676 }
 0x3ad   : > { %v800_v34 = vsel %vm701_vm6, %v677_v33, 0 }
 0x3ae   : > { %1821 = vmatpush3.bf16.xpose.msra.mxu0 %v800_v34  ;;  %v902_v34 = vld [vmem:[#allocation3 + $0x20] sm:$0xff] }
 0x3af   : > { %1832 = vmatprep.subr.bf16.mxu0 %v2444_v14 }
 0x3b1   : > { %1817 = vmatmul.mubr.msk.bf16.vlgmr.msra.gmra.mrb[4].mxu1 %vm701_vm6, %v698_v36 }
 0x3b2   : > { %1827 = vmatpush3.bf16.xpose.msra.mxu1 %v847_v38  ;;  %1828 = vmatprep.mubr.msk.bf16.mxu1 %vm2445_vm4, %v2444_v14  ;;  %v903_v38 = vld [vmem:[#allocation3 + $0x28] sm:$0xff] }
 0x3b3   : > { %1838 = vmatprep.subr.bf16.mxu1 %v2444_v14 }
 0x3b5   : > { %1823 = vmatmul.mubr.msk.bf16.vlgmr.msra.gmra.mrb[8].mxu0 %vm701_vm6, %v699_v39 }
 0x3b6   : > { %1833 = vmatpush3.bf16.msra.mxu0 %v1148_v40  ;;  %1834 = vmatprep.mubr.msk.bf16.mxu0 %vm2445_vm4, %v2444_v14 }
 0x3b7   : > { %1844 = vmatprep.subr.bf16.mxu0 %v2444_v14 }
 0x3b9   : > { %1829 = vmatmul.mubr.msk.bf16.vlgmr.msra.gmra.mrb[8].mxu1 %vm701_vm6, %v700_v41  ;;  %v3016_v41 = vld [vmem:[#allocation3 + $0x30] sm:$0xff] }
 0x3ba   : > { %1840 = vmatprep.mubr.msk.bf16.mxu1 %vm2445_vm4, %v2444_v14 }
 0x411   : > { %v742_v49 = vpop.f32.mrb[4].mxu0 }
 0x412   : > { %v2975_v50 = vadd.f32 %v742_v49, %v696_v48  ;;  %v1812_v51 = vpop.f32.mrb[5].mxu0 }
 0x413   : > { %v745_v52 = vpop.f32.mrb[6].mxu0 }
 0x414   : > { %v2977_v53 = vadd.f32 %v745_v52, %v696_v48  ;;  %v906_v54 = vsel %vm701_vm6, %v2975_v50, -inf  ;;  %v1813_v55 = vpop.f32.mrb[7].mxu0 }
 0x415   : > { %907 = vmax.xlane.f32.xlu1 %v906_v54 }
 0x416   : > { %v909_v56 = vsel %vm701_vm6, %v2977_v53, -inf }
 0x417   : > { %910 = vmax.xlane.f32.xlu0 %v909_v56 }
 0x484   : > { %v789_v58 = vpop.f32.mrb[4].mxu1 }
 0x485   : > { %v2983_v59 = vadd.f32 %v789_v58, %v696_v48  ;;  %v1818_v60 = vpop.f32.mrb[5].mxu1 }
 0x486   : > { %v792_v61 = vpop.f32.mrb[6].mxu1 }
 0x487   : > { %v2985_v62 = vadd.f32 %v792_v61, %v696_v48  ;;  %v1819_v63 = vpop.f32.mrb[7].mxu1  ;;  %v912_v0 = vsel %vm701_vm6, %v2983_v59, -inf }
 0x488   : > { %913 = vmax.xlane.f32.xlu0 %v912_v0  ;;  %v836_v1 = vpop.f32.mrb[8].mxu0 }
 0x489   : > { %v2989_v2 = vadd.f32 %v836_v1, %v696_v48  ;;  %v1824_v3 = vpop.f32.mrb[9].mxu0  ;;  %v915_v4 = vsel %vm701_vm6, %v2985_v62, -inf }
 0x48a   : > { %916 = vmax.xlane.f32.xlu1 %v915_v4  ;;  %v839_v5 = vpop.f32.mrb[10].mxu0 }
 0x48b   : > { %v2993_v6 = vadd.f32 %v839_v5, %v696_v48  ;;  %v1825_v7 = vpop.f32.mrb[11].mxu0  ;;  %v918_v8 = vsel %vm701_vm6, %v2989_v2, -inf }
 0x48c   : > { %v883_v9 = vpop.f32.mrb[8].mxu1  ;;  %919 = vmax.xlane.f32.xlu0 %v918_v8 }
 0x48d   : > { %v2997_v10 = vadd.f32 %v883_v9, %v696_v48  ;;  %v921_v11 = vsel %vm701_vm6, %v2993_v6, -inf  ;;  %v1830_v12 = vpop.f32.mrb[9].mxu1 }
 0x48e   : > { %922 = vmax.xlane.f32.xlu1 %v921_v11  ;;  %v886_v13 = vpop.f32.mrb[10].mxu1 }
 0x48f   : > { %v924_v15 = vsel %vm701_vm6, %v2997_v10, -inf  ;;  %v3003_v16 = vadd.f32 %v886_v13, %v696_v48  ;;  %v1831_v17 = vpop.f32.mrb[11].mxu1 }
 0x490   : > { %925 = vmax.xlane.f32.xlu0 %v924_v15 }
 0x491   : > { %v927_v18 = vsel %vm701_vm6, %v3003_v16, -inf }
 0x492   : > { %928 = vmax.xlane.f32.xlu1 %v927_v18 }
 0x4a2   : > { %v908_v20 = vpop.xlane.xlu1 %907 }
 0x4a3   : > { %v930_v22 = vmax.f32 %v898_v19, %v908_v20 }
 0x4a4   : > { %v911_v23 = vpop.xlane.xlu0 %910 }
 0x4a5   : > { %v938_v24 = vsub.f32 %v898_v19, %v930_v22  ;;  %1348 = vst.msk [vmem:[#allocation3] sm:$0xff] %vm1074_vm9, %v930_v22  ;;  %v931_v25 = vmax.f32 %v899_v21, %v911_v23 }
 0x4a6   : > { %964 = vperm.xlu0 %2034, %v930_v22  }
 0x4a7   : > { %v939_v26 = vsub.f32 %v899_v21, %v931_v25  ;;  %1349 = vst.msk [vmem:[#allocation3 + $0x8] sm:$0xff] %vm1074_vm9, %v931_v25  ;;  %969 = vperm.xlu1 %2035, %v931_v25   ;;  %v946_v60 = vmul.f32 1.442695, %v938_v24 }
 0x4a9   : > { %v948_v27 = vmul.f32 1.442695, %v939_v26 }
 0x4aa   : > { %684 = vrot.lane.b32.xlu0 %v2956_v37, %s2448_s30 }
 0x4ab   : > { %2040 = vpow2.f32 %v948_v27 }
 0x4b5   : > { %v3011_v28 = vpop.eup %2040 }
 0x4b6   : > { %1098 = vperm.xlu0 %2034, %v3011_v28  }
 0x515   : > { %v914_v30 = vpop.xlane.xlu0 %913 }
 0x516   : > { %v932_v32 = vmax.f32 %v900_v29, %v914_v30 }
 0x517   : > { %v917_v33 = vpop.xlane.xlu1 %916 }
 0x518   : > { %1350 = vst.msk [vmem:[#allocation3 + $0x10] sm:$0xff] %vm1074_vm9, %v932_v32  ;;  %v933_v35 = vmax.f32 %v901_v31, %v917_v33  ;;  %974 = vperm.xlu1 %2035, %v932_v32   ;;  %v940_v61 = vsub.f32 %v900_v29, %v932_v32 }
 0x519   : > { %v920_v36 = vpop.xlane.xlu0 %919 }
 0x51a   : > { %1351 = vst.msk [vmem:[#allocation3 + $0x18] sm:$0xff] %vm1074_vm9, %v933_v35  ;;  %v934_v39 = vmax.f32 %v902_v34, %v920_v36  ;;  %v950_v1 = vmul.f32 1.442695, %v940_v61 }
 0x51b   : > { %v923_v40 = vpop.xlane.xlu1 %922 }
 0x51c   : > { %v942_v42 = vsub.f32 %v902_v34, %v934_v39  ;;  %1352 = vst.msk [vmem:[#allocation3 + $0x20] sm:$0xff] %vm1074_vm9, %v934_v39  ;;  %v935_v43 = vmax.f32 %v903_v38, %v923_v40  ;;  %984 = vperm.xlu1 %2035, %v934_v39  }
 0x51d   : > { %v926_v44 = vpop.xlane.xlu0 %925 }
 0x51e   : > { %v954_v46 = vmul.f32 1.442695, %v942_v42  ;;  %1353 = vst.msk [vmem:[#allocation3 + $0x28] sm:$0xff] %vm1074_vm9, %v935_v43  ;;  %v3023_v47 = vmax.f32 %v3016_v41, %v926_v44  ;;  %v943_v3 = vsub.f32 %v903_v38, %v935_v43 }
 0x51f   : > { %v929_v48 = vpop.xlane.xlu1 %928 }
 0x520   : > { %2042 = vpow2.f32 %v954_v46  ;;  %979 = vperm.xlu1 %2035, %v933_v35   ;;  %v944_v49 = vsub.f32 %v3016_v41, %v3023_v47  ;;  %1354 = vst.msk [vmem:[#allocation3 + $0x30] sm:$0xff] %vm1074_vm9, %v3023_v47  ;;  %v3030_v51 = vmax.f32 %v3019_v45, %v929_v48  ;;  %v956_v7 = vmul.f32 1.442695, %v943_v3  ;;  %v1027_v41 = vld [vmem:[#allocation4 + $0x8] sm:$0xff] }
 0x522   : > { %v945_v52 = vsub.f32 %v3019_v45, %v3030_v51  ;;  %1355 = vst.msk [vmem:[#allocation3 + $0x38] sm:$0xff] %vm1074_vm9, %v3030_v51  ;;  %v1026_v45 = vld [vmem:[#allocation4] sm:$0xff] }
 0x524   : > { %989 = vperm.xlu1 %2035, %v935_v43  }
 0x525   : > { %v965_v54 = vpop.permute.xlu0 %964 }
 0x526   : > { %v1002_v55 = vsub.f32 %v2975_v50, %v965_v54  ;;  %v970_v56 = vpop.permute.xlu1 %969  ;;  %v941_v50 = vsub.f32 %v901_v31, %v933_v35 }
 0x527   : > { %v1003_v57 = vsub.f32 %v2977_v53, %v970_v56 }
 0x528   : > { %v1010_v58 = vmul.f32 1.442695, %v1002_v55  ;;  %994 = vperm.xlu1 %2035, %v3023_v47   ;;  %v952_v53 = vmul.f32 1.442695, %v941_v50  ;;  %v1035_v47 = vmul.f32 %v3011_v28, %v1027_v41 }
 0x529   : > { %v1012_v63 = vmul.f32 1.442695, %v1003_v57  ;;  %v685_v8 = vpop.permute.xlu0 %684 }
 0x52a   : > { %v3039_v0 = vpop.eup %2042  ;;  %2044 = vpow2.f32 %v1010_v58  ;;  %v1242_v12 = vsel %vm1146_vm7, %v685_v8, 0  ;;  %v960_v58 = vmul.f32 1.442695, %v945_v52 }
 0x52b   : > { %2046 = vpow2.f32 %v1012_v63  ;;  %1113 = vperm.xlu0 %2034, %v3039_v0   ;;  %v958_v63 = vmul.f32 1.442695, %v944_v49 }
 0x52c   : > { %999 = vperm.xlu1 %2035, %v3030_v51   ;;  %2048 = vpow2.f32 %v946_v60 }
 0x52d   : > { %2050 = vpow2.f32 %v950_v1 }
 0x52e   : > { %2052 = vpow2.f32 %v952_v53 }
 0x52f   : > { %2054 = vpow2.f32 %v956_v7 }
 0x530   : > { %682 = vrot.lane.b32.xlu1 %v2956_v37, %s2447_s18 }
 0x534   : > { %v2045_v4 = vpop.eup %2044  ;;  %686 = vrot.lane.b32.xlu1 %v2956_v37, %s2446_s21 }
 0x535   : > { %v2047_v5 = vpop.eup %2046  ;;  %v1042_v17 = vsel %vm701_vm6, %v2045_v4, 0.0  ;;  %v1099_v1 = vpop.permute.xlu0 %1098 }
 0x536   : > { %v1139_v9 = vpack.c.bf16 %v2047_v5, %v2045_v4  ;;  %v3047_v11 = vpop.eup %2048  ;;  %v1045_v18 = vsel %vm701_vm6, %v2047_v5, 0.0 }
 0x537   : > { %v3054_v13 = vpop.eup %2050  ;;  %v1034_v51 = vmul.f32 %v3047_v11, %v1026_v45 }
 0x538   : > { %1093 = vperm.xlu1 %2035, %v3047_v11   ;;  %1835 = vmatmul.mubr.msk.bf16.vlgmr.msra.gmra.mrb[12].mxu0 %vm701_vm6, %v1139_v9  ;;  %v3057_v37 = vpop.eup %2052 }
 0x539   : > { %1845 = vmatpush3.bf16.msra.mxu0 %v1242_v12  ;;  %1846 = vmatprep.mubr.msk.bf16.mxu0 %vm2445_vm4, %v2444_v14  ;;  %v3060_v15 = vpop.eup %2054  ;;  %v1083_v12 = vld [vmem:[#allocation5] sm:$0xff] }
 0x53c   : > { %1103 = vperm.xlu1 %2035, %v3054_v13  }
 0x540   : > { %1108 = vperm.xlu1 %2035, %v3057_v37  }
 0x544   : > { %1118 = vperm.xlu1 %2035, %v3060_v15  }
 0x54a   : > { %1043 = vadd.xlane.f32.xlu0 %v1042_v17  ;;  %v1084_v17 = vld [vmem:[#allocation5 + $0x8] sm:$0xff] }
 0x54b   : > { %v1132_v11 = vmul.f32 %v1099_v1, %v1084_v17 }
 0x568   : > { %1046 = vadd.xlane.f32.xlu1 %v1045_v18 }
 0x597   : > { %v975_v19 = vpop.permute.xlu1 %974 }
 0x598   : > { %v1004_v20 = vsub.f32 %v2983_v59, %v975_v19 }
 0x59a   : > { %v1014_v21 = vmul.f32 1.442695, %v1004_v20 }
 0x59b   : > { %v985_v22 = vpop.permute.xlu1 %984 }
 0x59c   : > { %2056 = vpow2.f32 %v1014_v21  ;;  %v1006_v23 = vsub.f32 %v2989_v2, %v985_v22 }
 0x59e   : > { %v1018_v24 = vmul.f32 1.442695, %v1006_v23 }
 0x59f   : > { %v980_v25 = vpop.permute.xlu1 %979 }
 0x5a0   : > { %2058 = vpow2.f32 %v1018_v24  ;;  %v1005_v26 = vsub.f32 %v2985_v62, %v980_v25  ;;  %v1028_v25 = vld [vmem:[#allocation4 + $0x10] sm:$0xff] }
 0x5a1   : > { %v1036_v28 = vmul.f32 %v3054_v13, %v1028_v25 }
 0x5a2   : > { %v1016_v27 = vmul.f32 1.442695, %v1005_v26 }
 0x5a3   : > { %v990_v29 = vpop.permute.xlu1 %989 }
 0x5a4   : > { %2060 = vpow2.f32 %v1016_v27  ;;  %v1007_v30 = vsub.f32 %v2993_v6, %v990_v29  ;;  %v1030_v27 = vld [vmem:[#allocation4 + $0x20] sm:$0xff] }
 0x5a6   : > { %v2057_v31 = vpop.eup %2056  ;;  %v1020_v32 = vmul.f32 1.442695, %v1007_v30  ;;  %v1038_v30 = vmul.f32 %v3039_v0, %v1030_v27 }
 0x5a7   : > { %v995_v33 = vpop.permute.xlu1 %994  ;;  %v1048_v59 = vsel %vm701_vm6, %v2057_v31, 0.0 }
 0x5a8   : > { %2062 = vpow2.f32 %v1020_v32  ;;  %v1008_v34 = vsub.f32 %v2997_v10, %v995_v33  ;;  %1049 = vadd.xlane.f32.xlu0 %v1048_v59  ;;  %v1029_v32 = vld [vmem:[#allocation4 + $0x18] sm:$0xff] }
 0x5a9   : > { %v1037_v59 = vmul.f32 %v3057_v37, %v1029_v32 }
 0x5aa   : > { %v2059_v2 = vpop.eup %2058  ;;  %v1022_v35 = vmul.f32 1.442695, %v1008_v34  ;;  %v1114_v53 = vpop.permute.xlu0 %1113 }
 0x5ab   : > { %v1000_v36 = vpop.permute.xlu1 %999  ;;  %v1054_v38 = vsel %vm701_vm6, %v2059_v2, 0.0 }
 0x5ac   : > { %2064 = vpow2.f32 %v1022_v35  ;;  %v1009_v62 = vsub.f32 %v3003_v16, %v1000_v36  ;;  %1055 = vadd.xlane.f32.xlu1 %v1054_v38  ;;  %v1032_v38 = vld [vmem:[#allocation4 + $0x30] sm:$0xff] }
 0x5ae   : > { %v2061_v39 = vpop.eup %2060  ;;  %v1024_v6 = vmul.f32 1.442695, %v1009_v62 }
 0x5af   : > { %v683_v40 = vpop.permute.xlu1 %682  ;;  %v1051_v42 = vsel %vm701_vm6, %v2061_v39, 0.0  ;;  %v1140_v44 = vpack.c.bf16 %v2061_v39, %v2057_v31 }
 0x5b0   : > { %2066 = vpow2.f32 %v1024_v6  ;;  %v1195_v43 = vsel %vm1146_vm7, %v683_v40, 0  ;;  %1052 = vadd.xlane.f32.xlu0 %v1051_v42  ;;  %v1033_v6 = vld [vmem:[#allocation4 + $0x38] sm:$0xff] }
 0x5b1   : > { %1839 = vmatpush3.bf16.msra.mxu1 %v1195_v43  ;;  %2068 = vpow2.f32 %v960_v58 }
 0x5b2   : > { %v2063_v10 = vpop.eup %2062  ;;  %1850 = vmatprep.subr.bf16.mxu1 %v2444_v14  ;;  %2070 = vpow2.f32 %v958_v63 }
 0x5b3   : > { %v687_v46 = vpop.permute.xlu1 %686  ;;  %v1057_v48 = vsel %vm701_vm6, %v2063_v10, 0.0  ;;  %v1141_v54 = vpack.c.bf16 %v2063_v10, %v2059_v2  ;;  %v1031_v2 = vld [vmem:[#allocation4 + $0x28] sm:$0xff]  ;;  %v1085_v10 = vld [vmem:[#allocation5 + $0x10] sm:$0xff] }
 0x5b4   : > { %v1289_v16 = vsel %vm1146_vm7, %v687_v46, 0  ;;  %1058 = vadd.xlane.f32.xlu0 %v1057_v48  ;;  %1841 = vmatmul.mubr.msk.bf16.vlgmr.msra.gmra.mrb[12].mxu1 %vm701_vm6, %v1140_v44  ;;  %v1039_v13 = vmul.f32 %v3060_v15, %v1031_v2  ;;  %v1087_v44 = vld [vmem:[#allocation5 + $0x20] sm:$0xff]  ;;  %v1086_v46 = vld [vmem:[#allocation5 + $0x18] sm:$0xff]  ;;  %v1088_v48 = vld [vmem:[#allocation5 + $0x28] sm:$0xff] }
 0x5b5   : > { %1847 = vmatmul.mubr.msk.bf16.vlgmr.msra.gmra.mrb[16].mxu0 %vm701_vm6, %v1141_v54  ;;  %1851 = vmatpush3.bf16.msra.mxu1 %v1289_v16  ;;  %v1135_v54 = vmul.f32 %v1114_v53, %v1087_v44 }
 0x5b6   : > { %v2065_v55 = vpop.eup %2064  ;;  %1852 = vmatprep.mubr.msk.bf16.mxu1 %vm2445_vm4, %v2444_v14 }
 0x5b7   : > { %v1060_v56 = vsel %vm701_vm6, %v2065_v55, 0.0  ;;  %v1094_v4 = vpop.permute.xlu1 %1093 }
 0x5b8   : > { %1061 = vadd.xlane.f32.xlu1 %v1060_v56  ;;  %v1131_v18 = vmul.f32 %v1094_v4, %v1083_v12  ;;  %v1090_v4 = vld [vmem:[#allocation5 + $0x38] sm:$0xff] }
 0x5ba   : > { %v2067_v57 = vpop.eup %2066 }
 0x5bb   : > { %v1063_v60 = vsel %vm701_vm6, %v2067_v57, 0.0  ;;  %v1142_v61 = vpack.c.bf16 %v2067_v57, %v2065_v55  ;;  %v2069_v14 = vpop.eup %2068  ;;  %v1104_v5 = vpop.permute.xlu1 %1103 }
 0x5bc   : > { %1064 = vadd.xlane.f32.xlu0 %v1063_v60  ;;  %v2071_v50 = vpop.eup %2070  ;;  %v1041_v42 = vmul.f32 %v2069_v14, %v1033_v6  ;;  %v1133_v15 = vmul.f32 %v1104_v5, %v1085_v10 }
 0x5bd   : > { %1853 = vmatmul.mubr.msk.bf16.vlgmr.msra.gmra.mrb[16].mxu1 %vm701_vm6, %v1142_v61  ;;  %v1040_v0 = vmul.f32 %v2071_v50, %v1032_v38 }
 0x5bf   : > { %v1109_v7 = vpop.permute.xlu1 %1108 }
 0x5c0   : > { %v1134_v55 = vmul.f32 %v1109_v7, %v1086_v46 }
 0x5c3   : > { %v1119_v8 = vpop.permute.xlu1 %1118 }
 0x5c4   : > { %v1136_v60 = vmul.f32 %v1119_v8, %v1088_v48 }
 0x5c9   : > { %1128 = vperm.xlu1 %2035, %v2069_v14  }
 0x5d2   : > { %1123 = vperm.xlu0 %2034, %v2071_v50  }
 0x5d7   : > { %v1044_v52 = vpop.xlane.xlu0 %1043 }
 0x5d8   : > { %v1066_v3 = vadd.f32 %v1044_v52, %v1034_v51 }
 0x5da   : > { %1075 = vst.msk [vmem:[#allocation4] sm:$0xff] %vm1074_vm9, %v1066_v3  ;;  %v1089_v3 = vld [vmem:[#allocation5 + $0x30] sm:$0xff] }
 0x5e1   : > { %v1368_v25 = vld [vmem:[#allocation4] sm:$0xff] (!%p1745_p5) }
 0x5f5   : > { %v1047_v49 = vpop.xlane.xlu1 %1046 }
 0x5f6   : > { %v1067_v9 = vadd.f32 %v1047_v49, %v1035_v47 }
 0x5f8   : > { %1076 = vst.msk [vmem:[#allocation4 + $0x8] sm:$0xff] %vm1074_vm9, %v1067_v9 }
 0x60b   : > { %v1184_v19 = vpop.f32.mrb[12].mxu0 }
 0x60c   : > { %v1332_v20 = vadd.f32 %v1184_v19, %v1131_v18  ;;  %v1836_v21 = vpop.f32.mrb[13].mxu0 }
 0x60d   : > { %v1187_v22 = vpop.f32.mrb[14].mxu0 }
 0x60e   : > { %1340 = vst.msk [vmem:[#allocation5] sm:$0xff] %vm701_vm6, %v1332_v20  ;;  %v1333_v23 = vadd.f32 %v1187_v22, %v1132_v11  ;;  %v1837_v24 = vpop.f32.mrb[15].mxu0  ;;  %v2451_v20 = vmov (!%p1745_p5), 0  }
 0x60f   : > { %2073 = vset.pattern.permute.xlu1 (!%p1745_p5), %v2451_v20  ;;  %2072 = vset.pattern.permute.xlu0 (!%p1745_p5), %v2451_v20  ;;  %v1369_v24 = vld [vmem:[#allocation4 + $0x8] sm:$0xff] (!%p1745_p5) }
 0x610   : > { %1341 = vst.msk [vmem:[#allocation5 + $0x8] sm:$0xff] %vm701_vm6, %v1333_v23 }
 0x635   : > { %v1050_v26 = vpop.xlane.xlu0 %1049 }
 0x636   : > { %v1068_v29 = vadd.f32 %v1050_v26, %v1036_v28 }
 0x638   : > { %1077 = vst.msk [vmem:[#allocation4 + $0x10] sm:$0xff] %vm1074_vm9, %v1068_v29 }
 0x639   : > { %v1056_v31 = vpop.xlane.xlu1 %1055 }
 0x63a   : > { %v1070_v33 = vadd.f32 %v1056_v31, %v1038_v30 }
 0x63c   : > { %1079 = vst.msk [vmem:[#allocation4 + $0x20] sm:$0xff] %vm1074_vm9, %v1070_v33 }
 0x63d   : > { %v1053_v34 = vpop.xlane.xlu0 %1052 }
 0x63e   : > { %v1069_v35 = vadd.f32 %v1053_v34, %v1037_v59  ;;  %v2089_v59 = vld [vmem:[#allocation17] sm:$0xff] (!%p1745_p5)   ;;  %v2452_v34 = vmov (!%p1745_p5), 0.0  }
 0x63f   : > { %v1370_v19 = vld [vmem:[#allocation4 + $0x10] sm:$0xff] (!%p1745_p5)  ;;  %1856 = vmatprep.subr.bf16.mxu0 (!%p1745_p5), %v2452_v34  ;;  %1860 = vmatprep.mubr.msk.bf16.mxu0 (!%p1745_p5), %vm2453_vm10, %v2452_v34 }
 0x640   : > { %1078 = vst.msk [vmem:[#allocation4 + $0x18] sm:$0xff] %vm1074_vm9, %v1069_v35  ;;  %1857 = vmatpush3.bf16.msra.mxu0 (!%p1745_p5), %v2089_v59 }
 0x641   : > { %v1059_v36 = vpop.xlane.xlu0 %1058  ;;  %1858 = vmatprep.subr.bf16.mxu0 (!%p1745_p5), %v2452_v34 }
 0x642   : > { %v1071_v62 = vadd.f32 %v1059_v36, %v1039_v13  ;;  %v2090_v13 = vld [vmem:[#allocation17 + $0x8] sm:$0xff] (!%p1745_p5)  }
 0x643   : > { %v1372_v18 = vld [vmem:[#allocation4 + $0x20] sm:$0xff] (!%p1745_p5) }
 0x644   : > { %1080 = vst.msk [vmem:[#allocation4 + $0x28] sm:$0xff] %vm1074_vm9, %v1071_v62  ;;  %2091 = vrcp.f32 (!%p1745_p5), %v1372_v18  ;;  %1859 = vmatpush3.bf16.msra.mxu0 (!%p1745_p5), %v2090_v13 }
 0x645   : > { %v1062_v39 = vpop.xlane.xlu1 %1061  ;;  %2093 = vrcp.f32 (!%p1745_p5), %v1370_v19 }
 0x646   : > { %v1072_v40 = vadd.f32 %v1062_v39, %v1040_v0 }
 0x647   : > { %v1371_v21 = vld [vmem:[#allocation4 + $0x18] sm:$0xff] (!%p1745_p5) }
 0x648   : > { %1081 = vst.msk [vmem:[#allocation4 + $0x30] sm:$0xff] %vm1074_vm9, %v1072_v40 }
 0x649   : > { %v1065_v37 = vpop.xlane.xlu0 %1064  ;;  %v1129_v5 = vpop.permute.xlu1 %1128 }
 0x64a   : > { %v1073_v43 = vadd.f32 %v1065_v37, %v1041_v42  ;;  %v1138_v41 = vmul.f32 %v1129_v5, %v1090_v4 }
 0x64b   : > { %v1373_v11 = vld [vmem:[#allocation4 + $0x28] sm:$0xff] (!%p1745_p5) }
 0x64c   : > { %1082 = vst.msk [vmem:[#allocation4 + $0x38] sm:$0xff] %vm1074_vm9, %v1073_v43  ;;  %2095 = vrcp.f32 (!%p1745_p5), %v1373_v11 }
 0x64d   : > { %2097 = vrcp.f32 (!%p1745_p5), %v1371_v21 }
 0x64e   : > { %v2092_v28 = vpop.eup (!%p1745_p5), %2091 }
 0x64f   : > { %v1374_v23 = vld [vmem:[#allocation4 + $0x30] sm:$0xff] (!%p1745_p5)  ;;  %v2094_v26 = vpop.eup (!%p1745_p5), %2093  ;;  %1406 = vperm.xlu1 (!%p1745_p5), %2073, %v2092_v28  }
 0x650   : > { %1396 = vperm.xlu0 (!%p1745_p5), %2072, %v2094_v26  }
 0x651   : > { %v1124_v53 = vpop.permute.xlu0 %1123 }
 0x652   : > { %v1137_v7 = vmul.f32 %v1124_v53, %v1089_v3 }
 0x653   : > { %v1375_v22 = vld [vmem:[#allocation4 + $0x38] sm:$0xff] (!%p1745_p5) }
 0x654   : > { %2099 = vrcp.f32 (!%p1745_p5), %v1375_v22 }
 0x655   : > { %2101 = vrcp.f32 (!%p1745_p5), %v1374_v23 }
 0x656   : > { %2103 = vrcp.f32 (!%p1745_p5), %v1369_v24  ;;  %v2096_v27 = vpop.eup (!%p1745_p5), %2095 }
 0x657   : > { %2105 = vrcp.f32 (!%p1745_p5), %v1368_v25  ;;  %v2098_v29 = vpop.eup (!%p1745_p5), %2097  ;;  %1411 = vperm.xlu1 (!%p1745_p5), %2073, %v2096_v27  }
 0x658   : > { %1401 = vperm.xlu0 (!%p1745_p5), %2072, %v2098_v29  }
 0x65e   : > { %v2100_v30 = vpop.eup (!%p1745_p5), %2099 }
 0x65f   : > { %v2102_v31 = vpop.eup (!%p1745_p5), %2101  ;;  %1421 = vperm.xlu1 (!%p1745_p5), %2073, %v2100_v30  }
 0x660   : > { %v2104_v32 = vpop.eup (!%p1745_p5), %2103  ;;  %1416 = vperm.xlu0 (!%p1745_p5), %2072, %v2102_v31  }
 0x661   : > { %v2106_v33 = vpop.eup (!%p1745_p5), %2105 }
 0x663   : > { %1391 = vperm.xlu1 (!%p1745_p5), %2073, %v2104_v32  }
 0x664   : > { %1386 = vperm.xlu0 (!%p1745_p5), %2072, %v2106_v33  }
 0x687   : > { %v1231_v16 = vpop.f32.mrb[12].mxu1 }
 0x688   : > { %v1334_v56 = vadd.f32 %v1231_v16, %v1133_v15  ;;  %v1842_v57 = vpop.f32.mrb[13].mxu1  ;;  %v1278_v58 = vpop.f32.mrb[16].mxu0 }
 0x689   : > { %v1336_v61 = vadd.f32 %v1278_v58, %v1135_v54  ;;  %v1234_v63 = vpop.f32.mrb[14].mxu1  ;;  %v1848_v1 = vpop.f32.mrb[17].mxu0 }
 0x68a   : > { %1342 = vst.msk [vmem:[#allocation5 + $0x10] sm:$0xff] %vm701_vm6, %v1334_v56  ;;  %v1335_v14 = vadd.f32 %v1234_v63, %v1134_v55  ;;  %v1843_v50 = vpop.f32.mrb[15].mxu1  ;;  %v1281_v45 = vpop.f32.mrb[18].mxu0 }
 0x68b   : > { %1344 = vst.msk [vmem:[#allocation5 + $0x20] sm:$0xff] %vm701_vm6, %v1336_v61  ;;  %v1337_v51 = vadd.f32 %v1281_v45, %v1136_v60  ;;  %v1849_v52 = vpop.f32.mrb[19].mxu0  ;;  %v1361_v60 = vld [vmem:[#allocation5 + $0x8] sm:$0xff] (!%p1745_p5)  ;;  %v1360_v61 = vld [vmem:[#allocation5] sm:$0xff] (!%p1745_p5) }
 0x68c   : > { %1343 = vst.msk [vmem:[#allocation5 + $0x18] sm:$0xff] %vm701_vm6, %v1335_v14 }
 0x68d   : > { %1345 = vst.msk [vmem:[#allocation5 + $0x28] sm:$0xff] %vm701_vm6, %v1337_v51 }
 0x68f   : > { %1359 = sbr.rel (%p1745_p5) target bundleno = 2099 (0x833), region = 80 }
 0x690   : > { %v1325_v8 = vpop.f32.mrb[16].mxu1 }
 0x691   : > { %v1338_v47 = vadd.f32 %v1325_v8, %v1137_v7  ;;  %v1854_v49 = vpop.f32.mrb[17].mxu1  ;;  %v1362_v62 = vld [vmem:[#allocation5 + $0x10] sm:$0xff] (!%p1745_p5) }
 0x692   : > { %v1328_v9 = vpop.f32.mrb[18].mxu1  ;;  %v1364_v36 = vld [vmem:[#allocation5 + $0x20] sm:$0xff] (!%p1745_p5) }
 0x693   : > { %1346 = vst.msk [vmem:[#allocation5 + $0x30] sm:$0xff] %vm701_vm6, %v1338_v47  ;;  %v1339_v12 = vadd.f32 %v1328_v9, %v1138_v41  ;;  %v1855_v17 = vpop.f32.mrb[19].mxu1  ;;  %v1363_v0 = vld [vmem:[#allocation5 + $0x18] sm:$0xff] (!%p1745_p5) }
 0x694   : > { %v1365_v38 = vld [vmem:[#allocation5 + $0x28] sm:$0xff] (!%p1745_p5) }
 0x695   : > { %1347 = vst.msk [vmem:[#allocation5 + $0x38] sm:$0xff] %vm701_vm6, %v1339_v12 }
 0x69a   : > { %v1366_v46 = vld [vmem:[#allocation5 + $0x30] sm:$0xff] }
 0x69c   : > { %v1367_v10 = vld [vmem:[#allocation5 + $0x38] sm:$0xff] }
 0x6ce   : > { %v1407_v2 = vpop.permute.xlu1 %1406 }
 0x6cf   : > { %v1397_v35 = vpop.permute.xlu0 %1396  ;;  %v1428_v6 = vmul.f32 %v1407_v2, %v1364_v36 }
 0x6d0   : > { %v1426_v37 = vmul.f32 %v1397_v35, %v1362_v62 }
 0x6d6   : > { %v1412_v39 = vpop.permute.xlu1 %1411 }
 0x6d7   : > { %v1429_v40 = vmul.f32 %v1412_v39, %v1365_v38  ;;  %v1402_v42 = vpop.permute.xlu0 %1401 }
 0x6d8   : > { %v1427_v43 = vmul.f32 %v1402_v42, %v1363_v0 }
 0x6d9   : > { %v2079_v44 = vpack.i.bf16 %v1429_v40, %v1428_v6 }
 0x6da   : > { %v2074_v15 = vpack.i.bf16 %v1427_v43, %v1426_v37 }
 0x6db   : > { %2080 = vrot.lane.b32.xlu1 %v2079_v44, %s2454_s11 }
 0x6dc   : > { %2075 = vrot.lane.b32.xlu0 %v2074_v15, %s2455_s22 }
 0x6de   : > { %v1422_v48 = vpop.permute.xlu1 %1421 }
 0x6df   : > { %v1431_v54 = vmul.f32 %v1422_v48, %v1367_v10  ;;  %v1417_v16 = vpop.permute.xlu0 %1416 }
 0x6e0   : > { %v1430_v55 = vmul.f32 %v1417_v16, %v1366_v46 }
 0x6e2   : > { %v2084_v56 = vpack.i.bf16 %v1431_v54, %v1430_v55  ;;  %v1392_v57 = vpop.permute.xlu1 %1391 }
 0x6e3   : > { %v1387_v58 = vpop.permute.xlu0 %1386  ;;  %v1425_v14 = vmul.f32 %v1392_v57, %v1361_v60 }
 0x6e4   : > { %2085 = vrot.lane.b32.xlu0 %v2084_v56, %s2456_s13  ;;  %v1424_v50 = vmul.f32 %v1387_v58, %v1360_v61 }
 0x74d   : > { %v2081_v63 = vpop.permute.xlu1 %2080 }
 0x74e   : > { %v2076_v1 = vpop.permute.xlu0 %2075  ;;  %v2083_v52 = vunpack.i.h.bf16 %v2081_v63  ;;  %v2082_v3 = vunpack.i.l.bf16 %v2081_v63 }
 0x74f   : > { %v2078_v45 = vunpack.i.h.bf16 %v2076_v1  ;;  %v2077_v51 = vunpack.i.l.bf16 %v2076_v1 }
 0x751   : > { %v1456_v53 = vsel %vm701_vm6, %v1424_v50, %v2077_v51  ;;  %v1457_v4 = vsel %vm701_vm6, %v1425_v14, %v2078_v45 }
 0x752   : > { %v1459_v41 = vsel %vm1458_vm11, %v1456_v53, %v2082_v3  ;;  %v1460_v47 = vsel %vm1458_vm11, %v1457_v4, %v2083_v52 }
 0x756   : > { %v2086_v5 = vpop.permute.xlu0 %2085 }
 0x757   : > { %v2088_v7 = vunpack.i.h.bf16 %v2086_v5  ;;  %v2087_v8 = vunpack.i.l.bf16 %v2086_v5 }
 0x759   : > { %v1462_v49 = vsel %vm1461_vm12, %v1459_v41, %v2087_v8  ;;  %v1463_v9 = vsel %vm1461_vm12, %v1460_v47, %v2088_v7 }
 0x75a   : > { %v1464_v12 = vpack.c.bf16 %v1463_v9, %v1462_v49 }
 0x75c   : > { %1861 = vmatmul.mubr.msk.bf16.vlgmr.msra.gmra.mrb[0].mxu0 %vm569_vm5, %v1464_v12 }
 0x82f   : > { %v1518_v17 = vpop.f32.mrb[0].mxu0 }
 0x830   : > { %1525 = vst.msk [vmem:[%s2887_s12] sm:$0xff] %vm569_vm5, %v1518_v17  ;;  %v1862_v18 = vpop.f32.mrb[1].mxu0 }
 0x831   : > { %v1521_v19 = vpop.f32.mrb[2].mxu0 }
 0x832   : > { %1526 = vst.msk [vmem:[%s2887_s12 + $0x8] sm:$0xff] %vm569_vm5, %v1521_v19  ;;  %v1863_v11 = vpop.f32.mrb[3].mxu0 }
 0x833 PF: > { %s3284_s14 = sld [smem:[#allocation30_spill]]  ;;  %s3285_s10 = sld [smem:[#allocation36_spill]] }
 0x834   : > { %s3286_s20 = sld [smem:[#allocation43_spill]]  ;;  %s1541_s24 = sshll.u32 %s2887_s12, 4  ;;  %s3128_s24 = int_to_ptr.vmem [resolvable:$true] %s1541_s24 }
 0x835   : > { %s1528_s28 = scalar_lea.sflag [#allocation10], %s2858_s4  ;;  %s2291_s15 = scalar_lea.vmem %s3128_s24, 256 }
 0x836   : > { %p2292_p8 = scmp.ne.s32.totalorder %s3128_s24, %s2291_s15  ;;  %s2457_s21 = smov [#allocation19]  }
 0x837   : > { %s2295_s18 = sshll.u32 %s2457_s21, 4  ;;  %s2296_s18 = int_to_ptr.vmem [resolvable:$false] %s2295_s18 }
 0x838   : > { %s2297_s30 = scalar_lea.vmem %s2296_s18, 512  ;;  %p2298_p10 = scmp.lt.s32.totalorder %s3128_s24, %s2296_s18 }
 0x839   : > { %s1755_s27 = sshll.u32 %s3284_s14, 8  ;;  %p3288_p6 = scmp.ne.s32.totalorder %s3285_s10, 0 }
 0x83a   : > { %s3287_s2 = smov %s3286_s20  ;;  %s3125_s17 = scalar_lea.hbm %s3286_s20, %s1755_s27 }
 0x83b   : > { %p2293_p7 = pnand %p2292_p8, %p3288_p6  ;;  %p2299_p0 = scmp.lt.s32.totalorder %s2297_s30, %s2291_s15 }
 0x83d   : > { %p2294_p2 = pneg %p2293_p7  ;;  %p2300_p12 = por %p2299_p0, %p2298_p10 }
 0x83f   : > { %p2301_p13 = pnand %p2300_p12, %p2294_p2 }
 0x841   : > { %2304 = shalt.err (!%p2301_p13)
}
 0x842   : > { %s2305_s12 = scalar_lea.hbm %s3125_s17, 256  ;;  %s2309_s16 = scalar_lea.hbm %s3287_s2, 512 }
 0x843   : > { %p2306_p4 = scmp.ne.s32.totalorder %s3125_s17, %s2305_s12  ;;  %p2310_p11 = scmp.lt.u32.totalorder %s3125_s17, %s3287_s2 }
 0x844   : > { %p2311_p9 = scmp.lt.u32.totalorder %s2309_s16, %s2305_s12  ;;  %p2313_p8 = scmp.lt.u32.totalorder %s2305_s12, %s3125_s17 }
 0x845   : > { %p2307_p1 = pnand %p2306_p4, %p3288_p6 }
 0x846   : > { %p2312_p5 = por %p2311_p9, %p2310_p11 }
 0x847   : > { %p2308_p3 = pneg %p2307_p1 }
 0x848   : > { %p2314_p7 = por %p2313_p8, %p2312_p5 }
 0x84a   : > { %p2315_p2 = pnand %p2314_p7, %p2308_p3 }
 0x84c   : > { %2318 = shalt.err (!%p2315_p2)
}
 0x84d   : > { %s2458_s22 = smov 128   ;;  %s2459_s13 = smov 8  }
 0x84e   : > { %1882 = dma.vmem_to_hbm [thread:$0]  (%p3288_p6), %s3128_s24, 256, %s3125_s17, %s1528_s28, %s2458_s22, %s2458_s22, %s2459_s13  }
 0x84f PF: > { %s3289_s14 = sld [smem:[#allocation32_spill]]  ;;  %s3290_s27 = sld [smem:[#allocation28_spill]] }
 0x850   : > { %s3291_s9 = sld [smem:[#allocation33_spill]] }
 0x855   : > { %p1915_p10 = scmp.ge.s32.totalorder %s3289_s14, 2  ;;  %s1556_s25 = sand.u32 1, %s3290_s27  }
 0x856   : > { %p3292_p0 = scmp.ne.s32.totalorder %s3291_s9, 0  ;;  %s1557_s20 = scalar_lea.sflag [#allocation10], %s1556_s25 }
 0x858   : > { %p1905_p12 = pnand %p1915_p10, %p3292_p0 }
 0x85a   : > { %2382 = dma.done.wait (!%p1905_p12), %s1557_s20, 256  }
 0x85b   : > { %2384 = vsyncadd (!%p1905_p12), %s1557_s20, 4294967040  ;;  %s33_s24 = sadd.s32 1, %s3289_s14   ;;  %s3293_s15 = sld [smem:[#allocation26_spill]] }
 0x85c   : > { %p30_p13 = scmp.ge.s32.totalorder %s33_s24, 6   ;;  %s3294_s16 = sld [smem:[#allocation27_spill]] }
 0x85d   : > { %s3295_s17 = sld [smem:[#allocation39_spill]]  ;;  %s3296_s4 = sld [smem:[#allocation38_spill]] }
 0x85e   : > { %s3297_s20 = sld [smem:[#allocation31_spill]]  ;;  %s3298_s22 = sld [smem:[#allocation34_spill]] }
 0x85f   : > { %s3299_s10 = sld [smem:[#allocation35_spill]]  ;;  %s3300_s18 = smov %s2403_s0 }
 0x860   : > { %s3301_s0 = smov %s2407_s19  ;;  %s3303_s21 = smov %s2423_s23 }
 0x861   :  { %32 = sbr.rel (!%p30_p13) target bundleno = 26 (0x1a), region = 137 }
 0x863   : > { %s3302_s19 = smov %s3296_s4 }
 0x865   : > { %s3304_s23 = smov %s3299_s10 }
 0x868   :  { %1562 = vsyncpa [#allocation9], 1 }
 0x869   :  { %1564 = vsyncpa [#allocation9 + $0x1], 1 }
 0x86a   :  { %1565 = vsyncpa [#allocation12], 1 }
 0x86b   :  { %1567 = vsyncpa [#allocation12 + $0x1], 1 }
 0x86c   :  { %1568 = vsyncpa [#allocation15], 1 }
 0x86d   :  { %1569 = vsyncpa [#allocation18], 1 }
 0x86e   :  { %1570 = vsyncpa [#allocation10], 1 }
 0x86f   :  { %1572 = vsyncpa [#allocation10 + $0x1], 1 }

// kernel: tpu_custom_call.1
= control target key start
LH: loop header
LB: loop body
LE: loop exit
PB: predicated region body
PF: predicated region fallthrough
CT: control target
= control target key end

     0   :  { %s3191_s0 = inlined_call_operand.hbm [shape: s32[2], index: 0, kind: input, shape index: {}]   ;;  %s3192_s1 = inlined_call_operand.hbm [shape: bf16[2,16,32], index: 1, kind: input, shape index: {}]   ;;  %s3193_s2 = inlined_call_operand.hbm [shape: bf16[2,16,32], index: 2, kind: input, shape index: {}]   ;;  %s3194_s3 = inlined_call_operand.hbm [shape: bf16[2,16,32], index: 3, kind: input, shape index: {}]   ;;  %s3195_s4 = inlined_call_operand.hbm [shape: bf16[32,32], index: 4, kind: input, shape index: {}]   ;;  %s3196_s5 = inlined_call_operand.vmem [shape: bf16[32,32], index: 5, kind: input, shape index: {}]   ;;  %s3197_s6 = inlined_call_operand.hbm [shape: bf16[32,32], index: 6, kind: input, shape index: {}]   ;;  %s3198_s7 = inlined_call_operand.hbm [shape: bf16[32,32], index: 7, kind: input, shape index: {}]   ;;  %s3199_s8 = inlined_call_operand.hbm [shape: f32[2,16,32], index: 8, kind: output, shape index: {}]  }
   0x1   :  { %3231 = sst [smem:[#allocation40_spill]] %s3193_s2  ;;  %s2107_s29 = scalar_lea.hbm %s3191_s0, 16 }
   0x2   :  { %3232 = sst [smem:[#allocation41_spill]] %s3195_s4  ;;  %p2108_p0 = scmp.ne.s32.totalorder %s3191_s0, %s2107_s29 }
   0x3   :  { %3233 = sst [smem:[#allocation42_spill]] %s3196_s5  ;;  %p2111_p1 = scmp.lt.u32.totalorder %s2107_s29, %s3191_s0 }
   0x4   :  { %3234 = sst [smem:[#allocation43_spill]] %s3199_s8 }
   0x5   :  { %p2113_p2 = pnand %p2111_p1, %p2108_p0 }
   0x7   :  { %2116 = shalt.err (!%p2113_p2)  }
   0x8   :  { %s2429_s12 = smov [#allocation7]  }
   0x9   :  { %14 = dma.hbm_to_smem %s3191_s0, 16, %s2429_s12, [#allocation6] }
   0xa   :  { %2363 = dma.done.wait [#allocation6], 16 }
   0xb   :  { %2364 = vsyncadd [#allocation6], 4294967280 }
   0xc   :  { %16 = sfence }
   0xd   :  { %17 = vsyncpa [#allocation9], 0 }
   0xe   :  { %19 = vsyncpa [#allocation9 + $0x1], 0 }
   0xf   :  { %20 = vsyncpa [#allocation12], 0 }
  0x10   :  { %22 = vsyncpa [#allocation12 + $0x1], 0 }
  0x11   :  { %23 = vsyncpa [#allocation15], 0 }
  0x12   :  { %24 = vsyncpa [#allocation18], 0 }
  0x13   :  { %25 = vsyncpa [#allocation10], 0 }
  0x14   :  { %27 = vsyncpa [#allocation10 + $0x1], 0  ;;  %s2517_s15 = smov 0   ;;  %s2519_s16 = smov 0  }
  0x15   :  { %s2521_s17 = smov 0   ;;  %s2523_s18 = smov 0  }
  0x16   :  { %s2525_s0 = smov 0   ;;  %s2527_s19 = smov 0  }
  0x17   :  { %s2529_s20 = smov 0   ;;  %s2531_s21 = smov 0  }
  0x18   :  { %s2533_s22 = smov 0   ;;  %s2535_s23 = smov 0  }
  0x19   :  { %s2537_s24 = smov 0  }
  0x1a LB: > { %3235 = sst [smem:[#allocation26_spill]] %s2391_s16  ;;  %s2573_s25 = sadd.s32 4294967295, %s2427_s24   ;;  %s2427_s24 = sphi %s2537_s24, %s33_s24   ;;  %s2423_s23 = sphi %s2535_s23, %s3304_s23   ;;  %s2419_s22 = sphi %s2533_s22, %s3298_s22   ;;  %s2415_s21 = sphi %s2531_s21, %s3303_s21   ;;  %s2411_s20 = sphi %s2529_s20, %s3297_s20   ;;  %s2407_s19 = sphi %s2527_s19, %s3302_s19   ;;  %s2403_s0 = sphi %s2525_s0, %s3301_s0   ;;  %s2399_s18 = sphi %s2523_s18, %s3300_s18   ;;  %s2395_s17 = sphi %s2521_s17, %s3295_s17   ;;  %s2391_s16 = sphi %s2519_s16, %s3294_s16   ;;  %s2387_s15 = sphi %s2517_s15, %s3293_s15  }
  0x1b   : > { %3236 = sst [smem:[#allocation27_spill]] %s2395_s17  ;;  %s1702_s26 = sadd.s32 4294967294, %s2427_s24  }
  0x1c   : > { %3237 = sst [smem:[#allocation28_spill]] %s2399_s18  ;;  %p65_p3 = scmp.ne.s32.totalorder %s2403_s0, %s2399_s18 }
  0x1d   : > { %3238 = sst [smem:[#allocation29_spill]] %s2411_s20  ;;  %p3202_p4 = scmp.eq.s32.totalorder %s2573_s25, 0 }
  0x1e   : > { %3239 = sst [smem:[#allocation30_spill]] %s2415_s21  ;;  %p235_p6 = scmp.eq.s32.totalorder %s1702_s26, 3 }
  0x1f   : > { %3240 = sst [smem:[#allocation31_spill]] %s2419_s22  ;;  %p2582_p7 = por %p3202_p4, %p65_p3 }
  0x20   : > { %3241 = sst [smem:[#allocation32_spill]] %s2427_s24  ;;  %p1703_p8 = scmp.ge.s32.totalorder %s2427_s24, 1 }
  0x21   : > { %s3242_s27 = scalar_select %p2582_p7, 1, 0 }
  0x22   : > { %p2587_p9 = por %p235_p6, %p65_p3  ;;  %p242_p10 = scmp.lt.s32.totalorder %s2427_s24, 5 }
  0x23   : > { %s2430_s30 = smov [#allocation14]   ;;  %s3247_s4 = sld [smem:[#allocation41_spill]] }
  0x24   : > { %s3243_s28 = scalar_select %p2587_p9, 1, 0 }
  0x25   : > { %p2592_p11 = pnand %p1703_p8, %p242_p10  ;;  %s254_s9 = sshll.u32 %s2430_s30, 4  ;;  %s255_s9 = int_to_ptr.vmem [resolvable:$true] %s254_s9 }
  0x26   : > { %3244 = sst [smem:[#allocation33_spill]] %s3243_s28 }
  0x27   : > { %s3245_s29 = scalar_select %p2592_p11, 1, 0 }
  0x28   : > { %p1884_p12 = pneg %p2592_p11 }
  0x29   : > { %s2117_s13 = scalar_lea.hbm %s3247_s4, 256 }
  0x2a   : > { %p2600_p13 = pnand %p1884_p12, %p3202_p4  ;;  %p2118_p0 = scmp.ne.s32.totalorder %s3247_s4, %s2117_s13 }
  0x2b   : > { %p2124_p6 = scmp.lt.u32.totalorder %s2117_s13, %s3247_s4 }
  0x2c   : > { %s3246_s10 = scalar_select %p2600_p13, 1, 0 }
  0x2d   : > { %p2612_p1 = pneg %p2600_p13 }
  0x2f   : > { %p2120_p2 = pnand %p2612_p1, %p2118_p0 }
  0x31   : > { %p2121_p3 = pneg %p2120_p2 }
  0x33   : > { %p2126_p8 = pnand %p2124_p6, %p2121_p3 }
  0x35   : > { %2129 = shalt.err (!%p2126_p8)
}
  0x36   : > { %s2130_s11 = scalar_lea.vmem %s255_s9, 256  ;;  %p2138_p5 = scmp.lt.s32.totalorder %s255_s9, %s255_s9 }
  0x37   : > { %p2131_p10 = scmp.ne.s32.totalorder %s255_s9, %s2130_s11  ;;  %p2139_p9 = scmp.lt.s32.totalorder %s2130_s11, %s2130_s11 }
  0x39   : > { %p2133_p12 = pnand %p2131_p10, %p2612_p1  ;;  %p2140_p7 = por %p2139_p9, %p2138_p5 }
  0x3b   : > { %p2134_p4 = pneg %p2133_p12 }
  0x3d   : > { %p2141_p11 = pnand %p2140_p7, %p2134_p4 }
  0x3f   : > { %2144 = shalt.err (!%p2141_p11)
}
  0x40   : > { %s3205_s12 = smov 64   ;;  %s3207_s18 = smov 4  }
  0x41   : > { %1887 = dma.hbm_to_vmem [thread:$0]  (!%p2600_p13), %s3247_s4, 256, %s255_s9, [#allocation15], %s3205_s12, %s3205_s12, %s3207_s18  }
  0x42   : > { %s42_s14 = sadd.s32 1, %s2419_s22  ;;  %s45_s26 = sadd.s32 1, %s2423_s23 }
  0x43   : > { %p43_p4 = scmp.ge.s32.totalorder %s42_s14, 2  ;;  %s52_s11 = sadd.s32 1, %s2407_s19 }
  0x44   : > { %p59_p5 = scmp.ne.s32.totalorder %s2407_s19, %s2403_s0  ;;  %p60_p7 = scmp.eq.s32.totalorder %s2427_s24, 0 }
  0x45   : > { %s3306_s14 = smov (%p43_p4, %s42_s14), 0  ;;  %s3308_s26 = smov (!%p43_p4, %s45_s26), %s2423_s23 }
  0x46   : > { %3249 = sst [smem:[#allocation34_spill]] %s3306_s14  ;;  %s76_s9 = ssub.s32 %s2419_s22, %s3306_s14 }
  0x47   : > { %p47_p9 = scmp.ge.s32.totalorder %s3308_s26, 2  ;;  %s80_s28 = sadd.s32 1, %s2395_s17 }
  0x48   : > { %p2646_p11 = por %p60_p7, %p59_p5  ;;  %p87_p0 = scmp.ne.s32.totalorder %s2395_s17, %s2391_s16 }
  0x49   : > { %s3310_s26 = smov (%p47_p9, %s3308_s26), 0  ;;  %p93_p3 = scmp.ne.s32.totalorder %s2391_s16, %s2387_s15 }
  0x4a   : > { %3251 = sst [smem:[#allocation35_spill]] %s3310_s26  ;;  %p2654_p2 = por %p87_p0, %p60_p7 }
  0x4b   : > { %s49_s18 = ssub.s32 %s2423_s23, %s3310_s26  ;;  %p3253_p6 = scmp.eq.s32.totalorder %s2573_s25, 3 }
  0x4c   : > { %p50_p10 = scmp.eq.s32.totalorder %s49_s18, 0  ;;  %s77_s14 = sor.u32 %s76_s9, %s49_s18 }
  0x4d   : > { %p2667_p8 = por %p3253_p6, %p59_p5  ;;  %p78_p12 = scmp.eq.s32.totalorder %s77_s14, 0 }
  0x4e   : > { %p3256_p4 = scmp.eq.s32.totalorder %s2573_s25, 0  ;;  %p1911_p7 = scmp.lt.s32.totalorder %s2427_s24, 4 }
  0x4f   : > { %s3254_s4 = scalar_select %p2667_p8, 1, 0 }
  0x50   : > { %p2673_p9 = por %p93_p3, %p3256_p4  ;;  %s318_s15 = sand.u32 1, %s2427_s24  }
  0x51   : > { %3255 = sst [smem:[#allocation36_spill]] %s3254_s4  ;;  %s320_s26 = sand.u32 1, %s2395_s17  }
  0x52   : > { %s3257_s8 = scalar_select %p2673_p9, 1, 0 }
  0x53   : > { %s2678_s21 = scalar_select %p50_p10, %s2407_s19, %s52_s11  }
  0x54   : > { %3258 = sst [smem:[#allocation37_spill]] %s3257_s8  ;;  %p2688_p5 = pnand %p1911_p7, %p2646_p11 }
  0x55   : > { %3259 = sst [smem:[#allocation38_spill]] %s2678_s21  ;;  %s2692_s18 = sshll.u32 %s320_s26, 2 }
  0x56   : > { %s2681_s5 = scalar_select %p78_p12, %s2395_s17, %s80_s28  }
  0x57   : > { %s3261_s20 = scalar_select %p2688_p5, 1, 0 }
  0x58   : > { %3260 = sst [smem:[#allocation39_spill]] %s2681_s5  ;;  %s1712_s14 = sshll.u32 %s2423_s23, 1 }
  0x59   : > { %s327_s9 = sadd.s32 %s2419_s22, %s1712_s14  ;;  %s322_s16 = scalar_lea.vmem [#allocation11], %s2692_s18 }
  0x5a   : > { %s1713_s4 = sshll.u32 %s327_s9, 6  ;;  %s331_s8 = sshll.u32 %s322_s16, 4  ;;  %s2702_s8 = int_to_ptr.vmem [resolvable:$true] %s331_s8 }
  0x5b   : > { %s3262_s2 = sld [smem:[#allocation40_spill]]  ;;  %p2706_p11 = pnand %p1911_p7, %p2654_p2 }
  0x5c   : > { %s2713_s16 = scalar_lea.hbm %s3194_s3, %s1713_s4  ;;  %s2433_s21 = smov [#allocation16]  }
  0x5d   : > { %s3263_s26 = scalar_select %p2706_p11, 1, 0 }
  0x5e   : > { %s2715_s9 = sshll.u32 %s2433_s21, 4  ;;  %s2717_s11 = scalar_lea.sflag [#allocation12], %s318_s15  ;;  %s271_s9 = int_to_ptr.vmem [resolvable:$true] %s2715_s9 }
  0x5f   : > { %p3225_p3 = pneg %p2706_p11 }
  0x61   : > { %s2700_s28 = scalar_lea.hbm %s3262_s2, %s1713_s4  ;;  %s2150_s13 = scalar_lea.hbm %s3262_s2, 256 }
  0x62   : > { %s2145_s22 = scalar_lea.hbm %s2700_s28, 64  ;;  %p2151_p10 = scmp.lt.u32.totalorder %s2700_s28, %s3262_s2 }
  0x63   : > { %p2146_p0 = scmp.ne.s32.totalorder %s2700_s28, %s2145_s22  ;;  %p2152_p12 = scmp.lt.u32.totalorder %s2150_s13, %s2145_s22 }
  0x64   : > { %p2154_p7 = scmp.lt.u32.totalorder %s2145_s22, %s2700_s28 }
  0x65   : > { %p2148_p2 = pnand %p3225_p3, %p2146_p0  ;;  %p2153_p4 = por %p2152_p12, %p2151_p10 }
  0x67   : > { %p2149_p6 = pneg %p2148_p2  ;;  %p2155_p8 = por %p2154_p7, %p2153_p4 }
  0x69   : > { %p2156_p9 = pnand %p2155_p8, %p2149_p6 }
  0x6b   : > { %2159 = shalt.err (!%p2156_p9)
}
  0x6c   : > { %s2160_s15 = scalar_lea.vmem %s2702_s8, 64  ;;  %s2434_s5 = smov [#allocation11]  }
  0x6d   : > { %p2161_p0 = scmp.ne.s32.totalorder %s2702_s8, %s2160_s15  ;;  %s2165_s21 = sshll.u32 %s2434_s5, 4  ;;  %s2166_s21 = int_to_ptr.vmem [resolvable:$false] %s2165_s21 }
  0x6e   : > { %s2167_s12 = scalar_lea.vmem %s2166_s21, 128  ;;  %p2168_p13 = scmp.lt.s32.totalorder %s2702_s8, %s2166_s21 }
  0x6f   : > { %p2163_p2 = pnand %p2161_p0, %p3225_p3  ;;  %p2169_p10 = scmp.lt.s32.totalorder %s2167_s12, %s2160_s15 }
  0x71   : > { %p2164_p5 = pneg %p2163_p2  ;;  %p2170_p12 = por %p2169_p10, %p2168_p13 }
  0x73   : > { %p2171_p4 = pnand %p2170_p12, %p2164_p5 }
  0x75   : > { %2174 = shalt.err (!%p2171_p4)
}
  0x76   : > { %1900 = dma.hbm_to_vmem [thread:$0]  (!%p2706_p11), %s2700_s28, 64, %s2702_s8, %s2717_s11  }
  0x77   : > { %s2175_s14 = scalar_lea.hbm %s3197_s6, 256 }
  0x78   : > { %p2176_p8 = scmp.ne.s32.totalorder %s3197_s6, %s2175_s14  ;;  %p2182_p5 = scmp.lt.u32.totalorder %s2175_s14, %s3197_s6 }
  0x7a   : > { %p2178_p13 = pnand %p2176_p8, %p2612_p1 }
  0x7c   : > { %p2179_p9 = pneg %p2178_p13 }
  0x7e   : > { %p2184_p6 = pnand %p2182_p5, %p2179_p9 }
  0x80   : > { %2187 = shalt.err (!%p2184_p6)
}
  0x81   : > { %s2188_s12 = scalar_lea.vmem %s271_s9, 256  ;;  %p2196_p10 = scmp.lt.s32.totalorder %s271_s9, %s271_s9 }
  0x82   : > { %p2189_p7 = scmp.ne.s32.totalorder %s271_s9, %s2188_s12  ;;  %p2197_p12 = scmp.lt.s32.totalorder %s2188_s12, %s2188_s12 }
  0x84   : > { %p2191_p0 = pnand %p2189_p7, %p2612_p1  ;;  %p2198_p4 = por %p2197_p12, %p2196_p10 }
  0x86   : > { %p2192_p2 = pneg %p2191_p0 }
  0x88   : > { %p2199_p3 = pnand %p2198_p4, %p2192_p2 }
  0x8a   : > { %2202 = shalt.err (!%p2199_p3)
}
  0x8b   : > { %p3264_p8 = scmp.ne.s32.totalorder %s3246_s10, 0  ;;  %s3265_s8 = smov 4  }
  0x8c   : > { %s3266_s28 = smov 64   ;;  %s2435_s14 = smov [#allocation17]  }
  0x8d   : > { %1890 = dma.hbm_to_vmem [thread:$0]  (!%p3264_p8), %s3197_s6, 256, %s271_s9, [#allocation15], %s3266_s28, %s3266_s28, %s3265_s8  }
  0x8e   : > { %s283_s4 = sshll.u32 %s2435_s14, 4  ;;  %s297_s5 = sand.u32 1, %s2407_s19   ;;  %s284_s4 = int_to_ptr.vmem [resolvable:$true] %s283_s4 }
  0x8f   : > { %s2203_s12 = scalar_lea.hbm %s3198_s7, 256 }
  0x90   : > { %p2204_p3 = scmp.ne.s32.totalorder %s3198_s7, %s2203_s12  ;;  %p2210_p5 = scmp.lt.u32.totalorder %s2203_s12, %s3198_s7 }
  0x92   : > { %p2206_p13 = pnand %p2204_p3, %p2612_p1 }
  0x94   : > { %p2207_p9 = pneg %p2206_p13 }
  0x96   : > { %p2212_p6 = pnand %p2210_p5, %p2207_p9 }
  0x98   : > { %2215 = shalt.err (!%p2212_p6)
}
  0x99   : > { %s2216_s9 = scalar_lea.vmem %s284_s4, 256  ;;  %p2224_p10 = scmp.lt.s32.totalorder %s284_s4, %s284_s4 }
  0x9a   : > { %p2217_p7 = scmp.ne.s32.totalorder %s284_s4, %s2216_s9  ;;  %p2225_p12 = scmp.lt.s32.totalorder %s2216_s9, %s2216_s9 }
  0x9c   : > { %p2219_p0 = pnand %p2217_p7, %p2612_p1  ;;  %p2226_p4 = por %p2225_p12, %p2224_p10 }
  0x9e   : > { %p2220_p2 = pneg %p2219_p0 }
  0xa0   : > { %p2227_p11 = pnand %p2226_p4, %p2220_p2 }
  0xa2   : > { %2230 = shalt.err (!%p2227_p11)
}
  0xa3   : > { %1893 = dma.hbm_to_vmem [thread:$0]  (!%p3264_p8), %s3198_s7, 256, %s284_s4, [#allocation18], %s3266_s28, %s3266_s28, %s3265_s8  }
  0xa4   : > { %s1708_s24 = sshll.u32 %s297_s5, 3  ;;  %s1754_s30 = sshll.u32 %s2423_s23, 7 }
  0xa5   : > { %s2793_s15 = scalar_lea.hbm %s3192_s1, %s1754_s30  ;;  %s301_s10 = scalar_lea.vmem [#allocation8], %s1708_s24 }
  0xa6   : > { %s308_s21 = sshll.u32 %s301_s10, 4  ;;  %s342_s12 = scalar_lea.vmem [#allocation13], %s2692_s18  ;;  %s2796_s21 = int_to_ptr.vmem [resolvable:$true] %s308_s21 }
  0xa7   : > { %s351_s22 = sshll.u32 %s342_s12, 4  ;;  %s2800_s4 = scalar_lea.sflag [#allocation9], %s297_s5  ;;  %s2798_s22 = int_to_ptr.vmem [resolvable:$true] %s351_s22 }
  0xa8   : > { %s2231_s9 = scalar_lea.hbm %s2793_s15, 128  ;;  %p3267_p11 = scmp.ne.s32.totalorder %s3261_s20, 0 }
  0xa9   : > { %p2232_p1 = scmp.ne.s32.totalorder %s2793_s15, %s2231_s9  ;;  %s2236_s24 = scalar_lea.hbm %s3192_s1, 256 }
  0xaa   : > { %p2233_p8 = pneg %p3267_p11  ;;  %p2237_p9 = scmp.lt.u32.totalorder %s2793_s15, %s3192_s1 }
  0xab   : > { %p2238_p5 = scmp.lt.u32.totalorder %s2236_s24, %s2231_s9  ;;  %p2240_p7 = scmp.lt.u32.totalorder %s2231_s9, %s2793_s15 }
  0xac   : > { %p2234_p3 = pnand %p2233_p8, %p2232_p1 }
  0xad   : > { %p2239_p6 = por %p2238_p5, %p2237_p9 }
  0xae   : > { %p2235_p13 = pneg %p2234_p3 }
  0xaf   : > { %p2241_p0 = por %p2240_p7, %p2239_p6 }
  0xb1   : > { %p2242_p2 = pnand %p2241_p0, %p2235_p13 }
  0xb3   : > { %2245 = shalt.err (!%p2242_p2)
}
  0xb4   : > { %s2246_s5 = scalar_lea.vmem %s2796_s21, 128  ;;  %s2436_s13 = smov [#allocation8]  }
  0xb5   : > { %p2247_p10 = scmp.ne.s32.totalorder %s2796_s21, %s2246_s5  ;;  %s2251_s14 = sshll.u32 %s2436_s13, 4  ;;  %s2252_s14 = int_to_ptr.vmem [resolvable:$false] %s2251_s14 }
  0xb6   : > { %s2253_s10 = scalar_lea.vmem %s2252_s14, 256  ;;  %p2254_p1 = scmp.lt.s32.totalorder %s2796_s21, %s2252_s14 }
  0xb7   : > { %p2249_p12 = pnand %p2247_p10, %p2233_p8  ;;  %p2255_p3 = scmp.lt.s32.totalorder %s2253_s10, %s2246_s5 }
  0xb9   : > { %p2250_p4 = pneg %p2249_p12  ;;  %p2256_p9 = por %p2255_p3, %p2254_p1 }
  0xbb   : > { %p2257_p5 = pnand %p2256_p9, %p2250_p4 }
  0xbd   : > { %2260 = shalt.err (!%p2257_p5)
}
  0xbe   : > { %1897 = dma.hbm_to_vmem [thread:$0]  (!%p3267_p11), %s2793_s15, 128, %s2796_s21, %s2800_s4, %s3266_s28, %s3266_s28, %s3265_s8  }
  0xbf   : > { %s2261_s12 = scalar_lea.hbm %s2713_s16, 64  ;;  %p3268_p13 = scmp.ne.s32.totalorder %s3263_s26, 0 }
  0xc0   : > { %p2262_p8 = scmp.ne.s32.totalorder %s2713_s16, %s2261_s12  ;;  %s2266_s2 = scalar_lea.hbm %s3194_s3, 256 }
  0xc1   : > { %p3269_p6 = pneg %p3268_p13  ;;  %p2267_p2 = scmp.lt.u32.totalorder %s2713_s16, %s3194_s3 }
  0xc2   : > { %p2268_p10 = scmp.lt.u32.totalorder %s2266_s2, %s2261_s12  ;;  %p2270_p4 = scmp.lt.u32.totalorder %s2261_s12, %s2713_s16 }
  0xc3   : > { %p2264_p7 = pnand %p2262_p8, %p3269_p6 }
  0xc4   : > { %p2269_p12 = por %p2268_p10, %p2267_p2 }
  0xc5   : > { %p2265_p0 = pneg %p2264_p7 }
  0xc6   : > { %p2271_p1 = por %p2270_p4, %p2269_p12 }
  0xc8   : > { %p2272_p3 = pnand %p2271_p1, %p2265_p0 }
  0xca   : > { %2275 = shalt.err (!%p2272_p3)
}
  0xcb   : > { %s2276_s8 = scalar_lea.vmem %s2798_s22, 64  ;;  %p3270_p9 = pmov %p3269_p6 }
  0xcc   : > { %p2277_p11 = scmp.ne.s32.totalorder %s2798_s22, %s2276_s8  ;;  %s2437_s28 = smov [#allocation13]  }
  0xcd   : > { %s2281_s15 = sshll.u32 %s2437_s28, 4  ;;  %s2282_s15 = int_to_ptr.vmem [resolvable:$false] %s2281_s15 }
  0xce   : > { %p2279_p5 = pnand %p2277_p11, %p3270_p9  ;;  %s2283_s21 = scalar_lea.vmem %s2282_s15, 128 }
  0xcf   : > { %p2284_p6 = scmp.lt.s32.totalorder %s2798_s22, %s2282_s15  ;;  %p2285_p7 = scmp.lt.s32.totalorder %s2283_s21, %s2276_s8 }
  0xd0   : > { %p2280_p8 = pneg %p2279_p5 }
  0xd1   : > { %p2286_p2 = por %p2285_p7, %p2284_p6 }
  0xd3   : > { %p2287_p10 = pnand %p2286_p2, %p2280_p8 }
  0xd5   : > { %2290 = shalt.err (!%p2287_p10)
}
  0xd6   : > { %1903 = dma.hbm_to_vmem [thread:$0]  (!%p3268_p13), %s2713_s16, 64, %s2798_s22, %s2717_s11  }
  0xd7   : > { %p3271_p0 = scmp.ne.s32.totalorder %s3245_s29, 0 }
  0xd8   : > { %s2858_s4 = sand.u32 (!%p3271_p0), 1, %s2403_s0   ;;  %p3272_p12 = scmp.ne.s32.totalorder (!%p3271_p0), %s3242_s27, 0 }
  0xd9   : > { %360 = sbr.rel (%p3271_p0) target bundleno = 2127 (0x84f), region = 48  ;;  %s1718_s18 = sshll.u32 (!%p3271_p0), %s2858_s4, 3 }
  0xda   : > { %s363_s30 = scalar_lea.sflag (!%p3271_p0), [#allocation9], %s2858_s4  ;;  %s2862_s5 = scalar_lea.vmem (!%p3271_p0), [#allocation8], %s1718_s18 }
  0xe0   : > { %2366 = dma.done.wait (%p3272_p12), %s363_s30, 128  }
  0xe1   : > { %2368 = vsyncadd (%p3272_p12), %s363_s30, 4294967168  ;;  %s3273_s26 = sld [smem:[#allocation26_spill]]  ;;  %s3274_s16 = sld [smem:[#allocation37_spill]] }
  0xe2   : > { %s371_s29 = sand.u32 1, %s2573_s25  }
  0xe3   : > { %s372_s13 = scalar_lea.sflag [#allocation12], %s371_s29 }
  0xe7   : > { %s373_s11 = sand.u32 1, %s3273_s26   ;;  %p3275_p13 = scmp.ne.s32.totalorder %s3274_s16, 0 }
  0xe8   : > { %s2870_s22 = sshll.u32 %s373_s11, 2 }
  0xe9   : > { %s375_s14 = scalar_lea.vmem [#allocation11], %s2870_s22 }
  0xea   : > { %2370 = dma.done.wait (%p3275_p13), %s372_s13, 128  }
  0xeb   : > { %2372 = vsyncadd (%p3275_p13), %s372_s13, 4294967168  ;;  %s384_s10 = scalar_lea.vmem [#allocation13], %s2870_s22  ;;  %p3276_p4 = scmp.eq.s32.totalorder %s2573_s25, 0 }
  0xed   : > { %2374 = dma.done.wait (%p3276_p4), [#allocation15], 512   ;;  %p3277_p1 = pmov %p3276_p4 }
  0xef   : > { %2376 = vsyncadd (%p3277_p1), [#allocation15], 4294966784  ;;  %p3278_p3 = pmov %p3277_p1 }
  0xf0   : > { %p3279_p11 = pmov %p3277_p1 }
  0xf1   : > { %2378 = dma.done.wait (%p3278_p3), [#allocation18], 256  }
  0xf2   : > { %2380 = vsyncadd (%p3279_p11), [#allocation18], 4294967040  ;;  %s1724_s27 = sshll.u32 %s2858_s4, 4  ;;  %s3280_s9 = sld [smem:[#allocation29_spill]] }
  0xf3   : > { %s2887_s12 = scalar_lea.vmem [#allocation19], %s1724_s27 }
  0xf8   : > { %p1725_p9 = scmp.ne.s32.totalorder %s3280_s9, 0 }
  0xf9   : > { %vm526_vm0 = vcmask (!%p1725_p9), 7168   ;;  %v2438_v0 = vmov (!%p1725_p9), 0.0   ;;  %v2439_v1 = vmov (!%p1725_p9), -1e+30   ;;  %v2031_v2 = vld [vmem:[#allocation14] sm:$0xff] (!%p1725_p9)   ;;  %vm2440_vm1 = vmmov (!%p1725_p9), 0  }
  0xfa   : > { %441 = sbr.rel (%p1725_p9) target bundleno = 594 (0x252), region = 76  ;;  %1784 = vmatprep.subr.bf16.mxu0 (!%p1725_p9), %v2438_v0  ;;  %527 = vst.msk [vmem:[#allocation3] sm:$0xff] (!%p1725_p9), %vm526_vm0, %v2439_v1  ;;  %528 = vst.msk [vmem:[#allocation3 + $0x8] sm:$0xff] (!%p1725_p9), %vm526_vm0, %v2439_v1  ;;  %1788 = vmatprep.mubr.msk.bf16.mxu0 (!%p1725_p9), %vm2440_vm1, %v2438_v0  ;;  %v2032_v3 = vld [vmem:[#allocation14 + $0x8] sm:$0xff] (!%p1725_p9)   ;;  %vm465_vm2 = vcmask (!%p1725_p9), 261120   ;;  %vm521_vm3 = vcmask (!%p1725_p9), 64512  }
  0xfb   : > { %529 = vst.msk [vmem:[#allocation3 + $0x10] sm:$0xff] (!%p1725_p9), %vm526_vm0, %v2439_v1  ;;  %530 = vst.msk [vmem:[#allocation3 + $0x18] sm:$0xff] (!%p1725_p9), %vm526_vm0, %v2439_v1  ;;  %1785 = vmatpush3.bf16.msra.mxu0 (!%p1725_p9), %v2031_v2  ;;  %v2033_v4 = vld [vmem:[%s2862_s5] sm:$0xff] (!%p1725_p9)   ;;  %s2441_s25 = smov (!%p1725_p9), 104   ;;  %s2442_s20 = smov (!%p1725_p9), 120  }
  0xfc   : > { %531 = vst.msk [vmem:[#allocation3 + $0x20] sm:$0xff] (!%p1725_p9), %vm526_vm0, %v2439_v1  ;;  %532 = vst.msk [vmem:[#allocation3 + $0x28] sm:$0xff] (!%p1725_p9), %vm526_vm0, %v2439_v1  ;;  %1786 = vmatprep.subr.bf16.mxu0 (!%p1725_p9), %v2438_v0  ;;  %s2443_s2 = smov (!%p1725_p9), 112  }
  0xfd   : > { %533 = vst.msk [vmem:[#allocation3 + $0x30] sm:$0xff] (!%p1725_p9), %vm526_vm0, %v2439_v1  ;;  %534 = vst.msk [vmem:[#allocation3 + $0x38] sm:$0xff] (!%p1725_p9), %vm526_vm0, %v2439_v1 }
  0xfe   : > { %535 = vst.msk [vmem:[#allocation4] sm:$0xff] (!%p1725_p9), %vm526_vm0, %v2438_v0  ;;  %536 = vst.msk [vmem:[#allocation4 + $0x8] sm:$0xff] (!%p1725_p9), %vm526_vm0, %v2438_v0 }
  0xff   : > { %537 = vst.msk [vmem:[#allocation4 + $0x10] sm:$0xff] (!%p1725_p9), %vm526_vm0, %v2438_v0  ;;  %538 = vst.msk [vmem:[#allocation4 + $0x18] sm:$0xff] (!%p1725_p9), %vm526_vm0, %v2438_v0  ;;  %1787 = vmatpush3.bf16.msra.mxu0 (!%p1725_p9), %v2032_v3 }
 0x100   : > { %539 = vst.msk [vmem:[#allocation4 + $0x20] sm:$0xff] (!%p1725_p9), %vm526_vm0, %v2438_v0  ;;  %540 = vst.msk [vmem:[#allocation4 + $0x28] sm:$0xff] (!%p1725_p9), %vm526_vm0, %v2438_v0 }
 0x101   : > { %541 = vst.msk [vmem:[#allocation4 + $0x30] sm:$0xff] %vm526_vm0, %v2438_v0  ;;  %542 = vst.msk [vmem:[#allocation4 + $0x38] sm:$0xff] %vm526_vm0, %v2438_v0 }
 0x102   : > { %1789 = vmatmul.mubr.msk.bf16.vlgmr.msra.gmra.mrb[0].mxu0 %vm465_vm2, %v2033_v4  ;;  %543 = vst.msk [vmem:[#allocation5] sm:$0xff] %vm521_vm3, %v2438_v0  ;;  %544 = vst.msk [vmem:[#allocation5 + $0x8] sm:$0xff] %vm521_vm3, %v2438_v0 }
 0x103   : > { %545 = vst.msk [vmem:[#allocation5 + $0x10] sm:$0xff] %vm521_vm3, %v2438_v0  ;;  %546 = vst.msk [vmem:[#allocation5 + $0x18] sm:$0xff] %vm521_vm3, %v2438_v0 }
 0x104   : > { %547 = vst.msk [vmem:[#allocation5 + $0x20] sm:$0xff] %vm521_vm3, %v2438_v0  ;;  %548 = vst.msk [vmem:[#allocation5 + $0x28] sm:$0xff] %vm521_vm3, %v2438_v0 }
 0x105   : > { %549 = vst.msk [vmem:[#allocation5 + $0x30] sm:$0xff] %vm521_vm3, %v2438_v0  ;;  %550 = vst.msk [vmem:[#allocation5 + $0x38] sm:$0xff] %vm521_vm3, %v2438_v0 }
 0x1d5   : > { %v503_v5 = vpop.f32.mrb[0].mxu0 }
 0x1d6   : > { %v1790_v6 = vpop.f32.mrb[1].mxu0 }
 0x1d7   : > { %v506_v7 = vpop.f32.mrb[2].mxu0 }
 0x1d8   : > { %v510_v8 = vpack.c.bf16 %v506_v7, %v503_v5  ;;  %v1791_v9 = vpop.f32.mrb[3].mxu0 }
 0x1da   : > { %522 = vst.msk [vmem:[#allocation2] sm:$0xff] %vm521_vm3, %v510_v8  ;;  %518 = vrot.lane.b32.xlu1 %v510_v8, %s2441_s25  ;;  %512 = vrot.lane.b32.xlu0 %v510_v8, %s2442_s20 }
 0x1de   : > { %515 = vrot.lane.b32.xlu0 %v510_v8, %s2443_s2 }
 0x24c   : > { %v519_v10 = vpop.permute.xlu1 %518  ;;  %v513_v11 = vpop.permute.xlu0 %512 }
 0x24d   : > { %525 = vst.msk [vmem:[#allocation2 + $0x18] sm:$0xff] %vm521_vm3, %v519_v10  ;;  %523 = vst.msk [vmem:[#allocation2 + $0x8] sm:$0xff] %vm521_vm3, %v513_v11 }
 0x250   : > { %v516_v12 = vpop.permute.xlu0 %515 }
 0x251   : > { %524 = vst.msk [vmem:[#allocation2 + $0x10] sm:$0xff] %vm521_vm3, %v516_v12 }
 0x252 PF: > { %s3281_s8 = sld [smem:[#allocation42_spill]]  ;;  %v2444_v14 = vmov 0.0   ;;  %vm2445_vm4 = vmmov 0   ;;  %v551_v16 = vld [vmem:[%s375_s14] sm:$0xf]  ;;  %vm569_vm5 = vcmask 261120   ;;  %v689_v42 = vlaneseq }
 0x253   : > { %1792 = vmatprep.subr.bf16.mxu0 %v2444_v14  ;;  %1800 = vmatprep.subr.bf16.mxu1 %v2444_v14  ;;  %v2038_v17 = vld [vmem:[#allocation16] sm:$0xff]   ;;  %v2039_v18 = vld [vmem:[#allocation16 + $0x8] sm:$0xff]   ;;  %vm701_vm6 = vcmask 64512   ;;  %s2446_s21 = smov 104   ;;  %s2447_s18 = smov 120   ;;  %v697_v26 = vld [vmem:[#allocation2] sm:$0xff] }
 0x254   : > { %1796 = vmatprep.mubr.msk.bf16.mxu0 %vm2445_vm4, %v2444_v14  ;;  %1804 = vmatprep.mubr.msk.bf16.mxu1 %vm2445_vm4, %v2444_v14  ;;  %v552_v19 = vld [vmem:[%s384_s10] sm:$0xf]  ;;  %s2448_s30 = smov 112   ;;  %v698_v36 = vld [vmem:[#allocation2 + $0x8] sm:$0xff]  ;;  %vm1146_vm7 = vcmask 1043456   ;;  %s3282_s5 = sld [smem:[#allocation30_spill]] }
 0x255   : > { %1801 = vmatpush3.bf16.msra.mxu1 %v2038_v17  ;;  %s3283_s26 = sld [smem:[#allocation29_spill]]  ;;  %v700_v41 = vld [vmem:[#allocation2 + $0x18] sm:$0xff]  ;;  %v690_v43 = vand.u32 127, %v689_v42  ;;  %v2449_v47 = vmov -1e+30   ;;  %v2450_v57 = vmov 0  }
 0x256   : > { %1802 = vmatprep.subr.bf16.mxu1 %v2444_v14  ;;  %2034 = vset.pattern.permute.xlu0 %v2450_v57  ;;  %vm1074_vm9 = vcmask 7168  }
 0x257   : > { %2035 = vset.pattern.permute.xlu1 %v2450_v57 }
 0x258   : > { %v2036_v13 = vld [vmem:[%s3281_s8] sm:$0xff]   ;;  %v2037_v15 = vld [vmem:[%s3281_s8 + $0x8] sm:$0xff]  }
 0x259   : > { %1793 = vmatpush3.bf16.msra.mxu0 %v2036_v13  ;;  %1803 = vmatpush3.bf16.msra.mxu1 %v2039_v18  ;;  %v699_v39 = vld [vmem:[#allocation2 + $0x10] sm:$0xff] }
 0x25a   : > { %1794 = vmatprep.subr.bf16.mxu0 %v2444_v14  ;;  %1814 = vmatprep.subr.bf16.mxu1 %v2444_v14  ;;  %s693_s16 = sld [smem:[#allocation7 + %s3282_s5]] }
 0x25b   : > { %s1736_s29 = sshll.u32 %s3283_s26, 3  ;;  %p1745_p5 = scmp.ne.s32.totalorder %s3283_s26, 1 }
 0x25c   : > { %1805 = vmatmul.mubr.msk.bf16.vlgmr.msra.gmra.mrb[0].mxu1 %vm569_vm5, %v552_v19  ;;  %v691_v44 = vstv %s1736_s29  ;;  %v898_v19 = vld [vmem:[#allocation3] sm:$0xff]  ;;  %vm2453_vm10 = vmmov (!%p1745_p5), 0   ;;  %s2454_s11 = smov (!%p1745_p5), 16   ;;  %s2455_s22 = smov (!%p1745_p5), 8   ;;  %vm1458_vm11 = vcmask (!%p1745_p5), 130048   ;;  %vm1461_vm12 = vcmask (!%p1745_p5), 195584  }
 0x25d   : > { %1795 = vmatpush3.bf16.msra.mxu0 %v2037_v15  ;;  %1816 = vmatprep.mubr.msk.bf16.mxu1 %vm2445_vm4, %v2444_v14  ;;  %v692_v45 = vadd.s32 %v691_v44, %v690_v43  ;;  %s2456_s13 = smov (!%p1745_p5), 24  }
 0x25e   : > { %1808 = vmatprep.subr.bf16.mxu0 %v2444_v14 }
 0x260   : > { %1797 = vmatmul.mubr.msk.bf16.vlgmr.msra.gmra.mrb[0].mxu0 %vm569_vm5, %v551_v16  ;;  %v694_v46 = vstv %s693_s16 }
 0x261   : > { %1810 = vmatprep.mubr.msk.bf16.mxu0 %vm2445_vm4, %v2444_v14  ;;  %vm695_vm8 = vcmp.lt.s32.totalorder %v692_v45, %v694_v46  ;;  %v3019_v45 = vld [vmem:[#allocation3 + $0x38] sm:$0xff] }
 0x262   : > { %v696_v48 = vsel %vm695_vm8, 0.0, %v2449_v47 }
 0x32f   : > { %v666_v27 = vpop.f32.mrb[0].mxu1 }
 0x330   : > { %v1806_v28 = vpop.f32.mrb[1].mxu1  ;;  %v2956_v37 = vpack.c.bf16 %v666_v27, %v666_v27 }
 0x331   : > { %v669_v29 = vpop.f32.mrb[2].mxu1 }
 0x332   : > { %v1807_v30 = vpop.f32.mrb[3].mxu1  ;;  %v1148_v40 = vsel %vm1146_vm7, %v2956_v37, 0  ;;  %v900_v29 = vld [vmem:[#allocation3 + $0x10] sm:$0xff] }
 0x333   : > { %v607_v20 = vpop.f32.mrb[0].mxu0 }
 0x334   : > { %v672_v21 = vpack.c.bf16 %v607_v20, %v607_v20  ;;  %v1798_v22 = vpop.f32.mrb[1].mxu0 }
 0x335   : > { %v610_v23 = vpop.f32.mrb[2].mxu0 }
 0x336   : > { %678 = vrot.lane.b32.xlu1 %v672_v21, %s2446_s21  ;;  %674 = vrot.lane.b32.xlu0 %v672_v21, %s2447_s18  ;;  %v1799_v24 = vpop.f32.mrb[3].mxu0  ;;  %v706_v25 = vsel %vm701_vm6, %v672_v21, 0 }
 0x337   : > { %1809 = vmatpush3.bf16.xpose.msra.mxu0 %v706_v25 }
 0x338   : > { %1820 = vmatprep.subr.bf16.mxu0 %v2444_v14 }
 0x33a   : > { %676 = vrot.lane.b32.xlu0 %v672_v21, %s2448_s30  ;;  %v899_v21 = vld [vmem:[#allocation3 + $0x8] sm:$0xff] }
 0x33e   : > { %1811 = vmatmul.mubr.msk.bf16.vlgmr.msra.gmra.mrb[4].mxu0 %vm701_vm6, %v697_v26 }
 0x33f   : > { %1822 = vmatprep.mubr.msk.bf16.mxu0 %vm2445_vm4, %v2444_v14 }
 0x3a8   : > { %v675_v31 = vpop.permute.xlu0 %674  ;;  %v679_v35 = vpop.permute.xlu1 %678 }
 0x3a9   : > { %v753_v32 = vsel %vm701_vm6, %v675_v31, 0  ;;  %v847_v38 = vsel %vm701_vm6, %v679_v35, 0  ;;  %v901_v31 = vld [vmem:[#allocation3 + $0x18] sm:$0xff] }
 0x3aa   : > { %1815 = vmatpush3.bf16.xpose.msra.mxu1 %v753_v32 }
 0x3ab   : > { %1826 = vmatprep.subr.bf16.mxu1 %v2444_v14 }
 0x3ac   : > { %v677_v33 = vpop.permute.xlu0 %676 }
 0x3ad   : > { %v800_v34 = vsel %vm701_vm6, %v677_v33, 0 }
 0x3ae   : > { %1821 = vmatpush3.bf16.xpose.msra.mxu0 %v800_v34  ;;  %v902_v34 = vld [vmem:[#allocation3 + $0x20] sm:$0xff] }
 0x3af   : > { %1832 = vmatprep.subr.bf16.mxu0 %v2444_v14 }
 0x3b1   : > { %1817 = vmatmul.mubr.msk.bf16.vlgmr.msra.gmra.mrb[4].mxu1 %vm701_vm6, %v698_v36 }
 0x3b2   : > { %1827 = vmatpush3.bf16.xpose.msra.mxu1 %v847_v38  ;;  %1828 = vmatprep.mubr.msk.bf16.mxu1 %vm2445_vm4, %v2444_v14  ;;  %v903_v38 = vld [vmem:[#allocation3 + $0x28] sm:$0xff] }
 0x3b3   : > { %1838 = vmatprep.subr.bf16.mxu1 %v2444_v14 }
 0x3b5   : > { %1823 = vmatmul.mubr.msk.bf16.vlgmr.msra.gmra.mrb[8].mxu0 %vm701_vm6, %v699_v39 }
 0x3b6   : > { %1833 = vmatpush3.bf16.msra.mxu0 %v1148_v40  ;;  %1834 = vmatprep.mubr.msk.bf16.mxu0 %vm2445_vm4, %v2444_v14 }
 0x3b7   : > { %1844 = vmatprep.subr.bf16.mxu0 %v2444_v14 }
 0x3b9   : > { %1829 = vmatmul.mubr.msk.bf16.vlgmr.msra.gmra.mrb[8].mxu1 %vm701_vm6, %v700_v41  ;;  %v3016_v41 = vld [vmem:[#allocation3 + $0x30] sm:$0xff] }
 0x3ba   : > { %1840 = vmatprep.mubr.msk.bf16.mxu1 %vm2445_vm4, %v2444_v14 }
 0x411   : > { %v742_v49 = vpop.f32.mrb[4].mxu0 }
 0x412   : > { %v2975_v50 = vadd.f32 %v742_v49, %v696_v48  ;;  %v1812_v51 = vpop.f32.mrb[5].mxu0 }
 0x413   : > { %v745_v52 = vpop.f32.mrb[6].mxu0 }
 0x414   : > { %v2977_v53 = vadd.f32 %v745_v52, %v696_v48  ;;  %v906_v54 = vsel %vm701_vm6, %v2975_v50, -inf  ;;  %v1813_v55 = vpop.f32.mrb[7].mxu0 }
 0x415   : > { %907 = vmax.xlane.f32.xlu1 %v906_v54 }
 0x416   : > { %v909_v56 = vsel %vm701_vm6, %v2977_v53, -inf }
 0x417   : > { %910 = vmax.xlane.f32.xlu0 %v909_v56 }
 0x484   : > { %v789_v58 = vpop.f32.mrb[4].mxu1 }
 0x485   : > { %v2983_v59 = vadd.f32 %v789_v58, %v696_v48  ;;  %v1818_v60 = vpop.f32.mrb[5].mxu1 }
 0x486   : > { %v792_v61 = vpop.f32.mrb[6].mxu1 }
 0x487   : > { %v2985_v62 = vadd.f32 %v792_v61, %v696_v48  ;;  %v1819_v63 = vpop.f32.mrb[7].mxu1  ;;  %v912_v0 = vsel %vm701_vm6, %v2983_v59, -inf }
 0x488   : > { %913 = vmax.xlane.f32.xlu0 %v912_v0  ;;  %v836_v1 = vpop.f32.mrb[8].mxu0 }
 0x489   : > { %v2989_v2 = vadd.f32 %v836_v1, %v696_v48  ;;  %v1824_v3 = vpop.f32.mrb[9].mxu0  ;;  %v915_v4 = vsel %vm701_vm6, %v2985_v62, -inf }
 0x48a   : > { %916 = vmax.xlane.f32.xlu1 %v915_v4  ;;  %v839_v5 = vpop.f32.mrb[10].mxu0 }
 0x48b   : > { %v2993_v6 = vadd.f32 %v839_v5, %v696_v48  ;;  %v1825_v7 = vpop.f32.mrb[11].mxu0  ;;  %v918_v8 = vsel %vm701_vm6, %v2989_v2, -inf }
 0x48c   : > { %v883_v9 = vpop.f32.mrb[8].mxu1  ;;  %919 = vmax.xlane.f32.xlu0 %v918_v8 }
 0x48d   : > { %v2997_v10 = vadd.f32 %v883_v9, %v696_v48  ;;  %v921_v11 = vsel %vm701_vm6, %v2993_v6, -inf  ;;  %v1830_v12 = vpop.f32.mrb[9].mxu1 }
 0x48e   : > { %922 = vmax.xlane.f32.xlu1 %v921_v11  ;;  %v886_v13 = vpop.f32.mrb[10].mxu1 }
 0x48f   : > { %v924_v15 = vsel %vm701_vm6, %v2997_v10, -inf  ;;  %v3003_v16 = vadd.f32 %v886_v13, %v696_v48  ;;  %v1831_v17 = vpop.f32.mrb[11].mxu1 }
 0x490   : > { %925 = vmax.xlane.f32.xlu0 %v924_v15 }
 0x491   : > { %v927_v18 = vsel %vm701_vm6, %v3003_v16, -inf }
 0x492   : > { %928 = vmax.xlane.f32.xlu1 %v927_v18 }
 0x4a2   : > { %v908_v20 = vpop.xlane.xlu1 %907 }
 0x4a3   : > { %v930_v22 = vmax.f32 %v898_v19, %v908_v20 }
 0x4a4   : > { %v911_v23 = vpop.xlane.xlu0 %910 }
 0x4a5   : > { %v938_v24 = vsub.f32 %v898_v19, %v930_v22  ;;  %1348 = vst.msk [vmem:[#allocation3] sm:$0xff] %vm1074_vm9, %v930_v22  ;;  %v931_v25 = vmax.f32 %v899_v21, %v911_v23 }
 0x4a6   : > { %964 = vperm.xlu0 %2034, %v930_v22  }
 0x4a7   : > { %v939_v26 = vsub.f32 %v899_v21, %v931_v25  ;;  %1349 = vst.msk [vmem:[#allocation3 + $0x8] sm:$0xff] %vm1074_vm9, %v931_v25  ;;  %969 = vperm.xlu1 %2035, %v931_v25   ;;  %v946_v60 = vmul.f32 1.442695, %v938_v24 }
 0x4a9   : > { %v948_v27 = vmul.f32 1.442695, %v939_v26 }
 0x4aa   : > { %684 = vrot.lane.b32.xlu0 %v2956_v37, %s2448_s30 }
 0x4ab   : > { %2040 = vpow2.f32 %v948_v27 }
 0x4b5   : > { %v3011_v28 = vpop.eup %2040 }
 0x4b6   : > { %1098 = vperm.xlu0 %2034, %v3011_v28  }
 0x515   : > { %v914_v30 = vpop.xlane.xlu0 %913 }
 0x516   : > { %v932_v32 = vmax.f32 %v900_v29, %v914_v30 }
 0x517   : > { %v917_v33 = vpop.xlane.xlu1 %916 }
 0x518   : > { %1350 = vst.msk [vmem:[#allocation3 + $0x10] sm:$0xff] %vm1074_vm9, %v932_v32  ;;  %v933_v35 = vmax.f32 %v901_v31, %v917_v33  ;;  %974 = vperm.xlu1 %2035, %v932_v32   ;;  %v940_v61 = vsub.f32 %v900_v29, %v932_v32 }
 0x519   : > { %v920_v36 = vpop.xlane.xlu0 %919 }
 0x51a   : > { %1351 = vst.msk [vmem:[#allocation3 + $0x18] sm:$0xff] %vm1074_vm9, %v933_v35  ;;  %v934_v39 = vmax.f32 %v902_v34, %v920_v36  ;;  %v950_v1 = vmul.f32 1.442695, %v940_v61 }
 0x51b   : > { %v923_v40 = vpop.xlane.xlu1 %922 }
 0x51c   : > { %v942_v42 = vsub.f32 %v902_v34, %v934_v39  ;;  %1352 = vst.msk [vmem:[#allocation3 + $0x20] sm:$0xff] %vm1074_vm9, %v934_v39  ;;  %v935_v43 = vmax.f32 %v903_v38, %v923_v40  ;;  %984 = vperm.xlu1 %2035, %v934_v39  }
 0x51d   : > { %v926_v44 = vpop.xlane.xlu0 %925 }
 0x51e   : > { %v954_v46 = vmul.f32 1.442695, %v942_v42  ;;  %1353 = vst.msk [vmem:[#allocation3 + $0x28] sm:$0xff] %vm1074_vm9, %v935_v43  ;;  %v3023_v47 = vmax.f32 %v3016_v41, %v926_v44  ;;  %v943_v3 = vsub.f32 %v903_v38, %v935_v43 }
 0x51f   : > { %v929_v48 = vpop.xlane.xlu1 %928 }
 0x520   : > { %2042 = vpow2.f32 %v954_v46  ;;  %979 = vperm.xlu1 %2035, %v933_v35   ;;  %v944_v49 = vsub.f32 %v3016_v41, %v3023_v47  ;;  %1354 = vst.msk [vmem:[#allocation3 + $0x30] sm:$0xff] %vm1074_vm9, %v3023_v47  ;;  %v3030_v51 = vmax.f32 %v3019_v45, %v929_v48  ;;  %v956_v7 = vmul.f32 1.442695, %v943_v3  ;;  %v1027_v41 = vld [vmem:[#allocation4 + $0x8] sm:$0xff] }
 0x522   : > { %v945_v52 = vsub.f32 %v3019_v45, %v3030_v51  ;;  %1355 = vst.msk [vmem:[#allocation3 + $0x38] sm:$0xff] %vm1074_vm9, %v3030_v51  ;;  %v1026_v45 = vld [vmem:[#allocation4] sm:$0xff] }
 0x524   : > { %989 = vperm.xlu1 %2035, %v935_v43  }
 0x525   : > { %v965_v54 = vpop.permute.xlu0 %964 }
 0x526   : > { %v1002_v55 = vsub.f32 %v2975_v50, %v965_v54  ;;  %v970_v56 = vpop.permute.xlu1 %969  ;;  %v941_v50 = vsub.f32 %v901_v31, %v933_v35 }
 0x527   : > { %v1003_v57 = vsub.f32 %v2977_v53, %v970_v56 }
 0x528   : > { %v1010_v58 = vmul.f32 1.442695, %v1002_v55  ;;  %994 = vperm.xlu1 %2035, %v3023_v47   ;;  %v952_v53 = vmul.f32 1.442695, %v941_v50  ;;  %v1035_v47 = vmul.f32 %v3011_v28, %v1027_v41 }
 0x529   : > { %v1012_v63 = vmul.f32 1.442695, %v1003_v57  ;;  %v685_v8 = vpop.permute.xlu0 %684 }
 0x52a   : > { %v3039_v0 = vpop.eup %2042  ;;  %2044 = vpow2.f32 %v1010_v58  ;;  %v1242_v12 = vsel %vm1146_vm7, %v685_v8, 0  ;;  %v960_v58 = vmul.f32 1.442695, %v945_v52 }
 0x52b   : > { %2046 = vpow2.f32 %v1012_v63  ;;  %1113 = vperm.xlu0 %2034, %v3039_v0   ;;  %v958_v63 = vmul.f32 1.442695, %v944_v49 }
 0x52c   : > { %999 = vperm.xlu1 %2035, %v3030_v51   ;;  %2048 = vpow2.f32 %v946_v60 }
 0x52d   : > { %2050 = vpow2.f32 %v950_v1 }
 0x52e   : > { %2052 = vpow2.f32 %v952_v53 }
 0x52f   : > { %2054 = vpow2.f32 %v956_v7 }
 0x530   : > { %682 = vrot.lane.b32.xlu1 %v2956_v37, %s2447_s18 }
 0x534   : > { %v2045_v4 = vpop.eup %2044  ;;  %686 = vrot.lane.b32.xlu1 %v2956_v37, %s2446_s21 }
 0x535   : > { %v2047_v5 = vpop.eup %2046  ;;  %v1042_v17 = vsel %vm701_vm6, %v2045_v4, 0.0  ;;  %v1099_v1 = vpop.permute.xlu0 %1098 }
 0x536   : > { %v1139_v9 = vpack.c.bf16 %v2047_v5, %v2045_v4  ;;  %v3047_v11 = vpop.eup %2048  ;;  %v1045_v18 = vsel %vm701_vm6, %v2047_v5, 0.0 }
 0x537   : > { %v3054_v13 = vpop.eup %2050  ;;  %v1034_v51 = vmul.f32 %v3047_v11, %v1026_v45 }
 0x538   : > { %1093 = vperm.xlu1 %2035, %v3047_v11   ;;  %1835 = vmatmul.mubr.msk.bf16.vlgmr.msra.gmra.mrb[12].mxu0 %vm701_vm6, %v1139_v9  ;;  %v3057_v37 = vpop.eup %2052 }
 0x539   : > { %1845 = vmatpush3.bf16.msra.mxu0 %v1242_v12  ;;  %1846 = vmatprep.mubr.msk.bf16.mxu0 %vm2445_vm4, %v2444_v14  ;;  %v3060_v15 = vpop.eup %2054  ;;  %v1083_v12 = vld [vmem:[#allocation5] sm:$0xff] }
 0x53c   : > { %1103 = vperm.xlu1 %2035, %v3054_v13  }
 0x540   : > { %1108 = vperm.xlu1 %2035, %v3057_v37  }
 0x544   : > { %1118 = vperm.xlu1 %2035, %v3060_v15  }
 0x54a   : > { %1043 = vadd.xlane.f32.xlu0 %v1042_v17  ;;  %v1084_v17 = vld [vmem:[#allocation5 + $0x8] sm:$0xff] }
 0x54b   : > { %v1132_v11 = vmul.f32 %v1099_v1, %v1084_v17 }
 0x568   : > { %1046 = vadd.xlane.f32.xlu1 %v1045_v18 }
 0x597   : > { %v975_v19 = vpop.permute.xlu1 %974 }
 0x598   : > { %v1004_v20 = vsub.f32 %v2983_v59, %v975_v19 }
 0x59a   : > { %v1014_v21 = vmul.f32 1.442695, %v1004_v20 }
 0x59b   : > { %v985_v22 = vpop.permute.xlu1 %984 }
 0x59c   : > { %2056 = vpow2.f32 %v1014_v21  ;;  %v1006_v23 = vsub.f32 %v2989_v2, %v985_v22 }
 0x59e   : > { %v1018_v24 = vmul.f32 1.442695, %v1006_v23 }
 0x59f   : > { %v980_v25 = vpop.permute.xlu1 %979 }
 0x5a0   : > { %2058 = vpow2.f32 %v1018_v24  ;;  %v1005_v26 = vsub.f32 %v2985_v62, %v980_v25  ;;  %v1028_v25 = vld [vmem:[#allocation4 + $0x10] sm:$0xff] }
 0x5a1   : > { %v1036_v28 = vmul.f32 %v3054_v13, %v1028_v25 }
 0x5a2   : > { %v1016_v27 = vmul.f32 1.442695, %v1005_v26 }
 0x5a3   : > { %v990_v29 = vpop.permute.xlu1 %989 }
 0x5a4   : > { %2060 = vpow2.f32 %v1016_v27  ;;  %v1007_v30 = vsub.f32 %v2993_v6, %v990_v29  ;;  %v1030_v27 = vld [vmem:[#allocation4 + $0x20] sm:$0xff] }
 0x5a6   : > { %v2057_v31 = vpop.eup %2056  ;;  %v1020_v32 = vmul.f32 1.442695, %v1007_v30  ;;  %v1038_v30 = vmul.f32 %v3039_v0, %v1030_v27 }
 0x5a7   : > { %v995_v33 = vpop.permute.xlu1 %994  ;;  %v1048_v59 = vsel %vm701_vm6, %v2057_v31, 0.0 }
 0x5a8   : > { %2062 = vpow2.f32 %v1020_v32  ;;  %v1008_v34 = vsub.f32 %v2997_v10, %v995_v33  ;;  %1049 = vadd.xlane.f32.xlu0 %v1048_v59  ;;  %v1029_v32 = vld [vmem:[#allocation4 + $0x18] sm:$0xff] }
 0x5a9   : > { %v1037_v59 = vmul.f32 %v3057_v37, %v1029_v32 }
 0x5aa   : > { %v2059_v2 = vpop.eup %2058  ;;  %v1022_v35 = vmul.f32 1.442695, %v1008_v34  ;;  %v1114_v53 = vpop.permute.xlu0 %1113 }
 0x5ab   : > { %v1000_v36 = vpop.permute.xlu1 %999  ;;  %v1054_v38 = vsel %vm701_vm6, %v2059_v2, 0.0 }
 0x5ac   : > { %2064 = vpow2.f32 %v1022_v35  ;;  %v1009_v62 = vsub.f32 %v3003_v16, %v1000_v36  ;;  %1055 = vadd.xlane.f32.xlu1 %v1054_v38  ;;  %v1032_v38 = vld [vmem:[#allocation4 + $0x30] sm:$0xff] }
 0x5ae   : > { %v2061_v39 = vpop.eup %2060  ;;  %v1024_v6 = vmul.f32 1.442695, %v1009_v62 }
 0x5af   : > { %v683_v40 = vpop.permute.xlu1 %682  ;;  %v1051_v42 = vsel %vm701_vm6, %v2061_v39, 0.0  ;;  %v1140_v44 = vpack.c.bf16 %v2061_v39, %v2057_v31 }
 0x5b0   : > { %2066 = vpow2.f32 %v1024_v6  ;;  %v1195_v43 = vsel %vm1146_vm7, %v683_v40, 0  ;;  %1052 = vadd.xlane.f32.xlu0 %v1051_v42  ;;  %v1033_v6 = vld [vmem:[#allocation4 + $0x38] sm:$0xff] }
 0x5b1   : > { %1839 = vmatpush3.bf16.msra.mxu1 %v1195_v43  ;;  %2068 = vpow2.f32 %v960_v58 }
 0x5b2   : > { %v2063_v10 = vpop.eup %2062  ;;  %1850 = vmatprep.subr.bf16.mxu1 %v2444_v14  ;;  %2070 = vpow2.f32 %v958_v63 }
 0x5b3   : > { %v687_v46 = vpop.permute.xlu1 %686  ;;  %v1057_v48 = vsel %vm701_vm6, %v2063_v10, 0.0  ;;  %v1141_v54 = vpack.c.bf16 %v2063_v10, %v2059_v2  ;;  %v1031_v2 = vld [vmem:[#allocation4 + $0x28] sm:$0xff]  ;;  %v1085_v10 = vld [vmem:[#allocation5 + $0x10] sm:$0xff] }
 0x5b4   : > { %v1289_v16 = vsel %vm1146_vm7, %v687_v46, 0  ;;  %1058 = vadd.xlane.f32.xlu0 %v1057_v48  ;;  %1841 = vmatmul.mubr.msk.bf16.vlgmr.msra.gmra.mrb[12].mxu1 %vm701_vm6, %v1140_v44  ;;  %v1039_v13 = vmul.f32 %v3060_v15, %v1031_v2  ;;  %v1087_v44 = vld [vmem:[#allocation5 + $0x20] sm:$0xff]  ;;  %v1086_v46 = vld [vmem:[#allocation5 + $0x18] sm:$0xff]  ;;  %v1088_v48 = vld [vmem:[#allocation5 + $0x28] sm:$0xff] }
 0x5b5   : > { %1847 = vmatmul.mubr.msk.bf16.vlgmr.msra.gmra.mrb[16].mxu0 %vm701_vm6, %v1141_v54  ;;  %1851 = vmatpush3.bf16.msra.mxu1 %v1289_v16  ;;  %v1135_v54 = vmul.f32 %v1114_v53, %v1087_v44 }
 0x5b6   : > { %v2065_v55 = vpop.eup %2064  ;;  %1852 = vmatprep.mubr.msk.bf16.mxu1 %vm2445_vm4, %v2444_v14 }
 0x5b7   : > { %v1060_v56 = vsel %vm701_vm6, %v2065_v55, 0.0  ;;  %v1094_v4 = vpop.permute.xlu1 %1093 }
 0x5b8   : > { %1061 = vadd.xlane.f32.xlu1 %v1060_v56  ;;  %v1131_v18 = vmul.f32 %v1094_v4, %v1083_v12  ;;  %v1090_v4 = vld [vmem:[#allocation5 + $0x38] sm:$0xff] }
 0x5ba   : > { %v2067_v57 = vpop.eup %2066 }
 0x5bb   : > { %v1063_v60 = vsel %vm701_vm6, %v2067_v57, 0.0  ;;  %v1142_v61 = vpack.c.bf16 %v2067_v57, %v2065_v55  ;;  %v2069_v14 = vpop.eup %2068  ;;  %v1104_v5 = vpop.permute.xlu1 %1103 }
 0x5bc   : > { %1064 = vadd.xlane.f32.xlu0 %v1063_v60  ;;  %v2071_v50 = vpop.eup %2070  ;;  %v1041_v42 = vmul.f32 %v2069_v14, %v1033_v6  ;;  %v1133_v15 = vmul.f32 %v1104_v5, %v1085_v10 }
 0x5bd   : > { %1853 = vmatmul.mubr.msk.bf16.vlgmr.msra.gmra.mrb[16].mxu1 %vm701_vm6, %v1142_v61  ;;  %v1040_v0 = vmul.f32 %v2071_v50, %v1032_v38 }
 0x5bf   : > { %v1109_v7 = vpop.permute.xlu1 %1108 }
 0x5c0   : > { %v1134_v55 = vmul.f32 %v1109_v7, %v1086_v46 }
 0x5c3   : > { %v1119_v8 = vpop.permute.xlu1 %1118 }
 0x5c4   : > { %v1136_v60 = vmul.f32 %v1119_v8, %v1088_v48 }
 0x5c9   : > { %1128 = vperm.xlu1 %2035, %v2069_v14  }
 0x5d2   : > { %1123 = vperm.xlu0 %2034, %v2071_v50  }
 0x5d7   : > { %v1044_v52 = vpop.xlane.xlu0 %1043 }
 0x5d8   : > { %v1066_v3 = vadd.f32 %v1044_v52, %v1034_v51 }
 0x5da   : > { %1075 = vst.msk [vmem:[#allocation4] sm:$0xff] %vm1074_vm9, %v1066_v3  ;;  %v1089_v3 = vld [vmem:[#allocation5 + $0x30] sm:$0xff] }
 0x5e1   : > { %v1368_v25 = vld [vmem:[#allocation4] sm:$0xff] (!%p1745_p5) }
 0x5f5   : > { %v1047_v49 = vpop.xlane.xlu1 %1046 }
 0x5f6   : > { %v1067_v9 = vadd.f32 %v1047_v49, %v1035_v47 }
 0x5f8   : > { %1076 = vst.msk [vmem:[#allocation4 + $0x8] sm:$0xff] %vm1074_vm9, %v1067_v9 }
 0x60b   : > { %v1184_v19 = vpop.f32.mrb[12].mxu0 }
 0x60c   : > { %v1332_v20 = vadd.f32 %v1184_v19, %v1131_v18  ;;  %v1836_v21 = vpop.f32.mrb[13].mxu0 }
 0x60d   : > { %v1187_v22 = vpop.f32.mrb[14].mxu0 }
 0x60e   : > { %1340 = vst.msk [vmem:[#allocation5] sm:$0xff] %vm701_vm6, %v1332_v20  ;;  %v1333_v23 = vadd.f32 %v1187_v22, %v1132_v11  ;;  %v1837_v24 = vpop.f32.mrb[15].mxu0  ;;  %v2451_v20 = vmov (!%p1745_p5), 0  }
 0x60f   : > { %2073 = vset.pattern.permute.xlu1 (!%p1745_p5), %v2451_v20  ;;  %2072 = vset.pattern.permute.xlu0 (!%p1745_p5), %v2451_v20  ;;  %v1369_v24 = vld [vmem:[#allocation4 + $0x8] sm:$0xff] (!%p1745_p5) }
 0x610   : > { %1341 = vst.msk [vmem:[#allocation5 + $0x8] sm:$0xff] %vm701_vm6, %v1333_v23 }
 0x635   : > { %v1050_v26 = vpop.xlane.xlu0 %1049 }
 0x636   : > { %v1068_v29 = vadd.f32 %v1050_v26, %v1036_v28 }
 0x638   : > { %1077 = vst.msk [vmem:[#allocation4 + $0x10] sm:$0xff] %vm1074_vm9, %v1068_v29 }
 0x639   : > { %v1056_v31 = vpop.xlane.xlu1 %1055 }
 0x63a   : > { %v1070_v33 = vadd.f32 %v1056_v31, %v1038_v30 }
 0x63c   : > { %1079 = vst.msk [vmem:[#allocation4 + $0x20] sm:$0xff] %vm1074_vm9, %v1070_v33 }
 0x63d   : > { %v1053_v34 = vpop.xlane.xlu0 %1052 }
 0x63e   : > { %v1069_v35 = vadd.f32 %v1053_v34, %v1037_v59  ;;  %v2089_v59 = vld [vmem:[#allocation17] sm:$0xff] (!%p1745_p5)   ;;  %v2452_v34 = vmov (!%p1745_p5), 0.0  }
 0x63f   : > { %v1370_v19 = vld [vmem:[#allocation4 + $0x10] sm:$0xff] (!%p1745_p5)  ;;  %1856 = vmatprep.subr.bf16.mxu0 (!%p1745_p5), %v2452_v34  ;;  %1860 = vmatprep.mubr.msk.bf16.mxu0 (!%p1745_p5), %vm2453_vm10, %v2452_v34 }
 0x640   : > { %1078 = vst.msk [vmem:[#allocation4 + $0x18] sm:$0xff] %vm1074_vm9, %v1069_v35  ;;  %1857 = vmatpush3.bf16.msra.mxu0 (!%p1745_p5), %v2089_v59 }
 0x641   : > { %v1059_v36 = vpop.xlane.xlu0 %1058  ;;  %1858 = vmatprep.subr.bf16.mxu0 (!%p1745_p5), %v2452_v34 }
 0x642   : > { %v1071_v62 = vadd.f32 %v1059_v36, %v1039_v13  ;;  %v2090_v13 = vld [vmem:[#allocation17 + $0x8] sm:$0xff] (!%p1745_p5)  }
 0x643   : > { %v1372_v18 = vld [vmem:[#allocation4 + $0x20] sm:$0xff] (!%p1745_p5) }
 0x644   : > { %1080 = vst.msk [vmem:[#allocation4 + $0x28] sm:$0xff] %vm1074_vm9, %v1071_v62  ;;  %2091 = vrcp.f32 (!%p1745_p5), %v1372_v18  ;;  %1859 = vmatpush3.bf16.msra.mxu0 (!%p1745_p5), %v2090_v13 }
 0x645   : > { %v1062_v39 = vpop.xlane.xlu1 %1061  ;;  %2093 = vrcp.f32 (!%p1745_p5), %v1370_v19 }
 0x646   : > { %v1072_v40 = vadd.f32 %v1062_v39, %v1040_v0 }
 0x647   : > { %v1371_v21 = vld [vmem:[#allocation4 + $0x18] sm:$0xff] (!%p1745_p5) }
 0x648   : > { %1081 = vst.msk [vmem:[#allocation4 + $0x30] sm:$0xff] %vm1074_vm9, %v1072_v40 }
 0x649   : > { %v1065_v37 = vpop.xlane.xlu0 %1064  ;;  %v1129_v5 = vpop.permute.xlu1 %1128 }
 0x64a   : > { %v1073_v43 = vadd.f32 %v1065_v37, %v1041_v42  ;;  %v1138_v41 = vmul.f32 %v1129_v5, %v1090_v4 }
 0x64b   : > { %v1373_v11 = vld [vmem:[#allocation4 + $0x28] sm:$0xff] (!%p1745_p5) }
 0x64c   : > { %1082 = vst.msk [vmem:[#allocation4 + $0x38] sm:$0xff] %vm1074_vm9, %v1073_v43  ;;  %2095 = vrcp.f32 (!%p1745_p5), %v1373_v11 }
 0x64d   : > { %2097 = vrcp.f32 (!%p1745_p5), %v1371_v21 }
 0x64e   : > { %v2092_v28 = vpop.eup (!%p1745_p5), %2091 }
 0x64f   : > { %v1374_v23 = vld [vmem:[#allocation4 + $0x30] sm:$0xff] (!%p1745_p5)  ;;  %v2094_v26 = vpop.eup (!%p1745_p5), %2093  ;;  %1406 = vperm.xlu1 (!%p1745_p5), %2073, %v2092_v28  }
 0x650   : > { %1396 = vperm.xlu0 (!%p1745_p5), %2072, %v2094_v26  }
 0x651   : > { %v1124_v53 = vpop.permute.xlu0 %1123 }
 0x652   : > { %v1137_v7 = vmul.f32 %v1124_v53, %v1089_v3 }
 0x653   : > { %v1375_v22 = vld [vmem:[#allocation4 + $0x38] sm:$0xff] (!%p1745_p5) }
 0x654   : > { %2099 = vrcp.f32 (!%p1745_p5), %v1375_v22 }
 0x655   : > { %2101 = vrcp.f32 (!%p1745_p5), %v1374_v23 }
 0x656   : > { %2103 = vrcp.f32 (!%p1745_p5), %v1369_v24  ;;  %v2096_v27 = vpop.eup (!%p1745_p5), %2095 }
 0x657   : > { %2105 = vrcp.f32 (!%p1745_p5), %v1368_v25  ;;  %v2098_v29 = vpop.eup (!%p1745_p5), %2097  ;;  %1411 = vperm.xlu1 (!%p1745_p5), %2073, %v2096_v27  }
 0x658   : > { %1401 = vperm.xlu0 (!%p1745_p5), %2072, %v2098_v29  }
 0x65e   : > { %v2100_v30 = vpop.eup (!%p1745_p5), %2099 }
 0x65f   : > { %v2102_v31 = vpop.eup (!%p1745_p5), %2101  ;;  %1421 = vperm.xlu1 (!%p1745_p5), %2073, %v2100_v30  }
 0x660   : > { %v2104_v32 = vpop.eup (!%p1745_p5), %2103  ;;  %1416 = vperm.xlu0 (!%p1745_p5), %2072, %v2102_v31  }
 0x661   : > { %v2106_v33 = vpop.eup (!%p1745_p5), %2105 }
 0x663   : > { %1391 = vperm.xlu1 (!%p1745_p5), %2073, %v2104_v32  }
 0x664   : > { %1386 = vperm.xlu0 (!%p1745_p5), %2072, %v2106_v33  }
 0x687   : > { %v1231_v16 = vpop.f32.mrb[12].mxu1 }
 0x688   : > { %v1334_v56 = vadd.f32 %v1231_v16, %v1133_v15  ;;  %v1842_v57 = vpop.f32.mrb[13].mxu1  ;;  %v1278_v58 = vpop.f32.mrb[16].mxu0 }
 0x689   : > { %v1336_v61 = vadd.f32 %v1278_v58, %v1135_v54  ;;  %v1234_v63 = vpop.f32.mrb[14].mxu1  ;;  %v1848_v1 = vpop.f32.mrb[17].mxu0 }
 0x68a   : > { %1342 = vst.msk [vmem:[#allocation5 + $0x10] sm:$0xff] %vm701_vm6, %v1334_v56  ;;  %v1335_v14 = vadd.f32 %v1234_v63, %v1134_v55  ;;  %v1843_v50 = vpop.f32.mrb[15].mxu1  ;;  %v1281_v45 = vpop.f32.mrb[18].mxu0 }
 0x68b   : > { %1344 = vst.msk [vmem:[#allocation5 + $0x20] sm:$0xff] %vm701_vm6, %v1336_v61  ;;  %v1337_v51 = vadd.f32 %v1281_v45, %v1136_v60  ;;  %v1849_v52 = vpop.f32.mrb[19].mxu0  ;;  %v1361_v60 = vld [vmem:[#allocation5 + $0x8] sm:$0xff] (!%p1745_p5)  ;;  %v1360_v61 = vld [vmem:[#allocation5] sm:$0xff] (!%p1745_p5) }
 0x68c   : > { %1343 = vst.msk [vmem:[#allocation5 + $0x18] sm:$0xff] %vm701_vm6, %v1335_v14 }
 0x68d   : > { %1345 = vst.msk [vmem:[#allocation5 + $0x28] sm:$0xff] %vm701_vm6, %v1337_v51 }
 0x68f   : > { %1359 = sbr.rel (%p1745_p5) target bundleno = 2099 (0x833), region = 80 }
 0x690   : > { %v1325_v8 = vpop.f32.mrb[16].mxu1 }
 0x691   : > { %v1338_v47 = vadd.f32 %v1325_v8, %v1137_v7  ;;  %v1854_v49 = vpop.f32.mrb[17].mxu1  ;;  %v1362_v62 = vld [vmem:[#allocation5 + $0x10] sm:$0xff] (!%p1745_p5) }
 0x692   : > { %v1328_v9 = vpop.f32.mrb[18].mxu1  ;;  %v1364_v36 = vld [vmem:[#allocation5 + $0x20] sm:$0xff] (!%p1745_p5) }
 0x693   : > { %1346 = vst.msk [vmem:[#allocation5 + $0x30] sm:$0xff] %vm701_vm6, %v1338_v47  ;;  %v1339_v12 = vadd.f32 %v1328_v9, %v1138_v41  ;;  %v1855_v17 = vpop.f32.mrb[19].mxu1  ;;  %v1363_v0 = vld [vmem:[#allocation5 + $0x18] sm:$0xff] (!%p1745_p5) }
 0x694   : > { %v1365_v38 = vld [vmem:[#allocation5 + $0x28] sm:$0xff] (!%p1745_p5) }
 0x695   : > { %1347 = vst.msk [vmem:[#allocation5 + $0x38] sm:$0xff] %vm701_vm6, %v1339_v12 }
 0x69a   : > { %v1366_v46 = vld [vmem:[#allocation5 + $0x30] sm:$0xff] }
 0x69c   : > { %v1367_v10 = vld [vmem:[#allocation5 + $0x38] sm:$0xff] }
 0x6ce   : > { %v1407_v2 = vpop.permute.xlu1 %1406 }
 0x6cf   : > { %v1397_v35 = vpop.permute.xlu0 %1396  ;;  %v1428_v6 = vmul.f32 %v1407_v2, %v1364_v36 }
 0x6d0   : > { %v1426_v37 = vmul.f32 %v1397_v35, %v1362_v62 }
 0x6d6   : > { %v1412_v39 = vpop.permute.xlu1 %1411 }
 0x6d7   : > { %v1429_v40 = vmul.f32 %v1412_v39, %v1365_v38  ;;  %v1402_v42 = vpop.permute.xlu0 %1401 }
 0x6d8   : > { %v1427_v43 = vmul.f32 %v1402_v42, %v1363_v0 }
 0x6d9   : > { %v2079_v44 = vpack.i.bf16 %v1429_v40, %v1428_v6 }
 0x6da   : > { %v2074_v15 = vpack.i.bf16 %v1427_v43, %v1426_v37 }
 0x6db   : > { %2080 = vrot.lane.b32.xlu1 %v2079_v44, %s2454_s11 }
 0x6dc   : > { %2075 = vrot.lane.b32.xlu0 %v2074_v15, %s2455_s22 }
 0x6de   : > { %v1422_v48 = vpop.permute.xlu1 %1421 }
 0x6df   : > { %v1431_v54 = vmul.f32 %v1422_v48, %v1367_v10  ;;  %v1417_v16 = vpop.permute.xlu0 %1416 }
 0x6e0   : > { %v1430_v55 = vmul.f32 %v1417_v16, %v1366_v46 }
 0x6e2   : > { %v2084_v56 = vpack.i.bf16 %v1431_v54, %v1430_v55  ;;  %v1392_v57 = vpop.permute.xlu1 %1391 }
 0x6e3   : > { %v1387_v58 = vpop.permute.xlu0 %1386  ;;  %v1425_v14 = vmul.f32 %v1392_v57, %v1361_v60 }
 0x6e4   : > { %2085 = vrot.lane.b32.xlu0 %v2084_v56, %s2456_s13  ;;  %v1424_v50 = vmul.f32 %v1387_v58, %v1360_v61 }
 0x74d   : > { %v2081_v63 = vpop.permute.xlu1 %2080 }
 0x74e   : > { %v2076_v1 = vpop.permute.xlu0 %2075  ;;  %v2083_v52 = vunpack.i.h.bf16 %v2081_v63  ;;  %v2082_v3 = vunpack.i.l.bf16 %v2081_v63 }
 0x74f   : > { %v2078_v45 = vunpack.i.h.bf16 %v2076_v1  ;;  %v2077_v51 = vunpack.i.l.bf16 %v2076_v1 }
 0x751   : > { %v1456_v53 = vsel %vm701_vm6, %v1424_v50, %v2077_v51  ;;  %v1457_v4 = vsel %vm701_vm6, %v1425_v14, %v2078_v45 }
 0x752   : > { %v1459_v41 = vsel %vm1458_vm11, %v1456_v53, %v2082_v3  ;;  %v1460_v47 = vsel %vm1458_vm11, %v1457_v4, %v2083_v52 }
 0x756   : > { %v2086_v5 = vpop.permute.xlu0 %2085 }
 0x757   : > { %v2088_v7 = vunpack.i.h.bf16 %v2086_v5  ;;  %v2087_v8 = vunpack.i.l.bf16 %v2086_v5 }
 0x759   : > { %v1462_v49 = vsel %vm1461_vm12, %v1459_v41, %v2087_v8  ;;  %v1463_v9 = vsel %vm1461_vm12, %v1460_v47, %v2088_v7 }
 0x75a   : > { %v1464_v12 = vpack.c.bf16 %v1463_v9, %v1462_v49 }
 0x75c   : > { %1861 = vmatmul.mubr.msk.bf16.vlgmr.msra.gmra.mrb[0].mxu0 %vm569_vm5, %v1464_v12 }
 0x82f   : > { %v1518_v17 = vpop.f32.mrb[0].mxu0 }
 0x830   : > { %1525 = vst.msk [vmem:[%s2887_s12] sm:$0xff] %vm569_vm5, %v1518_v17  ;;  %v1862_v18 = vpop.f32.mrb[1].mxu0 }
 0x831   : > { %v1521_v19 = vpop.f32.mrb[2].mxu0 }
 0x832   : > { %1526 = vst.msk [vmem:[%s2887_s12 + $0x8] sm:$0xff] %vm569_vm5, %v1521_v19  ;;  %v1863_v11 = vpop.f32.mrb[3].mxu0 }
 0x833 PF: > { %s3284_s14 = sld [smem:[#allocation30_spill]]  ;;  %s3285_s10 = sld [smem:[#allocation36_spill]] }
 0x834   : > { %s3286_s20 = sld [smem:[#allocation43_spill]]  ;;  %s1541_s24 = sshll.u32 %s2887_s12, 4  ;;  %s3128_s24 = int_to_ptr.vmem [resolvable:$true] %s1541_s24 }
 0x835   : > { %s1528_s28 = scalar_lea.sflag [#allocation10], %s2858_s4  ;;  %s2291_s15 = scalar_lea.vmem %s3128_s24, 256 }
 0x836   : > { %p2292_p8 = scmp.ne.s32.totalorder %s3128_s24, %s2291_s15  ;;  %s2457_s21 = smov [#allocation19]  }
 0x837   : > { %s2295_s18 = sshll.u32 %s2457_s21, 4  ;;  %s2296_s18 = int_to_ptr.vmem [resolvable:$false] %s2295_s18 }
 0x838   : > { %s2297_s30 = scalar_lea.vmem %s2296_s18, 512  ;;  %p2298_p10 = scmp.lt.s32.totalorder %s3128_s24, %s2296_s18 }
 0x839   : > { %s1755_s27 = sshll.u32 %s3284_s14, 8  ;;  %p3288_p6 = scmp.ne.s32.totalorder %s3285_s10, 0 }
 0x83a   : > { %s3287_s2 = smov %s3286_s20  ;;  %s3125_s17 = scalar_lea.hbm %s3286_s20, %s1755_s27 }
 0x83b   : > { %p2293_p7 = pnand %p2292_p8, %p3288_p6  ;;  %p2299_p0 = scmp.lt.s32.totalorder %s2297_s30, %s2291_s15 }
 0x83d   : > { %p2294_p2 = pneg %p2293_p7  ;;  %p2300_p12 = por %p2299_p0, %p2298_p10 }
 0x83f   : > { %p2301_p13 = pnand %p2300_p12, %p2294_p2 }
 0x841   : > { %2304 = shalt.err (!%p2301_p13)
}
 0x842   : > { %s2305_s12 = scalar_lea.hbm %s3125_s17, 256  ;;  %s2309_s16 = scalar_lea.hbm %s3287_s2, 512 }
 0x843   : > { %p2306_p4 = scmp.ne.s32.totalorder %s3125_s17, %s2305_s12  ;;  %p2310_p11 = scmp.lt.u32.totalorder %s3125_s17, %s3287_s2 }
 0x844   : > { %p2311_p9 = scmp.lt.u32.totalorder %s2309_s16, %s2305_s12  ;;  %p2313_p8 = scmp.lt.u32.totalorder %s2305_s12, %s3125_s17 }
 0x845   : > { %p2307_p1 = pnand %p2306_p4, %p3288_p6 }
 0x846   : > { %p2312_p5 = por %p2311_p9, %p2310_p11 }
 0x847   : > { %p2308_p3 = pneg %p2307_p1 }
 0x848   : > { %p2314_p7 = por %p2313_p8, %p2312_p5 }
 0x84a   : > { %p2315_p2 = pnand %p2314_p7, %p2308_p3 }
 0x84c   : > { %2318 = shalt.err (!%p2315_p2)
}
 0x84d   : > { %s2458_s22 = smov 128   ;;  %s2459_s13 = smov 8  }
 0x84e   : > { %1882 = dma.vmem_to_hbm [thread:$0]  (%p3288_p6), %s3128_s24, 256, %s3125_s17, %s1528_s28, %s2458_s22, %s2458_s22, %s2459_s13  }
 0x84f PF: > { %s3289_s14 = sld [smem:[#allocation32_spill]]  ;;  %s3290_s27 = sld [smem:[#allocation28_spill]] }
 0x850   : > { %s3291_s9 = sld [smem:[#allocation33_spill]] }
 0x855   : > { %p1915_p10 = scmp.ge.s32.totalorder %s3289_s14, 2  ;;  %s1556_s25 = sand.u32 1, %s3290_s27  }
 0x856   : > { %p3292_p0 = scmp.ne.s32.totalorder %s3291_s9, 0  ;;  %s1557_s20 = scalar_lea.sflag [#allocation10], %s1556_s25 }
 0x858   : > { %p1905_p12 = pnand %p1915_p10, %p3292_p0 }
 0x85a   : > { %2382 = dma.done.wait (!%p1905_p12), %s1557_s20, 256  }
 0x85b   : > { %2384 = vsyncadd (!%p1905_p12), %s1557_s20, 4294967040  ;;  %s33_s24 = sadd.s32 1, %s3289_s14   ;;  %s3293_s15 = sld [smem:[#allocation26_spill]] }
 0x85c   : > { %p30_p13 = scmp.ge.s32.totalorder %s33_s24, 6   ;;  %s3294_s16 = sld [smem:[#allocation27_spill]] }
 0x85d   : > { %s3295_s17 = sld [smem:[#allocation39_spill]]  ;;  %s3296_s4 = sld [smem:[#allocation38_spill]] }
 0x85e   : > { %s3297_s20 = sld [smem:[#allocation31_spill]]  ;;  %s3298_s22 = sld [smem:[#allocation34_spill]] }
 0x85f   : > { %s3299_s10 = sld [smem:[#allocation35_spill]]  ;;  %s3300_s18 = smov %s2403_s0 }
 0x860   : > { %s3301_s0 = smov %s2407_s19  ;;  %s3303_s21 = smov %s2423_s23 }
 0x861   :  { %32 = sbr.rel (!%p30_p13) target bundleno = 26 (0x1a), region = 137 }
 0x863   : > { %s3302_s19 = smov %s3296_s4 }
 0x865   : > { %s3304_s23 = smov %s3299_s10 }
 0x868   :  { %1562 = vsyncpa [#allocation9], 1 }
 0x869   :  { %1564 = vsyncpa [#allocation9 + $0x1], 1 }
 0x86a   :  { %1565 = vsyncpa [#allocation12], 1 }
 0x86b   :  { %1567 = vsyncpa [#allocation12 + $0x1], 1 }
 0x86c   :  { %1568 = vsyncpa [#allocation15], 1 }
 0x86d   :  { %1569 = vsyncpa [#allocation18], 1 }
 0x86e   :  { %1570 = vsyncpa [#allocation10], 1 }
 0x86f   :  { %1572 = vsyncpa [#allocation10 + $0x1], 1 }

</bundles_post_ra>
